<compile_context>
chip_gen: v7x
topology: tpu7x:2x2x1
jax: 0.10.0
libtpu: 0.0.40
codegen_flags: <defaults>
</compile_context>

<pallas_src>
import functools

import jax
import jax.numpy as jnp
from jax.experimental import pallas as pl
from jax.experimental.pallas import tpu as pltpu

EPS = 1e-5                      # PyTorch BatchNorm2d default eps
TM_CAP = 512                    # row-tile cap
TN_CAP = 1024                   # col-tile cap (weight stays resident per j)
HALO = 64                       # halo rows (>= Wp+1 = 35 for the 64x64 model)
VMEM_LIMIT_BYTES = 32 * 1024 * 1024


def _round_up(x, m):
    return (x + m - 1) // m * m


def _pick_tile(dim, cap):
    """(tile, padded_dim): full extent if it fits, else cap-sized tiles."""
    if dim <= cap:
        return dim, dim
    return cap, _round_up(dim, cap)


# --------------------- fused implicit-GEMM (+ BN stats) ----------------------

def _fused_gemm_kernel(a_ref, halo_ref, w_ref, rv_ref, oh_ref,
                       y_ref, s_ref, q_ref, *, offsets, activation):
    """One (row-tile, col-tile) step of the parity-decomposed ConvTranspose.

    a_ref    : (tm, Cin)        current row tile of the flat padded activation
    halo_ref : (halo, Cin)      next rows (for the shifted window views)
    w_ref    : (n_win, Cin, tn) weight, one (Cin, tn) slab per window position
    rv_ref   : (tm, G)          per-row validity per parity group (crop mask)
    oh_ref   : (G, tn)          column-group one-hot
    y_ref    : (tm, tn)         conv output (optionally tanh'd)
    s_ref/q_ref : (1, 1, tn)    masked per-column sum / sum-of-squares
    """
    tm = y_ref.shape[0]
    a = a_ref[...]
    if len(offsets) > 1:
        # f32 so the odd-row shifts are plain sublane moves (no packed bf16
        # sub-sublane offsets); values round-trip exactly back to bf16.
        ext = jnp.concatenate([a, halo_ref[...]], axis=0).astype(jnp.float32)

    acc = None
    for wi, off in enumerate(offsets):
        if len(offsets) == 1:
            view = a
        else:
            view = ext[off:off + tm, :].astype(jnp.bfloat16)
        part = jnp.dot(view, w_ref[wi], preferred_element_type=jnp.float32)
        acc = part if acc is None else acc + part

    # Fused BatchNorm statistics on the pre-activation output, masked so the
    # 1-pixel border (cropped by the assemble step) and pad rows are excluded.
    mask = jnp.dot(rv_ref[...], oh_ref[...], preferred_element_type=jnp.float32)
    masked = acc * mask
    s_ref[...] = jnp.sum(masked, axis=0, keepdims=True)[None]
    q_ref[...] = jnp.sum(masked * acc, axis=0, keepdims=True)[None]

    r = acc
    if activation == "tanh":
        r = jnp.tanh(r)            # EUP slot; free under the MXU/DMA-bound step
    y_ref[...] = r.astype(y_ref.dtype)


def _fused_gemm(x2d, w3, rv, onehot, *, offsets, halo_rows, tm, tn,
                m_tiles, n_tiles, activation, out_dtype):
    rows, K = x2d.shape
    n_win, _, Npad = w3.shape
    G = rv.shape[1]
    Mp = m_tiles * tm

    if len(offsets) > 1:
        bpt = tm // halo_rows
        halo_map = lambda j, i: ((i + 1) * bpt, 0)
    else:
        halo_map = lambda j, i: (0, 0)

    out_bytes = jnp.dtype(out_dtype).itemsize
    cost = pl.CostEstimate(
        flops=2 * Mp * K * n_win * Npad + 2 * Mp * G * Npad,
        transcendentals=Mp * Npad if activation == "tanh" else 0,
        bytes_accessed=(n_tiles * (Mp + halo_rows) * K * 2
                        + n_win * K * Npad * 2
                        + Mp * Npad * out_bytes
                        + Mp * G * 4 + 2 * m_tiles * Npad * 4))

    kern = functools.partial(_fused_gemm_kernel, offsets=tuple(offsets),
                             activation=activation)
    return pl.pallas_call(
        kern,
        out_shape=(jax.ShapeDtypeStruct((Mp, Npad), out_dtype),
                   jax.ShapeDtypeStruct((m_tiles, 1, Npad), jnp.float32),
                   jax.ShapeDtypeStruct((m_tiles, 1, Npad), jnp.float32)),
        grid_spec=pltpu.PrefetchScalarGridSpec(
            num_scalar_prefetch=0,
            # rows (i) fastest: activation streams, the weight slab for column
            # tile j stays VMEM-resident across the whole row sweep.
            grid=(n_tiles, m_tiles),
            in_specs=[pl.BlockSpec((tm, K), lambda j, i: (i, 0)),
                      pl.BlockSpec((halo_rows, K), halo_map),
                      pl.BlockSpec((n_win, K, tn), lambda j, i: (0, 0, j)),
                      pl.BlockSpec((tm, G), lambda j, i: (i, 0)),
                      pl.BlockSpec((G, tn), lambda j, i: (0, j))],
            out_specs=[pl.BlockSpec((tm, tn), lambda j, i: (i, j)),
                       pl.BlockSpec((1, 1, tn), lambda j, i: (i, 0, j)),
                       pl.BlockSpec((1, 1, tn), lambda j, i: (i, 0, j))]),
        compiler_params=pltpu.CompilerParams(
            dimension_semantics=("parallel", "parallel"),
            vmem_limit_bytes=VMEM_LIMIT_BYTES),
        cost_estimate=cost,
    )(x2d, x2d, w3, rv, onehot)


# ----------------------------- BN apply + ReLU -------------------------------

def _bn_relu_kernel(y_ref, sc_ref, sh_ref, o_ref):
    y = y_ref[...].astype(jnp.float32)
    o_ref[...] = jnp.maximum(y * sc_ref[...] + sh_ref[...],
                             0.0).astype(o_ref.dtype)


def _bn_relu_apply(y, scale, shift, *, tm, tn):
    Mp, Npad = y.shape
    m_tiles, n_tiles = Mp // tm, Npad // tn
    cost = pl.CostEstimate(flops=2 * Mp * Npad, transcendentals=0,
                           bytes_accessed=4 * Mp * Npad + 8 * Npad)
    return pl.pallas_call(
        _bn_relu_kernel,
        out_shape=jax.ShapeDtypeStruct((Mp, Npad), jnp.bfloat16),
        grid_spec=pltpu.PrefetchScalarGridSpec(
            num_scalar_prefetch=0, grid=(m_tiles, n_tiles),
            in_specs=[pl.BlockSpec((tm, tn), lambda i, j: (i, j)),
                      pl.BlockSpec((1, tn), lambda i, j: (0, j)),
                      pl.BlockSpec((1, tn), lambda i, j: (0, j))],
            out_specs=pl.BlockSpec((tm, tn), lambda i, j: (i, j))),
        compiler_params=pltpu.CompilerParams(
            dimension_semantics=("parallel", "parallel"),
            vmem_limit_bytes=VMEM_LIMIT_BYTES),
        cost_estimate=cost,
    )(y, scale, shift)


# ------------------------- wrapper-side helpers ------------------------------

def _convt_s2_weight_matrix(w):
    """PyTorch ConvTranspose2d weight (Cin, Cout, 4, 4) -> (4*Cin, 4*Cout):
    rows ordered (wh, ww, ci), columns ordered (rh, rw, co);
    taps kh = 2*(1-wh)+rh, kw = 2*(1-ww)+rw (parity decomposition)."""
    Cin, Cout = w.shape[0], w.shape[1]
    wm = w.reshape(Cin, Cout, 2, 2, 2, 2)
    wm = wm[:, :, ::-1, :, ::-1, :]
    wm = jnp.transpose(wm, (2, 4, 0, 3, 5, 1))
    return wm.reshape(4 * Cin, 4 * Cout)


def _parity_row_validity(N, H, W, Mp):
    """(Mp, 4) f32: row p (flat (n, ih, jw) over the padded grid) contributes
    to BN stats for parity group (rh, rw) iff the assembled pixel survives the
    1-pixel crop and the row is not padding."""
    Hp, Wp = H + 2, W + 2
    p = jnp.arange(Mp, dtype=jnp.int32)
    inimg = p < N * Hp * Wp
    rem = p % (Hp * Wp)
    ih = rem // Wp
    jw = rem % Wp
    cols = []
    for rh in (0, 1):
        vh = (2 * ih + rh >= 1) & (2 * ih + rh <= 2 * H)
        for rw in (0, 1):
            vw = (2 * jw + rw >= 1) & (2 * jw + rw <= 2 * W)
            cols.append((vh & vw & inimg).astype(jnp.float32))
    return jnp.stack(cols, axis=1)


def _group_onehot(groups, cout, Npad):
    c = jnp.arange(Npad, dtype=jnp.int32)
    g = jnp.arange(groups, dtype=jnp.int32)
    oh = ((c[None, :] // cout) == g[:, None]) & (c[None, :] < groups * cout)
    return oh.astype(jnp.float32)


def _bn_finalize(S, Q, gamma, beta, groups, cout, count, Npad):
    """Combine per-tile/per-group partial sums -> per-channel scale/shift,
    expanded back to the (groups, cout) column layout (padded to Npad)."""
    s = S.reshape(-1, Npad)[:, :groups * cout].reshape(-1, groups, cout).sum((0, 1))
    q = Q.reshape(-1, Npad)[:, :groups * cout].reshape(-1, groups, cout).sum((0, 1))
    mean = s / count
    var = jnp.maximum(q / count - mean * mean, 0.0)   # biased (train-mode) var
    scale = gamma.astype(jnp.float32) * jax.lax.rsqrt(var + EPS)
    shift = beta.astype(jnp.float32) - mean * scale
    pad = Npad - groups * cout
    scale_f = jnp.pad(jnp.tile(scale, groups), (0, pad)).reshape(1, Npad)
    shift_f = jnp.pad(jnp.tile(shift, groups), (0, pad)).reshape(1, Npad)
    return scale_f, shift_f


def _row_tiling(M, cap, align):
    m_tiles = pl.cdiv(M, cap)
    tm = _round_up(pl.cdiv(M, m_tiles), align)
    return tm, m_tiles, tm * m_tiles


# ------------------------------ layer blocks ---------------------------------

def _input_projection(z2d, w0, gamma, beta):
    """Layer 0: ConvTranspose2d(nz, c0, 4, 1, 0) on a 1x1 input == GEMM with
    columns (kh, kw, co), BN stats fused; returns (N, 4, 4, c0) NHWC bf16."""
    Nb, nz = z2d.shape
    c0 = w0.shape[1]
    Np = 16 * c0
    tm, m_tiles, Mp = _row_tiling(Nb, TM_CAP, 8)
    tn, Npad = _pick_tile(Np, TN_CAP)
    n_tiles = Npad // tn

    x2d = jnp.pad(z2d.astype(jnp.bfloat16), ((0, Mp - Nb), (0, 0)))
    w0m = jnp.transpose(w0, (0, 2, 3, 1)).reshape(nz, Np).astype(jnp.bfloat16)
    if Npad != Np:
        w0m = jnp.pad(w0m, ((0, 0), (0, Npad - Np)))
    w3 = w0m.reshape(1, nz, Npad)
    rv = (jnp.arange(Mp) < Nb).astype(jnp.float32).reshape(Mp, 1)
    oh = _group_onehot(1, Np, Npad)

    Y, S, Q = _fused_gemm(x2d, w3, rv, oh, offsets=(0,), halo_rows=8,
                          tm=tm, tn=tn, m_tiles=m_tiles, n_tiles=n_tiles,
                          activation=None, out_dtype=jnp.bfloat16)
    sc, sh = _bn_finalize(S, Q, gamma, beta, 16, c0, Nb * 16, Npad)
    A = _bn_relu_apply(Y, sc, sh, tm=tm, tn=tn)
    return A[:Nb, :Np].reshape(Nb, 4, 4, c0)


def _convt_s2_block(h, w_t, gamma, beta, *, activation=None):
    """ConvTranspose2d(k=4, s=2, p=1) (+ BN + ReLU, or + tanh) on NHWC input."""
    N, H, W, Cin = h.shape
    Cout = w_t.shape[1]
    Hp, Wp = H + 2, W + 2
    M = N * Hp * Wp
    Np = 4 * Cout
    tm, m_tiles, Mp = _row_tiling(M, TM_CAP, HALO)
    tn, Npad = _pick_tile(Np, TN_CAP)
    n_tiles = Npad // tn

    # pad + flatten (+ trailing halo/alignment rows) -> one fused XLA copy
    hp = jnp.pad(h.astype(jnp.bfloat16), ((0, 0), (1, 1), (1, 1), (0, 0)))
    x2d = jnp.pad(hp.reshape(M, Cin), ((0, Mp + HALO - M), (0, 0)))

    wm = _convt_s2_weight_matrix(w_t).astype(jnp.bfloat16)
    if Npad != Np:
        wm = jnp.pad(wm, ((0, 0), (0, Npad - Np)))
    w3 = wm.reshape(4, Cin, Npad)

    rv = _parity_row_validity(N, H, W, Mp)
    oh = _group_onehot(4, Cout, Npad)

    out_dtype = jnp.float32 if activation == "tanh" else jnp.bfloat16
    Y, S, Q = _fused_gemm(x2d, w3, rv, oh, offsets=(0, 1, Wp, Wp + 1),
                          halo_rows=HALO, tm=tm, tn=tn,
                          m_tiles=m_tiles, n_tiles=n_tiles,
                          activation=activation, out_dtype=out_dtype)

    if gamma is not None:
        count = N * (2 * H) * (2 * W)
        sc, sh = _bn_finalize(S, Q, gamma, beta, 4, Cout, count, Npad)
        Y = _bn_relu_apply(Y, sc, sh, tm=tm, tn=tn)

    # Parity re-interleave + border crop (bf16; XLA fuses the chain).
    # TODO(synk): folding this assemble into the BN-apply out_spec would save
    # one more HBM round-trip per layer but needs non-rectangular tiles.
    A = Y[:M, :Np].reshape(N, Hp, Wp, 2, 2, Cout)
    A = jnp.transpose(A, (0, 1, 3, 2, 4, 5)).reshape(N, 2 * Hp, 2 * Wp, Cout)
    return A[:, 1:2 * H + 1, 1:2 * W + 1, :]


# ------------------------------- Generator -----------------------------------

def init_generator_params(key, nz, ngf, nc):
    """Mirrors Generator.initialize_weights: conv ~ N(0, 0.02),
    BN gamma ~ N(1, 0.02), BN beta = 0."""
    chans = [nz, ngf * 8, ngf * 4, ngf * 2, ngf, nc]
    keys = jax.random.split(key, 9)
    params = {}
    for l in range(5):
        params[f"w{l}"] = 0.02 * jax.random.normal(
            keys[l], (chans[l], chans[l + 1], 4, 4), jnp.float32)
    for l in range(4):
        c = chans[l + 1]
        params[f"gamma{l}"] = 1.0 + 0.02 * jax.random.normal(
            keys[5 + l], (c,), jnp.float32)
        params[f"beta{l}"] = jnp.zeros((c,), jnp.float32)
    return params


def generator_forward(params, z_nchw):
    N, nz = z_nchw.shape[0], z_nchw.shape[1]
    z2d = z_nchw.reshape(N, nz).astype(jnp.float32)

    h = _input_projection(z2d, params["w0"], params["gamma0"], params["beta0"])
    for l in range(1, 4):
        h = _convt_s2_block(h, params[f"w{l}"],
                            params[f"gamma{l}"], params[f"beta{l}"])
    img = _convt_s2_block(h, params["w4"], None, None, activation="tanh")
    return jnp.transpose(img, (0, 3, 1, 2))            # NHWC -> NCHW (f32)
    # TODO(synk): BatchNorm running-stat updates (training side effect) are not
    # modeled; forward values match PyTorch .train()-mode batch statistics.


if __name__ == "__main__":
    # Small, module-consistent shapes: batch=2, nz=16, ngf=8, nc=3.
    nz, ngf, nc, batch = 16, 8, 3, 2
    key = jax.random.PRNGKey(0)
    k_param, k_z = jax.random.split(key)
    params = init_generator_params(k_param, nz, ngf, nc)
    z = jax.random.normal(k_z, (batch, nz, 1, 1), jnp.float32)  # NCHW latent

    fwd = jax.jit(generator_forward)
    out = fwd(params, z)
    out = jax.block_until_ready(out)

    assert out.shape == (batch, nc, 64, 64), out.shape
    assert bool(jnp.all(jnp.isfinite(out)))
    assert bool(jnp.all(jnp.abs(out) <= 1.0 + 1e-6))  # tanh range
    print("KERNEL_OK")
</pallas_src>

<mosaic_0001>
module attributes {stable_mosaic.version = 11 : i64} {
  func.func @_fused_gemm_kernel(%arg0: i32, %arg1: i32, %arg2: memref<8x16xbf16, #tpu.memory_space<vmem>>, %arg3: memref<8x16xbf16, #tpu.memory_space<vmem>>, %arg4: memref<1x16x1024xbf16, #tpu.memory_space<vmem>>, %arg5: memref<8x1xf32, #tpu.memory_space<vmem>>, %arg6: memref<1x1024xf32, #tpu.memory_space<vmem>>, %arg7: memref<8x1024xbf16, #tpu.memory_space<vmem>>, %arg8: memref<1x1x1024xf32, #tpu.memory_space<vmem>>, %arg9: memref<1x1x1024xf32, #tpu.memory_space<vmem>>) attributes {dimension_semantics = [#tpu.dimension_semantics<parallel>, #tpu.dimension_semantics<parallel>], iteration_bounds = array<i64: 1, 1>, scalar_prefetch = 0 : i64, scratch_operands = 0 : i64, tpu.core_type = #tpu.core_type<tc>, window_params = [{transform_indices = @transform_0, window_bounds = array<i64: 8, 16>}, {pipeline_mode = #tpu.pipeline_mode<synchronous>, transform_indices = @transform_1, window_bounds = array<i64: 8, 16>}, {transform_indices = @transform_2, window_bounds = array<i64: 1, 16, 1024>}, {transform_indices = @transform_3, window_bounds = array<i64: 8, 1>}, {transform_indices = @transform_4, window_bounds = array<i64: 1, 1024>}, {transform_indices = @transform_5, window_bounds = array<i64: 8, 1024>}, {transform_indices = @transform_6, window_bounds = array<i64: 1, 1, 1024>}, {transform_indices = @transform_7, window_bounds = array<i64: 1, 1, 1024>}]} {
    %c0 = arith.constant 0 : index
    %c0_0 = arith.constant 0 : index
    %0 = vector.load %arg2[%c0, %c0_0] : memref<8x16xbf16, #tpu.memory_space<vmem>>, vector<8x16xbf16>
    %c0_1 = arith.constant 0 : index
    %c0_2 = arith.constant 0 : index
    %c0_3 = arith.constant 0 : index
    %1 = vector.load %arg4[%c0_1, %c0_2, %c0_3] : memref<1x16x1024xbf16, #tpu.memory_space<vmem>>, vector<1x16x1024xbf16>
    %2 = vector.shape_cast %1 : vector<1x16x1024xbf16> to vector<16x1024xbf16>
    %cst = arith.constant dense<0.000000e+00> : vector<8x1024xf32>
    %3 = tpu.matmul %0, %2, %cst {dimension_numbers = #tpu.dot_dimension_numbers<[1], [0], [0], [1], [0, 0, 1, 1], [], []>} : vector<8x16xbf16>, vector<16x1024xbf16>, vector<8x1024xf32> -> vector<8x1024xf32>
    %c0_4 = arith.constant 0 : index
    %c0_5 = arith.constant 0 : index
    %4 = vector.load %arg5[%c0_4, %c0_5] : memref<8x1xf32, #tpu.memory_space<vmem>>, vector<8x1xf32>
    %c0_6 = arith.constant 0 : index
    %c0_7 = arith.constant 0 : index
    %5 = vector.load %arg6[%c0_6, %c0_7] : memref<1x1024xf32, #tpu.memory_space<vmem>>, vector<1x1024xf32>
    %cst_8 = arith.constant dense<0.000000e+00> : vector<8x1024xf32>
    %6 = tpu.matmul %4, %5, %cst_8 {dimension_numbers = #tpu.dot_dimension_numbers<[1], [0], [0], [1], [0, 0, 1, 1], [], []>} : vector<8x1xf32>, vector<1x1024xf32>, vector<8x1024xf32> -> vector<8x1024xf32>
    %7 = arith.mulf %3, %6 : vector<8x1024xf32>
    %cst_9 = arith.constant dense<0.000000e+00> : vector<1024xf32>
    %8 = vector.multi_reduction <add>, %7, %cst_9 [0] : vector<8x1024xf32> to vector<1024xf32>
    %9 = vector.shape_cast %8 : vector<1024xf32> to vector<1x1024xf32>
    %10 = vector.shape_cast %9 : vector<1x1024xf32> to vector<1x1x1024xf32>
    %c0_10 = arith.constant 0 : index
    %c0_11 = arith.constant 0 : index
    %c0_12 = arith.constant 0 : index
    %11 = vector.load %arg8[%c0_10, %c0_11, %c0_12] : memref<1x1x1024xf32, #tpu.memory_space<vmem>>, vector<1x1x1024xf32>
    tpu.vector_store %arg8[%c0_10, %c0_11, %c0_12], %10 {strides = array<i32>} : memref<1x1x1024xf32, #tpu.memory_space<vmem>>, vector<1x1x1024xf32>,
    %12 = arith.mulf %7, %3 : vector<8x1024xf32>
    %cst_13 = arith.constant dense<0.000000e+00> : vector<1024xf32>
    %13 = vector.multi_reduction <add>, %12, %cst_13 [0] : vector<8x1024xf32> to vector<1024xf32>
    %14 = vector.shape_cast %13 : vector<1024xf32> to vector<1x1024xf32>
    %15 = vector.shape_cast %14 : vector<1x1024xf32> to vector<1x1x1024xf32>
    %c0_14 = arith.constant 0 : index
    %c0_15 = arith.constant 0 : index
    %c0_16 = arith.constant 0 : index
    %16 = vector.load %arg9[%c0_14, %c0_15, %c0_16] : memref<1x1x1024xf32, #tpu.memory_space<vmem>>, vector<1x1x1024xf32>
    tpu.vector_store %arg9[%c0_14, %c0_15, %c0_16], %15 {strides = array<i32>} : memref<1x1x1024xf32, #tpu.memory_space<vmem>>, vector<1x1x1024xf32>,
    %17 = arith.truncf %3 : vector<8x1024xf32> to vector<8x1024xbf16>
    %c0_17 = arith.constant 0 : index
    %c0_18 = arith.constant 0 : index
    %18 = vector.load %arg7[%c0_17, %c0_18] : memref<8x1024xbf16, #tpu.memory_space<vmem>>, vector<8x1024xbf16>
    tpu.vector_store %arg7[%c0_17, %c0_18], %17 {strides = array<i32>} : memref<8x1024xbf16, #tpu.memory_space<vmem>>, vector<8x1024xbf16>,
    return
  }
  func.func @transform_0(%arg0: i32, %arg1: i32) -> (i32, i32) {
    %c0_i32 = arith.constant 0 : i32
    %c0_i32_0 = arith.constant 0 : i32
    return %arg1, %c0_i32 : i32, i32
  }
  func.func @transform_1(%arg0: i32, %arg1: i32) -> (i32, i32) {
    %c0_i32 = arith.constant 0 : i32
    %c0_i32_0 = arith.constant 0 : i32
    %c0_i32_1 = arith.constant 0 : i32
    return %c0_i32, %c0_i32_0 : i32, i32
  }
  func.func @transform_2(%arg0: i32, %arg1: i32) -> (i32, i32, i32) {
    %c0_i32 = arith.constant 0 : i32
    %c0_i32_0 = arith.constant 0 : i32
    %c0_i32_1 = arith.constant 0 : i32
    return %c0_i32, %c0_i32_0, %arg0 : i32, i32, i32
  }
  func.func @transform_3(%arg0: i32, %arg1: i32) -> (i32, i32) {
    %c0_i32 = arith.constant 0 : i32
    %c0_i32_0 = arith.constant 0 : i32
    return %arg1, %c0_i32 : i32, i32
  }
  func.func @transform_4(%arg0: i32, %arg1: i32) -> (i32, i32) {
    %c0_i32 = arith.constant 0 : i32
    %c0_i32_0 = arith.constant 0 : i32
    return %c0_i32, %arg0 : i32, i32
  }
  func.func @transform_5(%arg0: i32, %arg1: i32) -> (i32, i32) {
    %c0_i32 = arith.constant 0 : i32
    return %arg1, %arg0 : i32, i32
  }
  func.func @transform_6(%arg0: i32, %arg1: i32) -> (i32, i32, i32) {
    %c0_i32 = arith.constant 0 : i32
    %c0_i32_0 = arith.constant 0 : i32
    return %arg1, %c0_i32, %arg0 : i32, i32, i32
  }
  func.func @transform_7(%arg0: i32, %arg1: i32) -> (i32, i32, i32) {
    %c0_i32 = arith.constant 0 : i32
    %c0_i32_0 = arith.constant 0 : i32
    return %arg1, %c0_i32, %arg0 : i32, i32, i32
  }
}

module attributes {stable_mosaic.version = 11 : i64} {
  func.func @_bn_relu_kernel(%arg0: i32, %arg1: i32, %arg2: memref<8x1024xbf16, #tpu.memory_space<vmem>>, %arg3: memref<1x1024xf32, #tpu.memory_space<vmem>>, %arg4: memref<1x1024xf32, #tpu.memory_space<vmem>>, %arg5: memref<8x1024xbf16, #tpu.memory_space<vmem>>) attributes {dimension_semantics = [#tpu.dimension_semantics<parallel>, #tpu.dimension_semantics<parallel>], iteration_bounds = array<i64: 1, 1>, scalar_prefetch = 0 : i64, scratch_operands = 0 : i64, tpu.core_type = #tpu.core_type<tc>, window_params = [{transform_indices = @transform_0, window_bounds = array<i64: 8, 1024>}, {transform_indices = @transform_1, window_bounds = array<i64: 1, 1024>}, {transform_indices = @transform_2, window_bounds = array<i64: 1, 1024>}, {transform_indices = @transform_3, window_bounds = array<i64: 8, 1024>}]} {
    %c0 = arith.constant 0 : index
    %c0_0 = arith.constant 0 : index
    %0 = vector.load %arg2[%c0, %c0_0] : memref<8x1024xbf16, #tpu.memory_space<vmem>>, vector<8x1024xbf16>
    %1 = arith.extf %0 : vector<8x1024xbf16> to vector<8x1024xf32>
    %c0_1 = arith.constant 0 : index
    %c0_2 = arith.constant 0 : index
    %2 = vector.load %arg3[%c0_1, %c0_2] : memref<1x1024xf32, #tpu.memory_space<vmem>>, vector<1x1024xf32>
    %3 = vector.broadcast %2 : vector<1x1024xf32> to vector<8x1024xf32>
    %4 = arith.mulf %1, %3 : vector<8x1024xf32>
    %c0_3 = arith.constant 0 : index
    %c0_4 = arith.constant 0 : index
    %5 = vector.load %arg4[%c0_3, %c0_4] : memref<1x1024xf32, #tpu.memory_space<vmem>>, vector<1x1024xf32>
    %6 = vector.broadcast %5 : vector<1x1024xf32> to vector<8x1024xf32>
    %7 = arith.addf %4, %6 : vector<8x1024xf32>
    %cst = arith.constant 0.000000e+00 : f32
    %8 = vector.broadcast %cst : f32 to vector<8x1024xf32>
    %9 = arith.maximumf %7, %8 : vector<8x1024xf32>
    %10 = arith.truncf %9 : vector<8x1024xf32> to vector<8x1024xbf16>
    %c0_5 = arith.constant 0 : index
    %c0_6 = arith.constant 0 : index
    %11 = vector.load %arg5[%c0_5, %c0_6] : memref<8x1024xbf16, #tpu.memory_space<vmem>>, vector<8x1024xbf16>
    tpu.vector_store %arg5[%c0_5, %c0_6], %10 {strides = array<i32>} : memref<8x1024xbf16, #tpu.memory_space<vmem>>, vector<8x1024xbf16>,
    return
  }
  func.func @transform_0(%arg0: i32, %arg1: i32) -> (i32, i32) {
    %c0_i32 = arith.constant 0 : i32
    return %arg0, %arg1 : i32, i32
  }
  func.func @transform_1(%arg0: i32, %arg1: i32) -> (i32, i32) {
    %c0_i32 = arith.constant 0 : i32
    %c0_i32_0 = arith.constant 0 : i32
    return %c0_i32, %arg1 : i32, i32
  }
  func.func @transform_2(%arg0: i32, %arg1: i32) -> (i32, i32) {
    %c0_i32 = arith.constant 0 : i32
    %c0_i32_0 = arith.constant 0 : i32
    return %c0_i32, %arg1 : i32, i32
  }
  func.func @transform_3(%arg0: i32, %arg1: i32) -> (i32, i32) {
    %c0_i32 = arith.constant 0 : i32
    return %arg0, %arg1 : i32, i32
  }
}

module attributes {stable_mosaic.version = 11 : i64} {
  func.func @_fused_gemm_kernel(%arg0: i32, %arg1: i32, %arg2: memref<128x64xbf16, #tpu.memory_space<vmem>>, %arg3: memref<64x64xbf16, #tpu.memory_space<vmem>>, %arg4: memref<4x64x128xbf16, #tpu.memory_space<vmem>>, %arg5: memref<128x4xf32, #tpu.memory_space<vmem>>, %arg6: memref<4x128xf32, #tpu.memory_space<vmem>>, %arg7: memref<128x128xbf16, #tpu.memory_space<vmem>>, %arg8: memref<1x1x128xf32, #tpu.memory_space<vmem>>, %arg9: memref<1x1x128xf32, #tpu.memory_space<vmem>>) attributes {dimension_semantics = [#tpu.dimension_semantics<parallel>, #tpu.dimension_semantics<parallel>], iteration_bounds = array<i64: 1, 1>, scalar_prefetch = 0 : i64, scratch_operands = 0 : i64, tpu.core_type = #tpu.core_type<tc>, window_params = [{transform_indices = @transform_0, window_bounds = array<i64: 128, 64>}, {transform_indices = @transform_1, window_bounds = array<i64: 64, 64>}, {transform_indices = @transform_2, window_bounds = array<i64: 4, 64, 128>}, {transform_indices = @transform_3, window_bounds = array<i64: 128, 4>}, {transform_indices = @transform_4, window_bounds = array<i64: 4, 128>}, {transform_indices = @transform_5, window_bounds = array<i64: 128, 128>}, {transform_indices = @transform_6, window_bounds = array<i64: 1, 1, 128>}, {transform_indices = @transform_7, window_bounds = array<i64: 1, 1, 128>}]} {
    %c0 = arith.constant 0 : index
    %c0_0 = arith.constant 0 : index
    %0 = vector.load %arg2[%c0, %c0_0] : memref<128x64xbf16, #tpu.memory_space<vmem>>, vector<128x64xbf16>
    %c0_1 = arith.constant 0 : index
    %c0_2 = arith.constant 0 : index
    %1 = vector.load %arg3[%c0_1, %c0_2] : memref<64x64xbf16, #tpu.memory_space<vmem>>, vector<64x64xbf16>
    %2 = tpu.concatenate %0, %1 in 0 : vector<128x64xbf16>, vector<64x64xbf16> -> vector<192x64xbf16>
    %3 = arith.extf %2 : vector<192x64xbf16> to vector<192x64xf32>
    %4 = vector.extract_strided_slice %3 {offsets = [0, 0], sizes = [128, 64], strides = [1, 1]} : vector<192x64xf32> to vector<128x64xf32>
    %5 = arith.truncf %4 : vector<128x64xf32> to vector<128x64xbf16>
    %c0_3 = arith.constant 0 : index
    %c0_4 = arith.constant 0 : index
    %c0_5 = arith.constant 0 : index
    %6 = vector.load %arg4[%c0_3, %c0_4, %c0_5] : memref<4x64x128xbf16, #tpu.memory_space<vmem>>, vector<1x64x128xbf16>
    %7 = vector.shape_cast %6 : vector<1x64x128xbf16> to vector<64x128xbf16>
    %cst = arith.constant dense<0.000000e+00> : vector<128x128xf32>
    %8 = tpu.matmul %5, %7, %cst {dimension_numbers = #tpu.dot_dimension_numbers<[1], [0], [0], [1], [0, 0, 1, 1], [], []>} : vector<128x64xbf16>, vector<64x128xbf16>, vector<128x128xf32> -> vector<128x128xf32>
    %9 = vector.extract_strided_slice %3 {offsets = [1, 0], sizes = [128, 64], strides = [1, 1]} : vector<192x64xf32> to vector<128x64xf32>
    %10 = arith.truncf %9 : vector<128x64xf32> to vector<128x64xbf16>
    %c1 = arith.constant 1 : index
    %c0_6 = arith.constant 0 : index
    %c0_7 = arith.constant 0 : index
    %11 = vector.load %arg4[%c1, %c0_6, %c0_7] : memref<4x64x128xbf16, #tpu.memory_space<vmem>>, vector<1x64x128xbf16>
    %12 = vector.shape_cast %11 : vector<1x64x128xbf16> to vector<64x128xbf16>
    %cst_8 = arith.constant dense<0.000000e+00> : vector<128x128xf32>
    %13 = tpu.matmul %10, %12, %cst_8 {dimension_numbers = #tpu.dot_dimension_numbers<[1], [0], [0], [1], [0, 0, 1, 1], [], []>} : vector<128x64xbf16>, vector<64x128xbf16>, vector<128x128xf32> -> vector<128x128xf32>
    %14 = arith.addf %8, %13 : vector<128x128xf32>
    %15 = vector.extract_strided_slice %3 {offsets = [6, 0], sizes = [128, 64], strides = [1, 1]} : vector<192x64xf32> to vector<128x64xf32>
    %16 = arith.truncf %15 : vector<128x64xf32> to vector<128x64xbf16>
    %c2 = arith.constant 2 : index
    %c0_9 = arith.constant 0 : index
    %c0_10 = arith.constant 0 : index
    %17 = vector.load %arg4[%c2, %c0_9, %c0_10] : memref<4x64x128xbf16, #tpu.memory_space<vmem>>, vector<1x64x128xbf16>
    %18 = vector.shape_cast %17 : vector<1x64x128xbf16> to vector<64x128xbf16>
    %cst_11 = arith.constant dense<0.000000e+00> : vector<128x128xf32>
    %19 = tpu.matmul %16, %18, %cst_11 {dimension_numbers = #tpu.dot_dimension_numbers<[1], [0], [0], [1], [0, 0, 1, 1], [], []>} : vector<128x64xbf16>, vector<64x128xbf16>, vector<128x128xf32> -> vector<128x128xf32>
    %20 = arith.addf %14, %19 : vector<128x128xf32>
    %21 = vector.extract_strided_slice %3 {offsets = [7, 0], sizes = [128, 64], strides = [1, 1]} : vector<192x64xf32> to vector<128x64xf32>
    %22 = arith.truncf %21 : vector<128x64xf32> to vector<128x64xbf16>
    %c3 = arith.constant 3 : index
    %c0_12 = arith.constant 0 : index
    %c0_13 = arith.constant 0 : index
    %23 = vector.load %arg4[%c3, %c0_12, %c0_13] : memref<4x64x128xbf16, #tpu.memory_space<vmem>>, vector<1x64x128xbf16>
    %24 = vector.shape_cast %23 : vector<1x64x128xbf16> to vector<64x128xbf16>
    %cst_14 = arith.constant dense<0.000000e+00> : vector<128x128xf32>
    %25 = tpu.matmul %22, %24, %cst_14 {dimension_numbers = #tpu.dot_dimension_numbers<[1], [0], [0], [1], [0, 0, 1, 1], [], []>} : vector<128x64xbf16>, vector<64x128xbf16>, vector<128x128xf32> -> vector<128x128xf32>
    %26 = arith.addf %20, %25 : vector<128x128xf32>
    %c0_15 = arith.constant 0 : index
    %c0_16 = arith.constant 0 : index
    %27 = vector.load %arg5[%c0_15, %c0_16] : memref<128x4xf32, #tpu.memory_space<vmem>>, vector<128x4xf32>
    %c0_17 = arith.constant 0 : index
    %c0_18 = arith.constant 0 : index
    %28 = vector.load %arg6[%c0_17, %c0_18] : memref<4x128xf32, #tpu.memory_space<vmem>>, vector<4x128xf32>
    %cst_19 = arith.constant dense<0.000000e+00> : vector<128x128xf32>
    %29 = tpu.matmul %27, %28, %cst_19 {dimension_numbers = #tpu.dot_dimension_numbers<[1], [0], [0], [1], [0, 0, 1, 1], [], []>} : vector<128x4xf32>, vector<4x128xf32>, vector<128x128xf32> -> vector<128x128xf32>
    %30 = arith.mulf %26, %29 : vector<128x128xf32>
    %cst_20 = arith.constant dense<0.000000e+00> : vector<128xf32>
    %31 = vector.multi_reduction <add>, %30, %cst_20 [0] : vector<128x128xf32> to vector<128xf32>
    %32 = vector.shape_cast %31 : vector<128xf32> to vector<1x128xf32>
    %33 = vector.shape_cast %32 : vector<1x128xf32> to vector<1x1x128xf32>
    %c0_21 = arith.constant 0 : index
    %c0_22 = arith.constant 0 : index
    %c0_23 = arith.constant 0 : index
    %34 = vector.load %arg8[%c0_21, %c0_22, %c0_23] : memref<1x1x128xf32, #tpu.memory_space<vmem>>, vector<1x1x128xf32>
    tpu.vector_store %arg8[%c0_21, %c0_22, %c0_23], %33 {strides = array<i32>} : memref<1x1x128xf32, #tpu.memory_space<vmem>>, vector<1x1x128xf32>,
    %35 = arith.mulf %30, %26 : vector<128x128xf32>
    %cst_24 = arith.constant dense<0.000000e+00> : vector<128xf32>
    %36 = vector.multi_reduction <add>, %35, %cst_24 [0] : vector<128x128xf32> to vector<128xf32>
    %37 = vector.shape_cast %36 : vector<128xf32> to vector<1x128xf32>
    %38 = vector.shape_cast %37 : vector<1x128xf32> to vector<1x1x128xf32>
    %c0_25 = arith.constant 0 : index
    %c0_26 = arith.constant 0 : index
    %c0_27 = arith.constant 0 : index
    %39 = vector.load %arg9[%c0_25, %c0_26, %c0_27] : memref<1x1x128xf32, #tpu.memory_space<vmem>>, vector<1x1x128xf32>
    tpu.vector_store %arg9[%c0_25, %c0_26, %c0_27], %38 {strides = array<i32>} : memref<1x1x128xf32, #tpu.memory_space<vmem>>, vector<1x1x128xf32>,
    %40 = arith.truncf %26 : vector<128x128xf32> to vector<128x128xbf16>
    %c0_28 = arith.constant 0 : index
    %c0_29 = arith.constant 0 : index
    %41 = vector.load %arg7[%c0_28, %c0_29] : memref<128x128xbf16, #tpu.memory_space<vmem>>, vector<128x128xbf16>
    tpu.vector_store %arg7[%c0_28, %c0_29], %40 {strides = array<i32>} : memref<128x128xbf16, #tpu.memory_space<vmem>>, vector<128x128xbf16>,
    return
  }
  func.func @transform_0(%arg0: i32, %arg1: i32) -> (i32, i32) {
    %c0_i32 = arith.constant 0 : i32
    %c0_i32_0 = arith.constant 0 : i32
    return %arg1, %c0_i32 : i32, i32
  }
  func.func @transform_1(%arg0: i32, %arg1: i32) -> (i32, i32) {
    %c1_i32 = arith.constant 1 : i32
    %0 = arith.addi %arg1, %c1_i32 : i32
    %c2_i32 = arith.constant 2 : i32
    %1 = arith.muli %0, %c2_i32 : i32
    %c0_i32 = arith.constant 0 : i32
    %c0_i32_0 = arith.constant 0 : i32
    return %1, %c0_i32 : i32, i32
  }
  func.func @transform_2(%arg0: i32, %arg1: i32) -> (i32, i32, i32) {
    %c0_i32 = arith.constant 0 : i32
    %c0_i32_0 = arith.constant 0 : i32
    %c0_i32_1 = arith.constant 0 : i32
    return %c0_i32, %c0_i32_0, %arg0 : i32, i32, i32
  }
  func.func @transform_3(%arg0: i32, %arg1: i32) -> (i32, i32) {
    %c0_i32 = arith.constant 0 : i32
    %c0_i32_0 = arith.constant 0 : i32
    return %arg1, %c0_i32 : i32, i32
  }
  func.func @transform_4(%arg0: i32, %arg1: i32) -> (i32, i32) {
    %c0_i32 = arith.constant 0 : i32
    %c0_i32_0 = arith.constant 0 : i32
    return %c0_i32, %arg0 : i32, i32
  }
  func.func @transform_5(%arg0: i32, %arg1: i32) -> (i32, i32) {
    %c0_i32 = arith.constant 0 : i32
    return %arg1, %arg0 : i32, i32
  }
  func.func @transform_6(%arg0: i32, %arg1: i32) -> (i32, i32, i32) {
    %c0_i32 = arith.constant 0 : i32
    %c0_i32_0 = arith.constant 0 : i32
    return %arg1, %c0_i32, %arg0 : i32, i32, i32
  }
  func.func @transform_7(%arg0: i32, %arg1: i32) -> (i32, i32, i32) {
    %c0_i32 = arith.constant 0 : i32
    %c0_i32_0 = arith.constant 0 : i32
    return %arg1, %c0_i32, %arg0 : i32, i32, i32
  }
}

module attributes {stable_mosaic.version = 11 : i64} {
  func.func @_bn_relu_kernel(%arg0: i32, %arg1: i32, %arg2: memref<128x128xbf16, #tpu.memory_space<vmem>>, %arg3: memref<1x128xf32, #tpu.memory_space<vmem>>, %arg4: memref<1x128xf32, #tpu.memory_space<vmem>>, %arg5: memref<128x128xbf16, #tpu.memory_space<vmem>>) attributes {dimension_semantics = [#tpu.dimension_semantics<parallel>, #tpu.dimension_semantics<parallel>], iteration_bounds = array<i64: 1, 1>, scalar_prefetch = 0 : i64, scratch_operands = 0 : i64, tpu.core_type = #tpu.core_type<tc>, window_params = [{transform_indices = @transform_0, window_bounds = array<i64: 128, 128>}, {transform_indices = @transform_1, window_bounds = array<i64: 1, 128>}, {transform_indices = @transform_2, window_bounds = array<i64: 1, 128>}, {transform_indices = @transform_3, window_bounds = array<i64: 128, 128>}]} {
    %c0 = arith.constant 0 : index
    %c0_0 = arith.constant 0 : index
    %0 = vector.load %arg2[%c0, %c0_0] : memref<128x128xbf16, #tpu.memory_space<vmem>>, vector<128x128xbf16>
    %1 = arith.extf %0 : vector<128x128xbf16> to vector<128x128xf32>
    %c0_1 = arith.constant 0 : index
    %c0_2 = arith.constant 0 : index
    %2 = vector.load %arg3[%c0_1, %c0_2] : memref<1x128xf32, #tpu.memory_space<vmem>>, vector<1x128xf32>
    %3 = vector.broadcast %2 : vector<1x128xf32> to vector<128x128xf32>
    %4 = arith.mulf %1, %3 : vector<128x128xf32>
    %c0_3 = arith.constant 0 : index
    %c0_4 = arith.constant 0 : index
    %5 = vector.load %arg4[%c0_3, %c0_4] : memref<1x128xf32, #tpu.memory_space<vmem>>, vector<1x128xf32>
    %6 = vector.broadcast %5 : vector<1x128xf32> to vector<128x128xf32>
    %7 = arith.addf %4, %6 : vector<128x128xf32>
    %cst = arith.constant 0.000000e+00 : f32
    %8 = vector.broadcast %cst : f32 to vector<128x128xf32>
    %9 = arith.maximumf %7, %8 : vector<128x128xf32>
    %10 = arith.truncf %9 : vector<128x128xf32> to vector<128x128xbf16>
    %c0_5 = arith.constant 0 : index
    %c0_6 = arith.constant 0 : index
    %11 = vector.load %arg5[%c0_5, %c0_6] : memref<128x128xbf16, #tpu.memory_space<vmem>>, vector<128x128xbf16>
    tpu.vector_store %arg5[%c0_5, %c0_6], %10 {strides = array<i32>} : memref<128x128xbf16, #tpu.memory_space<vmem>>, vector<128x128xbf16>,
    return
  }
  func.func @transform_0(%arg0: i32, %arg1: i32) -> (i32, i32) {
    %c0_i32 = arith.constant 0 : i32
    return %arg0, %arg1 : i32, i32
  }
  func.func @transform_1(%arg0: i32, %arg1: i32) -> (i32, i32) {
    %c0_i32 = arith.constant 0 : i32
    %c0_i32_0 = arith.constant 0 : i32
    return %c0_i32, %arg1 : i32, i32
  }
  func.func @transform_2(%arg0: i32, %arg1: i32) -> (i32, i32) {
    %c0_i32 = arith.constant 0 : i32
    %c0_i32_0 = arith.constant 0 : i32
    return %c0_i32, %arg1 : i32, i32
  }
  func.func @transform_3(%arg0: i32, %arg1: i32) -> (i32, i32) {
    %c0_i32 = arith.constant 0 : i32
    return %arg0, %arg1 : i32, i32
  }
}

module attributes {stable_mosaic.version = 11 : i64} {
  func.func @_fused_gemm_kernel(%arg0: i32, %arg1: i32, %arg2: memref<256x32xbf16, #tpu.memory_space<vmem>>, %arg3: memref<64x32xbf16, #tpu.memory_space<vmem>>, %arg4: memref<4x32x64xbf16, #tpu.memory_space<vmem>>, %arg5: memref<256x4xf32, #tpu.memory_space<vmem>>, %arg6: memref<4x64xf32, #tpu.memory_space<vmem>>, %arg7: memref<256x64xbf16, #tpu.memory_space<vmem>>, %arg8: memref<1x1x64xf32, #tpu.memory_space<vmem>>, %arg9: memref<1x1x64xf32, #tpu.memory_space<vmem>>) attributes {dimension_semantics = [#tpu.dimension_semantics<parallel>, #tpu.dimension_semantics<parallel>], iteration_bounds = array<i64: 1, 1>, scalar_prefetch = 0 : i64, scratch_operands = 0 : i64, tpu.core_type = #tpu.core_type<tc>, window_params = [{transform_indices = @transform_0, window_bounds = array<i64: 256, 32>}, {transform_indices = @transform_1, window_bounds = array<i64: 64, 32>}, {transform_indices = @transform_2, window_bounds = array<i64: 4, 32, 64>}, {transform_indices = @transform_3, window_bounds = array<i64: 256, 4>}, {transform_indices = @transform_4, window_bounds = array<i64: 4, 64>}, {transform_indices = @transform_5, window_bounds = array<i64: 256, 64>}, {transform_indices = @transform_6, window_bounds = array<i64: 1, 1, 64>}, {transform_indices = @transform_7, window_bounds = array<i64: 1, 1, 64>}]} {
    %c0 = arith.constant 0 : index
    %c0_0 = arith.constant 0 : index
    %0 = vector.load %arg2[%c0, %c0_0] : memref<256x32xbf16, #tpu.memory_space<vmem>>, vector<256x32xbf16>
    %c0_1 = arith.constant 0 : index
    %c0_2 = arith.constant 0 : index
    %1 = vector.load %arg3[%c0_1, %c0_2] : memref<64x32xbf16, #tpu.memory_space<vmem>>, vector<64x32xbf16>
    %2 = tpu.concatenate %0, %1 in 0 : vector<256x32xbf16>, vector<64x32xbf16> -> vector<320x32xbf16>
    %3 = arith.extf %2 : vector<320x32xbf16> to vector<320x32xf32>
    %4 = vector.extract_strided_slice %3 {offsets = [0, 0], sizes = [256, 32], strides = [1, 1]} : vector<320x32xf32> to vector<256x32xf32>
    %5 = arith.truncf %4 : vector<256x32xf32> to vector<256x32xbf16>
    %c0_3 = arith.constant 0 : index
    %c0_4 = arith.constant 0 : index
    %c0_5 = arith.constant 0 : index
    %6 = vector.load %arg4[%c0_3, %c0_4, %c0_5] : memref<4x32x64xbf16, #tpu.memory_space<vmem>>, vector<1x32x64xbf16>
    %7 = vector.shape_cast %6 : vector<1x32x64xbf16> to vector<32x64xbf16>
    %cst = arith.constant dense<0.000000e+00> : vector<256x64xf32>
    %8 = tpu.matmul %5, %7, %cst {dimension_numbers = #tpu.dot_dimension_numbers<[1], [0], [0], [1], [0, 0, 1, 1], [], []>} : vector<256x32xbf16>, vector<32x64xbf16>, vector<256x64xf32> -> vector<256x64xf32>
    %9 = vector.extract_strided_slice %3 {offsets = [1, 0], sizes = [256, 32], strides = [1, 1]} : vector<320x32xf32> to vector<256x32xf32>
    %10 = arith.truncf %9 : vector<256x32xf32> to vector<256x32xbf16>
    %c1 = arith.constant 1 : index
    %c0_6 = arith.constant 0 : index
    %c0_7 = arith.constant 0 : index
    %11 = vector.load %arg4[%c1, %c0_6, %c0_7] : memref<4x32x64xbf16, #tpu.memory_space<vmem>>, vector<1x32x64xbf16>
    %12 = vector.shape_cast %11 : vector<1x32x64xbf16> to vector<32x64xbf16>
    %cst_8 = arith.constant dense<0.000000e+00> : vector<256x64xf32>
    %13 = tpu.matmul %10, %12, %cst_8 {dimension_numbers = #tpu.dot_dimension_numbers<[1], [0], [0], [1], [0, 0, 1, 1], [], []>} : vector<256x32xbf16>, vector<32x64xbf16>, vector<256x64xf32> -> vector<256x64xf32>
    %14 = arith.addf %8, %13 : vector<256x64xf32>
    %15 = vector.extract_strided_slice %3 {offsets = [10, 0], sizes = [256, 32], strides = [1, 1]} : vector<320x32xf32> to vector<256x32xf32>
    %16 = arith.truncf %15 : vector<256x32xf32> to vector<256x32xbf16>
    %c2 = arith.constant 2 : index
    %c0_9 = arith.constant 0 : index
    %c0_10 = arith.constant 0 : index
    %17 = vector.load %arg4[%c2, %c0_9, %c0_10] : memref<4x32x64xbf16, #tpu.memory_space<vmem>>, vector<1x32x64xbf16>
    %18 = vector.shape_cast %17 : vector<1x32x64xbf16> to vector<32x64xbf16>
    %cst_11 = arith.constant dense<0.000000e+00> : vector<256x64xf32>
    %19 = tpu.matmul %16, %18, %cst_11 {dimension_numbers = #tpu.dot_dimension_numbers<[1], [0], [0], [1], [0, 0, 1, 1], [], []>} : vector<256x32xbf16>, vector<32x64xbf16>, vector<256x64xf32> -> vector<256x64xf32>
    %20 = arith.addf %14, %19 : vector<256x64xf32>
    %21 = vector.extract_strided_slice %3 {offsets = [11, 0], sizes = [256, 32], strides = [1, 1]} : vector<320x32xf32> to vector<256x32xf32>
    %22 = arith.truncf %21 : vector<256x32xf32> to vector<256x32xbf16>
    %c3 = arith.constant 3 : index
    %c0_12 = arith.constant 0 : index
    %c0_13 = arith.constant 0 : index
    %23 = vector.load %arg4[%c3, %c0_12, %c0_13] : memref<4x32x64xbf16, #tpu.memory_space<vmem>>, vector<1x32x64xbf16>
    %24 = vector.shape_cast %23 : vector<1x32x64xbf16> to vector<32x64xbf16>
    %cst_14 = arith.constant dense<0.000000e+00> : vector<256x64xf32>
    %25 = tpu.matmul %22, %24, %cst_14 {dimension_numbers = #tpu.dot_dimension_numbers<[1], [0], [0], [1], [0, 0, 1, 1], [], []>} : vector<256x32xbf16>, vector<32x64xbf16>, vector<256x64xf32> -> vector<256x64xf32>
    %26 = arith.addf %20, %25 : vector<256x64xf32>
    %c0_15 = arith.constant 0 : index
    %c0_16 = arith.constant 0 : index
    %27 = vector.load %arg5[%c0_15, %c0_16] : memref<256x4xf32, #tpu.memory_space<vmem>>, vector<256x4xf32>
    %c0_17 = arith.constant 0 : index
    %c0_18 = arith.constant 0 : index
    %28 = vector.load %arg6[%c0_17, %c0_18] : memref<4x64xf32, #tpu.memory_space<vmem>>, vector<4x64xf32>
    %cst_19 = arith.constant dense<0.000000e+00> : vector<256x64xf32>
    %29 = tpu.matmul %27, %28, %cst_19 {dimension_numbers = #tpu.dot_dimension_numbers<[1], [0], [0], [1], [0, 0, 1, 1], [], []>} : vector<256x4xf32>, vector<4x64xf32>, vector<256x64xf32> -> vector<256x64xf32>
    %30 = arith.mulf %26, %29 : vector<256x64xf32>
    %cst_20 = arith.constant dense<0.000000e+00> : vector<64xf32>
    %31 = vector.multi_reduction <add>, %30, %cst_20 [0] : vector<256x64xf32> to vector<64xf32>
    %32 = vector.shape_cast %31 : vector<64xf32> to vector<1x64xf32>
    %33 = vector.shape_cast %32 : vector<1x64xf32> to vector<1x1x64xf32>
    %c0_21 = arith.constant 0 : index
    %c0_22 = arith.constant 0 : index
    %c0_23 = arith.constant 0 : index
    %34 = vector.load %arg8[%c0_21, %c0_22, %c0_23] : memref<1x1x64xf32, #tpu.memory_space<vmem>>, vector<1x1x64xf32>
    tpu.vector_store %arg8[%c0_21, %c0_22, %c0_23], %33 {strides = array<i32>} : memref<1x1x64xf32, #tpu.memory_space<vmem>>, vector<1x1x64xf32>,
    %35 = arith.mulf %30, %26 : vector<256x64xf32>
    %cst_24 = arith.constant dense<0.000000e+00> : vector<64xf32>
    %36 = vector.multi_reduction <add>, %35, %cst_24 [0] : vector<256x64xf32> to vector<64xf32>
    %37 = vector.shape_cast %36 : vector<64xf32> to vector<1x64xf32>
    %38 = vector.shape_cast %37 : vector<1x64xf32> to vector<1x1x64xf32>
    %c0_25 = arith.constant 0 : index
    %c0_26 = arith.constant 0 : index
    %c0_27 = arith.constant 0 : index
    %39 = vector.load %arg9[%c0_25, %c0_26, %c0_27] : memref<1x1x64xf32, #tpu.memory_space<vmem>>, vector<1x1x64xf32>
    tpu.vector_store %arg9[%c0_25, %c0_26, %c0_27], %38 {strides = array<i32>} : memref<1x1x64xf32, #tpu.memory_space<vmem>>, vector<1x1x64xf32>,
    %40 = arith.truncf %26 : vector<256x64xf32> to vector<256x64xbf16>
    %c0_28 = arith.constant 0 : index
    %c0_29 = arith.constant 0 : index
    %41 = vector.load %arg7[%c0_28, %c0_29] : memref<256x64xbf16, #tpu.memory_space<vmem>>, vector<256x64xbf16>
    tpu.vector_store %arg7[%c0_28, %c0_29], %40 {strides = array<i32>} : memref<256x64xbf16, #tpu.memory_space<vmem>>, vector<256x64xbf16>,
    return
  }
  func.func @transform_0(%arg0: i32, %arg1: i32) -> (i32, i32) {
    %c0_i32 = arith.constant 0 : i32
    %c0_i32_0 = arith.constant 0 : i32
    return %arg1, %c0_i32 : i32, i32
  }
  func.func @transform_1(%arg0: i32, %arg1: i32) -> (i32, i32) {
    %c1_i32 = arith.constant 1 : i32
    %0 = arith.addi %arg1, %c1_i32 : i32
    %c4_i32 = arith.constant 4 : i32
    %1 = arith.muli %0, %c4_i32 : i32
    %c0_i32 = arith.constant 0 : i32
    %c0_i32_0 = arith.constant 0 : i32
    return %1, %c0_i32 : i32, i32
  }
  func.func @transform_2(%arg0: i32, %arg1: i32) -> (i32, i32, i32) {
    %c0_i32 = arith.constant 0 : i32
    %c0_i32_0 = arith.constant 0 : i32
    %c0_i32_1 = arith.constant 0 : i32
    return %c0_i32, %c0_i32_0, %arg0 : i32, i32, i32
  }
  func.func @transform_3(%arg0: i32, %arg1: i32) -> (i32, i32) {
    %c0_i32 = arith.constant 0 : i32
    %c0_i32_0 = arith.constant 0 : i32
    return %arg1, %c0_i32 : i32, i32
  }
  func.func @transform_4(%arg0: i32, %arg1: i32) -> (i32, i32) {
    %c0_i32 = arith.constant 0 : i32
    %c0_i32_0 = arith.constant 0 : i32
    return %c0_i32, %arg0 : i32, i32
  }
  func.func @transform_5(%arg0: i32, %arg1: i32) -> (i32, i32) {
    %c0_i32 = arith.constant 0 : i32
    return %arg1, %arg0 : i32, i32
  }
  func.func @transform_6(%arg0: i32, %arg1: i32) -> (i32, i32, i32) {
    %c0_i32 = arith.constant 0 : i32
    %c0_i32_0 = arith.constant 0 : i32
    return %arg1, %c0_i32, %arg0 : i32, i32, i32
  }
  func.func @transform_7(%arg0: i32, %arg1: i32) -> (i32, i32, i32) {
    %c0_i32 = arith.constant 0 : i32
    %c0_i32_0 = arith.constant 0 : i32
    return %arg1, %c0_i32, %arg0 : i32, i32, i32
  }
}

module attributes {stable_mosaic.version = 11 : i64} {
  func.func @_bn_relu_kernel(%arg0: i32, %arg1: i32, %arg2: memref<256x64xbf16, #tpu.memory_space<vmem>>, %arg3: memref<1x64xf32, #tpu.memory_space<vmem>>, %arg4: memref<1x64xf32, #tpu.memory_space<vmem>>, %arg5: memref<256x64xbf16, #tpu.memory_space<vmem>>) attributes {dimension_semantics = [#tpu.dimension_semantics<parallel>, #tpu.dimension_semantics<parallel>], iteration_bounds = array<i64: 1, 1>, scalar_prefetch = 0 : i64, scratch_operands = 0 : i64, tpu.core_type = #tpu.core_type<tc>, window_params = [{transform_indices = @transform_0, window_bounds = array<i64: 256, 64>}, {transform_indices = @transform_1, window_bounds = array<i64: 1, 64>}, {transform_indices = @transform_2, window_bounds = array<i64: 1, 64>}, {transform_indices = @transform_3, window_bounds = array<i64: 256, 64>}]} {
    %c0 = arith.constant 0 : index
    %c0_0 = arith.constant 0 : index
    %0 = vector.load %arg2[%c0, %c0_0] : memref<256x64xbf16, #tpu.memory_space<vmem>>, vector<256x64xbf16>
    %1 = arith.extf %0 : vector<256x64xbf16> to vector<256x64xf32>
    %c0_1 = arith.constant 0 : index
    %c0_2 = arith.constant 0 : index
    %2 = vector.load %arg3[%c0_1, %c0_2] : memref<1x64xf32, #tpu.memory_space<vmem>>, vector<1x64xf32>
    %3 = vector.broadcast %2 : vector<1x64xf32> to vector<256x64xf32>
    %4 = arith.mulf %1, %3 : vector<256x64xf32>
    %c0_3 = arith.constant 0 : index
    %c0_4 = arith.constant 0 : index
    %5 = vector.load %arg4[%c0_3, %c0_4] : memref<1x64xf32, #tpu.memory_space<vmem>>, vector<1x64xf32>
    %6 = vector.broadcast %5 : vector<1x64xf32> to vector<256x64xf32>
    %7 = arith.addf %4, %6 : vector<256x64xf32>
    %cst = arith.constant 0.000000e+00 : f32
    %8 = vector.broadcast %cst : f32 to vector<256x64xf32>
    %9 = arith.maximumf %7, %8 : vector<256x64xf32>
    %10 = arith.truncf %9 : vector<256x64xf32> to vector<256x64xbf16>
    %c0_5 = arith.constant 0 : index
    %c0_6 = arith.constant 0 : index
    %11 = vector.load %arg5[%c0_5, %c0_6] : memref<256x64xbf16, #tpu.memory_space<vmem>>, vector<256x64xbf16>
    tpu.vector_store %arg5[%c0_5, %c0_6], %10 {strides = array<i32>} : memref<256x64xbf16, #tpu.memory_space<vmem>>, vector<256x64xbf16>,
    return
  }
  func.func @transform_0(%arg0: i32, %arg1: i32) -> (i32, i32) {
    %c0_i32 = arith.constant 0 : i32
    return %arg0, %arg1 : i32, i32
  }
  func.func @transform_1(%arg0: i32, %arg1: i32) -> (i32, i32) {
    %c0_i32 = arith.constant 0 : i32
    %c0_i32_0 = arith.constant 0 : i32
    return %c0_i32, %arg1 : i32, i32
  }
  func.func @transform_2(%arg0: i32, %arg1: i32) -> (i32, i32) {
    %c0_i32 = arith.constant 0 : i32
    %c0_i32_0 = arith.constant 0 : i32
    return %c0_i32, %arg1 : i32, i32
  }
  func.func @transform_3(%arg0: i32, %arg1: i32) -> (i32, i32) {
    %c0_i32 = arith.constant 0 : i32
    return %arg0, %arg1 : i32, i32
  }
}

module attributes {stable_mosaic.version = 11 : i64} {
  func.func @_fused_gemm_kernel(%arg0: i32, %arg1: i32, %arg2: memref<384x16xbf16, #tpu.memory_space<vmem>>, %arg3: memref<64x16xbf16, #tpu.memory_space<vmem>>, %arg4: memref<4x16x32xbf16, #tpu.memory_space<vmem>>, %arg5: memref<384x4xf32, #tpu.memory_space<vmem>>, %arg6: memref<4x32xf32, #tpu.memory_space<vmem>>, %arg7: memref<384x32xbf16, #tpu.memory_space<vmem>>, %arg8: memref<1x1x32xf32, #tpu.memory_space<vmem>>, %arg9: memref<1x1x32xf32, #tpu.memory_space<vmem>>) attributes {dimension_semantics = [#tpu.dimension_semantics<parallel>, #tpu.dimension_semantics<parallel>], iteration_bounds = array<i64: 1, 2>, scalar_prefetch = 0 : i64, scratch_operands = 0 : i64, tpu.core_type = #tpu.core_type<tc>, window_params = [{transform_indices = @transform_0, window_bounds = array<i64: 384, 16>}, {transform_indices = @transform_1, window_bounds = array<i64: 64, 16>}, {transform_indices = @transform_2, window_bounds = array<i64: 4, 16, 32>}, {transform_indices = @transform_3, window_bounds = array<i64: 384, 4>}, {transform_indices = @transform_4, window_bounds = array<i64: 4, 32>}, {transform_indices = @transform_5, window_bounds = array<i64: 384, 32>}, {transform_indices = @transform_6, window_bounds = array<i64: 1, 1, 32>}, {transform_indices = @transform_7, window_bounds = array<i64: 1, 1, 32>}]} {
    %c0 = arith.constant 0 : index
    %c0_0 = arith.constant 0 : index
    %0 = vector.load %arg2[%c0, %c0_0] : memref<384x16xbf16, #tpu.memory_space<vmem>>, vector<384x16xbf16>
    %c0_1 = arith.constant 0 : index
    %c0_2 = arith.constant 0 : index
    %1 = vector.load %arg3[%c0_1, %c0_2] : memref<64x16xbf16, #tpu.memory_space<vmem>>, vector<64x16xbf16>
    %2 = tpu.concatenate %0, %1 in 0 : vector<384x16xbf16>, vector<64x16xbf16> -> vector<448x16xbf16>
    %3 = arith.extf %2 : vector<448x16xbf16> to vector<448x16xf32>
    %4 = vector.extract_strided_slice %3 {offsets = [0, 0], sizes = [384, 16], strides = [1, 1]} : vector<448x16xf32> to vector<384x16xf32>
    %5 = arith.truncf %4 : vector<384x16xf32> to vector<384x16xbf16>
    %c0_3 = arith.constant 0 : index
    %c0_4 = arith.constant 0 : index
    %c0_5 = arith.constant 0 : index
    %6 = vector.load %arg4[%c0_3, %c0_4, %c0_5] : memref<4x16x32xbf16, #tpu.memory_space<vmem>>, vector<1x16x32xbf16>
    %7 = vector.shape_cast %6 : vector<1x16x32xbf16> to vector<16x32xbf16>
    %cst = arith.constant dense<0.000000e+00> : vector<384x32xf32>
    %8 = tpu.matmul %5, %7, %cst {dimension_numbers = #tpu.dot_dimension_numbers<[1], [0], [0], [1], [0, 0, 1, 1], [], []>} : vector<384x16xbf16>, vector<16x32xbf16>, vector<384x32xf32> -> vector<384x32xf32>
    %9 = vector.extract_strided_slice %3 {offsets = [1, 0], sizes = [384, 16], strides = [1, 1]} : vector<448x16xf32> to vector<384x16xf32>
    %10 = arith.truncf %9 : vector<384x16xf32> to vector<384x16xbf16>
    %c1 = arith.constant 1 : index
    %c0_6 = arith.constant 0 : index
    %c0_7 = arith.constant 0 : index
    %11 = vector.load %arg4[%c1, %c0_6, %c0_7] : memref<4x16x32xbf16, #tpu.memory_space<vmem>>, vector<1x16x32xbf16>
    %12 = vector.shape_cast %11 : vector<1x16x32xbf16> to vector<16x32xbf16>
    %cst_8 = arith.constant dense<0.000000e+00> : vector<384x32xf32>
    %13 = tpu.matmul %10, %12, %cst_8 {dimension_numbers = #tpu.dot_dimension_numbers<[1], [0], [0], [1], [0, 0, 1, 1], [], []>} : vector<384x16xbf16>, vector<16x32xbf16>, vector<384x32xf32> -> vector<384x32xf32>
    %14 = arith.addf %8, %13 : vector<384x32xf32>
    %15 = vector.extract_strided_slice %3 {offsets = [18, 0], sizes = [384, 16], strides = [1, 1]} : vector<448x16xf32> to vector<384x16xf32>
    %16 = arith.truncf %15 : vector<384x16xf32> to vector<384x16xbf16>
    %c2 = arith.constant 2 : index
    %c0_9 = arith.constant 0 : index
    %c0_10 = arith.constant 0 : index
    %17 = vector.load %arg4[%c2, %c0_9, %c0_10] : memref<4x16x32xbf16, #tpu.memory_space<vmem>>, vector<1x16x32xbf16>
    %18 = vector.shape_cast %17 : vector<1x16x32xbf16> to vector<16x32xbf16>
    %cst_11 = arith.constant dense<0.000000e+00> : vector<384x32xf32>
    %19 = tpu.matmul %16, %18, %cst_11 {dimension_numbers = #tpu.dot_dimension_numbers<[1], [0], [0], [1], [0, 0, 1, 1], [], []>} : vector<384x16xbf16>, vector<16x32xbf16>, vector<384x32xf32> -> vector<384x32xf32>
    %20 = arith.addf %14, %19 : vector<384x32xf32>
    %21 = vector.extract_strided_slice %3 {offsets = [19, 0], sizes = [384, 16], strides = [1, 1]} : vector<448x16xf32> to vector<384x16xf32>
    %22 = arith.truncf %21 : vector<384x16xf32> to vector<384x16xbf16>
    %c3 = arith.constant 3 : index
    %c0_12 = arith.constant 0 : index
    %c0_13 = arith.constant 0 : index
    %23 = vector.load %arg4[%c3, %c0_12, %c0_13] : memref<4x16x32xbf16, #tpu.memory_space<vmem>>, vector<1x16x32xbf16>
    %24 = vector.shape_cast %23 : vector<1x16x32xbf16> to vector<16x32xbf16>
    %cst_14 = arith.constant dense<0.000000e+00> : vector<384x32xf32>
    %25 = tpu.matmul %22, %24, %cst_14 {dimension_numbers = #tpu.dot_dimension_numbers<[1], [0], [0], [1], [0, 0, 1, 1], [], []>} : vector<384x16xbf16>, vector<16x32xbf16>, vector<384x32xf32> -> vector<384x32xf32>
    %26 = arith.addf %20, %25 : vector<384x32xf32>
    %c0_15 = arith.constant 0 : index
    %c0_16 = arith.constant 0 : index
    %27 = vector.load %arg5[%c0_15, %c0_16] : memref<384x4xf32, #tpu.memory_space<vmem>>, vector<384x4xf32>
    %c0_17 = arith.constant 0 : index
    %c0_18 = arith.constant 0 : index
    %28 = vector.load %arg6[%c0_17, %c0_18] : memref<4x32xf32, #tpu.memory_space<vmem>>, vector<4x32xf32>
    %cst_19 = arith.constant dense<0.000000e+00> : vector<384x32xf32>
    %29 = tpu.matmul %27, %28, %cst_19 {dimension_numbers = #tpu.dot_dimension_numbers<[1], [0], [0], [1], [0, 0, 1, 1], [], []>} : vector<384x4xf32>, vector<4x32xf32>, vector<384x32xf32> -> vector<384x32xf32>
    %30 = arith.mulf %26, %29 : vector<384x32xf32>
    %cst_20 = arith.constant dense<0.000000e+00> : vector<32xf32>
    %31 = vector.multi_reduction <add>, %30, %cst_20 [0] : vector<384x32xf32> to vector<32xf32>
    %32 = vector.shape_cast %31 : vector<32xf32> to vector<1x32xf32>
    %33 = vector.shape_cast %32 : vector<1x32xf32> to vector<1x1x32xf32>
    %c0_21 = arith.constant 0 : index
    %c0_22 = arith.constant 0 : index
    %c0_23 = arith.constant 0 : index
    %34 = vector.load %arg8[%c0_21, %c0_22, %c0_23] : memref<1x1x32xf32, #tpu.memory_space<vmem>>, vector<1x1x32xf32>
    tpu.vector_store %arg8[%c0_21, %c0_22, %c0_23], %33 {strides = array<i32>} : memref<1x1x32xf32, #tpu.memory_space<vmem>>, vector<1x1x32xf32>,
    %35 = arith.mulf %30, %26 : vector<384x32xf32>
    %cst_24 = arith.constant dense<0.000000e+00> : vector<32xf32>
    %36 = vector.multi_reduction <add>, %35, %cst_24 [0] : vector<384x32xf32> to vector<32xf32>
    %37 = vector.shape_cast %36 : vector<32xf32> to vector<1x32xf32>
    %38 = vector.shape_cast %37 : vector<1x32xf32> to vector<1x1x32xf32>
    %c0_25 = arith.constant 0 : index
    %c0_26 = arith.constant 0 : index
    %c0_27 = arith.constant 0 : index
    %39 = vector.load %arg9[%c0_25, %c0_26, %c0_27] : memref<1x1x32xf32, #tpu.memory_space<vmem>>, vector<1x1x32xf32>
    tpu.vector_store %arg9[%c0_25, %c0_26, %c0_27], %38 {strides = array<i32>} : memref<1x1x32xf32, #tpu.memory_space<vmem>>, vector<1x1x32xf32>,
    %40 = arith.truncf %26 : vector<384x32xf32> to vector<384x32xbf16>
    %c0_28 = arith.constant 0 : index
    %c0_29 = arith.constant 0 : index
    %41 = vector.load %arg7[%c0_28, %c0_29] : memref<384x32xbf16, #tpu.memory_space<vmem>>, vector<384x32xbf16>
    tpu.vector_store %arg7[%c0_28, %c0_29], %40 {strides = array<i32>} : memref<384x32xbf16, #tpu.memory_space<vmem>>, vector<384x32xbf16>,
    return
  }
  func.func @transform_0(%arg0: i32, %arg1: i32) -> (i32, i32) {
    %c0_i32 = arith.constant 0 : i32
    %c0_i32_0 = arith.constant 0 : i32
    return %arg1, %c0_i32 : i32, i32
  }
  func.func @transform_1(%arg0: i32, %arg1: i32) -> (i32, i32) {
    %c1_i32 = arith.constant 1 : i32
    %0 = arith.addi %arg1, %c1_i32 : i32
    %c6_i32 = arith.constant 6 : i32
    %1 = arith.muli %0, %c6_i32 : i32
    %c0_i32 = arith.constant 0 : i32
    %c0_i32_0 = arith.constant 0 : i32
    return %1, %c0_i32 : i32, i32
  }
  func.func @transform_2(%arg0: i32, %arg1: i32) -> (i32, i32, i32) {
    %c0_i32 = arith.constant 0 : i32
    %c0_i32_0 = arith.constant 0 : i32
    %c0_i32_1 = arith.constant 0 : i32
    return %c0_i32, %c0_i32_0, %arg0 : i32, i32, i32
  }
  func.func @transform_3(%arg0: i32, %arg1: i32) -> (i32, i32) {
    %c0_i32 = arith.constant 0 : i32
    %c0_i32_0 = arith.constant 0 : i32
    return %arg1, %c0_i32 : i32, i32
  }
  func.func @transform_4(%arg0: i32, %arg1: i32) -> (i32, i32) {
    %c0_i32 = arith.constant 0 : i32
    %c0_i32_0 = arith.constant 0 : i32
    return %c0_i32, %arg0 : i32, i32
  }
  func.func @transform_5(%arg0: i32, %arg1: i32) -> (i32, i32) {
    %c0_i32 = arith.constant 0 : i32
    return %arg1, %arg0 : i32, i32
  }
  func.func @transform_6(%arg0: i32, %arg1: i32) -> (i32, i32, i32) {
    %c0_i32 = arith.constant 0 : i32
    %c0_i32_0 = arith.constant 0 : i32
    return %arg1, %c0_i32, %arg0 : i32, i32, i32
  }
  func.func @transform_7(%arg0: i32, %arg1: i32) -> (i32, i32, i32) {
    %c0_i32 = arith.constant 0 : i32
    %c0_i32_0 = arith.constant 0 : i32
    return %arg1, %c0_i32, %arg0 : i32, i32, i32
  }
}

module attributes {stable_mosaic.version = 11 : i64} {
  func.func @_bn_relu_kernel(%arg0: i32, %arg1: i32, %arg2: memref<384x32xbf16, #tpu.memory_space<vmem>>, %arg3: memref<1x32xf32, #tpu.memory_space<vmem>>, %arg4: memref<1x32xf32, #tpu.memory_space<vmem>>, %arg5: memref<384x32xbf16, #tpu.memory_space<vmem>>) attributes {dimension_semantics = [#tpu.dimension_semantics<parallel>, #tpu.dimension_semantics<parallel>], iteration_bounds = array<i64: 2, 1>, scalar_prefetch = 0 : i64, scratch_operands = 0 : i64, tpu.core_type = #tpu.core_type<tc>, window_params = [{transform_indices = @transform_0, window_bounds = array<i64: 384, 32>}, {transform_indices = @transform_1, window_bounds = array<i64: 1, 32>}, {transform_indices = @transform_2, window_bounds = array<i64: 1, 32>}, {transform_indices = @transform_3, window_bounds = array<i64: 384, 32>}]} {
    %c0 = arith.constant 0 : index
    %c0_0 = arith.constant 0 : index
    %0 = vector.load %arg2[%c0, %c0_0] : memref<384x32xbf16, #tpu.memory_space<vmem>>, vector<384x32xbf16>
    %1 = arith.extf %0 : vector<384x32xbf16> to vector<384x32xf32>
    %c0_1 = arith.constant 0 : index
    %c0_2 = arith.constant 0 : index
    %2 = vector.load %arg3[%c0_1, %c0_2] : memref<1x32xf32, #tpu.memory_space<vmem>>, vector<1x32xf32>
    %3 = vector.broadcast %2 : vector<1x32xf32> to vector<384x32xf32>
    %4 = arith.mulf %1, %3 : vector<384x32xf32>
    %c0_3 = arith.constant 0 : index
    %c0_4 = arith.constant 0 : index
    %5 = vector.load %arg4[%c0_3, %c0_4] : memref<1x32xf32, #tpu.memory_space<vmem>>, vector<1x32xf32>
    %6 = vector.broadcast %5 : vector<1x32xf32> to vector<384x32xf32>
    %7 = arith.addf %4, %6 : vector<384x32xf32>
    %cst = arith.constant 0.000000e+00 : f32
    %8 = vector.broadcast %cst : f32 to vector<384x32xf32>
    %9 = arith.maximumf %7, %8 : vector<384x32xf32>
    %10 = arith.truncf %9 : vector<384x32xf32> to vector<384x32xbf16>
    %c0_5 = arith.constant 0 : index
    %c0_6 = arith.constant 0 : index
    %11 = vector.load %arg5[%c0_5, %c0_6] : memref<384x32xbf16, #tpu.memory_space<vmem>>, vector<384x32xbf16>
    tpu.vector_store %arg5[%c0_5, %c0_6], %10 {strides = array<i32>} : memref<384x32xbf16, #tpu.memory_space<vmem>>, vector<384x32xbf16>,
    return
  }
  func.func @transform_0(%arg0: i32, %arg1: i32) -> (i32, i32) {
    %c0_i32 = arith.constant 0 : i32
    return %arg0, %arg1 : i32, i32
  }
  func.func @transform_1(%arg0: i32, %arg1: i32) -> (i32, i32) {
    %c0_i32 = arith.constant 0 : i32
    %c0_i32_0 = arith.constant 0 : i32
    return %c0_i32, %arg1 : i32, i32
  }
  func.func @transform_2(%arg0: i32, %arg1: i32) -> (i32, i32) {
    %c0_i32 = arith.constant 0 : i32
    %c0_i32_0 = arith.constant 0 : i32
    return %c0_i32, %arg1 : i32, i32
  }
  func.func @transform_3(%arg0: i32, %arg1: i32) -> (i32, i32) {
    %c0_i32 = arith.constant 0 : i32
    return %arg0, %arg1 : i32, i32
  }
}

module attributes {stable_mosaic.version = 11 : i64} {
  func.func @_fused_gemm_kernel(%arg0: i32, %arg1: i32, %arg2: memref<512x8xbf16, #tpu.memory_space<vmem>>, %arg3: memref<64x8xbf16, #tpu.memory_space<vmem>>, %arg4: memref<4x8x12xbf16, #tpu.memory_space<vmem>>, %arg5: memref<512x4xf32, #tpu.memory_space<vmem>>, %arg6: memref<4x12xf32, #tpu.memory_space<vmem>>, %arg7: memref<512x12xf32, #tpu.memory_space<vmem>>, %arg8: memref<1x1x12xf32, #tpu.memory_space<vmem>>, %arg9: memref<1x1x12xf32, #tpu.memory_space<vmem>>) attributes {dimension_semantics = [#tpu.dimension_semantics<parallel>, #tpu.dimension_semantics<parallel>], iteration_bounds = array<i64: 1, 5>, scalar_prefetch = 0 : i64, scratch_operands = 0 : i64, tpu.core_type = #tpu.core_type<tc>, window_params = [{transform_indices = @transform_0, window_bounds = array<i64: 512, 8>}, {transform_indices = @transform_1, window_bounds = array<i64: 64, 8>}, {transform_indices = @transform_2, window_bounds = array<i64: 4, 8, 12>}, {transform_indices = @transform_3, window_bounds = array<i64: 512, 4>}, {transform_indices = @transform_4, window_bounds = array<i64: 4, 12>}, {transform_indices = @transform_5, window_bounds = array<i64: 512, 12>}, {transform_indices = @transform_6, window_bounds = array<i64: 1, 1, 12>}, {transform_indices = @transform_7, window_bounds = array<i64: 1, 1, 12>}]} {
    %c0 = arith.constant 0 : index
    %c0_0 = arith.constant 0 : index
    %0 = vector.load %arg2[%c0, %c0_0] : memref<512x8xbf16, #tpu.memory_space<vmem>>, vector<512x8xbf16>
    %c0_1 = arith.constant 0 : index
    %c0_2 = arith.constant 0 : index
    %1 = vector.load %arg3[%c0_1, %c0_2] : memref<64x8xbf16, #tpu.memory_space<vmem>>, vector<64x8xbf16>
    %2 = tpu.concatenate %0, %1 in 0 : vector<512x8xbf16>, vector<64x8xbf16> -> vector<576x8xbf16>
    %3 = arith.extf %2 : vector<576x8xbf16> to vector<576x8xf32>
    %4 = vector.extract_strided_slice %3 {offsets = [0, 0], sizes = [512, 8], strides = [1, 1]} : vector<576x8xf32> to vector<512x8xf32>
    %5 = arith.truncf %4 : vector<512x8xf32> to vector<512x8xbf16>
    %c0_3 = arith.constant 0 : index
    %c0_4 = arith.constant 0 : index
    %c0_5 = arith.constant 0 : index
    %6 = vector.load %arg4[%c0_3, %c0_4, %c0_5] : memref<4x8x12xbf16, #tpu.memory_space<vmem>>, vector<1x8x12xbf16>
    %7 = vector.shape_cast %6 : vector<1x8x12xbf16> to vector<8x12xbf16>
    %cst = arith.constant dense<0.000000e+00> : vector<512x12xf32>
    %8 = tpu.matmul %5, %7, %cst {dimension_numbers = #tpu.dot_dimension_numbers<[1], [0], [0], [1], [0, 0, 1, 1], [], []>} : vector<512x8xbf16>, vector<8x12xbf16>, vector<512x12xf32> -> vector<512x12xf32>
    %9 = vector.extract_strided_slice %3 {offsets = [1, 0], sizes = [512, 8], strides = [1, 1]} : vector<576x8xf32> to vector<512x8xf32>
    %10 = arith.truncf %9 : vector<512x8xf32> to vector<512x8xbf16>
    %c1 = arith.constant 1 : index
    %c0_6 = arith.constant 0 : index
    %c0_7 = arith.constant 0 : index
    %11 = vector.load %arg4[%c1, %c0_6, %c0_7] : memref<4x8x12xbf16, #tpu.memory_space<vmem>>, vector<1x8x12xbf16>
    %12 = vector.shape_cast %11 : vector<1x8x12xbf16> to vector<8x12xbf16>
    %cst_8 = arith.constant dense<0.000000e+00> : vector<512x12xf32>
    %13 = tpu.matmul %10, %12, %cst_8 {dimension_numbers = #tpu.dot_dimension_numbers<[1], [0], [0], [1], [0, 0, 1, 1], [], []>} : vector<512x8xbf16>, vector<8x12xbf16>, vector<512x12xf32> -> vector<512x12xf32>
    %14 = arith.addf %8, %13 : vector<512x12xf32>
    %15 = vector.extract_strided_slice %3 {offsets = [34, 0], sizes = [512, 8], strides = [1, 1]} : vector<576x8xf32> to vector<512x8xf32>
    %16 = arith.truncf %15 : vector<512x8xf32> to vector<512x8xbf16>
    %c2 = arith.constant 2 : index
    %c0_9 = arith.constant 0 : index
    %c0_10 = arith.constant 0 : index
    %17 = vector.load %arg4[%c2, %c0_9, %c0_10] : memref<4x8x12xbf16, #tpu.memory_space<vmem>>, vector<1x8x12xbf16>
    %18 = vector.shape_cast %17 : vector<1x8x12xbf16> to vector<8x12xbf16>
    %cst_11 = arith.constant dense<0.000000e+00> : vector<512x12xf32>
    %19 = tpu.matmul %16, %18, %cst_11 {dimension_numbers = #tpu.dot_dimension_numbers<[1], [0], [0], [1], [0, 0, 1, 1], [], []>} : vector<512x8xbf16>, vector<8x12xbf16>, vector<512x12xf32> -> vector<512x12xf32>
    %20 = arith.addf %14, %19 : vector<512x12xf32>
    %21 = vector.extract_strided_slice %3 {offsets = [35, 0], sizes = [512, 8], strides = [1, 1]} : vector<576x8xf32> to vector<512x8xf32>
    %22 = arith.truncf %21 : vector<512x8xf32> to vector<512x8xbf16>
    %c3 = arith.constant 3 : index
    %c0_12 = arith.constant 0 : index
    %c0_13 = arith.constant 0 : index
    %23 = vector.load %arg4[%c3, %c0_12, %c0_13] : memref<4x8x12xbf16, #tpu.memory_space<vmem>>, vector<1x8x12xbf16>
    %24 = vector.shape_cast %23 : vector<1x8x12xbf16> to vector<8x12xbf16>
    %cst_14 = arith.constant dense<0.000000e+00> : vector<512x12xf32>
    %25 = tpu.matmul %22, %24, %cst_14 {dimension_numbers = #tpu.dot_dimension_numbers<[1], [0], [0], [1], [0, 0, 1, 1], [], []>} : vector<512x8xbf16>, vector<8x12xbf16>, vector<512x12xf32> -> vector<512x12xf32>
    %26 = arith.addf %20, %25 : vector<512x12xf32>
    %c0_15 = arith.constant 0 : index
    %c0_16 = arith.constant 0 : index
    %27 = vector.load %arg5[%c0_15, %c0_16] : memref<512x4xf32, #tpu.memory_space<vmem>>, vector<512x4xf32>
    %c0_17 = arith.constant 0 : index
    %c0_18 = arith.constant 0 : index
    %28 = vector.load %arg6[%c0_17, %c0_18] : memref<4x12xf32, #tpu.memory_space<vmem>>, vector<4x12xf32>
    %cst_19 = arith.constant dense<0.000000e+00> : vector<512x12xf32>
    %29 = tpu.matmul %27, %28, %cst_19 {dimension_numbers = #tpu.dot_dimension_numbers<[1], [0], [0], [1], [0, 0, 1, 1], [], []>} : vector<512x4xf32>, vector<4x12xf32>, vector<512x12xf32> -> vector<512x12xf32>
    %30 = arith.mulf %26, %29 : vector<512x12xf32>
    %cst_20 = arith.constant dense<0.000000e+00> : vector<12xf32>
    %31 = vector.multi_reduction <add>, %30, %cst_20 [0] : vector<512x12xf32> to vector<12xf32>
    %32 = vector.shape_cast %31 : vector<12xf32> to vector<1x12xf32>
    %33 = vector.shape_cast %32 : vector<1x12xf32> to vector<1x1x12xf32>
    %c0_21 = arith.constant 0 : index
    %c0_22 = arith.constant 0 : index
    %c0_23 = arith.constant 0 : index
    %34 = vector.load %arg8[%c0_21, %c0_22, %c0_23] : memref<1x1x12xf32, #tpu.memory_space<vmem>>, vector<1x1x12xf32>
    tpu.vector_store %arg8[%c0_21, %c0_22, %c0_23], %33 {strides = array<i32>} : memref<1x1x12xf32, #tpu.memory_space<vmem>>, vector<1x1x12xf32>,
    %35 = arith.mulf %30, %26 : vector<512x12xf32>
    %cst_24 = arith.constant dense<0.000000e+00> : vector<12xf32>
    %36 = vector.multi_reduction <add>, %35, %cst_24 [0] : vector<512x12xf32> to vector<12xf32>
    %37 = vector.shape_cast %36 : vector<12xf32> to vector<1x12xf32>
    %38 = vector.shape_cast %37 : vector<1x12xf32> to vector<1x1x12xf32>
    %c0_25 = arith.constant 0 : index
    %c0_26 = arith.constant 0 : index
    %c0_27 = arith.constant 0 : index
    %39 = vector.load %arg9[%c0_25, %c0_26, %c0_27] : memref<1x1x12xf32, #tpu.memory_space<vmem>>, vector<1x1x12xf32>
    tpu.vector_store %arg9[%c0_25, %c0_26, %c0_27], %38 {strides = array<i32>} : memref<1x1x12xf32, #tpu.memory_space<vmem>>, vector<1x1x12xf32>,
    %40 = math.tanh %26 : vector<512x12xf32>
    %c0_28 = arith.constant 0 : index
    %c0_29 = arith.constant 0 : index
    %41 = vector.load %arg7[%c0_28, %c0_29] : memref<512x12xf32, #tpu.memory_space<vmem>>, vector<512x12xf32>
    tpu.vector_store %arg7[%c0_28, %c0_29], %40 {strides = array<i32>} : memref<512x12xf32, #tpu.memory_space<vmem>>, vector<512x12xf32>,
    return
  }
  func.func @transform_0(%arg0: i32, %arg1: i32) -> (i32, i32) {
    %c0_i32 = arith.constant 0 : i32
    %c0_i32_0 = arith.constant 0 : i32
    return %arg1, %c0_i32 : i32, i32
  }
  func.func @transform_1(%arg0: i32, %arg1: i32) -> (i32, i32) {
    %c1_i32 = arith.constant 1 : i32
    %0 = arith.addi %arg1, %c1_i32 : i32
    %c8_i32 = arith.constant 8 : i32
    %1 = arith.muli %0, %c8_i32 : i32
    %c0_i32 = arith.constant 0 : i32
    %c0_i32_0 = arith.constant 0 : i32
    return %1, %c0_i32 : i32, i32
  }
  func.func @transform_2(%arg0: i32, %arg1: i32) -> (i32, i32, i32) {
    %c0_i32 = arith.constant 0 : i32
    %c0_i32_0 = arith.constant 0 : i32
    %c0_i32_1 = arith.constant 0 : i32
    return %c0_i32, %c0_i32_0, %arg0 : i32, i32, i32
  }
  func.func @transform_3(%arg0: i32, %arg1: i32) -> (i32, i32) {
    %c0_i32 = arith.constant 0 : i32
    %c0_i32_0 = arith.constant 0 : i32
    return %arg1, %c0_i32 : i32, i32
  }
  func.func @transform_4(%arg0: i32, %arg1: i32) -> (i32, i32) {
    %c0_i32 = arith.constant 0 : i32
    %c0_i32_0 = arith.constant 0 : i32
    return %c0_i32, %arg0 : i32, i32
  }
  func.func @transform_5(%arg0: i32, %arg1: i32) -> (i32, i32) {
    %c0_i32 = arith.constant 0 : i32
    return %arg1, %arg0 : i32, i32
  }
  func.func @transform_6(%arg0: i32, %arg1: i32) -> (i32, i32, i32) {
    %c0_i32 = arith.constant 0 : i32
    %c0_i32_0 = arith.constant 0 : i32
    return %arg1, %c0_i32, %arg0 : i32, i32, i32
  }
  func.func @transform_7(%arg0: i32, %arg1: i32) -> (i32, i32, i32) {
    %c0_i32 = arith.constant 0 : i32
    %c0_i32_0 = arith.constant 0 : i32
    return %arg1, %c0_i32, %arg0 : i32, i32, i32
  }
}

</mosaic_0001>

<bundles_post_ra>
// kernel: tile.48
= control target key start
LH: loop header
LB: loop body
LE: loop exit
PB: predicated region body
PF: predicated region fallthrough
CT: control target
= control target key end

     0   :  { %s28_s0 = inlined_call_operand.vmem [shape: f32[64], index: 0, kind: input, shape index: {}]   ;;  %s29_s1 = inlined_call_operand.vmem [shape: f32[16,64], index: 1, kind: output, shape index: {}]  }
   0x1   :  { %v4_v0 = vld [vmem:[%s28_s0] ss:$0 sm:$0xff] }
   0x2   :  { %5 = vst [vmem:[%s29_s1] sm:$0xff] %v4_v0  ;;  %8 = vst [vmem:[%s29_s1 + $0x8] sm:$0xff] %v4_v0 }

// kernel: generator_forward.10
= control target key start
LH: loop header
LB: loop body
LE: loop exit
PB: predicated region body
PF: predicated region fallthrough
CT: control target
= control target key end

     0   :  { %v28_v0 = vlaneseq  ;;  %s232_s0 = inlined_call_operand.vmem [shape: bf16[8,1024], index: 0, kind: input, shape index: {}]   ;;  %s233_s1 = inlined_call_operand.vmem [shape: f32[1,1024], index: 1, kind: input, shape index: {}]   ;;  %s234_s2 = inlined_call_operand.vmem [shape: f32[1,1024], index: 2, kind: input, shape index: {}]   ;;  %s235_s3 = inlined_call_operand.vmem [shape: bf16[8,1024], index: 3, kind: output, shape index: {}]  }
   0x1   :  { %v14_v1 = vld [vmem:[%s232_s0] sm:$0xff]  ;;  %v15_v5 = vld [vmem:[%s232_s0 + $0x8] sm:$0xff]  ;;  %v16_v6 = vld [vmem:[%s232_s0 + $0x10] sm:$0xff] }
   0x2   :  { %v18_v2 = vunpack.c.l.bf16 %v14_v1  ;;  %v19_v3 = vunpack.c.h.bf16 %v14_v1  ;;  %v29_v4 = vshrl.u32 %v28_v0, 7  ;;  %v17_v7 = vld [vmem:[%s232_s0 + $0x18] sm:$0xff]  ;;  %v26_v8 = vld [vmem:[%s233_s1] sm:$0xff]  ;;  %v20_v10 = vunpack.c.l.bf16 %v15_v5 }
   0x3   :  { %v76_v9 = vld [vmem:[%s234_s2] sm:$0xff]  ;;  %v21_v11 = vunpack.c.h.bf16 %v15_v5  ;;  %v22_v12 = vunpack.c.l.bf16 %v16_v6  ;;  %v23_v13 = vunpack.c.h.bf16 %v16_v6  ;;  %v24_v20 = vunpack.c.l.bf16 %v17_v7 }
   0x4   :  { %v30_v14 = vsub.s32 0, %v29_v4  ;;  %v34_v15 = vsub.s32 1, %v29_v4  ;;  %v38_v16 = vsub.s32 2, %v29_v4  ;;  %v42_v17 = vsub.s32 3, %v29_v4 }
   0x5   :  { %v46_v18 = vsub.s32 4, %v29_v4  ;;  %v50_v19 = vsub.s32 5, %v29_v4  ;;  %v25_v21 = vunpack.c.h.bf16 %v17_v7  ;;  %v54_v44 = vsub.s32 6, %v29_v4 }
   0x6   :  { %v31_v22 = vrot.slane %v26_v8, %v30_v14  ;;  %v35_v23 = vrot.slane %v26_v8, %v34_v15  ;;  %v81_v24 = vrot.slane %v76_v9, %v30_v14  ;;  %v85_v25 = vrot.slane %v76_v9, %v34_v15 }
   0x7   :  { %v39_v26 = vrot.slane %v26_v8, %v38_v16  ;;  %v43_v27 = vrot.slane %v26_v8, %v42_v17  ;;  %v89_v28 = vrot.slane %v76_v9, %v38_v16  ;;  %v93_v29 = vrot.slane %v76_v9, %v42_v17 }
   0x8   :  { %v68_v30 = vmul.f32 %v31_v22, %v18_v2  ;;  %v69_v31 = vmul.f32 %v35_v23, %v19_v3  ;;  %v47_v32 = vrot.slane %v26_v8, %v46_v18  ;;  %v51_v33 = vrot.slane %v26_v8, %v50_v19 }
   0x9   :  { %v70_v34 = vmul.f32 %v39_v26, %v20_v10  ;;  %v71_v35 = vmul.f32 %v43_v27, %v21_v11  ;;  %v97_v36 = vrot.slane %v76_v9, %v46_v18  ;;  %v101_v37 = vrot.slane %v76_v9, %v50_v19 }
   0xa   :  { %v118_v38 = vadd.f32 %v81_v24, %v68_v30  ;;  %v119_v39 = vadd.f32 %v85_v25, %v69_v31  ;;  %v72_v40 = vmul.f32 %v47_v32, %v22_v12  ;;  %v73_v41 = vmul.f32 %v51_v33, %v23_v13 }
   0xb   :  { %v120_v42 = vadd.f32 %v89_v28, %v70_v34  ;;  %v121_v43 = vadd.f32 %v93_v29, %v71_v35  ;;  %v58_v45 = vsub.s32 7, %v29_v4  ;;  %v55_v52 = vrot.slane %v26_v8, %v54_v44 }
   0xc   :  { %v126_v46 = vmax.f32 %v118_v38, 0.0  ;;  %v127_v47 = vmax.f32 %v119_v39, 0.0  ;;  %v122_v48 = vadd.f32 %v97_v36, %v72_v40  ;;  %v123_v49 = vadd.f32 %v101_v37, %v73_v41 }
   0xd   :  { %v128_v50 = vmax.f32 %v120_v42, 0.0  ;;  %v129_v51 = vmax.f32 %v121_v43, 0.0  ;;  %v59_v53 = vrot.slane %v26_v8, %v58_v45  ;;  %v105_v57 = vrot.slane %v76_v9, %v54_v44 }
   0xe   :  { %v178_v54 = vpack.c.bf16 %v127_v47, %v126_v46  ;;  %v130_v55 = vmax.f32 %v122_v48, 0.0  ;;  %v131_v56 = vmax.f32 %v123_v49, 0.0  ;;  %v74_v59 = vmul.f32 %v55_v52, %v24_v20 }
   0xf   :  { %v179_v58 = vpack.c.bf16 %v129_v51, %v128_v50  ;;  %v75_v60 = vmul.f32 %v59_v53, %v25_v21  ;;  %v109_v61 = vrot.slane %v76_v9, %v58_v45 }
  0x10   :  { %166 = vst [vmem:[%s235_s3] sm:$0xff] %v178_v54  ;;  %v180_v62 = vpack.c.bf16 %v131_v56, %v130_v55  ;;  %v124_v63 = vadd.f32 %v105_v57, %v74_v59 }
  0x11   :  { %167 = vst [vmem:[%s235_s3 + $0x8] sm:$0xff] %v179_v58  ;;  %v125_v0 = vadd.f32 %v109_v61, %v75_v60 }
  0x12   :  { %168 = vst [vmem:[%s235_s3 + $0x10] sm:$0xff] %v180_v62  ;;  %v132_v1 = vmax.f32 %v124_v63, 0.0 }
  0x13   :  { %v133_v2 = vmax.f32 %v125_v0, 0.0 }
  0x15   :  { %v181_v3 = vpack.c.bf16 %v133_v2, %v132_v1 }
  0x17   :  { %169 = vst [vmem:[%s235_s3 + $0x18] sm:$0xff] %v181_v3 }

// kernel: generator_forward.9
= control target key start
LH: loop header
LB: loop body
LE: loop exit
PB: predicated region body
PF: predicated region fallthrough
CT: control target
= control target key end

     0   :  { %v244_v0 = vlaneseq  ;;  %v894_v4 = vmov 0   ;;  %vm73_vm0 = vcmask 130048   ;;  %vm280_vm1 = vcmask 1040384   ;;  %s1057_s1 = inlined_call_operand.vmem [shape: bf16[8,16], index: 1, kind: input, shape index: {}, may-alias: {0,1}]   ;;  %s1058_s2 = inlined_call_operand.vmem [shape: bf16[1,16,1024], index: 2, kind: input, shape index: {}]   ;;  %s1059_s4 = inlined_call_operand.vmem [shape: f32[1,1024], index: 4, kind: input, shape index: {}]   ;;  %s1060_s0 = inlined_call_operand.vmem [shape: bf16[8,16], index: 0, kind: input, shape index: {}, may-alias: {0,1}]   ;;  %s1061_s3 = inlined_call_operand.vmem [shape: f32[8,1], index: 3, kind: input, shape index: {}]   ;;  %s1062_s5 = inlined_call_operand.vmem [shape: bf16[8,1024], index: 5, kind: output, shape index: {0}]   ;;  %s1063_s6 = inlined_call_operand.vmem [shape: f32[1,1,1024], index: 6, kind: output, shape index: {1}]   ;;  %s1064_s7 = inlined_call_operand.vmem [shape: f32[1,1,1024], index: 7, kind: output, shape index: {2}]  }
   0x1   :  { %v25_v1 = vld [vmem:[%s1058_s2] sm:$0xff]  ;;  %v26_v3 = vld [vmem:[%s1058_s2 + $0x8] sm:$0xff]  ;;  %109 = vmatprep.mubr.bf16.mxu0 %v894_v4  ;;  %150 = vmatprep.mubr.bf16.mxu1 %v894_v4  ;;  %v27_v8 = vld [vmem:[%s1058_s2 + $0x10] sm:$0xff]  ;;  %v895_v34 = vmov 0.0   ;;  %vm276_vm2 = vcmask 7168  }
   0x2   :  { %v29_v2 = vld [vmem:[%s1058_s2 + $0x20] sm:$0xff]  ;;  %v30_v6 = vld [vmem:[%s1058_s2 + $0x28] sm:$0xff]  ;;  %v952_v9 = vshrl.u32 %v244_v0, 7  ;;  %v31_v12 = vld [vmem:[%s1058_s2 + $0x30] sm:$0xff]  ;;  %v896_v58 = vmov 1966171168  }
   0x3   :  { %v860_v5 = vcombine.high %v25_v1, %v29_v2  ;;  %v859_v7 = vcombine.low %v25_v1, %v29_v2  ;;  %v862_v10 = vcombine.high %v26_v3, %v30_v6  ;;  %v861_v11 = vcombine.low %v26_v3, %v30_v6  ;;  %v28_v13 = vld [vmem:[%s1058_s2 + $0x18] sm:$0xff]  ;;  %v242_v17 = vld [vmem:[%s1059_s4] sm:$0xff] }
   0x4   :  { %v32_v14 = vld [vmem:[%s1058_s2 + $0x38] sm:$0xff]  ;;  %v864_v15 = vcombine.high %v27_v8, %v31_v12  ;;  %v24_v18 = vld [vmem:[%s1060_s0] sm:$0xf]  ;;  %v863_v19 = vcombine.low %v27_v8, %v31_v12  ;;  %v250_v20 = vsub.s32 1, %v952_v9  ;;  %v258_v21 = vsub.s32 3, %v952_v9 }
   0x5   :  { %77 = vmatprep.subr.bf16.mxu0 %v860_v5  ;;  %v866_v16 = vcombine.high %v28_v13, %v32_v14  ;;  %118 = vmatprep.subr.bf16.mxu1 %v862_v10  ;;  %v865_v22 = vcombine.low %v28_v13, %v32_v14  ;;  %v246_v25 = vsub.s32 0, %v952_v9  ;;  %v254_v26 = vsub.s32 2, %v952_v9  ;;  %v241_v36 = vld [vmem:[%s1061_s3] sm:$0xff] }
   0x6   :  { %78 = vmatpush1.bf16.msra.mxu0 %v859_v7  ;;  %119 = vmatpush1.bf16.msra.mxu1 %v861_v11  ;;  %v251_v23 = vrot.slane %v242_v17, %v250_v20  ;;  %v259_v24 = vrot.slane %v242_v17, %v258_v21  ;;  %v266_v27 = vsub.s32 5, %v952_v9  ;;  %v274_v28 = vsub.s32 7, %v952_v9 }
   0x7   :  { %159 = vmatprep.subr.bf16.mxu0 %v864_v15  ;;  %200 = vmatprep.subr.bf16.mxu1 %v866_v16  ;;  %v247_v29 = vrot.slane %v242_v17, %v246_v25  ;;  %v255_v30 = vrot.slane %v242_v17, %v254_v26  ;;  %v262_v33 = vsub.s32 4, %v952_v9  ;;  %v270_v35 = vsub.s32 6, %v952_v9 }
   0x8   :  { %v267_v31 = vrot.slane %v242_v17, %v266_v27  ;;  %v275_v32 = vrot.slane %v242_v17, %v274_v28  ;;  %v650_v59 = vunpack.c.l.s4 %v896_v58 }
   0x9   :  { %867 = vmatmul.mubr.msk.bf16.vlgmr.msra.gmra.mrb[0].mxu0 %vm73_vm0, %v24_v18  ;;  %868 = vmatmul.mubr.msk.bf16.vlgmr.msra.gmra.mrb[0].mxu1 %vm73_vm0, %v24_v18  ;;  %v263_v37 = vrot.slane %v242_v17, %v262_v33  ;;  %v271_v38 = vrot.slane %v242_v17, %v270_v35 }
   0xa   :  { %160 = vmatpush1.bf16.msra.mxu0 %v863_v19  ;;  %201 = vmatpush1.bf16.msra.mxu1 %v865_v22  ;;  %v651_v61 = vunpack.c.0.s8 %v650_v59 }
   0xb   :  { %191 = vmatprep.mubr.bf16.mxu0 %v894_v4  ;;  %232 = vmatprep.mubr.bf16.mxu1 %v894_v4 }
   0xc   :  { %871 = vmatprep.subr.msk.mxu0 %vm280_vm1, %v251_v23  ;;  %874 = vmatprep.subr.msk.mxu1 %vm280_vm1, %v259_v24  ;;  %v1017_v7 = vsub.s32 %v651_v61, %v952_v9 }
  0x11   :  { %869 = vmatmul.mubr.msk.bf16.vlgmr.msra.gmra.mrb[4].mxu0 %vm73_vm0, %v24_v18  ;;  %870 = vmatmul.mubr.msk.bf16.vlgmr.msra.gmra.mrb[4].mxu1 %vm73_vm0, %v24_v18 }
  0x12   :  { %872 = vmatpush1.msk.msra.mxu0 %vm280_vm1, %v247_v29  ;;  %875 = vmatpush1.msk.msra.mxu1 %vm280_vm1, %v255_v30 }
  0x13   :  { %361 = vmatprep.mubr.f32.mxu0 %v895_v34  ;;  %432 = vmatprep.mubr.f32.mxu1 %v895_v34 }
  0x14   :  { %877 = vmatprep.subr.msk.mxu0 %vm280_vm1, %v267_v31  ;;  %880 = vmatprep.subr.msk.mxu1 %vm280_vm1, %v275_v32 }
  0x19   :  { %873 = vmatmul.mubr.msk.f32.vlgmr.msra.gmra.mrb[8].mxu0 %vm276_vm2, %v241_v36  ;;  %876 = vmatmul.mubr.msk.f32.vlgmr.msra.gmra.mrb[8].mxu1 %vm276_vm2, %v241_v36 }
  0x1a   :  { %878 = vmatpush1.msk.msra.mxu0 %vm280_vm1, %v263_v37  ;;  %881 = vmatpush1.msk.msra.mxu1 %vm280_vm1, %v271_v38 }
  0x1b   :  { %503 = vmatprep.mubr.f32.mxu0 %v895_v34  ;;  %574 = vmatprep.mubr.f32.mxu1 %v895_v34 }
  0x1d   :  { %879 = vmatmul.mubr.msk.f32.vlgmr.msra.gmra.mrb[10].mxu0 %vm276_vm2, %v241_v36  ;;  %882 = vmatmul.mubr.msk.f32.vlgmr.msra.gmra.mrb[10].mxu1 %vm276_vm2, %v241_v36 }
  0xdc   :  { %v111_v39 = vpop.f32.mrb[0].mxu0  ;;  %v152_v40 = vpop.f32.mrb[0].mxu1 }
  0xdd   :  { %v113_v41 = vpop.f32.mrb[1].mxu0  ;;  %v154_v43 = vpop.f32.mrb[1].mxu1 }
  0xde   :  { %v887_v42 = vpack.c.bf16 %v113_v41, %v111_v39  ;;  %v115_v44 = vpop.f32.mrb[2].mxu0  ;;  %v888_v45 = vpack.c.bf16 %v154_v43, %v152_v40  ;;  %v156_v46 = vpop.f32.mrb[2].mxu1 }
  0xdf   :  { %v116_v47 = vpop.f32.mrb[3].mxu0  ;;  %v157_v48 = vpop.f32.mrb[3].mxu1 }
  0xe0   :  { %843 = vst [vmem:[%s1062_s5] sm:$0xff] %v887_v42  ;;  %844 = vst [vmem:[%s1062_s5 + $0x8] sm:$0xff] %v888_v45 }
  0xe4   :  { %v998_v49 = vpop.f32.mrb[4].mxu0  ;;  %v1000_v50 = vpop.f32.mrb[4].mxu1 }
  0xe5   :  { %v1002_v51 = vpop.f32.mrb[5].mxu0  ;;  %v1006_v53 = vpop.f32.mrb[5].mxu1 }
  0xe6   :  { %v889_v52 = vpack.c.bf16 %v1002_v51, %v998_v49  ;;  %v197_v54 = vpop.f32.mrb[6].mxu0  ;;  %v890_v55 = vpack.c.bf16 %v1006_v53, %v1000_v50  ;;  %v238_v56 = vpop.f32.mrb[6].mxu1 }
  0xe7   :  { %v198_v57 = vpop.f32.mrb[7].mxu0  ;;  %v239_v60 = vpop.f32.mrb[7].mxu1 }
  0xe8   :  { %845 = vst [vmem:[%s1062_s5 + $0x10] sm:$0xff] %v889_v52  ;;  %846 = vst [vmem:[%s1062_s5 + $0x18] sm:$0xff] %v890_v55 }
  0xec   :  { %v363_v62 = vpop.f32.mrb[8].mxu0  ;;  %v434_v0 = vpop.f32.mrb[8].mxu1 }
  0xed   :  { %v581_v63 = vmul.f32 %v363_v62, %v111_v39  ;;  %v365_v1 = vpop.f32.mrb[9].mxu0  ;;  %v583_v2 = vmul.f32 %v434_v0, %v152_v40  ;;  %v436_v4 = vpop.f32.mrb[9].mxu1 }
  0xee   :  { %v582_v3 = vmul.f32 %v365_v1, %v113_v41  ;;  %v584_v8 = vmul.f32 %v436_v4, %v154_v43 }
  0xef   :  { %v589_v5 = vrot.slane %v581_v63, 4  ;;  %v696_v6 = vmul.f32 %v581_v63, %v111_v39  ;;  %v601_v10 = vrot.slane %v583_v2, 4  ;;  %v698_v11 = vmul.f32 %v583_v2, %v152_v40 }
  0xf0   :  { %v595_v12 = vrot.slane %v582_v3, 4  ;;  %v697_v13 = vmul.f32 %v582_v3, %v113_v41  ;;  %v505_v14 = vpop.f32.mrb[10].mxu0  ;;  %v607_v17 = vrot.slane %v584_v8, 4  ;;  %v699_v18 = vmul.f32 %v584_v8, %v154_v43  ;;  %v576_v19 = vpop.f32.mrb[10].mxu1 }
  0xf1   :  { %v590_v15 = vadd.f32 %v589_v5, %v581_v63  ;;  %v704_v16 = vrot.slane %v696_v6, 4  ;;  %v507_v20 = vpop.f32.mrb[11].mxu0  ;;  %v602_v21 = vadd.f32 %v601_v10, %v583_v2  ;;  %v716_v22 = vrot.slane %v698_v11, 4  ;;  %v1019_v25 = vpop.f32.mrb[11].mxu1 }
  0xf2   :  { %v596_v23 = vadd.f32 %v595_v12, %v582_v3  ;;  %v710_v24 = vrot.slane %v697_v13, 4  ;;  %v608_v27 = vadd.f32 %v607_v17, %v584_v8  ;;  %v722_v28 = vrot.slane %v699_v18, 4 }
  0xf3   :  { %v591_v9 = vrot.slane %v590_v15, 2  ;;  %v705_v26 = vadd.f32 %v704_v16, %v696_v6  ;;  %v603_v29 = vrot.slane %v602_v21, 2  ;;  %v717_v30 = vadd.f32 %v716_v22, %v698_v11 }
  0xf4   :  { %v597_v31 = vrot.slane %v596_v23, 2  ;;  %v711_v32 = vadd.f32 %v710_v24, %v697_v13  ;;  %v609_v35 = vrot.slane %v608_v27, 2  ;;  %v723_v36 = vadd.f32 %v722_v28, %v699_v18 }
  0xf5   :  { %v592_v33 = vadd.f32 %v591_v9, %v590_v15  ;;  %v706_v34 = vrot.slane %v705_v26, 2  ;;  %v604_v37 = vadd.f32 %v603_v29, %v602_v21  ;;  %v718_v38 = vrot.slane %v717_v30, 2 }
  0xf6   :  { %v598_v39 = vadd.f32 %v597_v31, %v596_v23  ;;  %v712_v40 = vrot.slane %v711_v32, 2  ;;  %v610_v43 = vadd.f32 %v609_v35, %v608_v27  ;;  %v724_v44 = vrot.slane %v723_v36, 2 }
  0xf7   :  { %v593_v41 = vrot.slane %v592_v33, 1  ;;  %v707_v42 = vadd.f32 %v706_v34, %v705_v26  ;;  %v605_v45 = vrot.slane %v604_v37, 1  ;;  %v719_v46 = vadd.f32 %v718_v38, %v717_v30 }
  0xf8   :  { %v599_v47 = vrot.slane %v598_v39, 1  ;;  %v713_v48 = vadd.f32 %v712_v40, %v711_v32  ;;  %v611_v55 = vrot.slane %v610_v43, 1  ;;  %v725_v56 = vadd.f32 %v724_v44, %v723_v36 }
  0xf9   :  { %v594_v52 = vadd.f32 %v593_v41, %v592_v33  ;;  %v708_v54 = vrot.slane %v707_v42, 1  ;;  %v606_v57 = vadd.f32 %v605_v45, %v604_v37  ;;  %v720_v58 = vrot.slane %v719_v46, 1 }
  0xfa   :  { %v600_v59 = vadd.f32 %v599_v47, %v598_v39  ;;  %v714_v60 = vrot.slane %v713_v48, 1  ;;  %v612_v62 = vadd.f32 %v611_v55, %v610_v43  ;;  %v726_v63 = vrot.slane %v725_v56, 1 }
  0xfb   :  { %v709_v61 = vadd.f32 %v708_v54, %v707_v42  ;;  %v585_v0 = vmul.f32 %v505_v14, %v998_v49  ;;  %v721_v1 = vadd.f32 %v720_v58, %v719_v46  ;;  %v587_v4 = vmul.f32 %v576_v19, %v1000_v50 }
  0xfc   :  { %v645_v2 = vcombine.low %v594_v52, %v600_v59  ;;  %v715_v3 = vadd.f32 %v714_v60, %v713_v48  ;;  %v646_v5 = vcombine.low %v606_v57, %v612_v62  ;;  %v727_v6 = vadd.f32 %v726_v63, %v725_v56 }
  0xfd   :  { %v613_v8 = vrot.slane %v585_v0, 4  ;;  %v700_v10 = vmul.f32 %v585_v0, %v998_v49  ;;  %v625_v13 = vrot.slane %v587_v4, 4  ;;  %v702_v15 = vmul.f32 %v587_v4, %v1000_v50 }
  0xfe   :  { %v1025_v11 = vrot.slane %v645_v2, %v1017_v7  ;;  %v760_v12 = vcombine.low %v709_v61, %v715_v3  ;;  %v1029_v16 = vrot.slane %v646_v5, %v1017_v7  ;;  %v761_v14 = vcombine.low %v721_v1, %v727_v6 }
  0xff   :  { %v614_v17 = vadd.f32 %v613_v8, %v585_v0  ;;  %v728_v18 = vrot.slane %v700_v10, 4  ;;  %v626_v21 = vadd.f32 %v625_v13, %v587_v4  ;;  %v740_v22 = vrot.slane %v702_v15, 4 }
 0x100   :  { %v1032_v19 = vrot.slane %v760_v12, %v1017_v7  ;;  %v586_v49 = vmul.f32 %v507_v20, %v1002_v51  ;;  %v677_v23 = vcombine.low %v1025_v11, %v1029_v16  ;;  %v777_v24 = vrot.slane %v761_v14, %v1017_v7 }
 0x101   :  { %v615_v9 = vrot.slane %v614_v17, 2  ;;  %v729_v50 = vadd.f32 %v728_v18, %v700_v10  ;;  %v741_v26 = vadd.f32 %v740_v22, %v702_v15  ;;  %v627_v32 = vrot.slane %v626_v21, 2 }
 0x102   :  { %v619_v27 = vrot.slane %v586_v49, 4  ;;  %v701_v28 = vmul.f32 %v586_v49, %v1002_v51  ;;  %v792_v29 = vcombine.low %v1032_v19, %v777_v24  ;;  %v588_v36 = vmul.f32 %v1019_v25, %v1006_v53 }
 0x103   :  { %v616_v30 = vadd.f32 %v615_v9, %v614_v17  ;;  %v730_v31 = vrot.slane %v729_v50, 2  ;;  %v742_v20 = vrot.slane %v741_v26, 2  ;;  %v628_v40 = vadd.f32 %v627_v32, %v626_v21 }
 0x104   :  { %v620_v33 = vadd.f32 %v619_v27, %v586_v49  ;;  %v734_v34 = vrot.slane %v701_v28, 4  ;;  %v631_v41 = vrot.slane %v588_v36, 4  ;;  %v703_v42 = vmul.f32 %v588_v36, %v1006_v53 }
 0x105   :  { %v731_v35 = vadd.f32 %v730_v31, %v729_v50  ;;  %v617_v37 = vrot.slane %v616_v30, 1  ;;  %v743_v45 = vadd.f32 %v742_v20, %v741_v26  ;;  %v629_v55 = vrot.slane %v628_v40, 1 }
 0x106   :  { %v621_v38 = vrot.slane %v620_v33, 2  ;;  %v735_v39 = vadd.f32 %v734_v34, %v701_v28  ;;  %v632_v46 = vadd.f32 %v631_v41, %v588_v36  ;;  %v746_v47 = vrot.slane %v703_v42, 4 }
 0x107   :  { %v732_v51 = vrot.slane %v731_v35, 1  ;;  %v618_v48 = vadd.f32 %v617_v37, %v616_v30  ;;  %v744_v60 = vrot.slane %v743_v45, 1  ;;  %v630_v0 = vadd.f32 %v629_v55, %v628_v40 }
 0x108   :  { %v622_v43 = vadd.f32 %v621_v38, %v620_v33  ;;  %v736_v44 = vrot.slane %v735_v39, 2  ;;  %v633_v56 = vrot.slane %v632_v46, 2  ;;  %v747_v57 = vadd.f32 %v746_v47, %v703_v42 }
 0x109   :  { %v733_v25 = vadd.f32 %v732_v51, %v731_v35  ;;  %v745_v4 = vadd.f32 %v744_v60, %v743_v45  ;;  %v685_v17 = vrot.slane %v677_v23, %v1017_v7  ;;  %v800_v21 = vrot.slane %v792_v29, %v1017_v7 }
 0x10a   :  { %v623_v52 = vrot.slane %v622_v43, 1  ;;  %v737_v54 = vadd.f32 %v736_v44, %v735_v39  ;;  %v634_v61 = vadd.f32 %v633_v56, %v632_v46  ;;  %v748_v62 = vrot.slane %v747_v57, 2 }
 0x10c   :  { %v624_v58 = vadd.f32 %v623_v52, %v622_v43  ;;  %v738_v59 = vrot.slane %v737_v54, 1  ;;  %v635_v1 = vrot.slane %v634_v61, 1  ;;  %v749_v2 = vadd.f32 %v748_v62, %v747_v57 }
 0x10e   :  { %v647_v63 = vcombine.low %v618_v48, %v624_v58  ;;  %v739_v53 = vadd.f32 %v738_v59, %v737_v54  ;;  %v636_v5 = vadd.f32 %v635_v1, %v634_v61  ;;  %v750_v6 = vrot.slane %v749_v2, 1 }
 0x110   :  { %v762_v3 = vcombine.low %v733_v25, %v739_v53  ;;  %v669_v8 = vrot.slane %v647_v63, %v1017_v7  ;;  %v648_v10 = vcombine.low %v630_v0, %v636_v5  ;;  %v751_v11 = vadd.f32 %v750_v6, %v749_v2 }
 0x112   :  { %v784_v12 = vrot.slane %v762_v3, %v1017_v7  ;;  %v676_v13 = vrot.slane %v648_v10, %v1017_v7  ;;  %v763_v15 = vcombine.low %v745_v4, %v751_v11 }
 0x114   :  { %v678_v16 = vcombine.low %v669_v8, %v676_v13  ;;  %v791_v14 = vrot.slane %v763_v15, %v1017_v7 }
 0x116   :  { %v692_v18 = vrot.slane %v678_v16, %v1017_v7  ;;  %v793_v19 = vcombine.low %v784_v12, %v791_v14 }
 0x118   :  { %v693_v22 = vcombine.low %v685_v17, %v692_v18  ;;  %v807_v49 = vrot.slane %v793_v19, %v1017_v7 }
 0x11a   :  { %695 = vst [vmem:[%s1063_s6] sm:$0xff] %v693_v22  ;;  %v808_v24 = vcombine.low %v800_v21, %v807_v49 }
 0x11c   :  { %810 = vst [vmem:[%s1064_s7] sm:$0xff] %v808_v24 }

// kernel: tile.58
= control target key start
LH: loop header
LB: loop body
LE: loop exit
PB: predicated region body
PF: predicated region fallthrough
CT: control target
= control target key end

     0   :  { %s22_s0 = inlined_call_operand.vmem [shape: f32[32], index: 0, kind: input, shape index: {}]   ;;  %s23_s1 = inlined_call_operand.vmem [shape: f32[4,32], index: 1, kind: output, shape index: {}]  }
   0x1   :  { %v4_v0 = vld [vmem:[%s22_s0] ss:$0 sm:$0xff] }
   0x2   :  { %5 = vst [vmem:[%s23_s1] sm:$0xf] %v4_v0 }

// kernel: generator_forward.12
= control target key start
LH: loop header
LB: loop body
LE: loop exit
PB: predicated region body
PF: predicated region fallthrough
CT: control target
= control target key end

     0   :  { %s422_s0 = inlined_call_operand.vmem [shape: bf16[128,128], index: 0, kind: input, shape index: {}]   ;;  %s423_s1 = inlined_call_operand.vmem [shape: f32[1,128], index: 1, kind: input, shape index: {}]   ;;  %s424_s2 = inlined_call_operand.vmem [shape: f32[1,128], index: 2, kind: input, shape index: {}]   ;;  %s425_s3 = inlined_call_operand.vmem [shape: bf16[128,128], index: 3, kind: output, shape index: {}]  }
   0x1   :  { %v227_v0 = vld [vmem:[%s422_s0] sm:$0xff]   ;;  %v298_v4 = vld [vmem:[%s422_s0 + $0x8] sm:$0xff]   ;;  %v299_v5 = vld [vmem:[%s422_s0 + $0x10] sm:$0xff]  }
   0x2   :  { %v338_v1 = vld [vmem:[%s423_s1] ss:$0 sm:$0xff]  ;;  %v228_v2 = vunpack.c.l.bf16 %v227_v0  ;;  %v229_v3 = vunpack.c.h.bf16 %v227_v0  ;;  %v300_v6 = vld [vmem:[%s422_s0 + $0x18] sm:$0xff]   ;;  %v232_v8 = vunpack.c.l.bf16 %v298_v4  ;;  %v233_v9 = vunpack.c.h.bf16 %v298_v4  ;;  %v302_v33 = vld [vmem:[%s422_s0 + $0x28] sm:$0xff]  }
   0x3   :  { %v352_v7 = vld [vmem:[%s424_s2] ss:$0 sm:$0xff]  ;;  %v236_v10 = vunpack.c.l.bf16 %v299_v5  ;;  %v237_v11 = vunpack.c.h.bf16 %v299_v5  ;;  %v240_v14 = vunpack.c.l.bf16 %v300_v6  ;;  %v241_v15 = vunpack.c.h.bf16 %v300_v6  ;;  %v303_v38 = vld [vmem:[%s422_s0 + $0x30] sm:$0xff]   ;;  %v304_v43 = vld [vmem:[%s422_s0 + $0x38] sm:$0xff]  }
   0x4   :  { %v53_v12 = vmul.f32 %v228_v2, %v338_v1  ;;  %v54_v13 = vmul.f32 %v229_v3, %v338_v1  ;;  %v55_v16 = vmul.f32 %v232_v8, %v338_v1  ;;  %v56_v17 = vmul.f32 %v233_v9, %v338_v1  ;;  %v301_v28 = vld [vmem:[%s422_s0 + $0x20] sm:$0xff]  }
   0x5   :  { %v57_v18 = vmul.f32 %v236_v10, %v338_v1  ;;  %v58_v19 = vmul.f32 %v237_v11, %v338_v1  ;;  %v59_v22 = vmul.f32 %v240_v14, %v338_v1  ;;  %v60_v23 = vmul.f32 %v241_v15, %v338_v1 }
   0x6   :  { %v76_v20 = vadd.f32 %v352_v7, %v53_v12  ;;  %v77_v21 = vadd.f32 %v352_v7, %v54_v13  ;;  %v78_v24 = vadd.f32 %v352_v7, %v55_v16  ;;  %v79_v25 = vadd.f32 %v352_v7, %v56_v17 }
   0x7   :  { %v80_v26 = vadd.f32 %v352_v7, %v57_v18  ;;  %v81_v27 = vadd.f32 %v352_v7, %v58_v19  ;;  %v82_v31 = vadd.f32 %v352_v7, %v59_v22  ;;  %v83_v32 = vadd.f32 %v352_v7, %v60_v23 }
   0x8   :  { %v92_v29 = vmax.f32 %v76_v20, 0.0  ;;  %v93_v30 = vmax.f32 %v77_v21, 0.0  ;;  %v94_v34 = vmax.f32 %v78_v24, 0.0  ;;  %v95_v35 = vmax.f32 %v79_v25, 0.0 }
   0x9   :  { %v96_v36 = vmax.f32 %v80_v26, 0.0  ;;  %v97_v37 = vmax.f32 %v81_v27, 0.0  ;;  %v98_v40 = vmax.f32 %v82_v31, 0.0  ;;  %v99_v41 = vmax.f32 %v83_v32, 0.0 }
   0xa   :  { %v261_v39 = vpack.c.bf16 %v93_v30, %v92_v29  ;;  %v244_v42 = vunpack.c.l.bf16 %v301_v28  ;;  %v266_v44 = vpack.c.bf16 %v95_v35, %v94_v34  ;;  %v245_v46 = vunpack.c.h.bf16 %v301_v28 }
   0xb   :  { %v271_v45 = vpack.c.bf16 %v97_v37, %v96_v36  ;;  %v248_v47 = vunpack.c.l.bf16 %v302_v33  ;;  %v276_v48 = vpack.c.bf16 %v99_v41, %v98_v40  ;;  %v249_v50 = vunpack.c.h.bf16 %v302_v33 }
   0xc   :  { %262 = vst [vmem:[%s425_s3] sm:$0xff] %v261_v39   ;;  %v61_v49 = vmul.f32 %v244_v42, %v338_v1  ;;  %v252_v51 = vunpack.c.l.bf16 %v303_v38  ;;  %305 = vst [vmem:[%s425_s3 + $0x8] sm:$0xff] %v266_v44   ;;  %v62_v52 = vmul.f32 %v245_v46, %v338_v1  ;;  %v253_v54 = vunpack.c.h.bf16 %v303_v38 }
   0xd   :  { %306 = vst [vmem:[%s425_s3 + $0x10] sm:$0xff] %v271_v45   ;;  %v63_v53 = vmul.f32 %v248_v47, %v338_v1  ;;  %v256_v55 = vunpack.c.l.bf16 %v304_v43  ;;  %307 = vst [vmem:[%s425_s3 + $0x18] sm:$0xff] %v276_v48   ;;  %v64_v57 = vmul.f32 %v249_v50, %v338_v1  ;;  %v257_v59 = vunpack.c.h.bf16 %v304_v43 }
   0xe   :  { %v84_v56 = vadd.f32 %v352_v7, %v61_v49  ;;  %v65_v58 = vmul.f32 %v252_v51, %v338_v1  ;;  %v85_v60 = vadd.f32 %v352_v7, %v62_v52  ;;  %v66_v62 = vmul.f32 %v253_v54, %v338_v1 }
   0xf   :  { %v86_v61 = vadd.f32 %v352_v7, %v63_v53  ;;  %v67_v63 = vmul.f32 %v256_v55, %v338_v1  ;;  %v87_v2 = vadd.f32 %v352_v7, %v64_v57  ;;  %v68_v4 = vmul.f32 %v257_v59, %v338_v1 }
  0x10   :  { %v100_v0 = vmax.f32 %v84_v56, 0.0  ;;  %v88_v3 = vadd.f32 %v352_v7, %v65_v58  ;;  %v101_v5 = vmax.f32 %v85_v60, 0.0  ;;  %v89_v8 = vadd.f32 %v352_v7, %v66_v62 }
  0x11   :  { %v102_v6 = vmax.f32 %v86_v61, 0.0  ;;  %v90_v9 = vadd.f32 %v352_v7, %v67_v63  ;;  %v103_v10 = vmax.f32 %v87_v2, 0.0  ;;  %v91_v12 = vadd.f32 %v352_v7, %v68_v4 }
  0x12   :  { %v104_v11 = vmax.f32 %v88_v3, 0.0  ;;  %v281_v13 = vpack.c.bf16 %v101_v5, %v100_v0  ;;  %v105_v14 = vmax.f32 %v89_v8, 0.0 }
  0x13   :  { %v106_v15 = vmax.f32 %v90_v9, 0.0  ;;  %v286_v16 = vpack.c.bf16 %v103_v10, %v102_v6  ;;  %v107_v17 = vmax.f32 %v91_v12, 0.0 }
  0x14   :  { %308 = vst [vmem:[%s425_s3 + $0x20] sm:$0xff] %v281_v13   ;;  %v291_v1 = vpack.c.bf16 %v105_v14, %v104_v11 }
  0x15   :  { %309 = vst [vmem:[%s425_s3 + $0x28] sm:$0xff] %v286_v16   ;;  %v296_v18 = vpack.c.bf16 %v107_v17, %v106_v15 }
  0x16   :  { %310 = vst [vmem:[%s425_s3 + $0x30] sm:$0xff] %v291_v1  }
  0x17   :  { %311 = vst [vmem:[%s425_s3 + $0x38] sm:$0xff] %v296_v18  }

// kernel: tile.68
= control target key start
LH: loop header
LB: loop body
LE: loop exit
PB: predicated region body
PF: predicated region fallthrough
CT: control target
= control target key end

     0   :  { %s22_s0 = inlined_call_operand.vmem [shape: f32[16], index: 0, kind: input, shape index: {}]   ;;  %s23_s1 = inlined_call_operand.vmem [shape: f32[4,16], index: 1, kind: output, shape index: {}]  }
   0x1   :  { %v4_v0 = vld [vmem:[%s22_s0] ss:$0 sm:$0xff] }
   0x2   :  { %5 = vst [vmem:[%s23_s1] sm:$0xf] %v4_v0 }

// kernel: generator_forward.11
= control target key start
LH: loop header
LB: loop body
LE: loop exit
PB: predicated region body
PF: predicated region fallthrough
CT: control target
= control target key end

     0   :  { %vm259_vm0 = vcmask 523264   ;;  %vm166_vm1 = vsmask.f32 7424  ;;  %vm536_vm2 = vcmask 1044480   ;;  %vm989_vm3 = vcmask 1043456   ;;  %s2194_s2 = inlined_call_operand.vmem [shape: bf16[4,64,128], index: 2, kind: input, shape index: {}]   ;;  %s2195_s0 = inlined_call_operand.vmem [shape: bf16[192,64], index: 0, kind: input, shape index: {}, may-alias: {0,1}]   ;;  %s2196_s1 = inlined_call_operand.vmem [shape: bf16[192,64], index: 1, kind: input, shape index: {}, may-alias: {0,1}]   ;;  %s2197_s4 = inlined_call_operand.vmem [shape: f32[4,128], index: 4, kind: input, shape index: {}]   ;;  %s2198_s3 = inlined_call_operand.vmem [shape: f32[128,4], index: 3, kind: input, shape index: {}]   ;;  %s2199_s5 = inlined_call_operand.vmem [shape: bf16[128,128], index: 5, kind: output, shape index: {0}]   ;;  %s2200_s6 = inlined_call_operand.vmem [shape: f32[1,1,128], index: 6, kind: output, shape index: {1}]   ;;  %s2201_s7 = inlined_call_operand.vmem [shape: f32[1,1,128], index: 7, kind: output, shape index: {2}]  }
   0x1   :  { %v1736_v0 = vld [vmem:[%s2194_s2 + $0x20] sm:$0xff]   ;;  %v1738_v2 = vld [vmem:[%s2194_s2 + $0x28] sm:$0xff]   ;;  %v1740_v4 = vld [vmem:[%s2194_s2 + $0x30] sm:$0xff]   ;;  %vm724_vm4 = vsmask.f32 4352  ;;  %vm940_vm5 = vcmask 31744  }
   0x2   :  { %v1737_v1 = vld [vmem:[%s2194_s2] sm:$0xff]   ;;  %1558 = vmatprep.subr.bf16.mxu1 %v1736_v0  ;;  %v1813_v3 = vld [vmem:[%s2194_s2 + $0x8] sm:$0xff]   ;;  %v1822_v5 = vld [vmem:[%s2194_s2 + $0x10] sm:$0xff]  }
   0x3   :  { %1582 = vmatprep.subr.bf16.mxu0 %v1737_v1  ;;  %1559 = vmatpush3.bf16.msra.mxu1 %v1736_v0  ;;  %v1742_v6 = vld [vmem:[%s2194_s2 + $0x38] sm:$0xff]   ;;  %v1837_v8 = vld [vmem:[%s2195_s0] sm:$0xff]   ;;  %v1842_v9 = vld [vmem:[%s2195_s0 + $0x8] sm:$0xff]  }
   0x4   :  { %1583 = vmatpush3.bf16.msra.mxu0 %v1737_v1  ;;  %1560 = vmatprep.subr.bf16.mxu1 %v1738_v2  ;;  %v1830_v7 = vld [vmem:[%s2194_s2 + $0x18] sm:$0xff]   ;;  %v1847_v10 = vld [vmem:[%s2195_s0 + $0x10] sm:$0xff]   ;;  %v168_v11 = vshrl.u32 %v1837_v8, 16  ;;  %v170_v12 = vshll.u32 %v1837_v8, 16  ;;  %v175_v13 = vshll.u32 %v1842_v9, 16  ;;  %v179_v14 = vshrl.u32 %v1842_v9, 16 }
   0x5   :  { %1584 = vmatprep.subr.bf16.mxu0 %v1813_v3  ;;  %1590 = vmatprep.mubr.msk.bf16.mxu0 %vm259_vm0, %v1837_v8  ;;  %v183_v15 = vshll.u32 %v1847_v10, 16  ;;  %v1747_v18 = vld [vmem:[%s2194_s2 + $0x40] sm:$0xff]   ;;  %v1870_v20 = vld [vmem:[%s2195_s0 + $0x18] sm:$0xff]   ;;  %v187_v23 = vshrl.u32 %v1847_v10, 16  ;;  %v1748_v29 = vld [vmem:[%s2194_s2 + $0x48] sm:$0xff]   ;;  %v537_v40 = vrot.slane %v1837_v8, 3 }
   0x6   :  { %v172_v16 = vrot.slane %v170_v12, 1  ;;  %v177_v17 = vrot.slane %v175_v13, 1  ;;  %v1880_v24 = vld [vmem:[%s2195_s0 + $0x20] sm:$0xff]   ;;  %v191_v25 = vshll.u32 %v1870_v20, 16  ;;  %v195_v26 = vshrl.u32 %v1870_v20, 16  ;;  %v1899_v33 = vld [vmem:[%s2195_s0 + $0x28] sm:$0xff]  }
   0x7   :  { %1561 = vmatpush3.bf16.msra.mxu1 %v1738_v2  ;;  %v185_v19 = vrot.slane %v183_v15, 1  ;;  %v199_v32 = vshll.u32 %v1880_v24, 16  ;;  %v203_v34 = vshrl.u32 %v1880_v24, 16  ;;  %v207_v38 = vshll.u32 %v1899_v33, 16  ;;  %v1751_v39 = vld [vmem:[%s2194_s2 + $0x50] sm:$0xff]   ;;  %v1933_v46 = vld [vmem:[%s2195_s0 + $0x38] sm:$0xff]  }
   0x8   :  { %1585 = vmatpush3.bf16.msra.mxu0 %v1813_v3  ;;  %1562 = vmatprep.subr.bf16.mxu1 %v1740_v4  ;;  %v173_v21 = vor.u32 %v172_v16, %v168_v11  ;;  %v181_v22 = vor.u32 %v179_v14, %v177_v17  ;;  %v193_v31 = vrot.slane %v191_v25, 1  ;;  %v1919_v41 = vld [vmem:[%s2195_s0 + $0x30] sm:$0xff]   ;;  %v538_v44 = vrot.slane %v1842_v9, 3  ;;  %v1752_v49 = vld [vmem:[%s2194_s2 + $0x58] sm:$0xff]   ;;  %v1958_v57 = vld [vmem:[%s2196_s1 + $0x40] ss:$0 sps:$4 sm:$0xff]  }
   0x9   :  { %1586 = vmatprep.subr.bf16.mxu0 %v1822_v5  ;;  %v189_v30 = vor.u32 %v187_v23, %v185_v19  ;;  %v201_v37 = vrot.slane %v199_v32, 1  ;;  %v209_v43 = vrot.slane %v207_v38, 1  ;;  %v215_v45 = vshll.u32 %v1919_v41, 16  ;;  %v1755_v58 = vld [vmem:[%s2194_s2 + $0x60] sm:$0xff]  }
   0xa   :  { %v178_v27 = vsel %vm166_vm1, %v173_v21, %v177_v17  ;;  %v186_v28 = vsel %vm166_vm1, %v181_v22, %v185_v19  ;;  %v197_v36 = vor.u32 %v195_v26, %v193_v31  ;;  %v211_v48 = vshrl.u32 %v1899_v33, 16 }
   0xb   :  { %1563 = vmatpush3.bf16.msra.mxu1 %v1740_v4  ;;  %1566 = vmatprep.mubr.msk.bf16.mxu1 %vm259_vm0, %v178_v27  ;;  %v194_v35 = vsel %vm166_vm1, %v189_v30, %v193_v31  ;;  %v205_v42 = vor.u32 %v203_v34, %v201_v37  ;;  %v219_v51 = vshrl.u32 %v1919_v41, 16  ;;  %v223_v52 = vshll.u32 %v1933_v46, 16  ;;  %v1760_v27 = vld [vmem:[%s2194_s2 + $0x78] sm:$0xff]  }
   0xc   :  { %1587 = vmatpush3.bf16.msra.mxu0 %v1822_v5  ;;  %1564 = vmatprep.subr.bf16.mxu1 %v1742_v6  ;;  %v202_v47 = vsel %vm166_vm1, %v197_v36, %v201_v37  ;;  %v539_v53 = vsel %vm536_vm2, %v537_v40, %v538_v44  ;;  %v217_v54 = vrot.slane %v215_v45, 1  ;;  %v213_v55 = vor.u32 %v211_v48, %v209_v43 }
   0xd   :  { %1588 = vmatprep.subr.bf16.mxu0 %v1830_v7  ;;  %v210_v50 = vsel %vm166_vm1, %v205_v42, %v209_v43  ;;  %v540_v56 = vrot.slane %v1847_v10, 3  ;;  %v225_v60 = vrot.slane %v223_v52, 1  ;;  %v542_v61 = vrot.slane %v1870_v20, 3  ;;  %v923_v42 = vld [vmem:[%s2198_s3] sm:$0xff] }
   0xe   :  { %v221_v59 = vor.u32 %v219_v51, %v217_v54  ;;  %v218_v62 = vsel %vm166_vm1, %v213_v55, %v217_v54  ;;  %v227_v0 = vshrl.u32 %v1933_v46, 16  ;;  %v546_v17 = vrot.slane %v1899_v33, 3 }
   0xf   :  { %1565 = vmatpush3.bf16.msra.mxu1 %v1742_v6  ;;  %v541_v63 = vsel %vm536_vm2, %v538_v44, %v540_v56  ;;  %v543_v4 = vsel %vm536_vm2, %v540_v56, %v542_v61  ;;  %v725_v31 = vrot.slane %v168_v11, 3  ;;  %v726_v36 = vrot.slane %v170_v12, 4  ;;  %v929_v56 = vld [vmem:[%s2198_s3 + $0x30] sm:$0xff] }
  0x10   :  { %1589 = vmatpush3.bf16.msra.mxu0 %v1830_v7  ;;  %1680 = vmatprep.subr.bf16.mxu1 %v1737_v1  ;;  %v226_v2 = vsel %vm166_vm1, %v221_v59, %v225_v60  ;;  %v229_v6 = vor.u32 %v227_v0, %v225_v60  ;;  %v728_v37 = vrot.slane %v179_v14, 3  ;;  %v552_v11 = vrot.slane %v1958_v57, 3 }
  0x11   :  { %1606 = vmatprep.subr.bf16.mxu0 %v1747_v18  ;;  %v727_v8 = vor.u32 %v726_v36, %v725_v31  ;;  %v736_v43 = vrot.slane %v195_v26, 3  ;;  %v737_v44 = vrot.slane %v191_v25, 4  ;;  %v924_v26 = vld [vmem:[%s2198_s3 + $0x8] sm:$0xff]  ;;  %v741_v25 = vrot.slane %v199_v32, 4 }
  0x12   :  { %1567 = vmatmul.mubr.msk.bf16.vlgmr.msra.gmra.mrb[0].mxu1 %vm259_vm0, %v186_v28  ;;  %v548_v28 = vrot.slane %v1919_v41, 3  ;;  %v748_v54 = vrot.slane %v219_v51, 3  ;;  %v749_v55 = vrot.slane %v215_v45, 4  ;;  %v752_v59 = vrot.slane %v227_v0, 3 }
  0x13   :  { %1591 = vmatmul.mubr.msk.bf16.vlgmr.msra.gmra.mrb[0].mxu0 %vm259_vm0, %v1842_v9  ;;  %1684 = vmatpush3.bf16.msra.mxu1 %v1737_v1  ;;  %v231_v1 = vshll.u32 %v1958_v57, 16  ;;  %v733_v9 = vrot.slane %v183_v15, 4  ;;  %v738_v15 = vor.u32 %v737_v44, %v736_v43  ;;  %v753_v60 = vrot.slane %v223_v52, 4 }
  0x14   :  { %1607 = vmatpush3.bf16.msra.mxu0 %v1747_v18  ;;  %1570 = vmatprep.mubr.msk.bf16.mxu1 %vm259_vm0, %v194_v35  ;;  %v1759_v18 = vld [vmem:[%s2194_s2 + $0x70] sm:$0xff]   ;;  %v549_v30 = vsel %vm536_vm2, %v546_v17, %v548_v28  ;;  %v729_v35 = vrot.slane %v175_v13, 4  ;;  %v732_v13 = vrot.slane %v187_v23, 3  ;;  %v750_v45 = vor.u32 %v749_v55, %v748_v54 }
  0x15   :  { %1608 = vmatprep.subr.bf16.mxu0 %v1748_v29  ;;  %1594 = vmatprep.mubr.msk.bf16.mxu0 %vm259_vm0, %v1847_v10  ;;  %v233_v16 = vrot.slane %v231_v1, 1  ;;  %v756_v51 = vshrl.u32 %v1958_v57, 16  ;;  %v754_v52 = vor.u32 %v753_v60, %v752_v59  ;;  %v759_v0 = vrot.slane %v231_v1, 4  ;;  %v935_v1 = vld [vmem:[%s2198_s3 + $0x60] sm:$0xff] }
  0x16   :  { %1681 = vmatprep.subr.bf16.mxu1 %v1813_v3  ;;  %v730_v12 = vor.u32 %v729_v35, %v728_v37  ;;  %v734_v10 = vor.u32 %v733_v9, %v732_v13 }
  0x17   :  { %1685 = vmatpush3.bf16.msra.mxu1 %v1813_v3  ;;  %v1758_v3 = vld [vmem:[%s2194_s2 + $0x68] sm:$0xff]   ;;  %v234_v19 = vsel %vm166_vm1, %v229_v6, %v233_v16  ;;  %v937_v16 = vld [vmem:[%s2198_s3 + $0x70] sm:$0xff] }
  0x18   :  { %1609 = vmatpush3.bf16.msra.mxu0 %v1748_v29  ;;  %1682 = vmatprep.subr.bf16.mxu1 %v1822_v5  ;;  %v550_v29 = vrot.slane %v1933_v46, 3  ;;  %v731_v40 = vsel %vm724_vm4, %v727_v8, %v730_v12  ;;  %v735_v23 = vsel %vm724_vm4, %v730_v12, %v734_v10  ;;  %v936_v6 = vld [vmem:[%s2198_s3 + $0x68] sm:$0xff] }
  0x19   :  { %1610 = vmatprep.subr.bf16.mxu0 %v1751_v39 }
  0x1a   :  { %1571 = vmatmul.mubr.msk.bf16.gmra.mrb[4].mxu1 %vm259_vm0, %v202_v47  ;;  %v553_v14 = vsel %vm536_vm2, %v550_v29, %v552_v11  ;;  %v925_v47 = vld [vmem:[%s2198_s3 + $0x10] sm:$0xff] }
  0x1b   :  { %1595 = vmatmul.mubr.msk.bf16.gmra.mrb[4].mxu0 %vm259_vm0, %v1870_v20  ;;  %1574 = vmatprep.mubr.msk.bf16.mxu1 %vm259_vm0, %v210_v50  ;;  %v740_v20 = vrot.slane %v203_v34, 3  ;;  %v744_v50 = vrot.slane %v211_v48, 3  ;;  %v927_v34 = vld [vmem:[%s2198_s3 + $0x20] sm:$0xff] }
  0x1c   :  { %1611 = vmatpush3.bf16.msra.mxu0 %v1751_v39  ;;  %1614 = vmatprep.mubr.msk.bf16.mxu0 %vm259_vm0, %v539_v53  ;;  %v551_v39 = vsel %vm536_vm2, %v548_v28, %v550_v29  ;;  %v745_v53 = vrot.slane %v207_v38, 4  ;;  %v928_v38 = vld [vmem:[%s2198_s3 + $0x28] sm:$0xff] }
  0x1d   :  { %1612 = vmatprep.subr.bf16.mxu0 %v1752_v49  ;;  %1686 = vmatpush3.bf16.msra.mxu1 %v1822_v5  ;;  %v939_v5 = vld [vmem:[%s2197_s4] sm:$0xf]  ;;  %v742_v32 = vor.u32 %v741_v25, %v740_v20 }
  0x1e   :  { %1683 = vmatprep.subr.bf16.mxu1 %v1830_v7  ;;  %v746_v48 = vor.u32 %v745_v53, %v744_v50 }
  0x20   :  { %1613 = vmatpush3.bf16.msra.mxu0 %v1752_v49  ;;  %v739_v49 = vsel %vm724_vm4, %v734_v10, %v738_v15 }
  0x21   :  { %1630 = vmatprep.subr.bf16.mxu0 %v1755_v58  ;;  %1687 = vmatpush3.bf16.msra.mxu1 %v1830_v7  ;;  %v544_v7 = vrot.slane %v1880_v24, 3 }
  0x22   :  { %1575 = vmatmul.mubr.msk.bf16.gmra.mrb[8].mxu1 %vm259_vm0, %v218_v62  ;;  %1654 = vmatprep.subr.msk.mxu1 %vm989_vm3, %v939_v5  ;;  %v932_v62 = vld [vmem:[%s2198_s3 + $0x48] sm:$0xff] }
  0x23   :  { %1615 = vmatmul.mubr.msk.bf16.vlgmr.msra.gmra.mrb[0].mxu0 %vm259_vm0, %v541_v63  ;;  %1578 = vmatprep.mubr.msk.bf16.mxu1 %vm259_vm0, %v226_v2  ;;  %v545_v21 = vsel %vm536_vm2, %v542_v61, %v544_v7  ;;  %v547_v22 = vsel %vm536_vm2, %v544_v7, %v546_v17  ;;  %v751_v61 = vsel %vm724_vm4, %v746_v48, %v750_v45  ;;  %v758_v63 = vrot.slane %v756_v51, 3  ;;  %v933_v2 = vld [vmem:[%s2198_s3 + $0x50] sm:$0xff]  ;;  %v938_v7 = vld [vmem:[%s2198_s3 + $0x78] sm:$0xff] }
  0x24   :  { %1631 = vmatpush3.bf16.msra.mxu0 %v1755_v58  ;;  %1618 = vmatprep.mubr.msk.bf16.mxu0 %vm259_vm0, %v543_v4  ;;  %v747_v58 = vsel %vm724_vm4, %v742_v32, %v746_v48  ;;  %v934_v4 = vld [vmem:[%s2198_s3 + $0x58] sm:$0xff] }
  0x25   :  { %1632 = vmatprep.subr.bf16.mxu0 %v1758_v3  ;;  %v760_v57 = vor.u32 %v759_v0, %v758_v63 }
  0x28   :  { %1633 = vmatpush3.bf16.msra.mxu0 %v1758_v3  ;;  %v755_v3 = vsel %vm724_vm4, %v750_v45, %v754_v52 }
  0x29   :  { %1634 = vmatprep.subr.bf16.mxu0 %v1759_v18 }
  0x2a   :  { %1579 = vmatmul.mubr.msk.bf16.gmra.mrb[12].mxu1 %vm259_vm0, %v234_v19 }
  0x2b   :  { %1619 = vmatmul.mubr.msk.bf16.gmra.mrb[4].mxu0 %vm259_vm0, %v545_v21  ;;  %1598 = vmatprep.mubr.msk.bf16.mxu1 %vm259_vm0, %v1880_v24  ;;  %v926_v24 = vld [vmem:[%s2198_s3 + $0x18] sm:$0xff] }
  0x2c   :  { %1622 = vmatprep.mubr.msk.bf16.mxu0 %vm259_vm0, %v547_v22  ;;  %1635 = vmatpush3.bf16.msra.mxu0 %v1759_v18 }
  0x2d   :  { %1636 = vmatprep.subr.bf16.mxu0 %v1760_v27 }
  0x30   :  { %1637 = vmatpush3.bf16.msra.mxu0 %v1760_v27 }
  0x32   :  { %1599 = vmatmul.mubr.msk.bf16.vlgmr.msra.gmra.mrb[8].mxu1 %vm259_vm0, %v1899_v33  ;;  %v743_v33 = vsel %vm724_vm4, %v738_v15, %v742_v32 }
  0x33   :  { %1623 = vmatmul.mubr.msk.bf16.gmra.mrb[8].mxu0 %vm259_vm0, %v549_v30  ;;  %1655 = vmatpush3.msk.msra.mxu1 %vm989_vm3, %v939_v5  ;;  %v761_v5 = vsel %vm724_vm4, %v754_v52, %v760_v57 }
  0x34   :  { %1602 = vmatprep.mubr.msk.bf16.mxu1 %vm259_vm0, %v1919_v41  ;;  %1626 = vmatprep.mubr.msk.bf16.mxu0 %vm259_vm0, %v551_v39  ;;  %v930_v41 = vld [vmem:[%s2198_s3 + $0x38] sm:$0xff] }
  0x3a   :  { %1603 = vmatmul.mubr.msk.bf16.gmra.mrb[12].mxu1 %vm259_vm0, %v1933_v46  ;;  %v931_v46 = vld [vmem:[%s2198_s3 + $0x40] sm:$0xff] }
  0x3b   :  { %1627 = vmatmul.mubr.msk.bf16.gmra.mrb[12].mxu0 %vm259_vm0, %v553_v14  ;;  %1656 = vmatprep.mubr.msk.f32.mxu1 %vm940_vm5, %v923_v42 }
  0x3c   :  { %1638 = vmatprep.mubr.msk.bf16.mxu0 %vm259_vm0, %v731_v40 }
  0x42   :  { %1657 = vmatmul.mubr.msk.f32.vlgmr.msra.gmra.mrb[16].mxu1 %vm940_vm5, %v924_v26 }
  0x43   :  { %1639 = vmatmul.mubr.msk.bf16.vlgmr.msra.gmra.mrb[0].mxu0 %vm259_vm0, %v735_v23  ;;  %1659 = vmatprep.mubr.msk.f32.mxu1 %vm940_vm5, %v925_v47 }
  0x44   :  { %1642 = vmatprep.mubr.msk.bf16.mxu0 %vm259_vm0, %v739_v49 }
  0x46   :  { %1660 = vmatmul.mubr.msk.f32.gmra.mrb[18].mxu1 %vm940_vm5, %v926_v24 }
  0x47   :  { %1662 = vmatprep.mubr.msk.f32.mxu1 %vm940_vm5, %v927_v34 }
  0x4a   :  { %1663 = vmatmul.mubr.msk.f32.gmra.mrb[20].mxu1 %vm940_vm5, %v928_v38 }
  0x4b   :  { %1643 = vmatmul.mubr.msk.bf16.gmra.mrb[4].mxu0 %vm259_vm0, %v743_v33  ;;  %1665 = vmatprep.mubr.msk.f32.mxu1 %vm940_vm5, %v929_v56 }
  0x4c   :  { %1646 = vmatprep.mubr.msk.bf16.mxu0 %vm259_vm0, %v747_v58 }
  0x4e   :  { %1666 = vmatmul.mubr.msk.f32.gmra.mrb[22].mxu1 %vm940_vm5, %v930_v41 }
  0x4f   :  { %1668 = vmatprep.mubr.msk.f32.mxu1 %vm940_vm5, %v931_v46 }
  0x52   :  { %1669 = vmatmul.mubr.msk.f32.gmra.mrb[24].mxu1 %vm940_vm5, %v932_v62 }
  0x53   :  { %1647 = vmatmul.mubr.msk.bf16.gmra.mrb[8].mxu0 %vm259_vm0, %v751_v61  ;;  %1671 = vmatprep.mubr.msk.f32.mxu1 %vm940_vm5, %v933_v2 }
  0x54   :  { %1650 = vmatprep.mubr.msk.bf16.mxu0 %vm259_vm0, %v755_v3 }
  0x56   :  { %1672 = vmatmul.mubr.msk.f32.gmra.mrb[26].mxu1 %vm940_vm5, %v934_v4 }
  0x57   :  { %1674 = vmatprep.mubr.msk.f32.mxu1 %vm940_vm5, %v935_v1 }
  0x5a   :  { %1675 = vmatmul.mubr.msk.f32.gmra.mrb[28].mxu1 %vm940_vm5, %v936_v6 }
  0x5b   :  { %1651 = vmatmul.mubr.msk.bf16.gmra.mrb[12].mxu0 %vm259_vm0, %v761_v5  ;;  %1677 = vmatprep.mubr.msk.f32.mxu1 %vm940_vm5, %v937_v16 }
  0x5e   :  { %1678 = vmatmul.mubr.msk.f32.gmra.mrb[30].mxu1 %vm940_vm5, %v938_v7 }
  0xe5   :  { %v1568_v17 = vpop.f32.mrb[0].mxu1 }
  0xe6   :  { %v318_v18 = vpop.f32.mrb[1].mxu1 }
  0xe7   :  { %v1569_v19 = vpop.f32.mrb[2].mxu1 }
  0xe8   :  { %v321_v21 = vpop.f32.mrb[3].mxu1 }
  0xed   :  { %v1572_v22 = vpop.f32.mrb[4].mxu1 }
  0xee   :  { %v334_v27 = vpop.f32.mrb[5].mxu1 }
  0xef   :  { %v1573_v28 = vpop.f32.mrb[6].mxu1 }
  0xf0   :  { %v337_v29 = vpop.f32.mrb[7].mxu1 }
 0x105   :  { %v2140_v30 = vpop.f32.mrb[8].mxu1 }
 0x106   :  { %v2142_v31 = vpop.f32.mrb[9].mxu1 }
 0x107   :  { %v2144_v35 = vpop.f32.mrb[10].mxu1 }
 0x108   :  { %v2146_v36 = vpop.f32.mrb[11].mxu1 }
 0x10d   :  { %v2148_v37 = vpop.f32.mrb[12].mxu1 }
 0x10e   :  { %v2150_v39 = vpop.f32.mrb[13].mxu1 }
 0x10f   :  { %v2152_v11 = vpop.f32.mrb[14].mxu1 }
 0x110   :  { %v2154_v8 = vpop.f32.mrb[15].mxu1 }
 0x115   :  { %v1658_v9 = vpop.f32.mrb[16].mxu1 }
 0x116   :  { %v1640_v12 = vpop.f32.mrb[0].mxu0  ;;  %v1059_v40 = vpop.f32.mrb[17].mxu1 }
 0x117   :  { %v1688_v13 = vadd.f32 %v1640_v12, %v1568_v17  ;;  %v844_v14 = vpop.f32.mrb[1].mxu0 }
 0x118   :  { %v1689_v42 = vadd.f32 %v844_v14, %v318_v18  ;;  %v1641_v43 = vpop.f32.mrb[2].mxu0 }
 0x119   :  { %v1690_v44 = vadd.f32 %v1641_v43, %v1569_v19  ;;  %v847_v10 = vpop.f32.mrb[3].mxu0  ;;  %v1661_v26 = vpop.f32.mrb[18].mxu1 }
 0x11a   :  { %v1691_v15 = vadd.f32 %v847_v10, %v321_v21  ;;  %v1138_v23 = vmul.f32 %v1689_v42, %v1059_v40  ;;  %v1069_v47 = vpop.f32.mrb[19].mxu1 }
 0x11b   :  { %v1454_v20 = vpack.c.bf16 %v1690_v44, %v1688_v13  ;;  %v1141_v25 = vmul.f32 %v1690_v44, %v1661_v26  ;;  %v1140_v24 = vmul.f32 %v1688_v13, %v1069_v47 }
 0x11c   :  { %v1449_v49 = vpack.c.bf16 %v1691_v15, %v1689_v42  ;;  %v1139_v50 = vmul.f32 %v1691_v15, %v1658_v9  ;;  %v1176_v53 = vmul.f32 %v1689_v42, %v1138_v23 }
 0x11d   :  { %1486 = vst [vmem:[%s2199_s5 + $0x8] sm:$0xff] %v1454_v20   ;;  %v1179_v32 = vmul.f32 %v1690_v44, %v1141_v25  ;;  %v1178_v33 = vmul.f32 %v1688_v13, %v1140_v24  ;;  %v1664_v54 = vpop.f32.mrb[20].mxu1 }
 0x11e   :  { %1450 = vst [vmem:[%s2199_s5] sm:$0xff] %v1449_v49   ;;  %v1154_v34 = vadd.f32 %v1139_v50, %v1138_v23  ;;  %v1177_v48 = vmul.f32 %v1691_v15, %v1139_v50  ;;  %v1644_v38 = vpop.f32.mrb[4].mxu0  ;;  %v1079_v58 = vpop.f32.mrb[21].mxu1 }
 0x11f   :  { %v1692_v55 = vadd.f32 %v1644_v38, %v1572_v22  ;;  %v860_v56 = vpop.f32.mrb[5].mxu0 }
 0x120   :  { %v1192_v59 = vadd.f32 %v1177_v48, %v1176_v53  ;;  %v1155_v60 = vadd.f32 %v1154_v34, %v1140_v24  ;;  %v1693_v41 = vadd.f32 %v860_v56, %v334_v27  ;;  %v1645_v45 = vpop.f32.mrb[6].mxu0 }
 0x121   :  { %v1694_v51 = vadd.f32 %v1645_v45, %v1573_v28  ;;  %v863_v46 = vpop.f32.mrb[7].mxu0  ;;  %v1667_v0 = vpop.f32.mrb[22].mxu1 }
 0x122   :  { %v1193_v52 = vadd.f32 %v1192_v59, %v1178_v33  ;;  %v1695_v61 = vadd.f32 %v863_v46, %v337_v29  ;;  %v1142_v62 = vmul.f32 %v1693_v41, %v1079_v58  ;;  %v1156_v63 = vadd.f32 %v1155_v60, %v1141_v25  ;;  %v1089_v4 = vpop.f32.mrb[23].mxu1 }
 0x123   :  { %v1464_v2 = vpack.c.bf16 %v1694_v51, %v1692_v55  ;;  %v1145_v3 = vmul.f32 %v1694_v51, %v1667_v0  ;;  %v1144_v17 = vmul.f32 %v1692_v55, %v1089_v4 }
 0x124   :  { %v1143_v57 = vmul.f32 %v1695_v61, %v1664_v54  ;;  %v1459_v1 = vpack.c.bf16 %v1695_v61, %v1693_v41  ;;  %v1157_v5 = vadd.f32 %v1156_v63, %v1142_v62  ;;  %v1180_v6 = vmul.f32 %v1693_v41, %v1142_v62 }
 0x125   :  { %1488 = vst [vmem:[%s2199_s5 + $0x18] sm:$0xff] %v1464_v2   ;;  %v1194_v16 = vadd.f32 %v1193_v52, %v1179_v32  ;;  %v1183_v7 = vmul.f32 %v1694_v51, %v1145_v3  ;;  %v1670_v22 = vpop.f32.mrb[24].mxu1  ;;  %v1182_v28 = vmul.f32 %v1692_v55, %v1144_v17 }
 0x126   :  { %v1181_v18 = vmul.f32 %v1695_v61, %v1143_v57  ;;  %1487 = vst [vmem:[%s2199_s5 + $0x10] sm:$0xff] %v1459_v1   ;;  %v1158_v19 = vadd.f32 %v1157_v5, %v1143_v57  ;;  %v1648_v21 = vpop.f32.mrb[8].mxu0  ;;  %v1099_v9 = vpop.f32.mrb[25].mxu1 }
 0x127   :  { %v1195_v27 = vadd.f32 %v1194_v16, %v1180_v6  ;;  %v1696_v29 = vadd.f32 %v1648_v21, %v2140_v30  ;;  %v876_v12 = vpop.f32.mrb[9].mxu0 }
 0x128   :  { %v1159_v13 = vadd.f32 %v1158_v19, %v1144_v17  ;;  %v1697_v14 = vadd.f32 %v876_v12, %v2142_v31  ;;  %v1649_v40 = vpop.f32.mrb[10].mxu0 }
 0x129   :  { %v1196_v42 = vadd.f32 %v1195_v27, %v1181_v18  ;;  %v1698_v43 = vadd.f32 %v1649_v40, %v2144_v35  ;;  %v879_v44 = vpop.f32.mrb[11].mxu0  ;;  %v1673_v26 = vpop.f32.mrb[26].mxu1 }
 0x12a   :  { %v1699_v10 = vadd.f32 %v879_v44, %v2146_v36  ;;  %v1146_v15 = vmul.f32 %v1697_v14, %v1099_v9  ;;  %v1160_v23 = vadd.f32 %v1159_v13, %v1145_v3  ;;  %v1109_v49 = vpop.f32.mrb[27].mxu1 }
 0x12b   :  { %v1197_v20 = vadd.f32 %v1196_v42, %v1182_v28  ;;  %v1474_v25 = vpack.c.bf16 %v1698_v43, %v1696_v29  ;;  %v1149_v47 = vmul.f32 %v1698_v43, %v1673_v26  ;;  %v1148_v32 = vmul.f32 %v1696_v29, %v1109_v49 }
 0x12c   :  { %v1147_v30 = vmul.f32 %v1699_v10, %v1670_v22  ;;  %v1469_v50 = vpack.c.bf16 %v1699_v10, %v1697_v14  ;;  %v1161_v53 = vadd.f32 %v1160_v23, %v1146_v15  ;;  %v1184_v24 = vmul.f32 %v1697_v14, %v1146_v15 }
 0x12d   :  { %1490 = vst [vmem:[%s2199_s5 + $0x28] sm:$0xff] %v1474_v25   ;;  %v1198_v31 = vadd.f32 %v1197_v20, %v1183_v7  ;;  %v1187_v35 = vmul.f32 %v1698_v43, %v1149_v47  ;;  %v1676_v33 = vpop.f32.mrb[28].mxu1  ;;  %v1186_v54 = vmul.f32 %v1696_v29, %v1148_v32 }
 0x12e   :  { %v1185_v34 = vmul.f32 %v1699_v10, %v1147_v30  ;;  %1489 = vst [vmem:[%s2199_s5 + $0x20] sm:$0xff] %v1469_v50   ;;  %v1162_v36 = vadd.f32 %v1161_v53, %v1147_v30  ;;  %v1652_v48 = vpop.f32.mrb[12].mxu0  ;;  %v1119_v58 = vpop.f32.mrb[29].mxu1 }
 0x12f   :  { %v1199_v38 = vadd.f32 %v1198_v31, %v1184_v24  ;;  %v1700_v55 = vadd.f32 %v1652_v48, %v2148_v37  ;;  %v892_v56 = vpop.f32.mrb[13].mxu0 }
 0x130   :  { %v1163_v59 = vadd.f32 %v1162_v36, %v1148_v32  ;;  %v1701_v60 = vadd.f32 %v892_v56, %v2150_v39  ;;  %v1653_v41 = vpop.f32.mrb[14].mxu0 }
 0x131   :  { %v1200_v45 = vadd.f32 %v1199_v38, %v1185_v34  ;;  %v1702_v51 = vadd.f32 %v1653_v41, %v2152_v11  ;;  %v895_v46 = vpop.f32.mrb[15].mxu0  ;;  %v1679_v63 = vpop.f32.mrb[30].mxu1 }
 0x132   :  { %v1703_v52 = vadd.f32 %v895_v46, %v2154_v8  ;;  %v1150_v61 = vmul.f32 %v1701_v60, %v1119_v58  ;;  %v1164_v62 = vadd.f32 %v1163_v59, %v1149_v47  ;;  %v1129_v4 = vpop.f32.mrb[31].mxu1 }
 0x133   :  { %v1201_v0 = vadd.f32 %v1200_v45, %v1186_v54  ;;  %v1484_v2 = vpack.c.bf16 %v1702_v51, %v1700_v55  ;;  %v1153_v3 = vmul.f32 %v1702_v51, %v1679_v63  ;;  %v1152_v6 = vmul.f32 %v1700_v55, %v1129_v4 }
 0x134   :  { %v1151_v37 = vmul.f32 %v1703_v52, %v1676_v33  ;;  %v1479_v57 = vpack.c.bf16 %v1703_v52, %v1701_v60  ;;  %v1165_v1 = vadd.f32 %v1164_v62, %v1150_v61  ;;  %v1188_v5 = vmul.f32 %v1701_v60, %v1150_v61 }
 0x135   :  { %1492 = vst [vmem:[%s2199_s5 + $0x38] sm:$0xff] %v1484_v2   ;;  %v1202_v39 = vadd.f32 %v1201_v0, %v1187_v35  ;;  %v1191_v11 = vmul.f32 %v1702_v51, %v1153_v3  ;;  %v1190_v17 = vmul.f32 %v1700_v55, %v1152_v6 }
 0x136   :  { %v1189_v16 = vmul.f32 %v1703_v52, %v1151_v37  ;;  %1491 = vst [vmem:[%s2199_s5 + $0x30] sm:$0xff] %v1479_v57   ;;  %v1166_v8 = vadd.f32 %v1165_v1, %v1151_v37 }
 0x137   :  { %v1203_v7 = vadd.f32 %v1202_v39, %v1188_v5 }
 0x138   :  { %v1167_v18 = vadd.f32 %v1166_v8, %v1152_v6 }
 0x139   :  { %v1204_v19 = vadd.f32 %v1203_v7, %v1189_v16 }
 0x13a   :  { %v1168_v21 = vadd.f32 %v1167_v18, %v1153_v3 }
 0x13b   :  { %v1205_v22 = vadd.f32 %v1204_v19, %v1190_v17 }
 0x13c   :  { %v1169_v27 = vrot.slane %v1168_v21, 4 }
 0x13d   :  { %v1206_v28 = vadd.f32 %v1205_v22, %v1191_v11 }
 0x13e   :  { %v1170_v29 = vadd.f32 %v1169_v27, %v1168_v21 }
 0x13f   :  { %v1207_v12 = vrot.slane %v1206_v28, 4 }
 0x140   :  { %v1171_v9 = vrot.slane %v1170_v29, 2 }
 0x141   :  { %v1208_v13 = vadd.f32 %v1207_v12, %v1206_v28 }
 0x142   :  { %v1172_v14 = vadd.f32 %v1171_v9, %v1170_v29 }
 0x143   :  { %v1209_v40 = vrot.slane %v1208_v13, 2 }
 0x144   :  { %v1173_v42 = vrot.slane %v1172_v14, 1 }
 0x145   :  { %v1210_v43 = vadd.f32 %v1209_v40, %v1208_v13 }
 0x146   :  { %v1174_v44 = vadd.f32 %v1173_v42, %v1172_v14 }
 0x147   :  { %v1211_v10 = vrot.slane %v1210_v43, 1 }
 0x148   :  { %1175 = vst [vmem:[%s2200_s6] sm:$0x1] %v1174_v44 }
 0x149   :  { %v1212_v15 = vadd.f32 %v1211_v10, %v1210_v43 }
 0x14b   :  { %1213 = vst [vmem:[%s2201_s7] sm:$0x1] %v1212_v15 }

// kernel: generator_forward.14
= control target key start
LH: loop header
LB: loop body
LE: loop exit
PB: predicated region body
PF: predicated region fallthrough
CT: control target
= control target key end

     0   :  { %vm316_vm0 = vcmask 519168   ;;  %s768_s0 = inlined_call_operand.vmem [shape: bf16[256,64], index: 0, kind: input, shape index: {}]   ;;  %s769_s1 = inlined_call_operand.vmem [shape: f32[1,64], index: 1, kind: input, shape index: {}]   ;;  %s770_s2 = inlined_call_operand.vmem [shape: f32[1,64], index: 2, kind: input, shape index: {}]   ;;  %s771_s3 = inlined_call_operand.vmem [shape: bf16[256,64], index: 3, kind: output, shape index: {}]  }
   0x1   :  { %v420_v0 = vld [vmem:[%s768_s0] sm:$0xff]   ;;  %v483_v4 = vld [vmem:[%s768_s0 + $0x8] sm:$0xff]   ;;  %v484_v5 = vld [vmem:[%s768_s0 + $0x10] sm:$0xff]  }
   0x2   :  { %v524_v1 = vld [vmem:[%s769_s1] ss:$0 sm:$0xff]  ;;  %v421_v2 = vunpack.c.l.bf16 %v420_v0  ;;  %v422_v3 = vunpack.c.h.bf16 %v420_v0  ;;  %v485_v6 = vld [vmem:[%s768_s0 + $0x18] sm:$0xff]   ;;  %v425_v8 = vunpack.c.l.bf16 %v483_v4  ;;  %v426_v9 = vunpack.c.h.bf16 %v483_v4  ;;  %v487_v41 = vld [vmem:[%s768_s0 + $0x28] sm:$0xff]  }
   0x3   :  { %v538_v7 = vld [vmem:[%s770_s2] ss:$0 sm:$0xff]  ;;  %v429_v10 = vunpack.c.l.bf16 %v484_v5  ;;  %v430_v11 = vunpack.c.h.bf16 %v484_v5  ;;  %v433_v14 = vunpack.c.l.bf16 %v485_v6  ;;  %v434_v15 = vunpack.c.h.bf16 %v485_v6  ;;  %v488_v42 = vld [vmem:[%s768_s0 + $0x30] sm:$0xff]   ;;  %v489_v47 = vld [vmem:[%s768_s0 + $0x38] sm:$0xff]  }
   0x4   :  { %v85_v12 = vmul.f32 %v421_v2, %v524_v1  ;;  %v86_v13 = vmul.f32 %v422_v3, %v524_v1  ;;  %v87_v16 = vmul.f32 %v425_v8, %v524_v1  ;;  %v88_v17 = vmul.f32 %v426_v9, %v524_v1  ;;  %v486_v36 = vld [vmem:[%s768_s0 + $0x20] sm:$0xff]  }
   0x5   :  { %v89_v18 = vmul.f32 %v429_v10, %v524_v1  ;;  %v90_v19 = vmul.f32 %v430_v11, %v524_v1  ;;  %v91_v22 = vmul.f32 %v433_v14, %v524_v1  ;;  %v92_v23 = vmul.f32 %v434_v15, %v524_v1 }
   0x6   :  { %v124_v20 = vadd.f32 %v538_v7, %v85_v12  ;;  %v125_v21 = vadd.f32 %v538_v7, %v86_v13  ;;  %v126_v24 = vadd.f32 %v538_v7, %v87_v16  ;;  %v127_v25 = vadd.f32 %v538_v7, %v88_v17 }
   0x7   :  { %v128_v26 = vadd.f32 %v538_v7, %v89_v18  ;;  %v129_v27 = vadd.f32 %v538_v7, %v90_v19  ;;  %v130_v30 = vadd.f32 %v538_v7, %v91_v22  ;;  %v131_v31 = vadd.f32 %v538_v7, %v92_v23  ;;  %v490_v18 = vld [vmem:[%s768_s0 + $0x40] sm:$0xff]   ;;  %v491_v23 = vld [vmem:[%s768_s0 + $0x48] sm:$0xff]  }
   0x8   :  { %v156_v28 = vmax.f32 %v124_v20, 0.0  ;;  %v157_v29 = vmax.f32 %v125_v21, 0.0  ;;  %v158_v32 = vmax.f32 %v126_v24, 0.0  ;;  %v159_v33 = vmax.f32 %v127_v25, 0.0  ;;  %v492_v24 = vld [vmem:[%s768_s0 + $0x50] sm:$0xff]  }
   0x9   :  { %v160_v34 = vmax.f32 %v128_v26, 0.0  ;;  %v161_v35 = vmax.f32 %v129_v27, 0.0  ;;  %v162_v39 = vmax.f32 %v130_v30, 0.0  ;;  %v163_v40 = vmax.f32 %v131_v31, 0.0 }
   0xa   :  { %v387_v37 = vpack.c.bf16 %v156_v28, %v156_v28  ;;  %v388_v38 = vpack.c.bf16 %v157_v29, %v157_v29  ;;  %v389_v43 = vpack.c.bf16 %v158_v32, %v158_v32  ;;  %v390_v44 = vpack.c.bf16 %v159_v33, %v159_v33  ;;  %v493_v29 = vld [vmem:[%s768_s0 + $0x58] sm:$0xff]  }
   0xb   :  { %v391_v45 = vpack.c.bf16 %v160_v34, %v160_v34  ;;  %v392_v46 = vpack.c.bf16 %v161_v35, %v161_v35  ;;  %v393_v48 = vpack.c.bf16 %v162_v39, %v162_v39  ;;  %v394_v49 = vpack.c.bf16 %v163_v40, %v163_v40 }
   0xc   :  { %317 = vst.msk [vmem:[%s771_s3] sm:$0xf] %vm316_vm0, %v387_v37  ;;  %318 = vst.msk [vmem:[%s771_s3 + $0x4] sm:$0xf] %vm316_vm0, %v388_v38  ;;  %v437_v50 = vunpack.c.l.bf16 %v486_v36  ;;  %v438_v51 = vunpack.c.h.bf16 %v486_v36  ;;  %v441_v52 = vunpack.c.l.bf16 %v487_v41  ;;  %v442_v53 = vunpack.c.h.bf16 %v487_v41 }
   0xd   :  { %319 = vst.msk [vmem:[%s771_s3 + $0x8] sm:$0xf] %vm316_vm0, %v389_v43  ;;  %320 = vst.msk [vmem:[%s771_s3 + $0xc] sm:$0xf] %vm316_vm0, %v390_v44  ;;  %v445_v54 = vunpack.c.l.bf16 %v488_v42  ;;  %v446_v55 = vunpack.c.h.bf16 %v488_v42  ;;  %v449_v58 = vunpack.c.l.bf16 %v489_v47  ;;  %v450_v59 = vunpack.c.h.bf16 %v489_v47 }
   0xe   :  { %321 = vst.msk [vmem:[%s771_s3 + $0x10] sm:$0xf] %vm316_vm0, %v391_v45  ;;  %322 = vst.msk [vmem:[%s771_s3 + $0x14] sm:$0xf] %vm316_vm0, %v392_v46  ;;  %v93_v56 = vmul.f32 %v437_v50, %v524_v1  ;;  %v94_v57 = vmul.f32 %v438_v51, %v524_v1  ;;  %v95_v60 = vmul.f32 %v441_v52, %v524_v1  ;;  %v453_v32 = vunpack.c.l.bf16 %v490_v18 }
   0xf   :  { %323 = vst.msk [vmem:[%s771_s3 + $0x18] sm:$0xf] %vm316_vm0, %v393_v48  ;;  %324 = vst.msk [vmem:[%s771_s3 + $0x1c] sm:$0xf] %vm316_vm0, %v394_v49  ;;  %v96_v61 = vmul.f32 %v442_v53, %v524_v1  ;;  %v97_v62 = vmul.f32 %v445_v54, %v524_v1  ;;  %v98_v63 = vmul.f32 %v446_v55, %v524_v1  ;;  %v454_v33 = vunpack.c.h.bf16 %v490_v18 }
  0x10   :  { %v132_v0 = vadd.f32 %v538_v7, %v93_v56  ;;  %v133_v2 = vadd.f32 %v538_v7, %v94_v57  ;;  %v99_v3 = vmul.f32 %v449_v58, %v524_v1  ;;  %v100_v4 = vmul.f32 %v450_v59, %v524_v1 }
  0x11   :  { %v134_v5 = vadd.f32 %v538_v7, %v95_v60  ;;  %v135_v6 = vadd.f32 %v538_v7, %v96_v61  ;;  %v136_v8 = vadd.f32 %v538_v7, %v97_v62  ;;  %v137_v9 = vadd.f32 %v538_v7, %v98_v63  ;;  %v494_v62 = vld [vmem:[%s768_s0 + $0x60] sm:$0xff]  }
  0x12   :  { %v164_v10 = vmax.f32 %v132_v0, 0.0  ;;  %v165_v11 = vmax.f32 %v133_v2, 0.0  ;;  %v138_v12 = vadd.f32 %v538_v7, %v99_v3  ;;  %v139_v13 = vadd.f32 %v538_v7, %v100_v4  ;;  %v495_v4 = vld [vmem:[%s768_s0 + $0x68] sm:$0xff]  }
  0x13   :  { %v166_v14 = vmax.f32 %v134_v5, 0.0  ;;  %v167_v15 = vmax.f32 %v135_v6, 0.0  ;;  %v168_v16 = vmax.f32 %v136_v8, 0.0  ;;  %v169_v17 = vmax.f32 %v137_v9, 0.0  ;;  %v496_v5 = vld [vmem:[%s768_s0 + $0x70] sm:$0xff]  }
  0x14   :  { %v395_v19 = vpack.c.bf16 %v164_v10, %v164_v10  ;;  %v396_v20 = vpack.c.bf16 %v165_v11, %v165_v11  ;;  %v170_v21 = vmax.f32 %v138_v12, 0.0  ;;  %v171_v22 = vmax.f32 %v139_v13, 0.0  ;;  %v497_v11 = vld [vmem:[%s768_s0 + $0x78] sm:$0xff]  }
  0x15   :  { %v397_v25 = vpack.c.bf16 %v166_v14, %v166_v14  ;;  %v398_v26 = vpack.c.bf16 %v167_v15, %v167_v15  ;;  %v399_v27 = vpack.c.bf16 %v168_v16, %v168_v16  ;;  %v400_v28 = vpack.c.bf16 %v169_v17, %v169_v17 }
  0x16   :  { %325 = vst.msk [vmem:[%s771_s3 + $0x20] sm:$0xf] %vm316_vm0, %v395_v19  ;;  %326 = vst.msk [vmem:[%s771_s3 + $0x24] sm:$0xf] %vm316_vm0, %v396_v20  ;;  %v401_v30 = vpack.c.bf16 %v170_v21, %v170_v21  ;;  %v402_v31 = vpack.c.bf16 %v171_v22, %v171_v22  ;;  %v457_v34 = vunpack.c.l.bf16 %v491_v23  ;;  %v458_v35 = vunpack.c.h.bf16 %v491_v23 }
  0x17   :  { %327 = vst.msk [vmem:[%s771_s3 + $0x28] sm:$0xf] %vm316_vm0, %v397_v25  ;;  %328 = vst.msk [vmem:[%s771_s3 + $0x2c] sm:$0xf] %vm316_vm0, %v398_v26  ;;  %v461_v36 = vunpack.c.l.bf16 %v492_v24  ;;  %v462_v37 = vunpack.c.h.bf16 %v492_v24  ;;  %v101_v38 = vmul.f32 %v453_v32, %v524_v1  ;;  %v102_v39 = vmul.f32 %v454_v33, %v524_v1 }
  0x18   :  { %329 = vst.msk [vmem:[%s771_s3 + $0x30] sm:$0xf] %vm316_vm0, %v399_v27  ;;  %330 = vst.msk [vmem:[%s771_s3 + $0x34] sm:$0xf] %vm316_vm0, %v400_v28  ;;  %v465_v40 = vunpack.c.l.bf16 %v493_v29  ;;  %v466_v41 = vunpack.c.h.bf16 %v493_v29  ;;  %v103_v42 = vmul.f32 %v457_v34, %v524_v1  ;;  %v104_v43 = vmul.f32 %v458_v35, %v524_v1 }
  0x19   :  { %331 = vst.msk [vmem:[%s771_s3 + $0x38] sm:$0xf] %vm316_vm0, %v401_v30  ;;  %332 = vst.msk [vmem:[%s771_s3 + $0x3c] sm:$0xf] %vm316_vm0, %v402_v31  ;;  %v105_v44 = vmul.f32 %v461_v36, %v524_v1  ;;  %v106_v45 = vmul.f32 %v462_v37, %v524_v1  ;;  %v140_v46 = vadd.f32 %v538_v7, %v101_v38  ;;  %v469_v14 = vunpack.c.l.bf16 %v494_v62 }
  0x1a   :  { %v141_v47 = vadd.f32 %v538_v7, %v102_v39  ;;  %v107_v48 = vmul.f32 %v465_v40, %v524_v1  ;;  %v108_v49 = vmul.f32 %v466_v41, %v524_v1  ;;  %v142_v50 = vadd.f32 %v538_v7, %v103_v42 }
  0x1b   :  { %v143_v51 = vadd.f32 %v538_v7, %v104_v43  ;;  %v144_v52 = vadd.f32 %v538_v7, %v105_v44  ;;  %v145_v53 = vadd.f32 %v538_v7, %v106_v45  ;;  %v172_v54 = vmax.f32 %v140_v46, 0.0 }
  0x1c   :  { %v173_v55 = vmax.f32 %v141_v47, 0.0  ;;  %v146_v56 = vadd.f32 %v538_v7, %v107_v48  ;;  %v147_v57 = vadd.f32 %v538_v7, %v108_v49  ;;  %v174_v58 = vmax.f32 %v142_v50, 0.0 }
  0x1d   :  { %v175_v59 = vmax.f32 %v143_v51, 0.0  ;;  %v176_v60 = vmax.f32 %v144_v52, 0.0  ;;  %v177_v61 = vmax.f32 %v145_v53, 0.0  ;;  %v403_v63 = vpack.c.bf16 %v172_v54, %v172_v54 }
  0x1e   :  { %v404_v0 = vpack.c.bf16 %v173_v55, %v173_v55  ;;  %v178_v2 = vmax.f32 %v146_v56, 0.0  ;;  %v179_v3 = vmax.f32 %v147_v57, 0.0  ;;  %v405_v6 = vpack.c.bf16 %v174_v58, %v174_v58 }
  0x1f   :  { %v406_v8 = vpack.c.bf16 %v175_v59, %v175_v59  ;;  %v407_v9 = vpack.c.bf16 %v176_v60, %v176_v60  ;;  %v408_v10 = vpack.c.bf16 %v177_v61, %v177_v61  ;;  %333 = vst.msk [vmem:[%s771_s3 + $0x40] sm:$0xf] %vm316_vm0, %v403_v63  ;;  %v470_v15 = vunpack.c.h.bf16 %v494_v62 }
  0x20   :  { %334 = vst.msk [vmem:[%s771_s3 + $0x44] sm:$0xf] %vm316_vm0, %v404_v0  ;;  %v409_v12 = vpack.c.bf16 %v178_v2, %v178_v2  ;;  %v410_v13 = vpack.c.bf16 %v179_v3, %v179_v3  ;;  %335 = vst.msk [vmem:[%s771_s3 + $0x48] sm:$0xf] %vm316_vm0, %v405_v6  ;;  %v473_v16 = vunpack.c.l.bf16 %v495_v4  ;;  %v474_v17 = vunpack.c.h.bf16 %v495_v4 }
  0x21   :  { %336 = vst.msk [vmem:[%s771_s3 + $0x4c] sm:$0xf] %vm316_vm0, %v406_v8  ;;  %337 = vst.msk [vmem:[%s771_s3 + $0x50] sm:$0xf] %vm316_vm0, %v407_v9  ;;  %v477_v18 = vunpack.c.l.bf16 %v496_v5  ;;  %v478_v19 = vunpack.c.h.bf16 %v496_v5  ;;  %v109_v20 = vmul.f32 %v469_v14, %v524_v1  ;;  %v110_v21 = vmul.f32 %v470_v15, %v524_v1 }
  0x22   :  { %338 = vst.msk [vmem:[%s771_s3 + $0x54] sm:$0xf] %vm316_vm0, %v408_v10  ;;  %339 = vst.msk [vmem:[%s771_s3 + $0x58] sm:$0xf] %vm316_vm0, %v409_v12  ;;  %v481_v22 = vunpack.c.l.bf16 %v497_v11  ;;  %v482_v23 = vunpack.c.h.bf16 %v497_v11  ;;  %v111_v24 = vmul.f32 %v473_v16, %v524_v1  ;;  %v112_v25 = vmul.f32 %v474_v17, %v524_v1 }
  0x23   :  { %340 = vst.msk [vmem:[%s771_s3 + $0x5c] sm:$0xf] %vm316_vm0, %v410_v13  ;;  %v113_v26 = vmul.f32 %v477_v18, %v524_v1  ;;  %v114_v27 = vmul.f32 %v478_v19, %v524_v1  ;;  %v148_v28 = vadd.f32 %v538_v7, %v109_v20  ;;  %v149_v29 = vadd.f32 %v538_v7, %v110_v21 }
  0x24   :  { %v115_v30 = vmul.f32 %v481_v22, %v524_v1  ;;  %v116_v31 = vmul.f32 %v482_v23, %v524_v1  ;;  %v150_v32 = vadd.f32 %v538_v7, %v111_v24  ;;  %v151_v33 = vadd.f32 %v538_v7, %v112_v25 }
  0x25   :  { %v152_v34 = vadd.f32 %v538_v7, %v113_v26  ;;  %v153_v35 = vadd.f32 %v538_v7, %v114_v27  ;;  %v180_v36 = vmax.f32 %v148_v28, 0.0  ;;  %v181_v37 = vmax.f32 %v149_v29, 0.0 }
  0x26   :  { %v154_v38 = vadd.f32 %v538_v7, %v115_v30  ;;  %v155_v39 = vadd.f32 %v538_v7, %v116_v31  ;;  %v182_v40 = vmax.f32 %v150_v32, 0.0  ;;  %v183_v41 = vmax.f32 %v151_v33, 0.0 }
  0x27   :  { %v184_v42 = vmax.f32 %v152_v34, 0.0  ;;  %v185_v43 = vmax.f32 %v153_v35, 0.0  ;;  %v411_v44 = vpack.c.bf16 %v180_v36, %v180_v36  ;;  %v412_v1 = vpack.c.bf16 %v181_v37, %v181_v37 }
  0x28   :  { %v186_v45 = vmax.f32 %v154_v38, 0.0  ;;  %v187_v46 = vmax.f32 %v155_v39, 0.0  ;;  %v413_v47 = vpack.c.bf16 %v182_v40, %v182_v40  ;;  %v414_v48 = vpack.c.bf16 %v183_v41, %v183_v41 }
  0x29   :  { %v415_v49 = vpack.c.bf16 %v184_v42, %v184_v42  ;;  %v416_v50 = vpack.c.bf16 %v185_v43, %v185_v43  ;;  %341 = vst.msk [vmem:[%s771_s3 + $0x60] sm:$0xf] %vm316_vm0, %v411_v44  ;;  %342 = vst.msk [vmem:[%s771_s3 + $0x64] sm:$0xf] %vm316_vm0, %v412_v1 }
  0x2a   :  { %v417_v7 = vpack.c.bf16 %v186_v45, %v186_v45  ;;  %v418_v51 = vpack.c.bf16 %v187_v46, %v187_v46  ;;  %343 = vst.msk [vmem:[%s771_s3 + $0x68] sm:$0xf] %vm316_vm0, %v413_v47  ;;  %344 = vst.msk [vmem:[%s771_s3 + $0x6c] sm:$0xf] %vm316_vm0, %v414_v48 }
  0x2b   :  { %345 = vst.msk [vmem:[%s771_s3 + $0x70] sm:$0xf] %vm316_vm0, %v415_v49  ;;  %346 = vst.msk [vmem:[%s771_s3 + $0x74] sm:$0xf] %vm316_vm0, %v416_v50 }
  0x2c   :  { %347 = vst.msk [vmem:[%s771_s3 + $0x78] sm:$0xf] %vm316_vm0, %v417_v7  ;;  %348 = vst.msk [vmem:[%s771_s3 + $0x7c] sm:$0xf] %vm316_vm0, %v418_v51 }

// kernel: generator_forward.13
= control target key start
LH: loop header
LB: loop body
LE: loop exit
PB: predicated region body
PF: predicated region fallthrough
CT: control target
= control target key end

     0   :  { %vm392_vm0 = vcmask 261120   ;;  %vm247_vm1 = vsmask.f32 7424  ;;  %vm846_vm2 = vcmask 1046528   ;;  %vm1674_vm3 = vcmask 1043456   ;;  %s3848_s2 = inlined_call_operand.vmem [shape: bf16[4,32,64], index: 2, kind: input, shape index: {}]   ;;  %s3849_s0 = inlined_call_operand.vmem [shape: bf16[320,32], index: 0, kind: input, shape index: {}, may-alias: {0,1}]   ;;  %s3850_s4 = inlined_call_operand.vmem [shape: f32[4,64], index: 4, kind: input, shape index: {}]   ;;  %s3851_s1 = inlined_call_operand.vmem [shape: bf16[320,32], index: 1, kind: input, shape index: {}, may-alias: {0,1}]   ;;  %s3852_s3 = inlined_call_operand.vmem [shape: f32[256,4], index: 3, kind: input, shape index: {}]   ;;  %s3853_s5 = inlined_call_operand.vmem [shape: bf16[256,64], index: 5, kind: output, shape index: {0}]   ;;  %s3854_s6 = inlined_call_operand.vmem [shape: f32[1,1,64], index: 6, kind: output, shape index: {1}]   ;;  %s3855_s7 = inlined_call_operand.vmem [shape: f32[1,1,64], index: 7, kind: output, shape index: {2}]  }
   0x1   :  { %v2891_v0 = vld [vmem:[%s3848_s2 + $0x10] sm:$0xff]   ;;  %v2892_v1 = vld [vmem:[%s3848_s2] sm:$0xff]   ;;  %v2893_v2 = vld [vmem:[%s3848_s2 + $0x18] sm:$0xff]   ;;  %vm1138_vm4 = vsmask.f32 6400  ;;  %vm1577_vm5 = vcmask 31744  }
   0x2   :  { %2597 = vmatprep.subr.bf16.mxu1 %v2891_v0  ;;  %2633 = vmatprep.subr.bf16.mxu0 %v2892_v1  ;;  %v2985_v3 = vld [vmem:[%s3848_s2 + $0x8] sm:$0xff]   ;;  %v2895_v4 = vld [vmem:[%s3849_s0] sm:$0xff]   ;;  %v2897_v6 = vld [vmem:[%s3849_s0 + $0x10] sm:$0xff]   ;;  %vm2237_vm6 = vcmask 519168   ;;  %vm1935_vm7 = vcmask 523264   ;;  %vm2005_vm8 = vcmask 516096  }
   0x3   :  { %2598 = vmatpush3.bf16.msra.mxu1 %v2891_v0  ;;  %2634 = vmatpush3.bf16.msra.mxu0 %v2892_v1  ;;  %v2896_v5 = vld [vmem:[%s3849_s0 + $0x8] sm:$0xff]   ;;  %v249_v7 = vshrl.u32 %v2895_v4, 16  ;;  %v251_v8 = vshll.u32 %v2895_v4, 16  ;;  %v264_v11 = vshll.u32 %v2897_v6, 16  ;;  %v2898_v12 = vld [vmem:[%s3848_s2 + $0x20] sm:$0xff]   ;;  %v2899_v15 = vld [vmem:[%s3849_s0 + $0x18] sm:$0xff]  }
   0x4   :  { %2599 = vmatprep.subr.bf16.mxu1 %v2893_v2  ;;  %2635 = vmatprep.subr.bf16.mxu0 %v2985_v3  ;;  %v256_v9 = vshll.u32 %v2896_v5, 16  ;;  %v260_v10 = vshrl.u32 %v2896_v5, 16  ;;  %v268_v16 = vshrl.u32 %v2897_v6, 16  ;;  %v2900_v18 = vld [vmem:[%s3849_s0 + $0x20] sm:$0xff]   ;;  %v272_v21 = vshll.u32 %v2899_v15, 16  ;;  %v2901_v25 = vld [vmem:[%s3849_s0 + $0x28] sm:$0xff]  }
   0x5   :  { %2637 = vmatprep.mubr.msk.bf16.mxu0 %vm392_vm0, %v2895_v4  ;;  %v253_v13 = vrot.slane %v251_v8, 1  ;;  %v266_v17 = vrot.slane %v264_v11, 1  ;;  %v276_v22 = vshrl.u32 %v2899_v15, 16  ;;  %v280_v24 = vshll.u32 %v2900_v18, 16  ;;  %v2903_v30 = vld [vmem:[%s3848_s2 + $0x28] sm:$0xff]   ;;  %v2902_v32 = vld [vmem:[%s3849_s0 + $0x30] sm:$0xff]  }
   0x6   :  { %v258_v14 = vrot.slane %v256_v9, 1  ;;  %v284_v26 = vshrl.u32 %v2900_v18, 16  ;;  %v274_v29 = vrot.slane %v272_v21, 1  ;;  %v288_v31 = vshll.u32 %v2901_v25, 16  ;;  %v3027_v35 = vld [vmem:[%s3849_s0 + $0x38] sm:$0xff]   ;;  %v3035_v41 = vld [vmem:[%s3849_s0 + $0x40] sm:$0xff]  }
   0x7   :  { %2600 = vmatpush3.bf16.msra.mxu1 %v2893_v2  ;;  %2636 = vmatpush3.bf16.msra.mxu0 %v2985_v3  ;;  %v254_v19 = vor.u32 %v253_v13, %v249_v7  ;;  %v270_v23 = vor.u32 %v268_v16, %v266_v17  ;;  %v282_v34 = vrot.slane %v280_v24, 1  ;;  %v296_v39 = vshll.u32 %v2902_v32, 16  ;;  %v3040_v42 = vld [vmem:[%s3849_s0 + $0x48] sm:$0xff]   ;;  %v3060_v49 = vld [vmem:[%s3849_s0 + $0x14] ss:$4 sps:$4 sm:$0xff]  }
   0x8   :  { %2791 = vmatprep.subr.bf16.mxu1 %v2892_v1  ;;  %2669 = vmatprep.subr.bf16.mxu0 %v2898_v12  ;;  %v262_v20 = vor.u32 %v260_v10, %v258_v14  ;;  %v278_v36 = vor.u32 %v276_v22, %v274_v29  ;;  %v290_v38 = vrot.slane %v288_v31, 1  ;;  %v292_v40 = vshrl.u32 %v2901_v25, 16  ;;  %v3048_v46 = vld [vmem:[%s3849_s0 + $0xc] ss:$4 sps:$4 sm:$0xff]   ;;  %v3055_v48 = vld [vmem:[%s3849_s0 + $0x4] ss:$4 sps:$4 sm:$0xff]  }
   0x9   :  { %v259_v27 = vsel %vm247_vm1, %v254_v19, %v258_v14  ;;  %v275_v33 = vsel %vm247_vm1, %v270_v23, %v274_v29  ;;  %v286_v37 = vor.u32 %v284_v26, %v282_v34  ;;  %v300_v44 = vshrl.u32 %v2902_v32, 16  ;;  %v3065_v51 = vld [vmem:[%s3848_s2 + $0x30] sm:$0xff]   ;;  %v3081_v57 = vld [vmem:[%s3849_s0 + $0x1c] ss:$4 sps:$4 sm:$0xff]   ;;  %v3093_v63 = vld [vmem:[%s3849_s0 + $0x24] ss:$4 sps:$4 sm:$0xff]  }
   0xa   :  { %2638 = vmatmul.mubr.msk.bf16.vlgmr.msra.gmra.mrb[0].mxu0 %vm392_vm0, %v2896_v5  ;;  %v267_v28 = vsel %vm247_vm1, %v262_v20, %v266_v17  ;;  %2601 = vmatprep.mubr.msk.bf16.mxu1 %vm392_vm0, %v259_v27  ;;  %v283_v43 = vsel %vm247_vm1, %v278_v36, %v282_v34  ;;  %v304_v45 = vshll.u32 %v3027_v35, 16  ;;  %v298_v50 = vrot.slane %v296_v39, 1  ;;  %v3074_v55 = vld [vmem:[%s3849_s0 + $0x50] sm:$0xff]   ;;  %v3088_v62 = vld [vmem:[%s3849_s0 + $0x58] sm:$0xff]   ;;  %v3111_v9 = vld [vmem:[%s3849_s0 + $0x68] sm:$0xff]  }
   0xb   :  { %2670 = vmatpush3.bf16.msra.mxu0 %v2898_v12  ;;  %2641 = vmatprep.mubr.msk.bf16.mxu0 %vm392_vm0, %v2897_v6  ;;  %v291_v47 = vsel %vm247_vm1, %v286_v37, %v290_v38  ;;  %v308_v52 = vshrl.u32 %v3027_v35, 16  ;;  %v312_v53 = vshll.u32 %v3035_v41, 16  ;;  %v320_v54 = vshll.u32 %v3040_v42, 16  ;;  %v3104_v6 = vld [vmem:[%s3849_s0 + $0x60] sm:$0xff]   ;;  %v3116_v10 = vld [vmem:[%s3849_s0 + $0x2c] ss:$4 sps:$4 sm:$0xff]  }
   0xc   :  { %2602 = vmatmul.mubr.msk.bf16.vlgmr.msra.gmra.mrb[0].mxu1 %vm392_vm0, %v267_v28  ;;  %2671 = vmatprep.subr.bf16.mxu0 %v2903_v30  ;;  %v294_v56 = vor.u32 %v292_v40, %v290_v38  ;;  %v302_v58 = vor.u32 %v300_v44, %v298_v50  ;;  %v306_v59 = vrot.slane %v304_v45, 1  ;;  %v316_v60 = vshrl.u32 %v3035_v41, 16  ;;  %v3124_v17 = vld [vmem:[%s3849_s0 + $0x70] sm:$0xff]   ;;  %v3145_v26 = vld [vmem:[%s3849_s0 + $0x3c] ss:$4 sps:$4 sm:$0xff]  }
   0xd   :  { %2793 = vmatpush3.bf16.msra.mxu1 %v2892_v1  ;;  %2605 = vmatprep.mubr.msk.bf16.mxu1 %vm392_vm0, %v275_v33  ;;  %v847_v61 = vrot.slane %v3055_v48, 1  ;;  %v322_v0 = vrot.slane %v320_v54, 1  ;;  %v848_v1 = vrot.slane %v3048_v46, 1  ;;  %v324_v2 = vshrl.u32 %v3040_v42, 16  ;;  %v3162_v34 = vld [vmem:[%s3850_s4] sm:$0xf] }
   0xe   :  { %2792 = vmatprep.subr.bf16.mxu1 %v2985_v3  ;;  %v299_v4 = vsel %vm247_vm1, %v294_v56, %v298_v50  ;;  %v314_v5 = vrot.slane %v312_v53, 1  ;;  %v307_v7 = vsel %vm247_vm1, %v302_v58, %v306_v59  ;;  %v336_v8 = vshll.u32 %v3088_v62, 16  ;;  %v3180_v45 = vld [vmem:[%s3849_s0 + $0x54] ss:$4 sps:$4 sm:$0xff]   ;;  %v3193_v56 = vld [vmem:[%s3849_s0 + $0x64] ss:$4 sps:$4 sm:$0xff]  }
   0xf   :  { %2672 = vmatpush3.bf16.msra.mxu0 %v2903_v30  ;;  %v310_v11 = vor.u32 %v308_v52, %v306_v59  ;;  %v850_v13 = vrot.slane %v3060_v49, 1  ;;  %v326_v14 = vor.u32 %v324_v2, %v322_v0  ;;  %v332_v16 = vshrl.u32 %v3074_v55, 16  ;;  %v3153_v30 = vld [vmem:[%s3849_s0 + $0x44] ss:$4 sps:$4 sm:$0xff]   ;;  %v3186_v52 = vld [vmem:[%s3849_s0 + $0x5c] ss:$4 sps:$4 sm:$0xff]  }
  0x10   :  { %2705 = vmatprep.subr.bf16.mxu0 %v3065_v51  ;;  %v318_v12 = vor.u32 %v316_v60, %v314_v5  ;;  %v849_v19 = vsel %vm846_vm2, %v847_v61, %v848_v1  ;;  %v852_v20 = vrot.slane %v3081_v57, 1  ;;  %v340_v21 = vshrl.u32 %v3088_v62, 16  ;;  %v3200_v60 = vld [vmem:[%s3851_s1 + $0x80] sm:$0xf]  ;;  %v3205_v61 = vld [vmem:[%s3849_s0 + $0x6c] ss:$4 sps:$4 sm:$0xff]  }
  0x11   :  { %2794 = vmatpush3.bf16.msra.mxu1 %v2985_v3  ;;  %v328_v3 = vshll.u32 %v3074_v55, 16  ;;  %v338_v22 = vrot.slane %v336_v8, 1  ;;  %v344_v23 = vshll.u32 %v3104_v6, 16  ;;  %v352_v24 = vshll.u32 %v3111_v9, 16  ;;  %v2927_v2 = vld [vmem:[%s3848_s2 + $0x38] sm:$0xff]  }
  0x12   :  { %2642 = vmatmul.mubr.msk.bf16.gmra.mrb[4].mxu0 %vm392_vm0, %v2899_v15  ;;  %v315_v27 = vsel %vm247_vm1, %v310_v11, %v314_v5  ;;  %v323_v28 = vsel %vm247_vm1, %v318_v12, %v322_v0  ;;  %v851_v29 = vsel %vm846_vm2, %v848_v1, %v850_v13  ;;  %v360_v33 = vshll.u32 %v3124_v17, 16  ;;  %2741 = vmatprep.subr.msk.mxu1 %vm1674_vm3, %v3162_v34 }
  0x13   :  { %2645 = vmatprep.mubr.msk.bf16.mxu0 %vm392_vm0, %v2900_v18  ;;  %v330_v15 = vrot.slane %v328_v3, 1  ;;  %v3129_v18 = vld [vmem:[%s3849_s0 + $0x34] ss:$4 sps:$4 sm:$0xff]   ;;  %v853_v36 = vsel %vm846_vm2, %v850_v13, %v852_v20  ;;  %v854_v37 = vrot.slane %v3093_v63, 1  ;;  %v348_v38 = vshrl.u32 %v3104_v6, 16 }
  0x14   :  { %2606 = vmatmul.mubr.msk.bf16.gmra.mrb[4].mxu1 %vm392_vm0, %v283_v43  ;;  %v342_v39 = vor.u32 %v340_v21, %v338_v22  ;;  %v354_v40 = vrot.slane %v352_v24, 1  ;;  %v356_v43 = vshrl.u32 %v3111_v9, 16  ;;  %v364_v44 = vshrl.u32 %v3124_v17, 16 }
  0x15   :  { %2609 = vmatprep.mubr.msk.bf16.mxu1 %vm392_vm0, %v291_v47  ;;  %v331_v31 = vsel %vm247_vm1, %v326_v14, %v330_v15  ;;  %v346_v47 = vrot.slane %v344_v23, 1  ;;  %v856_v53 = vrot.slane %v3116_v10, 1  ;;  %v362_v54 = vrot.slane %v360_v33, 1 }
  0x16   :  { %v858_v59 = vrot.slane %v3129_v18, 1  ;;  %v358_v0 = vor.u32 %v356_v43, %v354_v40  ;;  %v855_v8 = vsel %vm846_vm2, %v852_v20, %v854_v37  ;;  %v2458_v11 = vcombine.low %v3200_v60, %v3200_v60 }
  0x17   :  { %v350_v58 = vor.u32 %v348_v38, %v346_v47  ;;  %v366_v1 = vor.u32 %v364_v44, %v362_v54  ;;  %v857_v13 = vsel %vm846_vm2, %v854_v37, %v856_v53  ;;  %v862_v20 = vrot.slane %v3153_v30, 1 }
  0x18   :  { %v1157_v24 = vshrl.u32 %v3060_v49, 16  ;;  %v1175_v37 = vshrl.u32 %v3093_v63, 16 }
  0x19   :  { %v355_v12 = vsel %vm247_vm1, %v350_v58, %v354_v40 }
  0x1a   :  { %2646 = vmatmul.mubr.msk.bf16.gmra.mrb[8].mxu0 %vm392_vm0, %v2901_v25  ;;  %v3140_v25 = vld [vmem:[%s3849_s0 + $0x78] sm:$0xff]   ;;  %v1159_v33 = vrot.slane %v1157_v24, 1  ;;  %v1177_v44 = vrot.slane %v1175_v37, 1  ;;  %v1214_v24 = vshll.u32 %v3153_v30, 16  ;;  %v1229_v37 = vshrl.u32 %v3180_v45, 16 }
  0x1b   :  { %2649 = vmatprep.mubr.msk.bf16.mxu0 %vm392_vm0, %v2902_v32  ;;  %v334_v32 = vor.u32 %v332_v16, %v330_v15  ;;  %v368_v50 = vshll.u32 %v3140_v25, 16  ;;  %v372_v14 = vshrl.u32 %v3140_v25, 16  ;;  %v1148_v15 = vshrl.u32 %v3048_v46, 16 }
  0x1c   :  { %2610 = vmatmul.mubr.msk.bf16.gmra.mrb[8].mxu1 %vm392_vm0, %v299_v4  ;;  %v860_v4 = vrot.slane %v3145_v26, 1  ;;  %v3224_v16 = vsel %vm247_vm1, %v358_v0, %v362_v54  ;;  %v1187_v54 = vshll.u32 %v3116_v10, 16  ;;  %v1193_v0 = vshrl.u32 %v3129_v18, 16 }
  0x1d   :  { %2613 = vmatprep.mubr.msk.bf16.mxu1 %vm392_vm0, %v307_v7  ;;  %v370_v3 = vrot.slane %v368_v50, 1  ;;  %v339_v5 = vsel %vm247_vm1, %v334_v32, %v338_v22  ;;  %v347_v7 = vsel %vm247_vm1, %v342_v39, %v346_v47  ;;  %v1150_v23 = vrot.slane %v1148_v15, 1 }
  0x1e   :  { %v3235_v22 = vsel %vm846_vm2, %v858_v59, %v860_v4  ;;  %v1166_v32 = vshrl.u32 %v3081_v57, 16  ;;  %v1178_v47 = vshll.u32 %v3093_v63, 16  ;;  %v1211_v15 = vshrl.u32 %v3153_v30, 16 }
  0x1f   :  { %v3232_v21 = vsel %vm247_vm1, %v366_v1, %v370_v3  ;;  %v1196_v1 = vshll.u32 %v3129_v18, 16  ;;  %v1205_v18 = vshll.u32 %v3145_v26, 16 }
  0x20   :  { %v1168_v40 = vrot.slane %v1166_v32, 1  ;;  %v1213_v32 = vrot.slane %v1211_v15, 1 }
  0x22   :  { %2650 = vmatmul.mubr.msk.bf16.gmra.mrb[12].mxu0 %vm392_vm0, %v3027_v35  ;;  %v3171_v35 = vld [vmem:[%s3849_s0 + $0x4c] ss:$4 sps:$4 sm:$0xff]  }
  0x23   :  { %2673 = vmatprep.mubr.msk.bf16.mxu0 %vm392_vm0, %v849_v19  ;;  %v3227_v19 = vsel %vm846_vm2, %v856_v53, %v858_v59  ;;  %v864_v38 = vrot.slane %v3171_v35, 1  ;;  %v1184_v53 = vshrl.u32 %v3116_v10, 16  ;;  %v1180_v59 = vrot.slane %v1178_v47, 2 }
  0x24   :  { %2614 = vmatmul.mubr.msk.bf16.gmra.mrb[12].mxu1 %vm392_vm0, %v315_v27  ;;  %v3239_v27 = vshll.u32 %v2458_v11, 16  ;;  %v1198_v11 = vrot.slane %v1196_v1, 2  ;;  %v3303_v1 = vld [vmem:[%s3849_s0 + $0x74] ss:$4 sps:$4 sm:$0xff]  }
  0x25   :  { %2617 = vmatprep.mubr.msk.bf16.mxu1 %vm392_vm0, %v323_v28  ;;  %v1181_v10 = vor.u32 %v1180_v59, %v1177_v44  ;;  %v1238_v44 = vshrl.u32 %v3186_v52, 16  ;;  %v1265_v15 = vshrl.u32 %v3303_v1, 16 }
  0x2a   :  { %2674 = vmatmul.mubr.msk.bf16.vlgmr.msra.gmra.mrb[0].mxu0 %vm392_vm0, %v851_v29  ;;  %v1160_v29 = vshll.u32 %v3060_v49, 16 }
  0x2b   :  { %2706 = vmatpush3.bf16.msra.mxu0 %v3065_v51  ;;  %2677 = vmatprep.mubr.msk.bf16.mxu0 %vm392_vm0, %v853_v36  ;;  %v1151_v51 = vshll.u32 %v3048_v46, 16  ;;  %v3244_v46 = vor.u32 %v372_v14, %v370_v3  ;;  %v1169_v36 = vshll.u32 %v3081_v57, 16  ;;  %v378_v57 = vrot.slane %v3239_v27, 1  ;;  %v2289_v27 = vld [vmem:[%s3851_s1 + $0x84] sm:$0xf] }
  0x2c   :  { %2707 = vmatprep.subr.bf16.mxu0 %v2927_v2  ;;  %2618 = vmatmul.mubr.msk.bf16.gmra.mrb[16].mxu1 %vm392_vm0, %v331_v31  ;;  %v3251_v31 = vsel %vm846_vm2, %v860_v4, %v862_v20  ;;  %v1162_v39 = vrot.slane %v1160_v29, 2  ;;  %v1189_v3 = vrot.slane %v1187_v54, 2  ;;  %v1202_v4 = vshrl.u32 %v3145_v26, 16 }
  0x2d   :  { %v1153_v28 = vrot.slane %v1151_v51, 2  ;;  %2621 = vmatprep.mubr.msk.bf16.mxu1 %vm392_vm0, %v339_v5  ;;  %v1171_v43 = vrot.slane %v1169_v36, 2  ;;  %v1216_v36 = vrot.slane %v1214_v24, 2  ;;  %v1247_v54 = vshrl.u32 %v3193_v56, 16 }
  0x2e   :  { %v1163_v50 = vor.u32 %v1162_v39, %v1159_v33  ;;  %v1204_v14 = vrot.slane %v1202_v4, 1  ;;  %v1223_v33 = vshll.u32 %v3171_v35, 16  ;;  %v1250_v4 = vshll.u32 %v3193_v56, 16 }
  0x2f   :  { %2708 = vmatpush3.bf16.msra.mxu0 %v2927_v2  ;;  %v3254_v49 = vor.u32 %v1153_v28, %v1150_v23  ;;  %v1172_v58 = vor.u32 %v1171_v43, %v1168_v40  ;;  %v1186_v2 = vrot.slane %v1184_v53, 1  ;;  %v1220_v28 = vshrl.u32 %v3171_v35, 16 }
  0x30   :  { %v1225_v40 = vrot.slane %v1223_v33, 2  ;;  %v1232_v43 = vshll.u32 %v3180_v45, 16  ;;  %v1217_v47 = vor.u32 %v1216_v36, %v1213_v32  ;;  %v1241_v53 = vshll.u32 %v3186_v52, 16 }
  0x31   :  { %v3266_v63 = vsel %vm1138_vm4, %v3254_v49, %v1163_v50  ;;  %v3270_v5 = vsel %vm1138_vm4, %v1163_v50, %v1172_v58  ;;  %v3277_v51 = vsel %vm1138_vm4, %v1172_v58, %v1181_v10  ;;  %v1231_v50 = vrot.slane %v1229_v37, 1 }
  0x32   :  { %2678 = vmatmul.mubr.msk.bf16.gmra.mrb[4].mxu0 %vm392_vm0, %v855_v8  ;;  %v1195_v8 = vrot.slane %v1193_v0, 1  ;;  %v1240_v0 = vrot.slane %v1238_v44, 1  ;;  %v1267_v33 = vrot.slane %v1265_v15, 1  ;;  %v379_v30 = vsel %vm247_vm1, %v3244_v46, %v378_v57  ;;  %v1564_v15 = vld [vmem:[%s3852_s3 + $0xa0] sm:$0xff] }
  0x33   :  { %2681 = vmatprep.mubr.msk.bf16.mxu0 %vm392_vm0, %v857_v13  ;;  %v1190_v13 = vor.u32 %v1189_v3, %v1186_v2  ;;  %v1249_v3 = vrot.slane %v1247_v54, 1  ;;  %v870_v57 = vrot.slane %v3193_v56, 1  ;;  %v874_v56 = vrot.slane %v3303_v1, 1 }
  0x34   :  { %2622 = vmatmul.mubr.msk.bf16.gmra.mrb[20].mxu1 %vm392_vm0, %v347_v7  ;;  %v1199_v23 = vor.u32 %v1198_v11, %v1195_v8  ;;  %v1207_v7 = vrot.slane %v1205_v18, 2  ;;  %v1256_v11 = vshrl.u32 %v3205_v61, 16  ;;  %v1252_v18 = vrot.slane %v1250_v4, 2  ;;  %v1558_v4 = vld [vmem:[%s3852_s3 + $0x70] sm:$0xff] }
  0x35   :  { %2625 = vmatprep.mubr.msk.bf16.mxu1 %vm392_vm0, %v355_v12  ;;  %v3282_v29 = vsel %vm1138_vm4, %v1181_v10, %v1190_v13  ;;  %v1222_v12 = vrot.slane %v1220_v28, 1 }
  0x36   :  { %v3286_v26 = vsel %vm1138_vm4, %v1190_v13, %v1199_v23  ;;  %v1208_v39 = vor.u32 %v1207_v7, %v1204_v14  ;;  %v1259_v13 = vshll.u32 %v3205_v61, 16  ;;  %v1258_v28 = vrot.slane %v1256_v11, 1  ;;  %v1562_v11 = vld [vmem:[%s3852_s3 + $0x90] sm:$0xff] }
  0x37   :  { %v1226_v59 = vor.u32 %v1225_v40, %v1222_v12  ;;  %v868_v40 = vrot.slane %v3186_v52, 1  ;;  %v2306_v52 = vcombine.low %v3200_v60, %v2289_v27 }
  0x38   :  { %v3298_v58 = vsel %vm1138_vm4, %v1199_v23, %v1208_v39  ;;  %v3306_v2 = vsel %vm1138_vm4, %v1208_v39, %v1217_v47  ;;  %v1268_v23 = vshll.u32 %v3303_v1, 16  ;;  %v1261_v7 = vrot.slane %v1259_v13, 2  ;;  %v1552_v1 = vld [vmem:[%s3852_s3 + $0x40] sm:$0xff] }
  0x39   :  { %v3312_v10 = vsel %vm1138_vm4, %v1217_v47, %v1226_v59  ;;  %v219_v44 = vunpack.c.l.bf16 %v2306_v52  ;;  %v872_v47 = vrot.slane %v3205_v61, 1  ;;  %v1140_v61 = vshrl.u32 %v3055_v48, 16  ;;  %v1574_v52 = vld [vmem:[%s3852_s3 + $0xf0] sm:$0xff] }
  0x3a   :  { %2682 = vmatmul.mubr.msk.bf16.gmra.mrb[8].mxu0 %vm392_vm0, %v3227_v19  ;;  %v1234_v19 = vrot.slane %v1232_v43, 2  ;;  %v1270_v36 = vrot.slane %v1268_v23, 2  ;;  %v1262_v12 = vor.u32 %v1261_v7, %v1258_v28 }
  0x3b   :  { %2685 = vmatprep.mubr.msk.bf16.mxu0 %vm392_vm0, %v3235_v22  ;;  %v1243_v22 = vrot.slane %v1241_v53, 2  ;;  %v873_v35 = vsel %vm846_vm2, %v870_v57, %v872_v47  ;;  %v1142_v54 = vrot.slane %v1140_v61, 1 }
  0x3c   :  { %2626 = vmatmul.mubr.msk.bf16.gmra.mrb[24].mxu1 %vm392_vm0, %v3224_v16  ;;  %v1235_v8 = vor.u32 %v1234_v19, %v1231_v50  ;;  %v865_v16 = vsel %vm846_vm2, %v862_v20, %v864_v38  ;;  %v866_v20 = vrot.slane %v3180_v45, 1  ;;  %v3342_v39 = vor.u32 %v1270_v36, %v1267_v33  ;;  %v1567_v33 = vld [vmem:[%s3852_s3 + $0xb8] sm:$0xff] }
  0x3d   :  { %2629 = vmatprep.mubr.msk.bf16.mxu1 %vm392_vm0, %v3232_v21  ;;  %v1244_v14 = vor.u32 %v1243_v22, %v1240_v0  ;;  %v1253_v21 = vor.u32 %v1252_v18, %v1249_v3  ;;  %v218_v50 = vunpack.c.h.bf16 %v3140_v25  ;;  %v1544_v0 = vld [vmem:[%s3852_s3] sm:$0xff]  ;;  %v1554_v22 = vld [vmem:[%s3852_s3 + $0x50] sm:$0xff]  ;;  %v1563_v18 = vld [vmem:[%s3852_s3 + $0x98] sm:$0xff] }
  0x3e   :  { %v3326_v24 = vsel %vm1138_vm4, %v1226_v59, %v1235_v8  ;;  %v3353_v46 = vsel %vm1138_vm4, %v1262_v12, %v3342_v39  ;;  %v867_v45 = vsel %vm846_vm2, %v864_v38, %v866_v20  ;;  %v3389_v38 = vcombine.low %v2289_v27, %v2289_v27  ;;  %v1556_v3 = vld [vmem:[%s3852_s3 + $0x60] sm:$0xff] }
  0x3f   :  { %v3329_v32 = vsel %vm1138_vm4, %v1235_v8, %v1244_v14  ;;  %v3340_v37 = vsel %vm1138_vm4, %v1244_v14, %v1253_v21  ;;  %v3346_v43 = vsel %vm1138_vm4, %v1253_v21, %v1262_v12  ;;  %v3376_v60 = vpack.c.bf16 %v219_v44, %v218_v50  ;;  %v1560_v8 = vld [vmem:[%s3852_s3 + $0x80] sm:$0xff] }
  0x40   :  { %v1283_v28 = vshrl.u32 %v3389_v38, 16  ;;  %v1286_v7 = vshll.u32 %v3389_v38, 16 }
  0x41   :  { %v1274_v13 = vshrl.u32 %v3376_v60, 16  ;;  %v1277_v14 = vshll.u32 %v3376_v60, 16 }
  0x42   :  { %2686 = vmatmul.mubr.msk.bf16.gmra.mrb[12].mxu0 %vm392_vm0, %v3251_v31  ;;  %v869_v31 = vsel %vm846_vm2, %v866_v20, %v868_v40  ;;  %v1285_v36 = vrot.slane %v1283_v28, 1  ;;  %v1288_v12 = vrot.slane %v1286_v7, 2 }
  0x43   :  { %2689 = vmatprep.mubr.msk.bf16.mxu0 %vm392_vm0, %v865_v16  ;;  %v1276_v23 = vrot.slane %v1274_v13, 1  ;;  %v1279_v16 = vrot.slane %v1277_v14, 2 }
  0x44   :  { %2630 = vmatmul.mubr.msk.bf16.gmra.mrb[28].mxu1 %vm392_vm0, %v379_v30  ;;  %v1568_v30 = vld [vmem:[%s3852_s3 + $0xc0] sm:$0xff] }
  0x45   :  { %2653 = vmatprep.mubr.msk.bf16.mxu1 %vm392_vm0, %v3035_v41  ;;  %v871_v41 = vsel %vm846_vm2, %v868_v40, %v870_v57  ;;  %v1280_v21 = vor.u32 %v1279_v16, %v1276_v23  ;;  %v1289_v40 = vor.u32 %v1288_v12, %v1285_v36 }
  0x47   :  { %v1281_v20 = vsel %vm1138_vm4, %v3342_v39, %v1280_v21  ;;  %v1571_v39 = vld [vmem:[%s3852_s3 + $0xd8] sm:$0xff]  ;;  %v1290_v27 = vsel %vm1138_vm4, %v1280_v21, %v1289_v40 }
  0x4a   :  { %2690 = vmatmul.mubr.msk.bf16.gmra.mrb[16].mxu0 %vm392_vm0, %v867_v45  ;;  %v1573_v45 = vld [vmem:[%s3852_s3 + $0xe8] sm:$0xff] }
  0x4b   :  { %2693 = vmatprep.mubr.msk.bf16.mxu0 %vm392_vm0, %v869_v31  ;;  %v1575_v31 = vld [vmem:[%s3852_s3 + $0xf8] sm:$0xff] }
  0x4c   :  { %2654 = vmatmul.mubr.msk.bf16.vlgmr.msra.gmra.mrb[16].mxu1 %vm392_vm0, %v3040_v42  ;;  %v876_v42 = vrot.slane %v3376_v60, 1 }
  0x4d   :  { %2742 = vmatpush3.msk.msra.mxu1 %vm1674_vm3, %v3162_v34  ;;  %2657 = vmatprep.mubr.msk.bf16.mxu1 %vm392_vm0, %v3074_v55  ;;  %v1143_v34 = vshll.u32 %v3055_v48, 16  ;;  %v875_v55 = vsel %vm846_vm2, %v872_v47, %v874_v56  ;;  %v878_v48 = vrot.slane %v3389_v38, 1 }
  0x4e   :  { %v877_v53 = vsel %vm846_vm2, %v874_v56, %v876_v42 }
  0x4f   :  { %v1145_v59 = vrot.slane %v1143_v34, 2 }
  0x51   :  { %v1146_v19 = vor.u32 %v1145_v59, %v1142_v54 }
  0x52   :  { %2694 = vmatmul.mubr.msk.bf16.gmra.mrb[20].mxu0 %vm392_vm0, %v871_v41 }
  0x53   :  { %2697 = vmatprep.mubr.msk.bf16.mxu0 %vm392_vm0, %v873_v35 }
  0x54   :  { %2658 = vmatmul.mubr.msk.bf16.gmra.mrb[20].mxu1 %vm392_vm0, %v3088_v62  ;;  %v879_v62 = vsel %vm846_vm2, %v876_v42, %v878_v48 }
  0x55   :  { %2661 = vmatprep.mubr.msk.bf16.mxu1 %vm392_vm0, %v3104_v6  ;;  %v1155_v6 = vsel %vm1138_vm4, %v1146_v19, %v3254_v49  ;;  %v1548_v49 = vld [vmem:[%s3852_s3 + $0x20] sm:$0xff] }
  0x5a   :  { %2698 = vmatmul.mubr.msk.bf16.gmra.mrb[24].mxu0 %vm392_vm0, %v875_v55 }
  0x5b   :  { %2701 = vmatprep.mubr.msk.bf16.mxu0 %vm392_vm0, %v877_v53 }
  0x5c   :  { %2662 = vmatmul.mubr.msk.bf16.gmra.mrb[24].mxu1 %vm392_vm0, %v3111_v9  ;;  %v1545_v9 = vld [vmem:[%s3852_s3 + $0x8] sm:$0xff] }
  0x5d   :  { %2665 = vmatprep.mubr.msk.bf16.mxu1 %vm392_vm0, %v3124_v17  ;;  %v1546_v17 = vld [vmem:[%s3852_s3 + $0x10] sm:$0xff] }
  0x62   :  { %2702 = vmatmul.mubr.msk.bf16.gmra.mrb[28].mxu0 %vm392_vm0, %v879_v62 }
  0x63   :  { %2709 = vmatprep.mubr.msk.bf16.mxu0 %vm392_vm0, %v1155_v6 }
  0x64   :  { %2666 = vmatmul.mubr.msk.bf16.gmra.mrb[28].mxu1 %vm392_vm0, %v3140_v25  ;;  %v1547_v25 = vld [vmem:[%s3852_s3 + $0x18] sm:$0xff] }
  0x65   :  { %2743 = vmatprep.mubr.msk.f32.mxu1 %vm1577_vm5, %v1544_v0 }
  0x6a   :  { %2710 = vmatmul.mubr.msk.bf16.vlgmr.msra.gmra.mrb[0].mxu0 %vm392_vm0, %v3266_v63  ;;  %v1549_v63 = vld [vmem:[%s3852_s3 + $0x28] sm:$0xff] }
  0x6b   :  { %2713 = vmatprep.mubr.msk.bf16.mxu0 %vm392_vm0, %v3270_v5  ;;  %v1550_v5 = vld [vmem:[%s3852_s3 + $0x30] sm:$0xff] }
  0x6c   :  { %2744 = vmatmul.mubr.msk.f32.vlgmr.msra.gmra.mrb[32].mxu1 %vm1577_vm5, %v1545_v9 }
  0x6d   :  { %2746 = vmatprep.mubr.msk.f32.mxu1 %vm1577_vm5, %v1546_v17 }
  0x70   :  { %2747 = vmatmul.mubr.msk.f32.gmra.mrb[34].mxu1 %vm1577_vm5, %v1547_v25 }
  0x71   :  { %2749 = vmatprep.mubr.msk.f32.mxu1 %vm1577_vm5, %v1548_v49 }
  0x72   :  { %2714 = vmatmul.mubr.msk.bf16.gmra.mrb[4].mxu0 %vm392_vm0, %v3277_v51  ;;  %v1551_v51 = vld [vmem:[%s3852_s3 + $0x38] sm:$0xff] }
  0x73   :  { %2717 = vmatprep.mubr.msk.bf16.mxu0 %vm392_vm0, %v3282_v29  ;;  %v1553_v29 = vld [vmem:[%s3852_s3 + $0x48] sm:$0xff] }
  0x74   :  { %2750 = vmatmul.mubr.msk.f32.gmra.mrb[36].mxu1 %vm1577_vm5, %v1549_v63 }
  0x75   :  { %2752 = vmatprep.mubr.msk.f32.mxu1 %vm1577_vm5, %v1550_v5 }
  0x78   :  { %2753 = vmatmul.mubr.msk.f32.gmra.mrb[38].mxu1 %vm1577_vm5, %v1551_v51 }
  0x79   :  { %2755 = vmatprep.mubr.msk.f32.mxu1 %vm1577_vm5, %v1552_v1 }
  0x7a   :  { %2718 = vmatmul.mubr.msk.bf16.gmra.mrb[8].mxu0 %vm392_vm0, %v3286_v26  ;;  %v1555_v26 = vld [vmem:[%s3852_s3 + $0x58] sm:$0xff] }
  0x7b   :  { %2721 = vmatprep.mubr.msk.bf16.mxu0 %vm392_vm0, %v3298_v58  ;;  %v1557_v58 = vld [vmem:[%s3852_s3 + $0x68] sm:$0xff] }
  0x7c   :  { %2756 = vmatmul.mubr.msk.f32.gmra.mrb[40].mxu1 %vm1577_vm5, %v1553_v29 }
  0x7d   :  { %2758 = vmatprep.mubr.msk.f32.mxu1 %vm1577_vm5, %v1554_v22 }
  0x80   :  { %2759 = vmatmul.mubr.msk.f32.gmra.mrb[42].mxu1 %vm1577_vm5, %v1555_v26 }
  0x81   :  { %2761 = vmatprep.mubr.msk.f32.mxu1 %vm1577_vm5, %v1556_v3 }
  0x82   :  { %2722 = vmatmul.mubr.msk.bf16.gmra.mrb[12].mxu0 %vm392_vm0, %v3306_v2  ;;  %v1559_v2 = vld [vmem:[%s3852_s3 + $0x78] sm:$0xff] }
  0x83   :  { %2725 = vmatprep.mubr.msk.bf16.mxu0 %vm392_vm0, %v3312_v10  ;;  %v1561_v10 = vld [vmem:[%s3852_s3 + $0x88] sm:$0xff] }
  0x84   :  { %2762 = vmatmul.mubr.msk.f32.gmra.mrb[44].mxu1 %vm1577_vm5, %v1557_v58 }
  0x85   :  { %2764 = vmatprep.mubr.msk.f32.mxu1 %vm1577_vm5, %v1558_v4 }
  0x88   :  { %2765 = vmatmul.mubr.msk.f32.gmra.mrb[46].mxu1 %vm1577_vm5, %v1559_v2 }
  0x89   :  { %2767 = vmatprep.mubr.msk.f32.mxu1 %vm1577_vm5, %v1560_v8 }
  0x8a   :  { %2726 = vmatmul.mubr.msk.bf16.gmra.mrb[16].mxu0 %vm392_vm0, %v3326_v24  ;;  %v1565_v24 = vld [vmem:[%s3852_s3 + $0xa8] sm:$0xff] }
  0x8b   :  { %2729 = vmatprep.mubr.msk.bf16.mxu0 %vm392_vm0, %v3329_v32  ;;  %v1566_v32 = vld [vmem:[%s3852_s3 + $0xb0] sm:$0xff] }
  0x8c   :  { %2768 = vmatmul.mubr.msk.f32.gmra.mrb[48].mxu1 %vm1577_vm5, %v1561_v10 }
  0x8d   :  { %2770 = vmatprep.mubr.msk.f32.mxu1 %vm1577_vm5, %v1562_v11 }
  0x90   :  { %2771 = vmatmul.mubr.msk.f32.gmra.mrb[50].mxu1 %vm1577_vm5, %v1563_v18 }
  0x91   :  { %2773 = vmatprep.mubr.msk.f32.mxu1 %vm1577_vm5, %v1564_v15 }
  0x92   :  { %2730 = vmatmul.mubr.msk.bf16.gmra.mrb[20].mxu0 %vm392_vm0, %v3340_v37  ;;  %v1569_v37 = vld [vmem:[%s3852_s3 + $0xc8] sm:$0xff] }
  0x93   :  { %2733 = vmatprep.mubr.msk.bf16.mxu0 %vm392_vm0, %v3346_v43  ;;  %v1570_v43 = vld [vmem:[%s3852_s3 + $0xd0] sm:$0xff] }
  0x94   :  { %2774 = vmatmul.mubr.msk.f32.gmra.mrb[52].mxu1 %vm1577_vm5, %v1565_v24 }
  0x95   :  { %2776 = vmatprep.mubr.msk.f32.mxu1 %vm1577_vm5, %v1566_v32 }
  0x98   :  { %2777 = vmatmul.mubr.msk.f32.gmra.mrb[54].mxu1 %vm1577_vm5, %v1567_v33 }
  0x99   :  { %2779 = vmatprep.mubr.msk.f32.mxu1 %vm1577_vm5, %v1568_v30 }
  0x9a   :  { %2734 = vmatmul.mubr.msk.bf16.gmra.mrb[24].mxu0 %vm392_vm0, %v3353_v46  ;;  %v1572_v46 = vld [vmem:[%s3852_s3 + $0xe0] sm:$0xff] }
  0x9b   :  { %2737 = vmatprep.mubr.msk.bf16.mxu0 %vm392_vm0, %v1281_v20 }
  0x9c   :  { %2780 = vmatmul.mubr.msk.f32.gmra.mrb[56].mxu1 %vm1577_vm5, %v1569_v37 }
  0x9d   :  { %2782 = vmatprep.mubr.msk.f32.mxu1 %vm1577_vm5, %v1570_v43 }
  0xa0   :  { %2783 = vmatmul.mubr.msk.f32.gmra.mrb[58].mxu1 %vm1577_vm5, %v1571_v39 }
  0xa1   :  { %2785 = vmatprep.mubr.msk.f32.mxu1 %vm1577_vm5, %v1572_v46 }
  0xa2   :  { %2738 = vmatmul.mubr.msk.bf16.gmra.mrb[28].mxu0 %vm392_vm0, %v1290_v27 }
  0xa4   :  { %2786 = vmatmul.mubr.msk.f32.gmra.mrb[60].mxu1 %vm1577_vm5, %v1573_v45 }
  0xa5   :  { %2788 = vmatprep.mubr.msk.f32.mxu1 %vm1577_vm5, %v1574_v52 }
  0xa8   :  { %2789 = vmatmul.mubr.msk.f32.gmra.mrb[62].mxu1 %vm1577_vm5, %v1575_v31 }
  0xdf   :  { %v2603_v57 = vpop.f32.mrb[0].mxu1 }
  0xe0   :  { %v475_v44 = vpop.f32.mrb[1].mxu1 }
  0xe1   :  { %v2604_v47 = vpop.f32.mrb[2].mxu1 }
  0xe2   :  { %v478_v50 = vpop.f32.mrb[3].mxu1 }
  0xe7   :  { %v2607_v41 = vpop.f32.mrb[4].mxu1 }
  0xe8   :  { %v3569_v35 = vpop.f32.mrb[5].mxu1 }
  0xe9   :  { %v3571_v60 = vpop.f32.mrb[6].mxu1 }
  0xea   :  { %v3573_v56 = vpop.f32.mrb[7].mxu1 }
  0xef   :  { %v3575_v42 = vpop.f32.mrb[8].mxu1 }
  0xf0   :  { %v3577_v61 = vpop.f32.mrb[9].mxu1 }
  0xf1   :  { %v3579_v34 = vpop.f32.mrb[10].mxu1 }
  0xf2   :  { %v3581_v55 = vpop.f32.mrb[11].mxu1 }
  0xf7   :  { %v3583_v38 = vpop.f32.mrb[12].mxu1 }
  0xf8   :  { %v3585_v53 = vpop.f32.mrb[13].mxu1 }
  0xf9   :  { %v3587_v54 = vpop.f32.mrb[14].mxu1 }
  0xfa   :  { %v3589_v59 = vpop.f32.mrb[15].mxu1 }
 0x11f   :  { %v3591_v48 = vpop.f32.mrb[16].mxu1 }
 0x120   :  { %v3593_v19 = vpop.f32.mrb[17].mxu1 }
 0x121   :  { %v3595_v62 = vpop.f32.mrb[18].mxu1 }
 0x122   :  { %v3597_v6 = vpop.f32.mrb[19].mxu1 }
 0x127   :  { %v3599_v0 = vpop.f32.mrb[20].mxu1 }
 0x128   :  { %v3601_v9 = vpop.f32.mrb[21].mxu1 }
 0x129   :  { %v3603_v17 = vpop.f32.mrb[22].mxu1 }
 0x12a   :  { %v3605_v25 = vpop.f32.mrb[23].mxu1 }
 0x12f   :  { %v3607_v49 = vpop.f32.mrb[24].mxu1 }
 0x130   :  { %v3609_v63 = vpop.f32.mrb[25].mxu1 }
 0x131   :  { %v3611_v5 = vpop.f32.mrb[26].mxu1 }
 0x132   :  { %v3613_v51 = vpop.f32.mrb[27].mxu1 }
 0x137   :  { %v3615_v1 = vpop.f32.mrb[28].mxu1 }
 0x138   :  { %v3617_v29 = vpop.f32.mrb[29].mxu1 }
 0x139   :  { %v3619_v22 = vpop.f32.mrb[30].mxu1 }
 0x13a   :  { %v3621_v26 = vpop.f32.mrb[31].mxu1 }
 0x13d   :  { %v2711_v3 = vpop.f32.mrb[0].mxu0 }
 0x13e   :  { %v2795_v58 = vadd.f32 %v2711_v3, %v2603_v57  ;;  %v1385_v4 = vpop.f32.mrb[1].mxu0 }
 0x13f   :  { %v2796_v2 = vadd.f32 %v1385_v4, %v475_v44  ;;  %v2712_v8 = vpop.f32.mrb[2].mxu0  ;;  %v2745_v18 = vpop.f32.mrb[32].mxu1 }
 0x140   :  { %v2462_v10 = vpack.c.bf16 %v2795_v58, %v2795_v58  ;;  %v2797_v11 = vadd.f32 %v2712_v8, %v2604_v47  ;;  %v1388_v13 = vpop.f32.mrb[3].mxu0  ;;  %v1744_v16 = vpop.f32.mrb[33].mxu1 }
 0x141   :  { %v2460_v14 = vpack.c.bf16 %v2796_v2, %v2796_v2  ;;  %v2798_v15 = vadd.f32 %v1388_v13, %v478_v50  ;;  %v1903_v7 = vmul.f32 %v2796_v2, %v1744_v16 }
 0x142   :  { %2240 = vst.msk [vmem:[%s3853_s5 + $0x8] sm:$0xf] %vm2237_vm6, %v2462_v10  ;;  %v2463_v23 = vpack.c.bf16 %v2797_v11, %v2797_v11 }
 0x143   :  { %2238 = vst.msk [vmem:[%s3853_s5] sm:$0xf] %vm2237_vm6, %v2460_v14  ;;  %v1904_v24 = vmul.f32 %v2798_v15, %v2745_v18  ;;  %v2461_v28 = vpack.c.bf16 %v2798_v15, %v2798_v15  ;;  %v1936_v21 = vsel %vm1935_vm7, %v1903_v7, 0.0  ;;  %v2007_v36 = vmul.f32 %v2796_v2, %v1903_v7  ;;  %v2748_v12 = vpop.f32.mrb[34].mxu1 }
 0x144   :  { %2241 = vst.msk [vmem:[%s3853_s5 + $0xc] sm:$0xf] %vm2237_vm6, %v2463_v23  ;;  %v1906_v37 = vmul.f32 %v2797_v11, %v2748_v12  ;;  %v1754_v40 = vpop.f32.mrb[35].mxu1 }
 0x145   :  { %v2008_v32 = vmul.f32 %v2798_v15, %v1904_v24  ;;  %2239 = vst.msk [vmem:[%s3853_s5 + $0x4] sm:$0xf] %vm2237_vm6, %v2461_v28  ;;  %v1937_v33 = vsel %vm1935_vm7, %v1904_v24, 0.0  ;;  %v2715_v30 = vpop.f32.mrb[4].mxu0  ;;  %v2039_v27 = vsel %vm1935_vm7, %v2007_v36, 0.0  ;;  %v1905_v45 = vmul.f32 %v2795_v58, %v1754_v40 }
 0x146   :  { %v1938_v20 = vadd.f32 %v1937_v33, %v1936_v21  ;;  %v2799_v43 = vadd.f32 %v2715_v30, %v2607_v41  ;;  %v1401_v39 = vpop.f32.mrb[5].mxu0  ;;  %v2010_v44 = vmul.f32 %v2797_v11, %v1906_v37  ;;  %v1941_v11 = vsel %vm1935_vm7, %v1906_v37, 0.0 }
 0x147   :  { %v2040_v46 = vsel %vm1935_vm7, %v2008_v32, 0.0  ;;  %v2800_v52 = vadd.f32 %v1401_v39, %v3569_v35  ;;  %v2716_v31 = vpop.f32.mrb[6].mxu0  ;;  %v1939_v3 = vsel %vm1935_vm7, %v1905_v45, 0.0  ;;  %v2009_v4 = vmul.f32 %v2795_v58, %v1905_v45  ;;  %v2751_v41 = vpop.f32.mrb[36].mxu1 }
 0x148   :  { %v2041_v57 = vadd.f32 %v2040_v46, %v2039_v27  ;;  %v2466_v47 = vpack.c.bf16 %v2799_v43, %v2799_v43  ;;  %v1404_v50 = vpop.f32.mrb[7].mxu0  ;;  %v2801_v8 = vadd.f32 %v2716_v31, %v3571_v60  ;;  %v1940_v10 = vadd.f32 %v1939_v3, %v1938_v20  ;;  %v1764_v13 = vpop.f32.mrb[37].mxu1 }
 0x149   :  { %v2464_v2 = vpack.c.bf16 %v2800_v52, %v2800_v52  ;;  %v2802_v35 = vadd.f32 %v1404_v50, %v3573_v56  ;;  %v2042_v14 = vsel %vm1935_vm7, %v2009_v4, 0.0  ;;  %v1907_v58 = vmul.f32 %v2800_v52, %v1764_v13 }
 0x14a   :  { %2244 = vst.msk [vmem:[%s3853_s5 + $0x18] sm:$0xf] %vm2237_vm6, %v2466_v47  ;;  %v2467_v60 = vpack.c.bf16 %v2801_v8, %v2801_v8  ;;  %v2043_v18 = vadd.f32 %v2042_v14, %v2041_v57  ;;  %v1942_v16 = vadd.f32 %v1941_v11, %v1940_v10  ;;  %v2044_v24 = vsel %vm1935_vm7, %v2010_v44, 0.0 }
 0x14b   :  { %2242 = vst.msk [vmem:[%s3853_s5 + $0x10] sm:$0xf] %vm2237_vm6, %v2464_v2  ;;  %v1908_v15 = vmul.f32 %v2802_v35, %v2751_v41  ;;  %v2465_v23 = vpack.c.bf16 %v2802_v35, %v2802_v35  ;;  %v1943_v56 = vsel %vm1935_vm7, %v1907_v58, 0.0  ;;  %v2011_v28 = vmul.f32 %v2800_v52, %v1907_v58  ;;  %v2754_v7 = vpop.f32.mrb[38].mxu1 }
 0x14c   :  { %2245 = vst.msk [vmem:[%s3853_s5 + $0x1c] sm:$0xf] %vm2237_vm6, %v2467_v60  ;;  %v1944_v33 = vadd.f32 %v1943_v56, %v1942_v16  ;;  %v2045_v36 = vadd.f32 %v2044_v24, %v2043_v18  ;;  %v1910_v12 = vmul.f32 %v2801_v8, %v2754_v7  ;;  %v1774_v30 = vpop.f32.mrb[39].mxu1 }
 0x14d   :  { %v2719_v32 = vpop.f32.mrb[8].mxu0  ;;  %v2012_v21 = vmul.f32 %v2802_v35, %v1908_v15  ;;  %2243 = vst.msk [vmem:[%s3853_s5 + $0x14] sm:$0xf] %vm2237_vm6, %v2465_v23  ;;  %v2046_v37 = vsel %vm1935_vm7, %v2011_v28, 0.0  ;;  %v1909_v40 = vmul.f32 %v2799_v43, %v1774_v30  ;;  %v1945_v39 = vsel %vm1935_vm7, %v1908_v15, 0.0 }
 0x14e   :  { %v1417_v20 = vpop.f32.mrb[9].mxu0  ;;  %v2803_v27 = vadd.f32 %v2719_v32, %v3575_v42  ;;  %v2047_v52 = vadd.f32 %v2046_v37, %v2045_v36  ;;  %v2014_v31 = vmul.f32 %v2801_v8, %v1910_v12  ;;  %v1946_v44 = vadd.f32 %v1945_v39, %v1944_v33 }
 0x14f   :  { %v2720_v46 = vpop.f32.mrb[10].mxu0  ;;  %v2048_v45 = vsel %vm1935_vm7, %v2012_v21, 0.0  ;;  %v2013_v47 = vmul.f32 %v2799_v43, %v1909_v40  ;;  %v2757_v3 = vpop.f32.mrb[40].mxu1  ;;  %v1947_v4 = vsel %vm1935_vm7, %v1909_v40, 0.0  ;;  %v2804_v41 = vadd.f32 %v1417_v20, %v3577_v61 }
 0x150   :  { %v1420_v57 = vpop.f32.mrb[11].mxu0  ;;  %v2470_v50 = vpack.c.bf16 %v2803_v27, %v2803_v27  ;;  %v2049_v2 = vadd.f32 %v2048_v45, %v2047_v52  ;;  %v2805_v10 = vadd.f32 %v2720_v46, %v3579_v34  ;;  %v1784_v35 = vpop.f32.mrb[41].mxu1  ;;  %v1949_v42 = vsel %vm1935_vm7, %v1910_v12, 0.0 }
 0x151   :  { %v1948_v13 = vadd.f32 %v1947_v4, %v1946_v44  ;;  %v2050_v11 = vsel %vm1935_vm7, %v2013_v47, 0.0  ;;  %v2806_v43 = vadd.f32 %v1420_v57, %v3581_v55  ;;  %v2468_v14 = vpack.c.bf16 %v2804_v41, %v2804_v41 }
 0x152   :  { %2248 = vst.msk [vmem:[%s3853_s5 + $0x28] sm:$0xf] %vm2237_vm6, %v2470_v50  ;;  %v2051_v8 = vadd.f32 %v2050_v11, %v2049_v2  ;;  %v2471_v60 = vpack.c.bf16 %v2805_v10, %v2805_v10  ;;  %v1911_v58 = vmul.f32 %v2804_v41, %v1784_v35  ;;  %v2052_v61 = vsel %vm1935_vm7, %v2014_v31, 0.0 }
 0x153   :  { %v1912_v34 = vmul.f32 %v2806_v43, %v2757_v3  ;;  %v2469_v18 = vpack.c.bf16 %v2806_v43, %v2806_v43  ;;  %v1950_v15 = vadd.f32 %v1949_v42, %v1948_v13  ;;  %v2760_v23 = vpop.f32.mrb[42].mxu1  ;;  %2246 = vst.msk [vmem:[%s3853_s5 + $0x20] sm:$0xf] %vm2237_vm6, %v2468_v14 }
 0x154   :  { %2249 = vst.msk [vmem:[%s3853_s5 + $0x2c] sm:$0xf] %vm2237_vm6, %v2471_v60  ;;  %v1951_v55 = vsel %vm1935_vm7, %v1911_v58, 0.0  ;;  %v2015_v24 = vmul.f32 %v2804_v41, %v1911_v58  ;;  %v2053_v56 = vadd.f32 %v2052_v61, %v2051_v8  ;;  %v1914_v28 = vmul.f32 %v2805_v10, %v2760_v23  ;;  %v1794_v7 = vpop.f32.mrb[43].mxu1 }
 0x155   :  { %v2723_v16 = vpop.f32.mrb[12].mxu0  ;;  %v2016_v21 = vmul.f32 %v2806_v43, %v1912_v34  ;;  %2247 = vst.msk [vmem:[%s3853_s5 + $0x24] sm:$0xf] %vm2237_vm6, %v2469_v18  ;;  %v1952_v33 = vadd.f32 %v1951_v55, %v1950_v15  ;;  %v1913_v36 = vmul.f32 %v2803_v27, %v1794_v7  ;;  %v1953_v12 = vsel %vm1935_vm7, %v1912_v34, 0.0 }
 0x156   :  { %v1433_v32 = vpop.f32.mrb[13].mxu0  ;;  %v2054_v20 = vsel %vm1935_vm7, %v2015_v24, 0.0  ;;  %v2018_v37 = vmul.f32 %v2805_v10, %v1914_v28  ;;  %v2807_v40 = vadd.f32 %v2723_v16, %v3583_v38  ;;  %v1957_v52 = vsel %vm1935_vm7, %v1914_v28, 0.0 }
 0x157   :  { %v2724_v30 = vpop.f32.mrb[14].mxu0  ;;  %v2056_v46 = vsel %vm1935_vm7, %v2016_v21, 0.0  ;;  %v2055_v45 = vadd.f32 %v2054_v20, %v2053_v56  ;;  %v1954_v31 = vadd.f32 %v1953_v12, %v1952_v33  ;;  %v2763_v57 = vpop.f32.mrb[44].mxu1  ;;  %v1955_v44 = vsel %vm1935_vm7, %v1913_v36, 0.0 }
 0x158   :  { %v1436_v39 = vpop.f32.mrb[15].mxu0  ;;  %v2017_v47 = vmul.f32 %v2803_v27, %v1913_v36  ;;  %v2474_v50 = vpack.c.bf16 %v2807_v40, %v2807_v40  ;;  %v2808_v3 = vadd.f32 %v1433_v32, %v3585_v53  ;;  %v1804_v4 = vpop.f32.mrb[45].mxu1  ;;  %v2809_v10 = vadd.f32 %v2724_v30, %v3587_v54 }
 0x159   :  { %v1956_v2 = vadd.f32 %v1955_v44, %v1954_v31  ;;  %v2057_v41 = vadd.f32 %v2056_v46, %v2055_v45  ;;  %v2810_v38 = vadd.f32 %v1436_v39, %v3589_v59  ;;  %v2060_v35 = vsel %vm1935_vm7, %v2018_v37, 0.0 }
 0x15a   :  { %v2058_v42 = vsel %vm1935_vm7, %v2017_v47, 0.0  ;;  %2252 = vst.msk [vmem:[%s3853_s5 + $0x38] sm:$0xf] %vm2237_vm6, %v2474_v50  ;;  %v2472_v27 = vpack.c.bf16 %v2808_v3, %v2808_v3  ;;  %v1915_v13 = vmul.f32 %v2808_v3, %v1804_v4  ;;  %v2475_v53 = vpack.c.bf16 %v2809_v10, %v2809_v10 }
 0x15b   :  { %v2059_v11 = vadd.f32 %v2058_v42, %v2057_v41  ;;  %v1916_v43 = vmul.f32 %v2810_v38, %v2763_v57  ;;  %v2473_v8 = vpack.c.bf16 %v2810_v38, %v2810_v38  ;;  %v2766_v14 = vpop.f32.mrb[46].mxu1  ;;  %v1958_v54 = vadd.f32 %v1957_v52, %v1956_v2 }
 0x15c   :  { %2250 = vst.msk [vmem:[%s3853_s5 + $0x30] sm:$0xf] %vm2237_vm6, %v2472_v27  ;;  %v1959_v59 = vsel %vm1935_vm7, %v1915_v13, 0.0  ;;  %v2019_v58 = vmul.f32 %v2808_v3, %v1915_v13  ;;  %v1918_v61 = vmul.f32 %v2809_v10, %v2766_v14  ;;  %v1814_v34 = vpop.f32.mrb[47].mxu1  ;;  %2253 = vst.msk [vmem:[%s3853_s5 + $0x3c] sm:$0xf] %vm2237_vm6, %v2475_v53 }
 0x15d   :  { %v2727_v60 = vpop.f32.mrb[16].mxu0  ;;  %v2020_v15 = vmul.f32 %v2810_v38, %v1916_v43  ;;  %2251 = vst.msk [vmem:[%s3853_s5 + $0x34] sm:$0xf] %vm2237_vm6, %v2473_v8  ;;  %v2061_v23 = vadd.f32 %v2060_v35, %v2059_v11  ;;  %v1917_v16 = vmul.f32 %v2807_v40, %v1814_v34  ;;  %v1961_v55 = vsel %vm1935_vm7, %v1916_v43, 0.0 }
 0x15e   :  { %v1449_v18 = vpop.f32.mrb[17].mxu0  ;;  %v1960_v56 = vadd.f32 %v1959_v59, %v1958_v54  ;;  %v2062_v28 = vsel %vm1935_vm7, %v2019_v58, 0.0  ;;  %v1965_v7 = vsel %vm1935_vm7, %v1918_v61, 0.0  ;;  %v2022_v32 = vmul.f32 %v2809_v10, %v1918_v61 }
 0x15f   :  { %v2728_v24 = vpop.f32.mrb[18].mxu0  ;;  %v2064_v33 = vsel %vm1935_vm7, %v2020_v15, 0.0  ;;  %v2063_v36 = vadd.f32 %v2062_v28, %v2061_v23  ;;  %v1963_v12 = vsel %vm1935_vm7, %v1917_v16, 0.0  ;;  %v2021_v30 = vmul.f32 %v2807_v40, %v1917_v16  ;;  %v2769_v20 = vpop.f32.mrb[48].mxu1 }
 0x160   :  { %v1452_v21 = vpop.f32.mrb[19].mxu0  ;;  %v2068_v37 = vsel %vm1935_vm7, %v2022_v32, 0.0  ;;  %v1962_v39 = vadd.f32 %v1961_v55, %v1960_v56  ;;  %v2811_v46 = vadd.f32 %v2727_v60, %v3591_v48  ;;  %v2812_v45 = vadd.f32 %v1449_v18, %v3593_v19  ;;  %v1824_v52 = vpop.f32.mrb[49].mxu1 }
 0x161   :  { %v2065_v31 = vadd.f32 %v2064_v33, %v2063_v36  ;;  %v2066_v57 = vsel %vm1935_vm7, %v2021_v30, 0.0  ;;  %v2813_v44 = vadd.f32 %v2728_v24, %v3595_v62  ;;  %v2814_v47 = vadd.f32 %v1452_v21, %v3597_v6 }
 0x162   :  { %v1964_v50 = vadd.f32 %v1963_v12, %v1962_v39  ;;  %v2478_v3 = vpack.c.bf16 %v2811_v46, %v2811_v46  ;;  %v2476_v4 = vpack.c.bf16 %v2812_v45, %v2812_v45  ;;  %v1919_v40 = vmul.f32 %v2812_v45, %v1824_v52 }
 0x163   :  { %v2067_v2 = vadd.f32 %v2066_v57, %v2065_v31  ;;  %v2479_v41 = vpack.c.bf16 %v2813_v44, %v2813_v44  ;;  %v1920_v10 = vmul.f32 %v2814_v47, %v2769_v20  ;;  %v2477_v38 = vpack.c.bf16 %v2814_v47, %v2814_v47  ;;  %v2772_v35 = vpop.f32.mrb[50].mxu1 }
 0x164   :  { %2256 = vst.msk [vmem:[%s3853_s5 + $0x48] sm:$0xf] %vm2237_vm6, %v2478_v3  ;;  %2254 = vst.msk [vmem:[%s3853_s5 + $0x40] sm:$0xf] %vm2237_vm6, %v2476_v4  ;;  %v1966_v19 = vadd.f32 %v1965_v7, %v1964_v50  ;;  %v1967_v62 = vsel %vm1935_vm7, %v1919_v40, 0.0  ;;  %v2023_v6 = vmul.f32 %v2812_v45, %v1919_v40  ;;  %v1922_v42 = vmul.f32 %v2813_v44, %v2772_v35  ;;  %v1834_v27 = vpop.f32.mrb[51].mxu1 }
 0x165   :  { %v2731_v48 = vpop.f32.mrb[20].mxu0  ;;  %2257 = vst.msk [vmem:[%s3853_s5 + $0x4c] sm:$0xf] %vm2237_vm6, %v2479_v41  ;;  %v2024_v11 = vmul.f32 %v2814_v47, %v1920_v10  ;;  %2255 = vst.msk [vmem:[%s3853_s5 + $0x44] sm:$0xf] %vm2237_vm6, %v2477_v38  ;;  %v2069_v53 = vadd.f32 %v2068_v37, %v2067_v2  ;;  %v1921_v43 = vmul.f32 %v2811_v46, %v1834_v27  ;;  %v1969_v8 = vsel %vm1935_vm7, %v1920_v10, 0.0 }
 0x166   :  { %v1465_v13 = vpop.f32.mrb[21].mxu0  ;;  %v1968_v60 = vadd.f32 %v1967_v62, %v1966_v19  ;;  %v2070_v54 = vsel %vm1935_vm7, %v2023_v6, 0.0  ;;  %v1973_v59 = vsel %vm1935_vm7, %v1922_v42, 0.0  ;;  %v2026_v58 = vmul.f32 %v2813_v44, %v1922_v42 }
 0x167   :  { %v2732_v14 = vpop.f32.mrb[22].mxu0  ;;  %v2072_v34 = vsel %vm1935_vm7, %v2024_v11, 0.0  ;;  %v2071_v18 = vadd.f32 %v2070_v54, %v2069_v53  ;;  %v1971_v15 = vsel %vm1935_vm7, %v1921_v43, 0.0  ;;  %v2025_v23 = vmul.f32 %v2811_v46, %v1921_v43  ;;  %v2775_v16 = vpop.f32.mrb[52].mxu1 }
 0x168   :  { %v1468_v61 = vpop.f32.mrb[23].mxu0  ;;  %v2076_v55 = vsel %vm1935_vm7, %v2026_v58, 0.0  ;;  %v1970_v24 = vadd.f32 %v1969_v8, %v1968_v60  ;;  %v2815_v56 = vadd.f32 %v2731_v48, %v3599_v0  ;;  %v2816_v28 = vadd.f32 %v1465_v13, %v3601_v9  ;;  %v1844_v7 = vpop.f32.mrb[53].mxu1 }
 0x169   :  { %v2073_v32 = vadd.f32 %v2072_v34, %v2071_v18  ;;  %v2074_v21 = vsel %vm1935_vm7, %v2025_v23, 0.0  ;;  %v2817_v33 = vadd.f32 %v2732_v14, %v3603_v17  ;;  %v2818_v36 = vadd.f32 %v1468_v61, %v3605_v25 }
 0x16a   :  { %v1972_v12 = vadd.f32 %v1971_v15, %v1970_v24  ;;  %v2482_v30 = vpack.c.bf16 %v2815_v56, %v2815_v56  ;;  %v2480_v20 = vpack.c.bf16 %v2816_v28, %v2816_v28  ;;  %v1923_v37 = vmul.f32 %v2816_v28, %v1844_v7 }
 0x16b   :  { %v2075_v39 = vadd.f32 %v2074_v21, %v2073_v32  ;;  %v2483_v46 = vpack.c.bf16 %v2817_v33, %v2817_v33  ;;  %v1924_v45 = vmul.f32 %v2818_v36, %v2775_v16  ;;  %v2481_v52 = vpack.c.bf16 %v2818_v36, %v2818_v36  ;;  %v2778_v31 = vpop.f32.mrb[54].mxu1 }
 0x16c   :  { %2260 = vst.msk [vmem:[%s3853_s5 + $0x58] sm:$0xf] %vm2237_vm6, %v2482_v30  ;;  %2258 = vst.msk [vmem:[%s3853_s5 + $0x50] sm:$0xf] %vm2237_vm6, %v2480_v20  ;;  %v1974_v9 = vadd.f32 %v1973_v59, %v1972_v12  ;;  %v1975_v17 = vsel %vm1935_vm7, %v1923_v37, 0.0  ;;  %v2027_v25 = vmul.f32 %v2816_v28, %v1923_v37  ;;  %v1926_v57 = vmul.f32 %v2817_v33, %v2778_v31  ;;  %v1854_v44 = vpop.f32.mrb[55].mxu1 }
 0x16d   :  { %v2735_v0 = vpop.f32.mrb[24].mxu0  ;;  %2261 = vst.msk [vmem:[%s3853_s5 + $0x5c] sm:$0xf] %vm2237_vm6, %v2483_v46  ;;  %v2028_v50 = vmul.f32 %v2818_v36, %v1924_v45  ;;  %2259 = vst.msk [vmem:[%s3853_s5 + $0x54] sm:$0xf] %vm2237_vm6, %v2481_v52  ;;  %v2077_v3 = vadd.f32 %v2076_v55, %v2075_v39  ;;  %v1925_v4 = vmul.f32 %v2815_v56, %v1854_v44  ;;  %v1977_v40 = vsel %vm1935_vm7, %v1924_v45, 0.0 }
 0x16e   :  { %v1481_v47 = vpop.f32.mrb[25].mxu0  ;;  %v1976_v41 = vadd.f32 %v1975_v17, %v1974_v9  ;;  %v2078_v10 = vsel %vm1935_vm7, %v2027_v25, 0.0  ;;  %v1981_v38 = vsel %vm1935_vm7, %v1926_v57, 0.0  ;;  %v2030_v35 = vmul.f32 %v2817_v33, %v1926_v57 }
 0x16f   :  { %v2736_v2 = vpop.f32.mrb[26].mxu0  ;;  %v2080_v19 = vsel %vm1935_vm7, %v2028_v50, 0.0  ;;  %v2079_v62 = vadd.f32 %v2078_v10, %v2077_v3  ;;  %v1979_v6 = vsel %vm1935_vm7, %v1925_v4, 0.0  ;;  %v2029_v42 = vmul.f32 %v2815_v56, %v1925_v4  ;;  %v2781_v27 = vpop.f32.mrb[56].mxu1 }
 0x170   :  { %v1484_v48 = vpop.f32.mrb[27].mxu0  ;;  %v2084_v13 = vsel %vm1935_vm7, %v2030_v35, 0.0  ;;  %v1978_v11 = vadd.f32 %v1977_v40, %v1976_v41  ;;  %v2819_v53 = vadd.f32 %v2735_v0, %v3607_v49  ;;  %v2820_v43 = vadd.f32 %v1481_v47, %v3609_v63  ;;  %v1864_v8 = vpop.f32.mrb[57].mxu1 }
 0x171   :  { %v2081_v14 = vadd.f32 %v2080_v19, %v2079_v62  ;;  %v2082_v60 = vsel %vm1935_vm7, %v2029_v42, 0.0  ;;  %v2821_v54 = vadd.f32 %v2736_v2, %v3611_v5  ;;  %v2822_v59 = vadd.f32 %v1484_v48, %v3613_v51 }
 0x172   :  { %v1980_v58 = vadd.f32 %v1979_v6, %v1978_v11  ;;  %v2486_v61 = vpack.c.bf16 %v2819_v53, %v2819_v53  ;;  %v2484_v34 = vpack.c.bf16 %v2820_v43, %v2820_v43  ;;  %v1927_v18 = vmul.f32 %v2820_v43, %v1864_v8 }
 0x173   :  { %v2083_v15 = vadd.f32 %v2082_v60, %v2081_v14  ;;  %v2487_v23 = vpack.c.bf16 %v2821_v54, %v2821_v54  ;;  %v1928_v16 = vmul.f32 %v2822_v59, %v2781_v27  ;;  %v2485_v55 = vpack.c.bf16 %v2822_v59, %v2822_v59  ;;  %v2784_v24 = vpop.f32.mrb[58].mxu1 }
 0x174   :  { %2264 = vst.msk [vmem:[%s3853_s5 + $0x68] sm:$0xf] %vm2237_vm6, %v2486_v61  ;;  %2262 = vst.msk [vmem:[%s3853_s5 + $0x60] sm:$0xf] %vm2237_vm6, %v2484_v34  ;;  %v1982_v63 = vadd.f32 %v1981_v38, %v1980_v58  ;;  %v1983_v5 = vsel %vm1935_vm7, %v1927_v18, 0.0  ;;  %v2031_v51 = vmul.f32 %v2820_v43, %v1927_v18  ;;  %v1930_v56 = vmul.f32 %v2821_v54, %v2784_v24  ;;  %v1874_v28 = vpop.f32.mrb[59].mxu1 }
 0x175   :  { %v2739_v49 = vpop.f32.mrb[28].mxu0  ;;  %2265 = vst.msk [vmem:[%s3853_s5 + $0x6c] sm:$0xf] %vm2237_vm6, %v2487_v23  ;;  %v2032_v32 = vmul.f32 %v2822_v59, %v1928_v16  ;;  %2263 = vst.msk [vmem:[%s3853_s5 + $0x64] sm:$0xf] %vm2237_vm6, %v2485_v55  ;;  %v2085_v21 = vadd.f32 %v2084_v13, %v2083_v15  ;;  %v1929_v33 = vmul.f32 %v2819_v53, %v1874_v28  ;;  %v1985_v36 = vsel %vm1935_vm7, %v1928_v16, 0.0 }
 0x176   :  { %v1497_v7 = vpop.f32.mrb[29].mxu0  ;;  %v1984_v30 = vadd.f32 %v1983_v5, %v1982_v63  ;;  %v2086_v20 = vsel %vm1935_vm7, %v2031_v51, 0.0  ;;  %v1989_v37 = vsel %vm1935_vm7, %v1930_v56, 0.0  ;;  %v2034_v39 = vmul.f32 %v2821_v54, %v1930_v56 }
 0x177   :  { %v2740_v12 = vpop.f32.mrb[30].mxu0  ;;  %v2088_v45 = vsel %vm1935_vm7, %v2032_v32, 0.0  ;;  %v2087_v52 = vadd.f32 %v2086_v20, %v2085_v21  ;;  %v1987_v31 = vsel %vm1935_vm7, %v1929_v33, 0.0  ;;  %v2033_v0 = vmul.f32 %v2819_v53, %v1929_v33  ;;  %v2787_v9 = vpop.f32.mrb[60].mxu1 }
 0x178   :  { %v1500_v46 = vpop.f32.mrb[31].mxu0  ;;  %v2092_v17 = vsel %vm1935_vm7, %v2034_v39, 0.0  ;;  %v1986_v25 = vadd.f32 %v1985_v36, %v1984_v30  ;;  %v2823_v57 = vadd.f32 %v2739_v49, %v3615_v1  ;;  %v2824_v44 = vadd.f32 %v1497_v7, %v3617_v29  ;;  %v1884_v47 = vpop.f32.mrb[61].mxu1 }
 0x179   :  { %v2089_v50 = vadd.f32 %v2088_v45, %v2087_v52  ;;  %v2090_v3 = vsel %vm1935_vm7, %v2033_v0, 0.0  ;;  %v2825_v4 = vadd.f32 %v2740_v12, %v3619_v22  ;;  %v2826_v40 = vadd.f32 %v1500_v46, %v3621_v26 }
 0x17a   :  { %v1988_v2 = vadd.f32 %v1987_v31, %v1986_v25  ;;  %v2490_v41 = vpack.c.bf16 %v2823_v57, %v2823_v57  ;;  %v2488_v10 = vpack.c.bf16 %v2824_v44, %v2824_v44  ;;  %v1931_v38 = vmul.f32 %v2824_v44, %v1884_v47 }
 0x17b   :  { %v2091_v35 = vadd.f32 %v2090_v3, %v2089_v50  ;;  %v2491_v48 = vpack.c.bf16 %v2825_v4, %v2825_v4  ;;  %v1932_v19 = vmul.f32 %v2826_v40, %v2787_v9  ;;  %v2489_v62 = vpack.c.bf16 %v2826_v40, %v2826_v40  ;;  %v2790_v6 = vpop.f32.mrb[62].mxu1 }
 0x17c   :  { %2268 = vst.msk [vmem:[%s3853_s5 + $0x78] sm:$0xf] %vm2237_vm6, %v2490_v41  ;;  %2266 = vst.msk [vmem:[%s3853_s5 + $0x70] sm:$0xf] %vm2237_vm6, %v2488_v10  ;;  %v1990_v1 = vadd.f32 %v1989_v37, %v1988_v2  ;;  %v1991_v29 = vsel %vm1935_vm7, %v1931_v38, 0.0  ;;  %v2035_v22 = vmul.f32 %v2824_v44, %v1931_v38  ;;  %v1934_v26 = vmul.f32 %v2825_v4, %v2790_v6  ;;  %v1894_v42 = vpop.f32.mrb[63].mxu1 }
 0x17d   :  { %2269 = vst.msk [vmem:[%s3853_s5 + $0x7c] sm:$0xf] %vm2237_vm6, %v2491_v48  ;;  %v2036_v27 = vmul.f32 %v2826_v40, %v1932_v19  ;;  %2267 = vst.msk [vmem:[%s3853_s5 + $0x74] sm:$0xf] %vm2237_vm6, %v2489_v62  ;;  %v2093_v13 = vadd.f32 %v2092_v17, %v2091_v35  ;;  %v1933_v11 = vmul.f32 %v2823_v57, %v1894_v42  ;;  %v1993_v53 = vsel %vm1935_vm7, %v1932_v19, 0.0 }
 0x17e   :  { %v1992_v43 = vadd.f32 %v1991_v29, %v1990_v1  ;;  %v2094_v8 = vsel %vm1935_vm7, %v2035_v22, 0.0  ;;  %v2038_v14 = vmul.f32 %v2825_v4, %v1934_v26  ;;  %v1997_v23 = vsel %vm1935_vm7, %v1934_v26, 0.0 }
 0x17f   :  { %v2096_v60 = vsel %vm1935_vm7, %v2036_v27, 0.0  ;;  %v2095_v54 = vadd.f32 %v2094_v8, %v2093_v13  ;;  %v2037_v59 = vmul.f32 %v2823_v57, %v1933_v11  ;;  %v1995_v61 = vsel %vm1935_vm7, %v1933_v11, 0.0 }
 0x180   :  { %v1994_v58 = vadd.f32 %v1993_v53, %v1992_v43  ;;  %v2100_v55 = vsel %vm1935_vm7, %v2038_v14, 0.0 }
 0x181   :  { %v2097_v34 = vadd.f32 %v2096_v60, %v2095_v54  ;;  %v2098_v15 = vsel %vm1935_vm7, %v2037_v59, 0.0 }
 0x182   :  { %v1996_v18 = vadd.f32 %v1995_v61, %v1994_v58 }
 0x183   :  { %v2099_v16 = vadd.f32 %v2098_v15, %v2097_v34 }
 0x184   :  { %v1998_v24 = vadd.f32 %v1997_v23, %v1996_v18 }
 0x185   :  { %v2101_v49 = vadd.f32 %v2100_v55, %v2099_v16 }
 0x186   :  { %v1999_v63 = vrot.slane %v1998_v24, 4 }
 0x187   :  { %v2102_v5 = vrot.slane %v2101_v49, 4 }
 0x188   :  { %v2000_v51 = vadd.f32 %v1999_v63, %v1998_v24 }
 0x189   :  { %v2103_v56 = vadd.f32 %v2102_v5, %v2101_v49 }
 0x18a   :  { %v2001_v28 = vrot.slane %v2000_v51, 2 }
 0x18b   :  { %v2104_v7 = vrot.slane %v2103_v56, 2 }
 0x18c   :  { %v2002_v32 = vadd.f32 %v2001_v28, %v2000_v51 }
 0x18d   :  { %v2105_v21 = vadd.f32 %v2104_v7, %v2103_v56 }
 0x18e   :  { %v2003_v33 = vrot.slane %v2002_v32, 1 }
 0x18f   :  { %v2106_v36 = vrot.slane %v2105_v21, 1 }
 0x190   :  { %v2004_v12 = vadd.f32 %v2003_v33, %v2002_v32 }
 0x191   :  { %v2107_v30 = vadd.f32 %v2106_v36, %v2105_v21 }
 0x192   :  { %2006 = vst.msk [vmem:[%s3854_s6] sm:$0x1] %vm2005_vm8, %v2004_v12 }
 0x193   :  { %2108 = vst.msk [vmem:[%s3855_s7] sm:$0x1] %vm2005_vm8, %v2107_v30 }

// kernel: tile.78
= control target key start
LH: loop header
LB: loop body
LE: loop exit
PB: predicated region body
PF: predicated region fallthrough
CT: control target
= control target key end

     0   :  { %s22_s0 = inlined_call_operand.vmem [shape: f32[8], index: 0, kind: input, shape index: {}]   ;;  %s23_s1 = inlined_call_operand.vmem [shape: f32[4,8], index: 1, kind: output, shape index: {}]  }
   0x1   :  { %v4_v0 = vld [vmem:[%s22_s0] ss:$0 sm:$0xff] }
   0x2   :  { %5 = vst [vmem:[%s23_s1] sm:$0xf] %v4_v0 }

// kernel: generator_forward.16
= control target key start
LH: loop header
LB: loop body
LE: loop exit
PB: predicated region body
PF: predicated region fallthrough
CT: control target
= control target key end

     0   :  { %s1126_s12 = smov 0   ;;  %s1128_s13 = smov 0   ;;  %s1396_s0 = inlined_call_operand.vmem [shape: bf16[768,32], index: 0, kind: input, shape index: {}]   ;;  %s1397_s1 = inlined_call_operand.vmem [shape: f32[1,32], index: 1, kind: input, shape index: {}]   ;;  %s1398_s2 = inlined_call_operand.vmem [shape: f32[1,32], index: 2, kind: input, shape index: {}]   ;;  %s1399_s3 = inlined_call_operand.vmem [shape: bf16[768,32], index: 3, kind: output, shape index: {}]  }
   0x1   :  { %s1130_s14 = smov 0  }
   0x2 LB: > { %s25_s15 = sadd.s32 1, %s1100_s13  ;;  %p836_p0 = scmp.ge.s32.totalorder %s1104_s14, 1  ;;  %s1104_s14 = sphi %s1130_s14, %s13_s14   ;;  %s1100_s13 = sphi %s1128_s13, %s1401_s13   ;;  %s1096_s12 = sphi %s1126_s12, %s1400_s12  }
   0x3   : > { %p27_p1 = scmp.ge.s32.totalorder %s25_s15, 2  ;;  %p173_p2 = scmp.lt.s32.totalorder %s1104_s14, 3 }
   0x5   : > { %s1403_s15 = smov (%p27_p1, %s25_s15), 0  ;;  %p174_p3 = pnand %p836_p0, %p173_p2 }
   0x6   : > { %s209_s16 = smul.u32 (!%p174_p3), 48, %s1096_s12  ;;  %v1157_v0 = vld [vmem:[%s1397_s1] ss:$0 sm:$0xff] (!%p174_p3)  ;;  %vm679_vm0 = vcmask (!%p174_p3), 257024  }
   0x7   : > { %177 = sbr.rel (%p174_p3) target bundleno = 82 (0x52), region = 32  ;;  %v1166_v9 = vld [vmem:[%s1398_s2] ss:$0 sm:$0xff] (!%p174_p3) }
   0x8   : > { %p210_p4 = scmp.lt.s32.totalorder (!%p174_p3), %s209_s16, 95 }
   0xe   : > { %s1405_s16 = smov (!%p210_p4, %s209_s16), 95 }
   0xf   : > { %s837_s17 = sshll.u32 %s1405_s16, 2 }
  0x10   : > { %s1152_s20 = scalar_lea.vmem %s1396_s0, %s837_s17  ;;  %s1189_s27 = scalar_lea.vmem %s1399_s3, %s837_s17 }
  0x11   : > { %v940_v1 = vld [vmem:[%s1152_s20] sm:$0xff]   ;;  %v1035_v2 = vld [vmem:[%s1152_s20 + $0x8] sm:$0xff]   ;;  %v1036_v3 = vld [vmem:[%s1152_s20 + $0x10] sm:$0xff]  }
  0x12   : > { %v941_v4 = vunpack.c.l.bf16 %v940_v1  ;;  %v942_v5 = vunpack.c.h.bf16 %v940_v1  ;;  %v945_v6 = vunpack.c.l.bf16 %v1035_v2  ;;  %v946_v7 = vunpack.c.h.bf16 %v1035_v2  ;;  %v1037_v8 = vld [vmem:[%s1152_s20 + $0x18] sm:$0xff]   ;;  %v1038_v38 = vld [vmem:[%s1152_s20 + $0x20] sm:$0xff]   ;;  %v1039_v39 = vld [vmem:[%s1152_s20 + $0x28] sm:$0xff]  }
  0x13   : > { %v949_v10 = vunpack.c.l.bf16 %v1036_v3  ;;  %v950_v11 = vunpack.c.h.bf16 %v1036_v3  ;;  %v953_v12 = vunpack.c.l.bf16 %v1037_v8  ;;  %v954_v13 = vunpack.c.h.bf16 %v1037_v8  ;;  %v1040_v44 = vld [vmem:[%s1152_s20 + $0x30] sm:$0xff]   ;;  %v1041_v45 = vld [vmem:[%s1152_s20 + $0x38] sm:$0xff]  }
  0x14   : > { %v336_v14 = vmul.f32 %v941_v4, %v1157_v0  ;;  %v337_v15 = vmul.f32 %v942_v5, %v1157_v0  ;;  %v338_v16 = vmul.f32 %v945_v6, %v1157_v0  ;;  %v339_v17 = vmul.f32 %v946_v7, %v1157_v0 }
  0x15   : > { %v340_v18 = vmul.f32 %v949_v10, %v1157_v0  ;;  %v341_v19 = vmul.f32 %v950_v11, %v1157_v0  ;;  %v342_v20 = vmul.f32 %v953_v12, %v1157_v0  ;;  %v343_v21 = vmul.f32 %v954_v13, %v1157_v0 }
  0x16   : > { %v391_v22 = vadd.f32 %v1166_v9, %v336_v14  ;;  %v392_v23 = vadd.f32 %v1166_v9, %v337_v15  ;;  %v393_v24 = vadd.f32 %v1166_v9, %v338_v16  ;;  %v394_v25 = vadd.f32 %v1166_v9, %v339_v17 }
  0x17   : > { %v395_v26 = vadd.f32 %v1166_v9, %v340_v18  ;;  %v396_v27 = vadd.f32 %v1166_v9, %v341_v19  ;;  %v397_v28 = vadd.f32 %v1166_v9, %v342_v20  ;;  %v398_v29 = vadd.f32 %v1166_v9, %v343_v21  ;;  %v1042_v20 = vld [vmem:[%s1152_s20 + $0x40] sm:$0xff]   ;;  %v1043_v21 = vld [vmem:[%s1152_s20 + $0x48] sm:$0xff]  }
  0x18   : > { %v439_v30 = vmax.f32 %v391_v22, 0.0  ;;  %v440_v31 = vmax.f32 %v392_v23, 0.0  ;;  %v441_v32 = vmax.f32 %v393_v24, 0.0  ;;  %v442_v33 = vmax.f32 %v394_v25, 0.0 }
  0x19   : > { %v443_v34 = vmax.f32 %v395_v26, 0.0  ;;  %v444_v35 = vmax.f32 %v396_v27, 0.0  ;;  %v445_v36 = vmax.f32 %v397_v28, 0.0  ;;  %v446_v37 = vmax.f32 %v398_v29, 0.0  ;;  %v1044_v26 = vld [vmem:[%s1152_s20 + $0x50] sm:$0xff]   ;;  %v1045_v27 = vld [vmem:[%s1152_s20 + $0x58] sm:$0xff]  }
  0x1a   : > { %v891_v40 = vpack.c.bf16 %v439_v30, %v439_v30  ;;  %v892_v41 = vpack.c.bf16 %v440_v31, %v440_v31  ;;  %v893_v42 = vpack.c.bf16 %v441_v32, %v441_v32  ;;  %v894_v43 = vpack.c.bf16 %v442_v33, %v442_v33 }
  0x1b   : > { %v895_v46 = vpack.c.bf16 %v443_v34, %v443_v34  ;;  %v896_v47 = vpack.c.bf16 %v444_v35, %v444_v35  ;;  %v897_v48 = vpack.c.bf16 %v445_v36, %v445_v36  ;;  %v898_v49 = vpack.c.bf16 %v446_v37, %v446_v37 }
  0x1c   : > { %680 = vst.msk [vmem:[%s1189_s27] sm:$0xf] %vm679_vm0, %v891_v40  ;;  %681 = vst.msk [vmem:[%s1189_s27 + $0x4] sm:$0xf] %vm679_vm0, %v892_v41  ;;  %v957_v50 = vunpack.c.l.bf16 %v1038_v38  ;;  %v958_v51 = vunpack.c.h.bf16 %v1038_v38  ;;  %v961_v52 = vunpack.c.l.bf16 %v1039_v39  ;;  %v962_v53 = vunpack.c.h.bf16 %v1039_v39 }
  0x1d   : > { %682 = vst.msk [vmem:[%s1189_s27 + $0x8] sm:$0xf] %vm679_vm0, %v893_v42  ;;  %683 = vst.msk [vmem:[%s1189_s27 + $0xc] sm:$0xf] %vm679_vm0, %v894_v43  ;;  %v965_v54 = vunpack.c.l.bf16 %v1040_v44  ;;  %v966_v55 = vunpack.c.h.bf16 %v1040_v44  ;;  %v969_v56 = vunpack.c.l.bf16 %v1041_v45  ;;  %v970_v57 = vunpack.c.h.bf16 %v1041_v45 }
  0x1e   : > { %684 = vst.msk [vmem:[%s1189_s27 + $0x10] sm:$0xf] %vm679_vm0, %v895_v46  ;;  %685 = vst.msk [vmem:[%s1189_s27 + $0x14] sm:$0xf] %vm679_vm0, %v896_v47  ;;  %v344_v58 = vmul.f32 %v957_v50, %v1157_v0  ;;  %v345_v59 = vmul.f32 %v958_v51, %v1157_v0  ;;  %v346_v60 = vmul.f32 %v961_v52, %v1157_v0  ;;  %v973_v32 = vunpack.c.l.bf16 %v1042_v20 }
  0x1f   : > { %686 = vst.msk [vmem:[%s1189_s27 + $0x18] sm:$0xf] %vm679_vm0, %v897_v48  ;;  %687 = vst.msk [vmem:[%s1189_s27 + $0x1c] sm:$0xf] %vm679_vm0, %v898_v49  ;;  %v347_v61 = vmul.f32 %v962_v53, %v1157_v0  ;;  %v348_v62 = vmul.f32 %v965_v54, %v1157_v0  ;;  %v349_v63 = vmul.f32 %v966_v55, %v1157_v0  ;;  %v974_v33 = vunpack.c.h.bf16 %v1042_v20 }
  0x20   : > { %v350_v1 = vmul.f32 %v969_v56, %v1157_v0  ;;  %v351_v2 = vmul.f32 %v970_v57, %v1157_v0  ;;  %v399_v3 = vadd.f32 %v1166_v9, %v344_v58  ;;  %v400_v4 = vadd.f32 %v1166_v9, %v345_v59 }
  0x21   : > { %v401_v5 = vadd.f32 %v1166_v9, %v346_v60  ;;  %v402_v6 = vadd.f32 %v1166_v9, %v347_v61  ;;  %v403_v7 = vadd.f32 %v1166_v9, %v348_v62  ;;  %v404_v8 = vadd.f32 %v1166_v9, %v349_v63 }
  0x22   : > { %v405_v10 = vadd.f32 %v1166_v9, %v350_v1  ;;  %v406_v11 = vadd.f32 %v1166_v9, %v351_v2  ;;  %v447_v12 = vmax.f32 %v399_v3, 0.0  ;;  %v448_v13 = vmax.f32 %v400_v4, 0.0  ;;  %v1046_v1 = vld [vmem:[%s1152_s20 + $0x60] sm:$0xff]   ;;  %v1047_v2 = vld [vmem:[%s1152_s20 + $0x68] sm:$0xff]  }
  0x23   : > { %v449_v14 = vmax.f32 %v401_v5, 0.0  ;;  %v450_v15 = vmax.f32 %v402_v6, 0.0  ;;  %v451_v16 = vmax.f32 %v403_v7, 0.0  ;;  %v452_v17 = vmax.f32 %v404_v8, 0.0  ;;  %v1048_v7 = vld [vmem:[%s1152_s20 + $0x70] sm:$0xff]   ;;  %v1049_v8 = vld [vmem:[%s1152_s20 + $0x78] sm:$0xff]  }
  0x24   : > { %v453_v18 = vmax.f32 %v405_v10, 0.0  ;;  %v454_v19 = vmax.f32 %v406_v11, 0.0  ;;  %v899_v22 = vpack.c.bf16 %v447_v12, %v447_v12  ;;  %v900_v23 = vpack.c.bf16 %v448_v13, %v448_v13 }
  0x25   : > { %v901_v24 = vpack.c.bf16 %v449_v14, %v449_v14  ;;  %v902_v25 = vpack.c.bf16 %v450_v15, %v450_v15  ;;  %v903_v28 = vpack.c.bf16 %v451_v16, %v451_v16  ;;  %v904_v29 = vpack.c.bf16 %v452_v17, %v452_v17 }
  0x26   : > { %v905_v30 = vpack.c.bf16 %v453_v18, %v453_v18  ;;  %v906_v31 = vpack.c.bf16 %v454_v19, %v454_v19  ;;  %688 = vst.msk [vmem:[%s1189_s27 + $0x20] sm:$0xf] %vm679_vm0, %v899_v22  ;;  %689 = vst.msk [vmem:[%s1189_s27 + $0x24] sm:$0xf] %vm679_vm0, %v900_v23  ;;  %v977_v34 = vunpack.c.l.bf16 %v1043_v21  ;;  %v978_v35 = vunpack.c.h.bf16 %v1043_v21 }
  0x27   : > { %690 = vst.msk [vmem:[%s1189_s27 + $0x28] sm:$0xf] %vm679_vm0, %v901_v24  ;;  %691 = vst.msk [vmem:[%s1189_s27 + $0x2c] sm:$0xf] %vm679_vm0, %v902_v25  ;;  %v981_v36 = vunpack.c.l.bf16 %v1044_v26  ;;  %v982_v37 = vunpack.c.h.bf16 %v1044_v26  ;;  %v985_v38 = vunpack.c.l.bf16 %v1045_v27  ;;  %v986_v39 = vunpack.c.h.bf16 %v1045_v27 }
  0x28   : > { %692 = vst.msk [vmem:[%s1189_s27 + $0x30] sm:$0xf] %vm679_vm0, %v903_v28  ;;  %693 = vst.msk [vmem:[%s1189_s27 + $0x34] sm:$0xf] %vm679_vm0, %v904_v29  ;;  %v352_v40 = vmul.f32 %v973_v32, %v1157_v0  ;;  %v353_v41 = vmul.f32 %v974_v33, %v1157_v0  ;;  %v354_v42 = vmul.f32 %v977_v34, %v1157_v0  ;;  %v989_v14 = vunpack.c.l.bf16 %v1046_v1 }
  0x29   : > { %694 = vst.msk [vmem:[%s1189_s27 + $0x38] sm:$0xf] %vm679_vm0, %v905_v30  ;;  %695 = vst.msk [vmem:[%s1189_s27 + $0x3c] sm:$0xf] %vm679_vm0, %v906_v31  ;;  %v355_v43 = vmul.f32 %v978_v35, %v1157_v0  ;;  %v356_v44 = vmul.f32 %v981_v36, %v1157_v0  ;;  %v357_v45 = vmul.f32 %v982_v37, %v1157_v0  ;;  %v990_v15 = vunpack.c.h.bf16 %v1046_v1 }
  0x2a   : > { %v358_v46 = vmul.f32 %v985_v38, %v1157_v0  ;;  %v359_v47 = vmul.f32 %v986_v39, %v1157_v0  ;;  %v407_v48 = vadd.f32 %v1166_v9, %v352_v40  ;;  %v408_v49 = vadd.f32 %v1166_v9, %v353_v41 }
  0x2b   : > { %v409_v50 = vadd.f32 %v1166_v9, %v354_v42  ;;  %v410_v51 = vadd.f32 %v1166_v9, %v355_v43  ;;  %v411_v52 = vadd.f32 %v1166_v9, %v356_v44  ;;  %v412_v53 = vadd.f32 %v1166_v9, %v357_v45 }
  0x2c   : > { %v413_v54 = vadd.f32 %v1166_v9, %v358_v46  ;;  %v414_v55 = vadd.f32 %v1166_v9, %v359_v47  ;;  %v455_v56 = vmax.f32 %v407_v48, 0.0  ;;  %v456_v57 = vmax.f32 %v408_v49, 0.0  ;;  %v1050_v46 = vld [vmem:[%s1152_s20 + $0x80] sm:$0xff]   ;;  %v1051_v47 = vld [vmem:[%s1152_s20 + $0x88] sm:$0xff]  }
  0x2d   : > { %v457_v58 = vmax.f32 %v409_v50, 0.0  ;;  %v458_v59 = vmax.f32 %v410_v51, 0.0  ;;  %v459_v60 = vmax.f32 %v411_v52, 0.0  ;;  %v460_v61 = vmax.f32 %v412_v53, 0.0  ;;  %v1052_v52 = vld [vmem:[%s1152_s20 + $0x90] sm:$0xff]   ;;  %v1053_v53 = vld [vmem:[%s1152_s20 + $0x98] sm:$0xff]  }
  0x2e   : > { %v461_v62 = vmax.f32 %v413_v54, 0.0  ;;  %v462_v63 = vmax.f32 %v414_v55, 0.0  ;;  %v907_v3 = vpack.c.bf16 %v455_v56, %v455_v56  ;;  %v908_v4 = vpack.c.bf16 %v456_v57, %v456_v57 }
  0x2f   : > { %v909_v5 = vpack.c.bf16 %v457_v58, %v457_v58  ;;  %v910_v6 = vpack.c.bf16 %v458_v59, %v458_v59  ;;  %v911_v10 = vpack.c.bf16 %v459_v60, %v459_v60  ;;  %v912_v11 = vpack.c.bf16 %v460_v61, %v460_v61 }
  0x30   : > { %v913_v12 = vpack.c.bf16 %v461_v62, %v461_v62  ;;  %v914_v13 = vpack.c.bf16 %v462_v63, %v462_v63  ;;  %696 = vst.msk [vmem:[%s1189_s27 + $0x40] sm:$0xf] %vm679_vm0, %v907_v3  ;;  %697 = vst.msk [vmem:[%s1189_s27 + $0x44] sm:$0xf] %vm679_vm0, %v908_v4  ;;  %v993_v16 = vunpack.c.l.bf16 %v1047_v2  ;;  %v994_v17 = vunpack.c.h.bf16 %v1047_v2 }
  0x31   : > { %698 = vst.msk [vmem:[%s1189_s27 + $0x48] sm:$0xf] %vm679_vm0, %v909_v5  ;;  %699 = vst.msk [vmem:[%s1189_s27 + $0x4c] sm:$0xf] %vm679_vm0, %v910_v6  ;;  %v997_v18 = vunpack.c.l.bf16 %v1048_v7  ;;  %v998_v19 = vunpack.c.h.bf16 %v1048_v7  ;;  %v1001_v20 = vunpack.c.l.bf16 %v1049_v8  ;;  %v1002_v21 = vunpack.c.h.bf16 %v1049_v8 }
  0x32   : > { %700 = vst.msk [vmem:[%s1189_s27 + $0x50] sm:$0xf] %vm679_vm0, %v911_v10  ;;  %701 = vst.msk [vmem:[%s1189_s27 + $0x54] sm:$0xf] %vm679_vm0, %v912_v11  ;;  %v360_v22 = vmul.f32 %v989_v14, %v1157_v0  ;;  %v361_v23 = vmul.f32 %v990_v15, %v1157_v0  ;;  %v362_v24 = vmul.f32 %v993_v16, %v1157_v0  ;;  %v1005_v58 = vunpack.c.l.bf16 %v1050_v46 }
  0x33   : > { %702 = vst.msk [vmem:[%s1189_s27 + $0x58] sm:$0xf] %vm679_vm0, %v913_v12  ;;  %703 = vst.msk [vmem:[%s1189_s27 + $0x5c] sm:$0xf] %vm679_vm0, %v914_v13  ;;  %v363_v25 = vmul.f32 %v994_v17, %v1157_v0  ;;  %v364_v26 = vmul.f32 %v997_v18, %v1157_v0  ;;  %v365_v27 = vmul.f32 %v998_v19, %v1157_v0  ;;  %v1006_v59 = vunpack.c.h.bf16 %v1050_v46 }
  0x34   : > { %v366_v28 = vmul.f32 %v1001_v20, %v1157_v0  ;;  %v367_v29 = vmul.f32 %v1002_v21, %v1157_v0  ;;  %v415_v30 = vadd.f32 %v1166_v9, %v360_v22  ;;  %v416_v31 = vadd.f32 %v1166_v9, %v361_v23 }
  0x35   : > { %v417_v32 = vadd.f32 %v1166_v9, %v362_v24  ;;  %v418_v33 = vadd.f32 %v1166_v9, %v363_v25  ;;  %v419_v34 = vadd.f32 %v1166_v9, %v364_v26  ;;  %v420_v35 = vadd.f32 %v1166_v9, %v365_v27 }
  0x36   : > { %v421_v36 = vadd.f32 %v1166_v9, %v366_v28  ;;  %v422_v37 = vadd.f32 %v1166_v9, %v367_v29  ;;  %v463_v38 = vmax.f32 %v415_v30, 0.0  ;;  %v464_v39 = vmax.f32 %v416_v31, 0.0  ;;  %v1054_v28 = vld [vmem:[%s1152_s20 + $0xa0] sm:$0xff]   ;;  %v1055_v29 = vld [vmem:[%s1152_s20 + $0xa8] sm:$0xff]  }
  0x37   : > { %v465_v40 = vmax.f32 %v417_v32, 0.0  ;;  %v466_v41 = vmax.f32 %v418_v33, 0.0  ;;  %v467_v42 = vmax.f32 %v419_v34, 0.0  ;;  %v468_v43 = vmax.f32 %v420_v35, 0.0  ;;  %v1056_v34 = vld [vmem:[%s1152_s20 + $0xb0] sm:$0xff]   ;;  %v1057_v35 = vld [vmem:[%s1152_s20 + $0xb8] sm:$0xff]  }
  0x38   : > { %v469_v44 = vmax.f32 %v421_v36, 0.0  ;;  %v470_v45 = vmax.f32 %v422_v37, 0.0  ;;  %v915_v48 = vpack.c.bf16 %v463_v38, %v463_v38  ;;  %v916_v49 = vpack.c.bf16 %v464_v39, %v464_v39 }
  0x39   : > { %v917_v50 = vpack.c.bf16 %v465_v40, %v465_v40  ;;  %v918_v51 = vpack.c.bf16 %v466_v41, %v466_v41  ;;  %v919_v54 = vpack.c.bf16 %v467_v42, %v467_v42  ;;  %v920_v55 = vpack.c.bf16 %v468_v43, %v468_v43 }
  0x3a   : > { %v921_v56 = vpack.c.bf16 %v469_v44, %v469_v44  ;;  %v922_v57 = vpack.c.bf16 %v470_v45, %v470_v45  ;;  %704 = vst.msk [vmem:[%s1189_s27 + $0x60] sm:$0xf] %vm679_vm0, %v915_v48  ;;  %705 = vst.msk [vmem:[%s1189_s27 + $0x64] sm:$0xf] %vm679_vm0, %v916_v49  ;;  %v1009_v60 = vunpack.c.l.bf16 %v1051_v47  ;;  %v1010_v61 = vunpack.c.h.bf16 %v1051_v47 }
  0x3b   : > { %706 = vst.msk [vmem:[%s1189_s27 + $0x68] sm:$0xf] %vm679_vm0, %v917_v50  ;;  %707 = vst.msk [vmem:[%s1189_s27 + $0x6c] sm:$0xf] %vm679_vm0, %v918_v51  ;;  %v1013_v62 = vunpack.c.l.bf16 %v1052_v52  ;;  %v1014_v63 = vunpack.c.h.bf16 %v1052_v52  ;;  %v1017_v1 = vunpack.c.l.bf16 %v1053_v53  ;;  %v1018_v2 = vunpack.c.h.bf16 %v1053_v53 }
  0x3c   : > { %708 = vst.msk [vmem:[%s1189_s27 + $0x70] sm:$0xf] %vm679_vm0, %v919_v54  ;;  %709 = vst.msk [vmem:[%s1189_s27 + $0x74] sm:$0xf] %vm679_vm0, %v920_v55  ;;  %v368_v3 = vmul.f32 %v1005_v58, %v1157_v0  ;;  %v369_v4 = vmul.f32 %v1006_v59, %v1157_v0  ;;  %v370_v5 = vmul.f32 %v1009_v60, %v1157_v0  ;;  %v1021_v40 = vunpack.c.l.bf16 %v1054_v28 }
  0x3d   : > { %710 = vst.msk [vmem:[%s1189_s27 + $0x78] sm:$0xf] %vm679_vm0, %v921_v56  ;;  %711 = vst.msk [vmem:[%s1189_s27 + $0x7c] sm:$0xf] %vm679_vm0, %v922_v57  ;;  %v371_v6 = vmul.f32 %v1010_v61, %v1157_v0  ;;  %v372_v7 = vmul.f32 %v1013_v62, %v1157_v0  ;;  %v373_v8 = vmul.f32 %v1014_v63, %v1157_v0  ;;  %v1022_v41 = vunpack.c.h.bf16 %v1054_v28 }
  0x3e   : > { %v374_v10 = vmul.f32 %v1017_v1, %v1157_v0  ;;  %v375_v11 = vmul.f32 %v1018_v2, %v1157_v0  ;;  %v423_v12 = vadd.f32 %v1166_v9, %v368_v3  ;;  %v424_v13 = vadd.f32 %v1166_v9, %v369_v4 }
  0x3f   : > { %v425_v14 = vadd.f32 %v1166_v9, %v370_v5  ;;  %v426_v15 = vadd.f32 %v1166_v9, %v371_v6  ;;  %v427_v16 = vadd.f32 %v1166_v9, %v372_v7  ;;  %v428_v17 = vadd.f32 %v1166_v9, %v373_v8 }
  0x40   : > { %v429_v18 = vadd.f32 %v1166_v9, %v374_v10  ;;  %v430_v19 = vadd.f32 %v1166_v9, %v375_v11  ;;  %v471_v20 = vmax.f32 %v423_v12, 0.0  ;;  %v472_v21 = vmax.f32 %v424_v13, 0.0 }
  0x41   : > { %v473_v22 = vmax.f32 %v425_v14, 0.0  ;;  %v474_v23 = vmax.f32 %v426_v15, 0.0  ;;  %v475_v24 = vmax.f32 %v427_v16, 0.0  ;;  %v476_v25 = vmax.f32 %v428_v17, 0.0 }
  0x42   : > { %v477_v26 = vmax.f32 %v429_v18, 0.0  ;;  %v478_v27 = vmax.f32 %v430_v19, 0.0  ;;  %v923_v30 = vpack.c.bf16 %v471_v20, %v471_v20  ;;  %v924_v31 = vpack.c.bf16 %v472_v21, %v472_v21 }
  0x43   : > { %v925_v32 = vpack.c.bf16 %v473_v22, %v473_v22  ;;  %v926_v33 = vpack.c.bf16 %v474_v23, %v474_v23  ;;  %v927_v36 = vpack.c.bf16 %v475_v24, %v475_v24  ;;  %v928_v37 = vpack.c.bf16 %v476_v25, %v476_v25 }
  0x44   : > { %v929_v38 = vpack.c.bf16 %v477_v26, %v477_v26  ;;  %v930_v39 = vpack.c.bf16 %v478_v27, %v478_v27  ;;  %712 = vst.msk [vmem:[%s1189_s27 + $0x80] sm:$0xf] %vm679_vm0, %v923_v30  ;;  %713 = vst.msk [vmem:[%s1189_s27 + $0x84] sm:$0xf] %vm679_vm0, %v924_v31  ;;  %v1025_v42 = vunpack.c.l.bf16 %v1055_v29  ;;  %v1026_v43 = vunpack.c.h.bf16 %v1055_v29 }
  0x45   : > { %714 = vst.msk [vmem:[%s1189_s27 + $0x88] sm:$0xf] %vm679_vm0, %v925_v32  ;;  %715 = vst.msk [vmem:[%s1189_s27 + $0x8c] sm:$0xf] %vm679_vm0, %v926_v33  ;;  %v1029_v44 = vunpack.c.l.bf16 %v1056_v34  ;;  %v1030_v45 = vunpack.c.h.bf16 %v1056_v34  ;;  %v1033_v46 = vunpack.c.l.bf16 %v1057_v35  ;;  %v1034_v47 = vunpack.c.h.bf16 %v1057_v35 }
  0x46   : > { %716 = vst.msk [vmem:[%s1189_s27 + $0x90] sm:$0xf] %vm679_vm0, %v927_v36  ;;  %717 = vst.msk [vmem:[%s1189_s27 + $0x94] sm:$0xf] %vm679_vm0, %v928_v37  ;;  %v376_v48 = vmul.f32 %v1021_v40, %v1157_v0  ;;  %v377_v49 = vmul.f32 %v1022_v41, %v1157_v0  ;;  %v378_v50 = vmul.f32 %v1025_v42, %v1157_v0 }
  0x47   : > { %718 = vst.msk [vmem:[%s1189_s27 + $0x98] sm:$0xf] %vm679_vm0, %v929_v38  ;;  %719 = vst.msk [vmem:[%s1189_s27 + $0x9c] sm:$0xf] %vm679_vm0, %v930_v39  ;;  %v379_v51 = vmul.f32 %v1026_v43, %v1157_v0  ;;  %v380_v52 = vmul.f32 %v1029_v44, %v1157_v0  ;;  %v381_v53 = vmul.f32 %v1030_v45, %v1157_v0 }
  0x48   : > { %v382_v54 = vmul.f32 %v1033_v46, %v1157_v0  ;;  %v383_v55 = vmul.f32 %v1034_v47, %v1157_v0  ;;  %v431_v56 = vadd.f32 %v1166_v9, %v376_v48  ;;  %v432_v57 = vadd.f32 %v1166_v9, %v377_v49 }
  0x49   : > { %v433_v58 = vadd.f32 %v1166_v9, %v378_v50  ;;  %v434_v59 = vadd.f32 %v1166_v9, %v379_v51  ;;  %v435_v60 = vadd.f32 %v1166_v9, %v380_v52  ;;  %v436_v61 = vadd.f32 %v1166_v9, %v381_v53 }
  0x4a   : > { %v437_v62 = vadd.f32 %v1166_v9, %v382_v54  ;;  %v438_v63 = vadd.f32 %v1166_v9, %v383_v55  ;;  %v479_v1 = vmax.f32 %v431_v56, 0.0  ;;  %v480_v2 = vmax.f32 %v432_v57, 0.0 }
  0x4b   : > { %v481_v0 = vmax.f32 %v433_v58, 0.0  ;;  %v482_v3 = vmax.f32 %v434_v59, 0.0  ;;  %v483_v4 = vmax.f32 %v435_v60, 0.0  ;;  %v484_v5 = vmax.f32 %v436_v61, 0.0 }
  0x4c   : > { %v485_v6 = vmax.f32 %v437_v62, 0.0  ;;  %v486_v7 = vmax.f32 %v438_v63, 0.0  ;;  %v931_v8 = vpack.c.bf16 %v479_v1, %v479_v1  ;;  %v932_v10 = vpack.c.bf16 %v480_v2, %v480_v2 }
  0x4d   : > { %v933_v11 = vpack.c.bf16 %v481_v0, %v481_v0  ;;  %v934_v9 = vpack.c.bf16 %v482_v3, %v482_v3  ;;  %v935_v12 = vpack.c.bf16 %v483_v4, %v483_v4  ;;  %v936_v13 = vpack.c.bf16 %v484_v5, %v484_v5 }
  0x4e   : > { %v937_v14 = vpack.c.bf16 %v485_v6, %v485_v6  ;;  %v938_v15 = vpack.c.bf16 %v486_v7, %v486_v7  ;;  %720 = vst.msk [vmem:[%s1189_s27 + $0xa0] sm:$0xf] %vm679_vm0, %v931_v8  ;;  %721 = vst.msk [vmem:[%s1189_s27 + $0xa4] sm:$0xf] %vm679_vm0, %v932_v10 }
  0x4f   : > { %722 = vst.msk [vmem:[%s1189_s27 + $0xa8] sm:$0xf] %vm679_vm0, %v933_v11  ;;  %723 = vst.msk [vmem:[%s1189_s27 + $0xac] sm:$0xf] %vm679_vm0, %v934_v9 }
  0x50   : > { %724 = vst.msk [vmem:[%s1189_s27 + $0xb0] sm:$0xf] %vm679_vm0, %v935_v12  ;;  %725 = vst.msk [vmem:[%s1189_s27 + $0xb4] sm:$0xf] %vm679_vm0, %v936_v13 }
  0x51   : > { %726 = vst.msk [vmem:[%s1189_s27 + $0xb8] sm:$0xf] %vm679_vm0, %v937_v14  ;;  %727 = vst.msk [vmem:[%s1189_s27 + $0xbc] sm:$0xf] %vm679_vm0, %v938_v15 }
  0x52 PF: > { %s13_s14 = sadd.s32 1, %s1104_s14   ;;  %s1400_s12 = smov %s1100_s13 }
  0x53   : > { %p10_p5 = scmp.ge.s32.totalorder %s13_s14, 4   ;;  %s1401_s13 = smov %s1403_s15 }
  0x55   :  { %12 = sbr.rel (!%p10_p5) target bundleno = 2 (0x2), region = 68 }

// kernel: generator_forward.15
= control target key start
LH: loop header
LB: loop body
LE: loop exit
PB: predicated region body
PF: predicated region fallthrough
CT: control target
= control target key end

     0   :  { %s4640_s24 = smov 0   ;;  %s4642_s25 = smov 0   ;;  %s5941_s0 = inlined_call_operand.vmem [shape: bf16[832,16], index: 0, kind: input, shape index: {}, may-alias: {0,1}]   ;;  %s5942_s1 = inlined_call_operand.vmem [shape: bf16[832,16], index: 1, kind: input, shape index: {}, may-alias: {0,1}]   ;;  %s5943_s2 = inlined_call_operand.vmem [shape: bf16[4,16,32], index: 2, kind: input, shape index: {}]   ;;  %s5944_s3 = inlined_call_operand.vmem [shape: f32[768,4], index: 3, kind: input, shape index: {}]   ;;  %s5945_s4 = inlined_call_operand.vmem [shape: f32[4,32], index: 4, kind: input, shape index: {}]   ;;  %s5946_s5 = inlined_call_operand.vmem [shape: bf16[768,32], index: 5, kind: output, shape index: {0}]   ;;  %s5947_s6 = inlined_call_operand.vmem [shape: f32[2,1,32], index: 6, kind: output, shape index: {1}]   ;;  %s5948_s7 = inlined_call_operand.vmem [shape: f32[2,1,32], index: 7, kind: output, shape index: {2}]  }
   0x1   :  { %s4644_s26 = smov 0  }
   0x2 LB: > { %s27_s27 = sadd.s32 1, %s4594_s25  ;;  %p3663_p0 = scmp.ge.s32.totalorder %s4598_s26, 1  ;;  %s4598_s26 = sphi %s4644_s26, %s18_s26   ;;  %s4594_s25 = sphi %s4642_s25, %s6048_s25   ;;  %s4590_s24 = sphi %s4640_s24, %s6047_s24  }
   0x3   : > { %p28_p1 = scmp.ge.s32.totalorder %s27_s27, 2  ;;  %p317_p2 = scmp.lt.s32.totalorder %s4598_s26, 3 }
   0x5   : > { %s6050_s27 = smov (%p28_p1, %s27_s27), 0  ;;  %p318_p3 = pnand %p3663_p0, %p317_p2 }
   0x7   : > { %321 = sbr.rel (%p318_p3) target bundleno = 505 (0x1f9), region = 40 }
   0xe   : > { %v4545_v0 = vld [vmem:[%s5943_s2] sm:$0xff]   ;;  %s4664_s30 = smul.u32 48, %s4590_s24  ;;  %v4548_v1 = vld [vmem:[%s5943_s2 + $0x8] sm:$0xff]   ;;  %v4549_v2 = vld [vmem:[%s5943_s2 + $0x10] sm:$0xff]   ;;  %vm940_vm0 = vcmask 130048   ;;  %vm2606_vm2 = vcmask 1043456  }
   0xf   : > { %4151 = vmatprep.subr.bf16.mxu0 %v4545_v0  ;;  %4101 = vmatprep.subr.bf16.mxu1 %v4548_v1  ;;  %vm737_vm1 = vsmask.f32 7424  ;;  %v4682_v3 = vld [vmem:[%s5943_s2 + $0x18] sm:$0xff]   ;;  %v4722_v27 = vld [vmem:[%s5945_s4] sm:$0xf]  ;;  %s402_s21 = sadd.s32 1, %s4590_s24 }
  0x10   : > { %p393_p4 = scmp.lt.s32.totalorder %s4664_s30, 103  ;;  %4152 = vmatpush3.bf16.msra.mxu0 %v4545_v0  ;;  %4102 = vmatpush3.bf16.msra.mxu1 %v4548_v1  ;;  %vm1547_vm3 = vcmask 1046528   ;;  %s4796_s22 = smul.u32 48, %s402_s21  ;;  %vm1951_vm4 = vsmask.f32 6400  ;;  %vm2461_vm5 = vcmask 31744  }
  0x11   : > { %4201 = vmatprep.subr.bf16.mxu0 %v4549_v2  ;;  %4375 = vmatprep.subr.bf16.mxu1 %v4545_v0  ;;  %p417_p6 = scmp.lt.s32.totalorder %s4664_s30, 95  ;;  %vm3409_vm6 = vcmask 257024   ;;  %vm2963_vm7 = vcmask 261120   ;;  %p435_p7 = scmp.lt.s32.totalorder %s4590_s24, 1  ;;  %vm3065_vm8 = vcmask 253952  }
  0x12   : > { %s394_s12 = scalar_select %p393_p4, %s4664_s30, 103 }
  0x13   : > { %p405_p5 = scmp.lt.s32.totalorder %s4796_s22, 103  ;;  %s6054_s30 = smov (!%p417_p6, %s4664_s30), 95 }
  0x14   : > { %s3664_s13 = sshll.u32 %s394_s12, 2  ;;  %s3667_s9 = sshll.u32 %s6054_s30, 3 }
  0x15   : > { %s4677_s16 = scalar_lea.vmem %s5941_s0, %s3664_s13  ;;  %s6052_s22 = smov (!%p405_p5, %s4796_s22), 103 }
  0x16   : > { %v4546_v4 = vld [vmem:[%s4677_s16] sm:$0xff]   ;;  %v4686_v5 = vld [vmem:[%s4677_s16 + $0x8] sm:$0xff]   ;;  %v4694_v10 = vld [vmem:[%s4677_s16 + $0x10] sm:$0xff]   ;;  %s3666_s23 = sshll.u32 %s6052_s22, 2  ;;  %s5370_s12 = scalar_lea.vmem %s5944_s3, %s3667_s9 }
  0x17   : > { %4153 = vmatprep.mubr.msk.bf16.mxu0 %vm940_vm0, %v4546_v4  ;;  %v739_v6 = vshrl.u32 %v4546_v4, 16  ;;  %v741_v7 = vshll.u32 %v4546_v4, 16  ;;  %v746_v8 = vshll.u32 %v4686_v5, 16  ;;  %v750_v9 = vshrl.u32 %v4686_v5, 16  ;;  %v4697_v11 = vld [vmem:[%s4677_s16 + $0x18] sm:$0xff]   ;;  %v4700_v13 = vld [vmem:[%s4677_s16 + $0x20] sm:$0xff]   ;;  %s4946_s8 = scalar_lea.vmem %s5942_s1, %s3666_s23 }
  0x18   : > { %4154 = vmatmul.mubr.msk.bf16.vlgmr.msra.gmra.mrb[0].mxu0 %vm940_vm0, %v4686_v5  ;;  %v5988_v15 = vshll.u32 %v4694_v10, 16  ;;  %v5989_v16 = vshrl.u32 %v4694_v10, 16  ;;  %v762_v18 = vshll.u32 %v4697_v11, 16  ;;  %v5980_v19 = vshll.u32 %v4700_v13, 16  ;;  %v4710_v20 = vld [vmem:[%s4677_s16 + $0x28] sm:$0xff]   ;;  %v4730_v31 = vld [vmem:[%s4677_s16 + $0x30] sm:$0xff]  }
  0x19   : > { %4202 = vmatpush3.bf16.msra.mxu0 %v4549_v2  ;;  %v743_v12 = vrot.slane %v741_v7, 1  ;;  %v748_v14 = vrot.slane %v746_v8, 1  ;;  %4157 = vmatprep.mubr.msk.bf16.mxu0 %vm940_vm0, %v4694_v10  ;;  %v766_v23 = vshrl.u32 %v4697_v11, 16  ;;  %v5984_v26 = vshrl.u32 %v4700_v13, 16  ;;  %v4736_v33 = vld [vmem:[%s4677_s16 + $0x38] sm:$0xff]   ;;  %v4751_v38 = vld [vmem:[%s4677_s16 + $0x48] sm:$0xff]  }
  0x1a   : > { %4251 = vmatprep.subr.bf16.mxu0 %v4682_v3  ;;  %v756_v22 = vrot.slane %v5988_v15, 1  ;;  %v764_v25 = vrot.slane %v762_v18, 1  ;;  %v5976_v30 = vshll.u32 %v4710_v20, 16  ;;  %v772_v32 = vrot.slane %v5980_v19, 1  ;;  %v4755_v40 = vld [vmem:[%s4677_s16 + $0x40] sm:$0xff]   ;;  %v4762_v43 = vld [vmem:[%s4677_s16 + $0x50] sm:$0xff]  }
  0x1b   : > { %v744_v17 = vor.u32 %v743_v12, %v739_v6  ;;  %v752_v21 = vor.u32 %v750_v9, %v748_v14  ;;  %v5971_v39 = vshll.u32 %v4730_v31, 16  ;;  %v5977_v41 = vshrl.u32 %v4710_v20, 16  ;;  %v4767_v46 = vld [vmem:[%s4677_s16 + $0x58] sm:$0xff]   ;;  %v4794_v60 = vld [vmem:[%s4677_s16 + $0x60] sm:$0xff]   ;;  %v4812_v6 = vld [vmem:[%s4677_s16 + $0x68] sm:$0xff]   ;;  %s3668_s13 = sshll.u32 %s6054_s30, 2 }
  0x1c   : > { %v760_v29 = vor.u32 %v5989_v16, %v756_v22  ;;  %v768_v35 = vor.u32 %v766_v23, %v764_v25  ;;  %v776_v36 = vor.u32 %v5984_v26, %v772_v32  ;;  %v780_v37 = vrot.slane %v5976_v30, 1  ;;  %v4815_v7 = vld [vmem:[%s4677_s16 + $0x70] sm:$0xff]   ;;  %s6056_s24 = smov (!%p435_p7, %s4590_s24), 1 }
  0x1d   : > { %v749_v24 = vsel %vm737_vm1, %v744_v17, %v748_v14  ;;  %v757_v28 = vsel %vm737_vm1, %v752_v21, %v756_v22  ;;  %v5964_v42 = vshll.u32 %v4736_v33, 16  ;;  %v5972_v45 = vshrl.u32 %v4730_v31, 16  ;;  %s440_s18 = scalar_lea.vmem %s5947_s6, %s6056_s24  ;;  %s446_s21 = scalar_lea.vmem %s5948_s7, %s6056_s24 }
  0x1e   : > { %4103 = vmatprep.mubr.msk.bf16.mxu1 %vm940_vm0, %v749_v24  ;;  %v765_v34 = vsel %vm737_vm1, %v760_v29, %v764_v25  ;;  %v773_v44 = vsel %vm737_vm1, %v768_v35, %v772_v32  ;;  %v4769_v47 = vrot.slane %v746_v8, 2  ;;  %v781_v48 = vsel %vm737_vm1, %v776_v36, %v780_v37  ;;  %v4829_v25 = vld [vmem:[%s4677_s16 + $0x88] sm:$0xff]   ;;  %v4835_v32 = vld [vmem:[%s4677_s16 + $0x90] sm:$0xff]  }
  0x1f   : > { %4104 = vmatmul.mubr.msk.bf16.vlgmr.msra.gmra.mrb[0].mxu1 %vm940_vm0, %v757_v28  ;;  %v5959_v49 = vshll.u32 %v4751_v38, 16  ;;  %v4774_v50 = vrot.slane %v762_v18, 2  ;;  %v788_v51 = vrot.slane %v5971_v39, 1  ;;  %v5969_v52 = vshrl.u32 %v4736_v33, 16 }
  0x20   : > { %4376 = vmatpush3.bf16.msra.mxu1 %v4545_v0  ;;  %4158 = vmatmul.mubr.msk.bf16.gmra.mrb[4].mxu0 %vm940_vm0, %v4697_v11  ;;  %v5962_v53 = vshll.u32 %v4755_v40, 16  ;;  %v796_v54 = vrot.slane %v5964_v42, 1  ;;  %v5954_v55 = vshll.u32 %v4762_v43, 16  ;;  %v784_v56 = vor.u32 %v5977_v41, %v780_v37  ;;  %v4930_v42 = vld [vmem:[%s4677_s16 + $0xb8] sm:$0xff]  }
  0x21   : > { %4107 = vmatprep.mubr.msk.bf16.mxu1 %vm940_vm0, %v765_v34  ;;  %4161 = vmatprep.mubr.msk.bf16.mxu0 %vm940_vm0, %v4700_v13  ;;  %v792_v57 = vor.u32 %v5972_v45, %v788_v51  ;;  %v5963_v58 = vshrl.u32 %v4755_v40, 16  ;;  %v5950_v59 = vshll.u32 %v4767_v46, 16  ;;  %v812_v61 = vrot.slane %v5959_v49, 1 }
  0x22   : > { %4301 = vmatprep.subr.msk.mxu1 %vm2606_vm2, %v4722_v27  ;;  %v5961_v62 = vshrl.u32 %v4751_v38, 16  ;;  %v804_v63 = vrot.slane %v5962_v53, 1  ;;  %v5957_v0 = vshrl.u32 %v4762_v43, 16  ;;  %v800_v1 = vor.u32 %v5969_v52, %v796_v54 }
  0x23   : > { %v820_v2 = vrot.slane %v5954_v55, 1  ;;  %v5952_v4 = vshrl.u32 %v4767_v46, 16  ;;  %v789_v8 = vsel %vm737_vm1, %v784_v56, %v788_v51  ;;  %v797_v12 = vsel %vm737_vm1, %v792_v57, %v796_v54  ;;  %v4856_v51 = vld [vmem:[%s4677_s16 + $0x98] sm:$0xff]  }
  0x24   : > { %v828_v14 = vrot.slane %v5950_v59, 1  ;;  %v5949_v17 = vshll.u32 %v4794_v60, 16  ;;  %v808_v18 = vor.u32 %v5963_v58, %v804_v63  ;;  %v816_v21 = vor.u32 %v5961_v62, %v812_v61 }
  0x25   : > { %v1548_v22 = vrot.slane %v4686_v5, 1  ;;  %v1549_v24 = vrot.slane %v4694_v10, 1  ;;  %v824_v28 = vor.u32 %v5957_v0, %v820_v2  ;;  %v1551_v29 = vrot.slane %v4697_v11, 1 }
  0x26   : > { %v4839_v34 = vrot.slane %v766_v23, 1  ;;  %v805_v35 = vsel %vm737_vm1, %v800_v1, %v804_v63  ;;  %v5951_v36 = vshrl.u32 %v4794_v60, 16  ;;  %v5953_v37 = vshll.u32 %v4812_v6, 16  ;;  %v4869_v1 = vld [vmem:[%s4677_s16 + $0xa0] sm:$0xff]  }
  0x27   : > { %4108 = vmatmul.mubr.msk.bf16.gmra.mrb[4].mxu1 %vm940_vm0, %v773_v44  ;;  %v832_v11 = vor.u32 %v5952_v4, %v828_v14  ;;  %v836_v23 = vrot.slane %v5949_v17, 1  ;;  %v5970_v44 = vshrl.u32 %v4812_v6, 16  ;;  %v813_v54 = vsel %vm737_vm1, %v808_v18, %v812_v61  ;;  %v4899_v4 = vld [vmem:[%s4677_s16 + $0xa8] sm:$0xff]  }
  0x28   : > { %4162 = vmatmul.mubr.msk.bf16.gmra.mrb[8].mxu0 %vm940_vm0, %v4710_v20  ;;  %4111 = vmatprep.mubr.msk.bf16.mxu1 %vm940_vm0, %v781_v48  ;;  %v5958_v48 = vshll.u32 %v4815_v7, 16  ;;  %v4862_v56 = vsel %vm737_vm1, %v816_v21, %v820_v2  ;;  %v4865_v57 = vsel %vm1547_vm3, %v1548_v22, %v1549_v24  ;;  %v5955_v63 = vshll.u32 %v4829_v25, 16 }
  0x29   : > { %4165 = vmatprep.mubr.msk.bf16.mxu0 %vm940_vm0, %v4730_v31  ;;  %v5960_v17 = vshrl.u32 %v4829_v25, 16  ;;  %v5956_v61 = vshll.u32 %v4835_v32, 16  ;;  %v840_v2 = vor.u32 %v5951_v36, %v836_v23  ;;  %v844_v18 = vrot.slane %v5953_v37, 1 }
  0x2a   : > { %v1553_v21 = vrot.slane %v4700_v13, 1  ;;  %v4889_v22 = vrot.slane %v5955_v63, 1  ;;  %v5968_v59 = vshrl.u32 %v4835_v32, 16  ;;  %v5966_v36 = vshll.u32 %v4856_v51, 16  ;;  %v4909_v63 = vld [vmem:[%s4677_s16 + $0xb0] sm:$0xff]  }
  0x2b   : > { %v852_v37 = vrot.slane %v5958_v48, 1  ;;  %v1555_v55 = vrot.slane %v4710_v20, 1  ;;  %v5965_v49 = vshll.u32 %v4869_v1, 16  ;;  %v5974_v58 = vshrl.u32 %v4869_v1, 16 }
  0x2c   : > { %v892_v48 = vrot.slane %v5966_v36, 1  ;;  %v5975_v36 = vshll.u32 %v4909_v63, 16  ;;  %v5996_v5 = vshrl.u32 %v4700_v13, 16 }
  0x2e   : > { %v916_v39 = vrot.slane %v5975_v36, 1 }
  0x2f   : > { %4112 = vmatmul.mubr.msk.bf16.gmra.mrb[8].mxu1 %vm940_vm0, %v789_v8  ;;  %v4872_v8 = vsel %vm737_vm1, %v824_v28, %v828_v14  ;;  %v4885_v14 = vld [vmem:[%s4677_s16 + $0x78] sm:$0xff]   ;;  %v884_v28 = vrot.slane %v5956_v61, 1  ;;  %v5978_v61 = vshrl.u32 %v4815_v7, 16 }
  0x30   : > { %4166 = vmatmul.mubr.msk.bf16.gmra.mrb[12].mxu0 %vm940_vm0, %v4736_v33  ;;  %4115 = vmatprep.mubr.msk.bf16.mxu1 %vm940_vm0, %v797_v12  ;;  %v4875_v12 = vsel %vm1547_vm3, %v1549_v24, %v1551_v29  ;;  %v4892_v24 = vsel %vm737_vm1, %v832_v11, %v836_v23  ;;  %v880_v11 = vor.u32 %v5960_v17, %v4889_v22  ;;  %v5967_v23 = vshrl.u32 %v4856_v51, 16 }
  0x31   : > { %4169 = vmatprep.mubr.msk.bf16.mxu0 %vm940_vm0, %v4755_v40  ;;  %v888_v0 = vor.u32 %v5968_v59, %v884_v28  ;;  %v4922_v17 = vsel %vm737_vm1, %v840_v2, %v844_v18  ;;  %v5979_v62 = vshll.u32 %v4885_v14, 16  ;;  %v856_v45 = vor.u32 %v5978_v61, %v852_v37 }
  0x32   : > { %v4926_v53 = vsel %vm737_vm1, %v880_v11, %v884_v28  ;;  %v896_v2 = vor.u32 %v5967_v23, %v892_v48  ;;  %v900_v28 = vrot.slane %v5965_v49, 1  ;;  %v5973_v11 = vshll.u32 %v4899_v4, 16 }
  0x33   : > { %v5982_v49 = vshrl.u32 %v4899_v4, 16  ;;  %v5981_v23 = vshrl.u32 %v4909_v63, 16 }
  0x34   : > { %v4962_v59 = vsel %vm737_vm1, %v896_v2, %v900_v28  ;;  %v904_v52 = vor.u32 %v5974_v58, %v900_v28  ;;  %v5983_v2 = vshll.u32 %v4930_v42, 16  ;;  %v4982_v28 = vrot.slane %v5979_v62, 1  ;;  %v497_v58 = vld [vmem:[%s4946_s8 + $0x4] sm:$0xf] }
  0x35   : > { %v920_v30 = vor.u32 %v5981_v23, %v916_v39 }
  0x36   : > { %v924_v41 = vrot.slane %v5983_v2, 1 }
  0x37   : > { %4116 = vmatmul.mubr.msk.bf16.gmra.mrb[12].mxu1 %vm940_vm0, %v805_v35  ;;  %v4936_v35 = vsel %vm737_vm1, %v888_v0, %v892_v48  ;;  %v848_v0 = vor.u32 %v5970_v44, %v844_v18  ;;  %v4956_v48 = vld [vmem:[%s4677_s16 + $0x80] sm:$0xff]   ;;  %v908_v18 = vrot.slane %v5973_v11, 1  ;;  %v4972_v44 = vsel %vm1547_vm3, %v1553_v21, %v1555_v55  ;;  %s5615_s16 = scalar_lea.vmem %s5946_s5, %s3668_s13 }
  0x38   : > { %4170 = vmatmul.mubr.msk.bf16.gmra.mrb[16].mxu0 %vm940_vm0, %v4751_v38  ;;  %4119 = vmatprep.mubr.msk.bf16.mxu1 %vm940_vm0, %v813_v54  ;;  %v4953_v54 = vsel %vm1547_vm3, %v1551_v29, %v1553_v21  ;;  %v496_v29 = vld [vmem:[%s4946_s8] sm:$0xf]  ;;  %v5986_v36 = vshll.u32 %v4956_v48, 16 }
  0x39   : > { %4173 = vmatprep.mubr.msk.bf16.mxu0 %vm940_vm0, %v4762_v43  ;;  %v4985_v11 = vsel %vm737_vm1, %v904_v52, %v908_v18  ;;  %v912_v21 = vor.u32 %v5982_v49, %v908_v18  ;;  %v3902_v61 = vcombine.low %v496_v29, %v496_v29  ;;  %v4996_v62 = vsel %vm737_vm1, %v848_v0, %v852_v37 }
  0x3a   : > { %v5990_v52 = vrot.slane %v4730_v31, 1  ;;  %v5985_v18 = vshrl.u32 %v4930_v42, 16  ;;  %v5007_v49 = vsel %vm737_vm1, %v920_v30, %v924_v41  ;;  %v5009_v2 = vcombine.low %v496_v29, %v497_v58  ;;  %v5021_v30 = vld [vmem:[%s4946_s8 + $0x8] ss:$0 sps:$4 sm:$0xff]  }
  0x3b   : > { %v5000_v19 = vsel %vm737_vm1, %v912_v21, %v916_v39  ;;  %v930_v26 = vshll.u32 %v3902_v61, 16  ;;  %v1581_v0 = vrot.slane %v4835_v32, 1  ;;  %v5027_v58 = vsel %vm737_vm1, %v856_v45, %v4982_v28 }
  0x3c   : > { %v928_v37 = vor.u32 %v5985_v18, %v924_v41  ;;  %v1583_v41 = vrot.slane %v4856_v51, 1  ;;  %v1585_v21 = vrot.slane %v4869_v1, 1  ;;  %v1589_v18 = vrot.slane %v4909_v63, 1 }
  0x3d   : > { %v932_v61 = vrot.slane %v930_v26, 1  ;;  %v1591_v26 = vrot.slane %v4930_v42, 1  ;;  %v1593_v23 = vrot.slane %v5009_v2, 1  ;;  %v1595_v16 = vrot.slane %v5021_v30, 1 }
  0x3e   : > { %v5051_v39 = vsel %vm1547_vm3, %v1583_v41, %v1585_v21 }
  0x3f   : > { %4120 = vmatmul.mubr.msk.bf16.gmra.mrb[16].mxu1 %vm940_vm0, %v4862_v56  ;;  %v5987_v56 = vrot.slane %v4829_v25, 1  ;;  %v5043_v45 = vsel %vm737_vm1, %v928_v37, %v932_v61  ;;  %5991 = vst [vmem:[#allocation2_spill] sm:$0xff] %v5051_v39  ;;  %v1558_v37 = vsel %vm1547_vm3, %v1555_v55, %v5990_v52  ;;  %v5069_v61 = vsel %vm1547_vm3, %v1591_v26, %v1593_v23 }
  0x40   : > { %4174 = vmatmul.mubr.msk.bf16.gmra.mrb[20].mxu0 %vm940_vm0, %v4767_v46  ;;  %4123 = vmatprep.mubr.msk.bf16.mxu1 %vm940_vm0, %v4872_v8  ;;  %v5031_v8 = vrot.slane %v5986_v36, 1  ;;  %v5046_v36 = vsel %vm1547_vm3, %v1581_v0, %v1583_v41  ;;  %v1952_v41 = vrot.slane %v750_v9, 1  ;;  %v1961_v55 = vor.u32 %v4774_v50, %v4839_v34 }
  0x41   : > { %4203 = vmatprep.mubr.msk.bf16.mxu0 %vm940_vm0, %v4865_v57  ;;  %v5037_v29 = vsel %vm1547_vm3, %v5987_v56, %v1581_v0  ;;  %v1587_v57 = vrot.slane %v4899_v4, 1  ;;  %v5066_v0 = vsel %vm1547_vm3, %v1589_v18, %v1591_v26  ;;  %v1963_v9 = vrot.slane %v5996_v5, 1 }
  0x42   : > { %v5998_v50 = vshrl.u32 %v4710_v20, 16  ;;  %v6012_v52 = vshrl.u32 %v4794_v60, 16 }
  0x43   : > { %v5054_v56 = vsel %vm1547_vm3, %v1585_v21, %v1587_v57  ;;  %v5057_v15 = vsel %vm1547_vm3, %v1587_v57, %v1589_v18  ;;  %v5074_v21 = vsel %vm1547_vm3, %v1593_v23, %v1595_v16  ;;  %v5994_v57 = vshrl.u32 %v4694_v10, 16 }
  0x44   : > { %5992 = vst [vmem:[#allocation3_spill] sm:$0xff] %v5054_v56  ;;  %5993 = vst [vmem:[#allocation4_spill] sm:$0xff] %v5057_v15  ;;  %v5995_v56 = vshll.u32 %v4694_v10, 16  ;;  %v1954_v18 = vor.u32 %v4769_v47, %v1952_v41  ;;  %v5997_v16 = vshll.u32 %v4700_v13, 16  ;;  %v1967_v34 = vrot.slane %v5998_v50, 1 }
  0x45   : > { %v1955_v15 = vrot.slane %v5994_v57, 1  ;;  %v6000_v47 = vshrl.u32 %v4730_v31, 16 }
  0x46   : > { %v1956_v39 = vrot.slane %v5995_v56, 2  ;;  %v1964_v23 = vrot.slane %v5997_v16, 2  ;;  %v6004_v16 = vshrl.u32 %v4755_v40, 16 }
  0x47   : > { %4124 = vmatmul.mubr.msk.bf16.gmra.mrb[20].mxu1 %vm940_vm0, %v4892_v24  ;;  %v5999_v24 = vshll.u32 %v4710_v20, 16  ;;  %v1971_v26 = vrot.slane %v6000_v47, 1 }
  0x48   : > { %4204 = vmatmul.mubr.msk.bf16.vlgmr.msra.gmra.mrb[0].mxu0 %vm940_vm0, %v4875_v12  ;;  %4127 = vmatprep.mubr.msk.bf16.mxu1 %vm940_vm0, %v4922_v17  ;;  %v1957_v10 = vor.u32 %v1956_v39, %v1955_v15  ;;  %v1965_v13 = vor.u32 %v1964_v23, %v1963_v9  ;;  %v6001_v12 = vshll.u32 %v4730_v31, 16  ;;  %v6002_v15 = vshrl.u32 %v4736_v33, 16 }
  0x49   : > { %v1968_v56 = vrot.slane %v5999_v24, 2  ;;  %4252 = vmatpush3.bf16.msra.mxu0 %v4682_v3  ;;  %4207 = vmatprep.mubr.msk.bf16.mxu0 %vm940_vm0, %v4953_v54  ;;  %v6003_v39 = vshll.u32 %v4736_v33, 16  ;;  %v1979_v54 = vrot.slane %v6004_v16, 1  ;;  %v6005_v24 = vshll.u32 %v4755_v40, 16 }
  0x4a   : > { %v1972_v41 = vrot.slane %v6001_v12, 2  ;;  %v1975_v17 = vrot.slane %v6002_v15, 1  ;;  %v5109_v20 = vsel %vm1951_vm4, %v1954_v18, %v1957_v10  ;;  %v5112_v5 = vsel %vm1951_vm4, %v1957_v10, %v1961_v55 }
  0x4b   : > { %v1976_v57 = vrot.slane %v6003_v39, 2  ;;  %v1969_v3 = vor.u32 %v1968_v56, %v1967_v34  ;;  %v5117_v9 = vsel %vm1951_vm4, %v1961_v55, %v1965_v13  ;;  %v1980_v47 = vrot.slane %v6005_v24, 2 }
  0x4c   : > { %v1973_v23 = vor.u32 %v1972_v41, %v1971_v26  ;;  %v6006_v18 = vshrl.u32 %v4751_v38, 16  ;;  %v6007_v10 = vshll.u32 %v4751_v38, 16  ;;  %v6008_v56 = vshrl.u32 %v4762_v43, 16 }
  0x4d   : > { %v1977_v50 = vor.u32 %v1976_v57, %v1975_v17  ;;  %v5122_v12 = vsel %vm1951_vm4, %v1965_v13, %v1969_v3  ;;  %v1981_v41 = vor.u32 %v1980_v47, %v1979_v54  ;;  %v6009_v17 = vshll.u32 %v4762_v43, 16 }
  0x4e   : > { %v1983_v15 = vrot.slane %v6006_v18, 1  ;;  %v1984_v34 = vrot.slane %v6007_v10, 2  ;;  %v1987_v39 = vrot.slane %v6008_v56, 1  ;;  %v5131_v55 = vsel %vm1951_vm4, %v1969_v3, %v1973_v23 }
  0x4f   : > { %v5134_v26 = vsel %vm1951_vm4, %v1973_v23, %v1977_v50  ;;  %v1988_v13 = vrot.slane %v6009_v17, 2  ;;  %v6010_v16 = vshrl.u32 %v4767_v46, 16  ;;  %v6011_v18 = vshll.u32 %v4767_v46, 16  ;;  %4128 = vmatmul.mubr.msk.bf16.gmra.mrb[24].mxu1 %vm940_vm0, %v4996_v62 }
  0x50   : > { %v1985_v57 = vor.u32 %v1984_v34, %v1983_v15  ;;  %v1995_v56 = vrot.slane %v6012_v52, 1  ;;  %v5147_v3 = vsel %vm1951_vm4, %v1977_v50, %v1981_v41  ;;  %v6013_v23 = vshll.u32 %v4794_v60, 16  ;;  %4208 = vmatmul.mubr.msk.bf16.gmra.mrb[4].mxu0 %vm940_vm0, %v4972_v44  ;;  %4131 = vmatprep.mubr.msk.bf16.mxu1 %vm940_vm0, %v5027_v58 }
  0x51   : > { %v1991_v24 = vrot.slane %v6010_v16, 1  ;;  %v1992_v10 = vrot.slane %v6011_v18, 2  ;;  %v1989_v54 = vor.u32 %v1988_v13, %v1987_v39  ;;  %v6014_v15 = vshrl.u32 %v4812_v6, 16  ;;  %4211 = vmatprep.mubr.msk.bf16.mxu0 %vm940_vm0, %v1558_v37 }
  0x52   : > { %v1996_v47 = vrot.slane %v6013_v23, 2  ;;  %v6015_v52 = vshrl.u32 %v4885_v14, 16  ;;  %v5161_v50 = vsel %vm1951_vm4, %v1981_v41, %v1985_v57  ;;  %v6016_v17 = vshll.u32 %v4812_v6, 16 }
  0x53   : > { %v1999_v34 = vrot.slane %v6014_v15, 1  ;;  %v1993_v39 = vor.u32 %v1992_v10, %v1991_v24  ;;  %v6017_v16 = vshrl.u32 %v4956_v48, 16  ;;  %v1561_v18 = vrot.slane %v4755_v40, 1 }
  0x54   : > { %v864_v62 = vor.u32 %v6015_v52, %v4982_v28  ;;  %v2000_v13 = vrot.slane %v6016_v17, 2  ;;  %v5171_v58 = vsel %vm1951_vm4, %v1985_v57, %v1989_v54  ;;  %v1997_v23 = vor.u32 %v1996_v47, %v1995_v56 }
  0x55   : > { %v872_v44 = vor.u32 %v6017_v16, %v5031_v8  ;;  %v5174_v28 = vsel %vm1951_vm4, %v1989_v54, %v1993_v39  ;;  %v6018_v24 = vshrl.u32 %v4815_v7, 16  ;;  %v6019_v15 = vshll.u32 %v4815_v7, 16 }
  0x56   : > { %v2001_v41 = vor.u32 %v2000_v13, %v1999_v34  ;;  %v5181_v52 = vsel %vm1951_vm4, %v1993_v39, %v1997_v23  ;;  %v6020_v17 = vshrl.u32 %v4885_v14, 16  ;;  %v6021_v57 = vshll.u32 %v4885_v14, 16 }
  0x57   : > { %v2003_v10 = vrot.slane %v6018_v24, 1  ;;  %v2004_v37 = vrot.slane %v6019_v15, 2  ;;  %v869_v56 = vsel %vm737_vm1, %v864_v62, %v5031_v8  ;;  %v6022_v34 = vrot.slane %v4736_v33, 1 }
  0x58   : > { %v2007_v40 = vrot.slane %v6020_v17, 1  ;;  %v2008_v16 = vrot.slane %v6021_v57, 2  ;;  %v5190_v54 = vsel %vm1951_vm4, %v1997_v23, %v2001_v41  ;;  %v6023_v13 = vrot.slane %v4730_v31, 1  ;;  %4132 = vmatmul.mubr.msk.bf16.gmra.mrb[28].mxu1 %vm940_vm0, %v869_v56 }
  0x59   : > { %v2005_v47 = vor.u32 %v2004_v37, %v2003_v10  ;;  %v877_v24 = vsel %vm737_vm1, %v872_v44, %v4889_v22  ;;  %v6024_v17 = vmov %v6022_v34  ;;  %v1563_v31 = vrot.slane %v4751_v38, 1 }
  0x5a   : > { %v1560_v39 = vsel %vm1547_vm3, %v6023_v13, %v6022_v34  ;;  %v2009_v15 = vor.u32 %v2008_v16, %v2007_v40  ;;  %v1562_v57 = vsel %vm1547_vm3, %v6024_v17, %v1561_v18  ;;  %4135 = vmatprep.mubr.msk.bf16.mxu1 %vm940_vm0, %v877_v24  ;;  %v1565_v33 = vrot.slane %v4762_v43, 1 }
  0x5b   : > { %v5203_v8 = vsel %vm1951_vm4, %v2001_v41, %v2005_v47  ;;  %4212 = vmatmul.mubr.msk.bf16.gmra.mrb[8].mxu0 %vm940_vm0, %v1560_v39  ;;  %v6025_v22 = vshrl.u32 %v4956_v48, 16  ;;  %v6026_v23 = vshll.u32 %v4956_v48, 16  ;;  %v6027_v10 = vshrl.u32 %v4829_v25, 16 }
  0x5c   : > { %v5207_v62 = vsel %vm1951_vm4, %v2005_v47, %v2009_v15  ;;  %4215 = vmatprep.mubr.msk.bf16.mxu0 %vm940_vm0, %v1562_v57  ;;  %v6028_v40 = vshll.u32 %v4829_v25, 16  ;;  %v1564_v47 = vsel %vm1547_vm3, %v1561_v18, %v1563_v31  ;;  %v1566_v38 = vsel %vm1547_vm3, %v1563_v31, %v1565_v33 }
  0x5d   : > { %v2011_v44 = vrot.slane %v6025_v22, 1  ;;  %v2012_v41 = vrot.slane %v6026_v23, 2  ;;  %v2015_v37 = vrot.slane %v6027_v10, 1  ;;  %v1567_v18 = vrot.slane %v4767_v46, 1 }
  0x5e   : > { %v2016_v16 = vrot.slane %v6028_v40, 2  ;;  %v1569_v39 = vrot.slane %v4794_v60, 1  ;;  %v6029_v24 = vshrl.u32 %v4835_v32, 16  ;;  %v6030_v17 = vshll.u32 %v4835_v32, 16 }
  0x5f   : > { %v2013_v56 = vor.u32 %v2012_v41, %v2011_v44  ;;  %v6031_v57 = vshrl.u32 %v4856_v51, 16  ;;  %v6032_v22 = vshll.u32 %v4856_v51, 16  ;;  %v1573_v40 = vrot.slane %v4815_v7, 1 }
  0x60   : > { %v2017_v34 = vor.u32 %v2016_v16, %v2015_v37  ;;  %4136 = vmatmul.mubr.msk.bf16.gmra.mrb[32].mxu1 %vm940_vm0, %v4926_v53  ;;  %v2020_v53 = vrot.slane %v6030_v17, 2  ;;  %v1570_v46 = vsel %vm1547_vm3, %v1567_v18, %v1569_v39  ;;  %v6033_v16 = vshrl.u32 %v4869_v1, 16 }
  0x61   : > { %v5225_v43 = vsel %vm1951_vm4, %v2009_v15, %v2013_v56  ;;  %4139 = vmatprep.mubr.msk.bf16.mxu1 %vm940_vm0, %v4936_v35  ;;  %v2019_v15 = vrot.slane %v6029_v24, 1  ;;  %v2023_v31 = vrot.slane %v6031_v57, 1  ;;  %v2024_v44 = vrot.slane %v6032_v22, 2 }
  0x62   : > { %v5230_v13 = vsel %vm1951_vm4, %v2013_v56, %v2017_v34  ;;  %v1568_v35 = vsel %vm1547_vm3, %v1565_v33, %v1567_v18  ;;  %v1571_v33 = vrot.slane %v4812_v6, 1  ;;  %v2027_v56 = vrot.slane %v6033_v16, 1 }
  0x63   : > { %4216 = vmatmul.mubr.msk.bf16.gmra.mrb[12].mxu0 %vm940_vm0, %v1564_v47  ;;  %v2021_v23 = vor.u32 %v2020_v53, %v2019_v15  ;;  %v2025_v41 = vor.u32 %v2024_v44, %v2023_v31  ;;  %v6034_v47 = vshll.u32 %v4869_v1, 16  ;;  %v6036_v18 = vshll.u32 %v4899_v4, 16 }
  0x64   : > { %4219 = vmatprep.mubr.msk.bf16.mxu0 %vm940_vm0, %v1566_v38  ;;  %v1574_v53 = vsel %vm1547_vm3, %v1571_v33, %v1573_v40  ;;  %v1577_v22 = vrot.slane %v4956_v48, 1  ;;  %v6037_v44 = vshrl.u32 %v4909_v63, 16 }
  0x65   : > { %v5249_v10 = vsel %vm1951_vm4, %v2017_v34, %v2021_v23  ;;  %v5254_v37 = vsel %vm1951_vm4, %v2021_v23, %v2025_v41  ;;  %v6035_v34 = vshrl.u32 %v4899_v4, 16  ;;  %v2032_v24 = vrot.slane %v6036_v18, 2 }
  0x66   : > { %v2035_v23 = vrot.slane %v6037_v44, 1  ;;  %v2044_v18 = vshrl.u32 %v5009_v2, 16  ;;  %v6041_v44 = vrot.slane %v4829_v25, 1 }
  0x67   : > { %v2031_v38 = vrot.slane %v6035_v34, 1 }
  0x68   : > { %4140 = vmatmul.mubr.msk.bf16.gmra.mrb[36].mxu1 %vm940_vm0, %v4962_v59  ;;  %v2028_v59 = vrot.slane %v6034_v47, 2 }
  0x69   : > { %4143 = vmatprep.mubr.msk.bf16.mxu1 %vm940_vm0, %v4985_v11  ;;  %v1572_v11 = vsel %vm1547_vm3, %v1569_v39, %v1571_v33  ;;  %v2033_v17 = vor.u32 %v2032_v24, %v2031_v38  ;;  %v1575_v39 = vrot.slane %v4885_v14, 1  ;;  %v6040_v33 = vshll.u32 %v4930_v42, 16 }
  0x6a   : > { %v2029_v15 = vor.u32 %v2028_v59, %v2027_v56  ;;  %v2053_v24 = vshrl.u32 %v5021_v30, 16 }
  0x6b   : > { %4220 = vmatmul.mubr.msk.bf16.gmra.mrb[16].mxu0 %vm940_vm0, %v1568_v35  ;;  %v6038_v35 = vshll.u32 %v4909_v63, 16  ;;  %v2040_v16 = vrot.slane %v6040_v33, 2  ;;  %v1578_v59 = vsel %vm1547_vm3, %v1575_v39, %v1577_v22 }
  0x6c   : > { %4223 = vmatprep.mubr.msk.bf16.mxu0 %vm940_vm0, %v1570_v46  ;;  %v5273_v57 = vsel %vm1951_vm4, %v2025_v41, %v2029_v15  ;;  %v5278_v31 = vsel %vm1951_vm4, %v2029_v15, %v2033_v17  ;;  %v6039_v41 = vshrl.u32 %v4930_v42, 16  ;;  %v2056_v15 = vshll.u32 %v5021_v30, 16  ;;  %v2422_v30 = vld [vmem:[%s5370_s12 + $0x50] sm:$0xff] }
  0x6e   : > { %v2039_v46 = vrot.slane %v6039_v41, 1  ;;  %v2446_v41 = vld [vmem:[%s5370_s12 + $0x110] sm:$0xff] }
  0x70   : > { %4144 = vmatmul.mubr.msk.bf16.gmra.mrb[40].mxu1 %vm940_vm0, %v5000_v19  ;;  %v2036_v19 = vrot.slane %v6038_v35, 2  ;;  %v2041_v47 = vor.u32 %v2040_v16, %v2039_v46  ;;  %v2448_v46 = vld [vmem:[%s5370_s12 + $0x120] sm:$0xff] }
  0x71   : > { %4147 = vmatprep.mubr.msk.bf16.mxu1 %vm940_vm0, %v5007_v49  ;;  %v1576_v49 = vsel %vm1547_vm3, %v1573_v40, %v1575_v39  ;;  %v2047_v40 = vshll.u32 %v5009_v2, 16 }
  0x72   : > { %v2037_v56 = vor.u32 %v2036_v19, %v2035_v23  ;;  %v1580_v23 = vsel %vm1547_vm3, %v1577_v22, %v6041_v44  ;;  %v2442_v22 = vld [vmem:[%s5370_s12 + $0xf0] sm:$0xff]  ;;  %v2444_v19 = vld [vmem:[%s5370_s12 + $0x100] sm:$0xff]  ;;  %v2457_v44 = vld [vmem:[%s5370_s12 + $0x168] sm:$0xff] }
  0x73   : > { %4224 = vmatmul.mubr.msk.bf16.gmra.mrb[20].mxu0 %vm940_vm0, %v1572_v11  ;;  %v2046_v11 = vrot.slane %v2044_v18, 1 }
  0x74   : > { %4227 = vmatprep.mubr.msk.bf16.mxu0 %vm940_vm0, %v1574_v53  ;;  %v5297_v34 = vsel %vm1951_vm4, %v2033_v17, %v2037_v56  ;;  %v5302_v38 = vsel %vm1951_vm4, %v2037_v56, %v2041_v47  ;;  %v2055_v17 = vrot.slane %v2053_v24, 1  ;;  %v2058_v53 = vrot.slane %v2056_v15, 2  ;;  %v2454_v15 = vld [vmem:[%s5370_s12 + $0x150] sm:$0xff] }
  0x78   : > { %4148 = vmatmul.mubr.msk.bf16.gmra.mrb[44].mxu1 %vm940_vm0, %v5043_v45  ;;  %v2049_v45 = vrot.slane %v2047_v40, 2 }
  0x79   : > { %4177 = vmatprep.mubr.msk.bf16.mxu1 %vm940_vm0, %v4794_v60  ;;  %v2059_v60 = vor.u32 %v2058_v53, %v2055_v17 }
  0x7a   : > { %v2050_v39 = vor.u32 %v2049_v45, %v2046_v11  ;;  %v2455_v11 = vld [vmem:[%s5370_s12 + $0x158] sm:$0xff]  ;;  %v2456_v45 = vld [vmem:[%s5370_s12 + $0x160] sm:$0xff] }
  0x7b   : > { %4228 = vmatmul.mubr.msk.bf16.gmra.mrb[24].mxu0 %vm940_vm0, %v1576_v49  ;;  %v2450_v49 = vld [vmem:[%s5370_s12 + $0x130] sm:$0xff] }
  0x7c   : > { %4231 = vmatprep.mubr.msk.bf16.mxu0 %vm940_vm0, %v1578_v59  ;;  %v5316_v35 = vsel %vm1951_vm4, %v2041_v47, %v2050_v39  ;;  %v5321_v2 = vsel %vm1951_vm4, %v2050_v39, %v2059_v60  ;;  %v2451_v47 = vld [vmem:[%s5370_s12 + $0x138] sm:$0xff]  ;;  %v2452_v59 = vld [vmem:[%s5370_s12 + $0x140] sm:$0xff]  ;;  %v2458_v60 = vld [vmem:[%s5370_s12 + $0x170] sm:$0xff] }
  0x80   : > { %4178 = vmatmul.mubr.msk.bf16.vlgmr.msra.gmra.mrb[24].mxu1 %vm940_vm0, %v4812_v6  ;;  %v6042_v6 = vld [vmem:[#allocation2_spill] sm:$0xff] }
  0x81   : > { %4302 = vmatpush3.msk.msra.mxu1 %vm2606_vm2, %v4722_v27  ;;  %4181 = vmatprep.mubr.msk.bf16.mxu1 %vm940_vm0, %v4815_v7  ;;  %v6043_v27 = vld [vmem:[#allocation3_spill] sm:$0xff]  ;;  %v6044_v7 = vld [vmem:[#allocation4_spill] sm:$0xff] }
  0x83   : > { %4232 = vmatmul.mubr.msk.bf16.gmra.mrb[28].mxu0 %vm940_vm0, %v1580_v23 }
  0x84   : > { %4235 = vmatprep.mubr.msk.bf16.mxu0 %vm940_vm0, %v5037_v29  ;;  %v2423_v29 = vld [vmem:[%s5370_s12 + $0x58] sm:$0xff] }
  0x88   : > { %4182 = vmatmul.mubr.msk.bf16.gmra.mrb[28].mxu1 %vm940_vm0, %v4885_v14  ;;  %v2420_v14 = vld [vmem:[%s5370_s12 + $0x40] sm:$0xff] }
  0x89   : > { %4185 = vmatprep.mubr.msk.bf16.mxu1 %vm940_vm0, %v4956_v48  ;;  %v2421_v48 = vld [vmem:[%s5370_s12 + $0x48] sm:$0xff] }
  0x8b   : > { %4236 = vmatmul.mubr.msk.bf16.gmra.mrb[32].mxu0 %vm940_vm0, %v5046_v36  ;;  %v2416_v36 = vld [vmem:[%s5370_s12 + $0x20] sm:$0xff] }
  0x8c   : > { %4239 = vmatprep.mubr.msk.bf16.mxu0 %vm940_vm0, %v6042_v6 }
  0x90   : > { %4186 = vmatmul.mubr.msk.bf16.gmra.mrb[32].mxu1 %vm940_vm0, %v4829_v25  ;;  %v2413_v25 = vld [vmem:[%s5370_s12 + $0x8] sm:$0xff] }
  0x91   : > { %4189 = vmatprep.mubr.msk.bf16.mxu1 %vm940_vm0, %v4835_v32  ;;  %v2414_v32 = vld [vmem:[%s5370_s12 + $0x10] sm:$0xff] }
  0x93   : > { %4240 = vmatmul.mubr.msk.bf16.gmra.mrb[36].mxu0 %vm940_vm0, %v6043_v27 }
  0x94   : > { %4243 = vmatprep.mubr.msk.bf16.mxu0 %vm940_vm0, %v6044_v7 }
  0x98   : > { %4190 = vmatmul.mubr.msk.bf16.gmra.mrb[36].mxu1 %vm940_vm0, %v4856_v51  ;;  %v2417_v51 = vld [vmem:[%s5370_s12 + $0x28] sm:$0xff] }
  0x99   : > { %4193 = vmatprep.mubr.msk.bf16.mxu1 %vm940_vm0, %v4869_v1  ;;  %v2419_v1 = vld [vmem:[%s5370_s12 + $0x38] sm:$0xff] }
  0x9b   : > { %4244 = vmatmul.mubr.msk.bf16.gmra.mrb[40].mxu0 %vm940_vm0, %v5066_v0  ;;  %v2424_v0 = vld [vmem:[%s5370_s12 + $0x60] sm:$0xff] }
  0x9c   : > { %4247 = vmatprep.mubr.msk.bf16.mxu0 %vm940_vm0, %v5069_v61  ;;  %v2425_v61 = vld [vmem:[%s5370_s12 + $0x68] sm:$0xff] }
  0xa0   : > { %4194 = vmatmul.mubr.msk.bf16.gmra.mrb[40].mxu1 %vm940_vm0, %v4899_v4  ;;  %v2412_v4 = vld [vmem:[%s5370_s12] sm:$0xff] }
  0xa1   : > { %4197 = vmatprep.mubr.msk.bf16.mxu1 %vm940_vm0, %v4909_v63  ;;  %v2418_v63 = vld [vmem:[%s5370_s12 + $0x30] sm:$0xff] }
  0xa3   : > { %4248 = vmatmul.mubr.msk.bf16.gmra.mrb[44].mxu0 %vm940_vm0, %v5074_v21  ;;  %v2426_v21 = vld [vmem:[%s5370_s12 + $0x70] sm:$0xff] }
  0xa4   : > { %4253 = vmatprep.mubr.msk.bf16.mxu0 %vm940_vm0, %v5109_v20  ;;  %v2427_v20 = vld [vmem:[%s5370_s12 + $0x78] sm:$0xff] }
  0xa8   : > { %4198 = vmatmul.mubr.msk.bf16.gmra.mrb[44].mxu1 %vm940_vm0, %v4930_v42  ;;  %v2415_v42 = vld [vmem:[%s5370_s12 + $0x18] sm:$0xff] }
  0xa9   : > { %4303 = vmatprep.mubr.msk.f32.mxu1 %vm2461_vm5, %v2412_v4 }
  0xab   : > { %4254 = vmatmul.mubr.msk.bf16.vlgmr.msra.gmra.mrb[0].mxu0 %vm940_vm0, %v5112_v5  ;;  %v2428_v5 = vld [vmem:[%s5370_s12 + $0x80] sm:$0xff] }
  0xac   : > { %4257 = vmatprep.mubr.msk.bf16.mxu0 %vm940_vm0, %v5117_v9  ;;  %v2429_v9 = vld [vmem:[%s5370_s12 + $0x88] sm:$0xff] }
  0xb0   : > { %4304 = vmatmul.mubr.msk.f32.vlgmr.msra.gmra.mrb[48].mxu1 %vm2461_vm5, %v2413_v25 }
  0xb1   : > { %4306 = vmatprep.mubr.msk.f32.mxu1 %vm2461_vm5, %v2414_v32 }
  0xb3   : > { %4258 = vmatmul.mubr.msk.bf16.gmra.mrb[4].mxu0 %vm940_vm0, %v5122_v12  ;;  %v2430_v12 = vld [vmem:[%s5370_s12 + $0x90] sm:$0xff] }
  0xb4   : > { %4261 = vmatprep.mubr.msk.bf16.mxu0 %vm940_vm0, %v5131_v55  ;;  %4307 = vmatmul.mubr.msk.f32.gmra.mrb[50].mxu1 %vm2461_vm5, %v2415_v42  ;;  %v2431_v55 = vld [vmem:[%s5370_s12 + $0x98] sm:$0xff] }
  0xb5   : > { %4309 = vmatprep.mubr.msk.f32.mxu1 %vm2461_vm5, %v2416_v36 }
  0xb8   : > { %4310 = vmatmul.mubr.msk.f32.gmra.mrb[52].mxu1 %vm2461_vm5, %v2417_v51 }
  0xb9   : > { %4312 = vmatprep.mubr.msk.f32.mxu1 %vm2461_vm5, %v2418_v63 }
  0xbb   : > { %4262 = vmatmul.mubr.msk.bf16.gmra.mrb[8].mxu0 %vm940_vm0, %v5134_v26  ;;  %v2432_v26 = vld [vmem:[%s5370_s12 + $0xa0] sm:$0xff] }
  0xbc   : > { %4265 = vmatprep.mubr.msk.bf16.mxu0 %vm940_vm0, %v5147_v3  ;;  %4313 = vmatmul.mubr.msk.f32.gmra.mrb[54].mxu1 %vm2461_vm5, %v2419_v1  ;;  %v2433_v3 = vld [vmem:[%s5370_s12 + $0xa8] sm:$0xff] }
  0xbd   : > { %4315 = vmatprep.mubr.msk.f32.mxu1 %vm2461_vm5, %v2420_v14 }
  0xc0   : > { %4316 = vmatmul.mubr.msk.f32.gmra.mrb[56].mxu1 %vm2461_vm5, %v2421_v48 }
  0xc1   : > { %4318 = vmatprep.mubr.msk.f32.mxu1 %vm2461_vm5, %v2422_v30 }
  0xc3   : > { %4266 = vmatmul.mubr.msk.bf16.gmra.mrb[12].mxu0 %vm940_vm0, %v5161_v50  ;;  %v2434_v50 = vld [vmem:[%s5370_s12 + $0xb0] sm:$0xff] }
  0xc4   : > { %4269 = vmatprep.mubr.msk.bf16.mxu0 %vm940_vm0, %v5171_v58  ;;  %4319 = vmatmul.mubr.msk.f32.gmra.mrb[58].mxu1 %vm2461_vm5, %v2423_v29  ;;  %v2435_v58 = vld [vmem:[%s5370_s12 + $0xb8] sm:$0xff] }
  0xc5   : > { %4321 = vmatprep.mubr.msk.f32.mxu1 %vm2461_vm5, %v2424_v0 }
  0xc8   : > { %4322 = vmatmul.mubr.msk.f32.gmra.mrb[60].mxu1 %vm2461_vm5, %v2425_v61 }
  0xc9   : > { %4324 = vmatprep.mubr.msk.f32.mxu1 %vm2461_vm5, %v2426_v21 }
  0xcb   : > { %4270 = vmatmul.mubr.msk.bf16.gmra.mrb[16].mxu0 %vm940_vm0, %v5174_v28  ;;  %v2436_v28 = vld [vmem:[%s5370_s12 + $0xc0] sm:$0xff] }
  0xcc   : > { %4273 = vmatprep.mubr.msk.bf16.mxu0 %vm940_vm0, %v5181_v52  ;;  %4325 = vmatmul.mubr.msk.f32.gmra.mrb[62].mxu1 %vm2461_vm5, %v2427_v20  ;;  %v2437_v52 = vld [vmem:[%s5370_s12 + $0xc8] sm:$0xff] }
  0xcd   : > { %4327 = vmatprep.mubr.msk.f32.mxu1 %vm2461_vm5, %v2428_v5 }
  0xd0   : > { %4328 = vmatmul.mubr.msk.f32.gmra.mrb[64].mxu1 %vm2461_vm5, %v2429_v9 }
  0xd1   : > { %4330 = vmatprep.mubr.msk.f32.mxu1 %vm2461_vm5, %v2430_v12 }
  0xd3   : > { %4274 = vmatmul.mubr.msk.bf16.gmra.mrb[20].mxu0 %vm940_vm0, %v5190_v54  ;;  %v2438_v54 = vld [vmem:[%s5370_s12 + $0xd0] sm:$0xff] }
  0xd4   : > { %4277 = vmatprep.mubr.msk.bf16.mxu0 %vm940_vm0, %v5203_v8  ;;  %4331 = vmatmul.mubr.msk.f32.gmra.mrb[66].mxu1 %vm2461_vm5, %v2431_v55  ;;  %v2439_v8 = vld [vmem:[%s5370_s12 + $0xd8] sm:$0xff] }
  0xd5   : > { %4333 = vmatprep.mubr.msk.f32.mxu1 %vm2461_vm5, %v2432_v26 }
  0xd8   : > { %4334 = vmatmul.mubr.msk.f32.gmra.mrb[68].mxu1 %vm2461_vm5, %v2433_v3 }
  0xd9   : > { %4336 = vmatprep.mubr.msk.f32.mxu1 %vm2461_vm5, %v2434_v50 }
  0xdb   : > { %4278 = vmatmul.mubr.msk.bf16.gmra.mrb[24].mxu0 %vm940_vm0, %v5207_v62  ;;  %v2440_v62 = vld [vmem:[%s5370_s12 + $0xe0] sm:$0xff] }
  0xdc   : > { %4281 = vmatprep.mubr.msk.bf16.mxu0 %vm940_vm0, %v5225_v43  ;;  %4337 = vmatmul.mubr.msk.f32.gmra.mrb[70].mxu1 %vm2461_vm5, %v2435_v58  ;;  %v2441_v43 = vld [vmem:[%s5370_s12 + $0xe8] sm:$0xff] }
  0xdd   : > { %4339 = vmatprep.mubr.msk.f32.mxu1 %vm2461_vm5, %v2436_v28 }
  0xe0   : > { %4340 = vmatmul.mubr.msk.f32.gmra.mrb[72].mxu1 %vm2461_vm5, %v2437_v52 }
  0xe1   : > { %4342 = vmatprep.mubr.msk.f32.mxu1 %vm2461_vm5, %v2438_v54 }
  0xe3   : > { %4282 = vmatmul.mubr.msk.bf16.gmra.mrb[28].mxu0 %vm940_vm0, %v5230_v13  ;;  %v2443_v13 = vld [vmem:[%s5370_s12 + $0xf8] sm:$0xff] }
  0xe4   : > { %4285 = vmatprep.mubr.msk.bf16.mxu0 %vm940_vm0, %v5249_v10  ;;  %4343 = vmatmul.mubr.msk.f32.gmra.mrb[74].mxu1 %vm2461_vm5, %v2439_v8  ;;  %v2445_v10 = vld [vmem:[%s5370_s12 + $0x108] sm:$0xff] }
  0xe5   : > { %4345 = vmatprep.mubr.msk.f32.mxu1 %vm2461_vm5, %v2440_v62 }
  0xe8   : > { %4346 = vmatmul.mubr.msk.f32.gmra.mrb[76].mxu1 %vm2461_vm5, %v2441_v43 }
  0xe9   : > { %4348 = vmatprep.mubr.msk.f32.mxu1 %vm2461_vm5, %v2442_v22 }
  0xeb   : > { %4286 = vmatmul.mubr.msk.bf16.gmra.mrb[32].mxu0 %vm940_vm0, %v5254_v37  ;;  %v2447_v37 = vld [vmem:[%s5370_s12 + $0x118] sm:$0xff] }
  0xec   : > { %4289 = vmatprep.mubr.msk.bf16.mxu0 %vm940_vm0, %v5273_v57  ;;  %4349 = vmatmul.mubr.msk.f32.gmra.mrb[78].mxu1 %vm2461_vm5, %v2443_v13 }
  0xed   : > { %4351 = vmatprep.mubr.msk.f32.mxu1 %vm2461_vm5, %v2444_v19 }
  0xf0   : > { %4352 = vmatmul.mubr.msk.f32.gmra.mrb[80].mxu1 %vm2461_vm5, %v2445_v10 }
  0xf1   : > { %4354 = vmatprep.mubr.msk.f32.mxu1 %vm2461_vm5, %v2446_v41 }
  0xf2   : > { %v5486_v57 = vpop.f32.mrb[0].mxu1 }
  0xf3   : > { %4290 = vmatmul.mubr.msk.bf16.gmra.mrb[36].mxu0 %vm940_vm0, %v5278_v31  ;;  %v5488_v33 = vpop.f32.mrb[1].mxu1  ;;  %v2449_v31 = vld [vmem:[%s5370_s12 + $0x128] sm:$0xff] }
  0xf4   : > { %4293 = vmatprep.mubr.msk.bf16.mxu0 %vm940_vm0, %v5297_v34  ;;  %4355 = vmatmul.mubr.msk.f32.gmra.mrb[82].mxu1 %vm2461_vm5, %v2447_v37  ;;  %v5491_v16 = vpop.f32.mrb[2].mxu1 }
  0xf5   : > { %4357 = vmatprep.mubr.msk.f32.mxu1 %vm2461_vm5, %v2448_v46  ;;  %v5495_v56 = vpop.f32.mrb[3].mxu1 }
  0xf8   : > { %4358 = vmatmul.mubr.msk.f32.gmra.mrb[84].mxu1 %vm2461_vm5, %v2449_v31 }
  0xf9   : > { %4360 = vmatprep.mubr.msk.f32.mxu1 %vm2461_vm5, %v2450_v49 }
  0xfa   : > { %v5506_v34 = vpop.f32.mrb[4].mxu1 }
  0xfb   : > { %4294 = vmatmul.mubr.msk.bf16.gmra.mrb[40].mxu0 %vm940_vm0, %v5302_v38  ;;  %v5508_v18 = vpop.f32.mrb[5].mxu1  ;;  %v2453_v38 = vld [vmem:[%s5370_s12 + $0x148] sm:$0xff] }
  0xfc   : > { %4297 = vmatprep.mubr.msk.bf16.mxu0 %vm940_vm0, %v5316_v35  ;;  %4361 = vmatmul.mubr.msk.f32.gmra.mrb[86].mxu1 %vm2461_vm5, %v2451_v47  ;;  %v5511_v40 = vpop.f32.mrb[6].mxu1  ;;  %v2459_v35 = vld [vmem:[%s5370_s12 + $0x178] sm:$0xff] }
  0xfd   : > { %4363 = vmatprep.mubr.msk.f32.mxu1 %vm2461_vm5, %v2452_v59  ;;  %v5515_v24 = vpop.f32.mrb[7].mxu1 }
 0x100   : > { %4364 = vmatmul.mubr.msk.f32.gmra.mrb[88].mxu1 %vm2461_vm5, %v2453_v38 }
 0x101   : > { %4366 = vmatprep.mubr.msk.f32.mxu1 %vm2461_vm5, %v2454_v15 }
 0x102   : > { %v5524_v17 = vpop.f32.mrb[8].mxu1 }
 0x103   : > { %4298 = vmatmul.mubr.msk.bf16.gmra.mrb[44].mxu0 %vm940_vm0, %v5321_v2  ;;  %v5526_v53 = vpop.f32.mrb[9].mxu1 }
 0x104   : > { %4367 = vmatmul.mubr.msk.f32.gmra.mrb[90].mxu1 %vm2461_vm5, %v2455_v11  ;;  %v5529_v39 = vpop.f32.mrb[10].mxu1 }
 0x105   : > { %4369 = vmatprep.mubr.msk.f32.mxu1 %vm2461_vm5, %v2456_v45  ;;  %v5533_v23 = vpop.f32.mrb[11].mxu1 }
 0x108   : > { %4370 = vmatmul.mubr.msk.f32.gmra.mrb[92].mxu1 %vm2461_vm5, %v2457_v44 }
 0x109   : > { %4372 = vmatprep.mubr.msk.f32.mxu1 %vm2461_vm5, %v2458_v60 }
 0x10a   : > { %v5539_v2 = vpop.f32.mrb[12].mxu1 }
 0x10b   : > { %v5541_v6 = vpop.f32.mrb[13].mxu1 }
 0x10c   : > { %4373 = vmatmul.mubr.msk.f32.gmra.mrb[94].mxu1 %vm2461_vm5, %v2459_v35  ;;  %v5544_v27 = vpop.f32.mrb[14].mxu1 }
 0x10d   : > { %v5546_v7 = vpop.f32.mrb[15].mxu1 }
 0x112   : > { %v5548_v4 = vpop.f32.mrb[16].mxu1 }
 0x113   : > { %v5550_v25 = vpop.f32.mrb[17].mxu1 }
 0x114   : > { %v5552_v32 = vpop.f32.mrb[18].mxu1 }
 0x115   : > { %v5554_v42 = vpop.f32.mrb[19].mxu1 }
 0x11a   : > { %v5556_v36 = vpop.f32.mrb[20].mxu1 }
 0x11b   : > { %v5558_v51 = vpop.f32.mrb[21].mxu1 }
 0x11c   : > { %v5560_v63 = vpop.f32.mrb[22].mxu1 }
 0x11d   : > { %v5562_v1 = vpop.f32.mrb[23].mxu1 }
 0x153   : > { %v5564_v14 = vpop.f32.mrb[24].mxu1 }
 0x154   : > { %v5566_v48 = vpop.f32.mrb[25].mxu1 }
 0x155   : > { %v5568_v30 = vpop.f32.mrb[26].mxu1 }
 0x156   : > { %v5570_v29 = vpop.f32.mrb[27].mxu1 }
 0x15b   : > { %v5572_v0 = vpop.f32.mrb[28].mxu1 }
 0x15c   : > { %v5574_v61 = vpop.f32.mrb[29].mxu1 }
 0x15d   : > { %v5576_v21 = vpop.f32.mrb[30].mxu1 }
 0x15e   : > { %v5578_v20 = vpop.f32.mrb[31].mxu1 }
 0x163   : > { %v5580_v5 = vpop.f32.mrb[32].mxu1 }
 0x164   : > { %v5582_v9 = vpop.f32.mrb[33].mxu1 }
 0x165   : > { %v5584_v12 = vpop.f32.mrb[34].mxu1 }
 0x166   : > { %v5586_v55 = vpop.f32.mrb[35].mxu1 }
 0x16b   : > { %v5588_v26 = vpop.f32.mrb[36].mxu1 }
 0x16c   : > { %v5590_v3 = vpop.f32.mrb[37].mxu1 }
 0x16d   : > { %v5592_v50 = vpop.f32.mrb[38].mxu1 }
 0x16e   : > { %v5594_v58 = vpop.f32.mrb[39].mxu1 }
 0x173   : > { %v5596_v28 = vpop.f32.mrb[40].mxu1 }
 0x174   : > { %v5598_v52 = vpop.f32.mrb[41].mxu1 }
 0x175   : > { %v5600_v54 = vpop.f32.mrb[42].mxu1 }
 0x176   : > { %v5602_v8 = vpop.f32.mrb[43].mxu1 }
 0x17b   : > { %v5605_v62 = vpop.f32.mrb[44].mxu1 }
 0x17c   : > { %v5607_v43 = vpop.f32.mrb[45].mxu1 }
 0x17d   : > { %v5610_v19 = vpop.f32.mrb[46].mxu1 }
 0x17e   : > { %v4255_v22 = vpop.f32.mrb[0].mxu0  ;;  %v5618_v37 = vpop.f32.mrb[47].mxu1 }
 0x17f   : > { %v4377_v13 = vadd.f32 %v4255_v22, %v5486_v57  ;;  %v2173_v10 = vpop.f32.mrb[1].mxu0  ;;  %6045 = vst [vmem:[#allocation2_spill] sm:$0xff] %v5618_v37 }
 0x180   : > { %v4378_v41 = vadd.f32 %v2173_v10, %v5488_v33  ;;  %v4256_v46 = vpop.f32.mrb[2].mxu0 }
 0x181   : > { %v3906_v31 = vpack.c.bf16 %v4377_v13, %v4377_v13  ;;  %v4379_v57 = vadd.f32 %v4256_v46, %v5491_v16  ;;  %v2176_v49 = vpop.f32.mrb[3].mxu0 }
 0x182   : > { %v3904_v47 = vpack.c.bf16 %v4378_v41, %v4378_v41  ;;  %v4380_v59 = vadd.f32 %v2176_v49, %v5495_v56 }
 0x183   : > { %3412 = vst.msk [vmem:[%s5615_s16 + $0x8] sm:$0xf] %vm3409_vm6, %v3906_v31  ;;  %v3907_v38 = vpack.c.bf16 %v4379_v57, %v4379_v57  ;;  %v4305_v11 = vpop.f32.mrb[48].mxu1 }
 0x184   : > { %3410 = vst.msk [vmem:[%s5615_s16] sm:$0xf] %vm3409_vm6, %v3904_v47  ;;  %v3905_v15 = vpack.c.bf16 %v4380_v59, %v4380_v59  ;;  %v2916_v33 = vmul.f32 %v4380_v59, %v4305_v11  ;;  %v2676_v44 = vpop.f32.mrb[49].mxu1 }
 0x185   : > { %3413 = vst.msk [vmem:[%s5615_s16 + $0xc] sm:$0xf] %vm3409_vm6, %v3907_v38  ;;  %v2915_v60 = vmul.f32 %v4378_v41, %v2676_v44 }
 0x186   : > { %3411 = vst.msk [vmem:[%s5615_s16 + $0x4] sm:$0xf] %vm3409_vm6, %v3905_v15  ;;  %v4259_v45 = vpop.f32.mrb[4].mxu0  ;;  %v2965_v35 = vsel %vm2963_vm7, %v2916_v33, 0.0  ;;  %v3068_v22 = vmul.f32 %v4380_v59, %v2916_v33 }
 0x187   : > { %v5631_v16 = vadd.f32 %v4259_v45, %v5506_v34  ;;  %v2189_v56 = vpop.f32.mrb[5].mxu0  ;;  %v2964_v49 = vsel %vm2963_vm7, %v2915_v60, 0.0  ;;  %v3067_v47 = vmul.f32 %v4378_v41, %v2915_v60  ;;  %v4308_v15 = vpop.f32.mrb[50].mxu1 }
 0x188   : > { %v4382_v10 = vadd.f32 %v2189_v56, %v5508_v18  ;;  %v4260_v46 = vpop.f32.mrb[6].mxu0  ;;  %v3116_v11 = vsel %vm2963_vm7, %v3068_v22, 0.0  ;;  %v2966_v45 = vadd.f32 %v2965_v35, %v2964_v49  ;;  %v2686_v59 = vpop.f32.mrb[51].mxu1  ;;  %v2918_v37 = vmul.f32 %v4379_v57, %v4308_v15 }
 0x189   : > { %v3910_v31 = vpack.c.bf16 %v5631_v16, %v5631_v16  ;;  %v4383_v38 = vadd.f32 %v4260_v46, %v5511_v40  ;;  %v2192_v34 = vpop.f32.mrb[7].mxu0  ;;  %v3115_v33 = vsel %vm2963_vm7, %v3067_v47, 0.0  ;;  %v2917_v41 = vmul.f32 %v4377_v13, %v2686_v59 }
 0x18a   : > { %v3908_v44 = vpack.c.bf16 %v4382_v10, %v4382_v10  ;;  %v4384_v18 = vadd.f32 %v2192_v34, %v5515_v24  ;;  %v3117_v60 = vadd.f32 %v3116_v11, %v3115_v33  ;;  %v3070_v22 = vmul.f32 %v4379_v57, %v2918_v37 }
 0x18b   : > { %3416 = vst.msk [vmem:[%s5615_s16 + $0x18] sm:$0xf] %vm3409_vm6, %v3910_v31  ;;  %v3911_v56 = vpack.c.bf16 %v4383_v38, %v4383_v38  ;;  %v2967_v35 = vsel %vm2963_vm7, %v2917_v41, 0.0  ;;  %v3069_v46 = vmul.f32 %v4377_v13, %v2917_v41  ;;  %v4311_v49 = vpop.f32.mrb[52].mxu1  ;;  %v2969_v15 = vsel %vm2963_vm7, %v2918_v37, 0.0 }
 0x18c   : > { %3414 = vst.msk [vmem:[%s5615_s16 + $0x10] sm:$0xf] %vm3409_vm6, %v3908_v44  ;;  %v3909_v40 = vpack.c.bf16 %v4384_v18, %v4384_v18  ;;  %v2968_v24 = vadd.f32 %v2967_v35, %v2966_v45  ;;  %v2920_v31 = vmul.f32 %v4384_v18, %v4311_v49  ;;  %v2696_v47 = vpop.f32.mrb[53].mxu1  ;;  %v3120_v57 = vsel %vm2963_vm7, %v3070_v22, 0.0 }
 0x18d   : > { %3417 = vst.msk [vmem:[%s5615_s16 + $0x1c] sm:$0xf] %vm3409_vm6, %v3911_v56  ;;  %v3118_v11 = vsel %vm2963_vm7, %v3069_v46, 0.0  ;;  %v2919_v59 = vmul.f32 %v4382_v10, %v2696_v47 }
 0x18e   : > { %3415 = vst.msk [vmem:[%s5615_s16 + $0x14] sm:$0xf] %vm3409_vm6, %v3909_v40  ;;  %v4263_v34 = vpop.f32.mrb[8].mxu0  ;;  %v3119_v13 = vadd.f32 %v3118_v11, %v3117_v60  ;;  %v3072_v56 = vmul.f32 %v4384_v18, %v2920_v31  ;;  %v2970_v41 = vadd.f32 %v2969_v15, %v2968_v24 }
 0x18f   : > { %v5654_v44 = vadd.f32 %v4263_v34, %v5524_v17  ;;  %v2205_v33 = vpop.f32.mrb[9].mxu0  ;;  %v2971_v35 = vsel %vm2963_vm7, %v2919_v59, 0.0  ;;  %v3071_v37 = vmul.f32 %v4382_v10, %v2919_v59  ;;  %v4314_v17 = vpop.f32.mrb[54].mxu1  ;;  %v2973_v34 = vsel %vm2963_vm7, %v2920_v31, 0.0 }
 0x190   : > { %v4264_v40 = vpop.f32.mrb[10].mxu0  ;;  %v4386_v46 = vadd.f32 %v2205_v33, %v5526_v53  ;;  %v2972_v47 = vadd.f32 %v2971_v35, %v2970_v41  ;;  %v3121_v22 = vadd.f32 %v3120_v57, %v3119_v13  ;;  %v2706_v18 = vpop.f32.mrb[55].mxu1  ;;  %v2922_v11 = vmul.f32 %v4383_v38, %v4314_v17 }
 0x191   : > { %v3914_v45 = vpack.c.bf16 %v5654_v44, %v5654_v44  ;;  %v2208_v49 = vpop.f32.mrb[11].mxu0  ;;  %v4387_v60 = vadd.f32 %v4264_v40, %v5529_v39  ;;  %v3122_v24 = vsel %vm2963_vm7, %v3071_v37, 0.0  ;;  %v2921_v33 = vmul.f32 %v5631_v16, %v2706_v18 }
 0x192   : > { %v3912_v15 = vpack.c.bf16 %v4386_v46, %v4386_v46  ;;  %v4388_v10 = vadd.f32 %v2208_v49, %v5533_v23  ;;  %v3123_v53 = vadd.f32 %v3122_v24, %v3121_v22  ;;  %v2974_v31 = vadd.f32 %v2973_v34, %v2972_v47 }
 0x193   : > { %3420 = vst.msk [vmem:[%s5615_s16 + $0x28] sm:$0xf] %vm3409_vm6, %v3914_v45  ;;  %v3915_v59 = vpack.c.bf16 %v4387_v60, %v4387_v60  ;;  %v3124_v57 = vsel %vm2963_vm7, %v3072_v56, 0.0  ;;  %v3074_v13 = vmul.f32 %v4383_v38, %v2922_v11  ;;  %v4317_v41 = vpop.f32.mrb[56].mxu1  ;;  %v2975_v40 = vsel %vm2963_vm7, %v2921_v33, 0.0 }
 0x194   : > { %3418 = vst.msk [vmem:[%s5615_s16 + $0x20] sm:$0xf] %vm3409_vm6, %v3912_v15  ;;  %v3913_v39 = vpack.c.bf16 %v4388_v10, %v4388_v10  ;;  %v3073_v23 = vmul.f32 %v5631_v16, %v2921_v33  ;;  %v3125_v45 = vadd.f32 %v3124_v57, %v3123_v53  ;;  %v2924_v35 = vmul.f32 %v4388_v10, %v4317_v41  ;;  %v2716_v49 = vpop.f32.mrb[57].mxu1 }
 0x195   : > { %3421 = vst.msk [vmem:[%s5615_s16 + $0x2c] sm:$0xf] %vm3409_vm6, %v3915_v59  ;;  %v2976_v17 = vadd.f32 %v2975_v40, %v2974_v31  ;;  %v2923_v34 = vmul.f32 %v4386_v46, %v2716_v49  ;;  %v2977_v38 = vsel %vm2963_vm7, %v2922_v11, 0.0  ;;  %v3128_v57 = vsel %vm2963_vm7, %v3074_v13, 0.0 }
 0x196   : > { %v4267_v37 = vpop.f32.mrb[12].mxu0  ;;  %3419 = vst.msk [vmem:[%s5615_s16 + $0x24] sm:$0xf] %vm3409_vm6, %v3913_v39  ;;  %v3126_v22 = vsel %vm2963_vm7, %v3073_v23, 0.0  ;;  %v3076_v18 = vmul.f32 %v4388_v10, %v2924_v35 }
 0x197   : > { %v5678_v56 = vadd.f32 %v4267_v37, %v5539_v2  ;;  %v2221_v47 = vpop.f32.mrb[13].mxu0  ;;  %v3127_v15 = vadd.f32 %v3126_v22, %v3125_v45  ;;  %v2978_v59 = vadd.f32 %v2977_v38, %v2976_v17  ;;  %v2979_v2 = vsel %vm2963_vm7, %v2923_v34, 0.0  ;;  %v4320_v31 = vpop.f32.mrb[58].mxu1 }
 0x198   : > { %v4390_v16 = vadd.f32 %v2221_v47, %v5541_v6  ;;  %v4268_v24 = vpop.f32.mrb[14].mxu0  ;;  %v3075_v11 = vmul.f32 %v4386_v46, %v2923_v34  ;;  %v2726_v10 = vpop.f32.mrb[59].mxu1  ;;  %v2926_v45 = vmul.f32 %v4387_v60, %v4320_v31  ;;  %v2981_v37 = vsel %vm2963_vm7, %v2924_v35, 0.0 }
 0x199   : > { %v3918_v53 = vpack.c.bf16 %v5678_v56, %v5678_v56  ;;  %v2224_v33 = vpop.f32.mrb[15].mxu0  ;;  %v4391_v41 = vadd.f32 %v4268_v24, %v5544_v27  ;;  %v2980_v6 = vadd.f32 %v2979_v2, %v2978_v59  ;;  %v3129_v40 = vadd.f32 %v3128_v57, %v3127_v15 }
 0x19a   : > { %v3916_v39 = vpack.c.bf16 %v4390_v16, %v4390_v16  ;;  %v4392_v23 = vadd.f32 %v2224_v33, %v5546_v7  ;;  %v3130_v49 = vsel %vm2963_vm7, %v3075_v11, 0.0  ;;  %v2925_v13 = vmul.f32 %v5654_v44, %v2726_v10 }
 0x19b   : > { %3424 = vst.msk [vmem:[%s5615_s16 + $0x38] sm:$0xf] %vm3409_vm6, %v3918_v53  ;;  %v3919_v46 = vpack.c.bf16 %v4391_v41, %v4391_v41  ;;  %v3132_v27 = vsel %vm2963_vm7, %v3076_v18, 0.0  ;;  %v3131_v17 = vadd.f32 %v3130_v49, %v3129_v40  ;;  %v3078_v47 = vmul.f32 %v4387_v60, %v2926_v45  ;;  %v4323_v38 = vpop.f32.mrb[60].mxu1 }
 0x19c   : > { %3422 = vst.msk [vmem:[%s5615_s16 + $0x30] sm:$0xf] %vm3409_vm6, %v3916_v39  ;;  %v3917_v34 = vpack.c.bf16 %v4392_v23, %v4392_v23  ;;  %v2982_v7 = vadd.f32 %v2981_v37, %v2980_v6  ;;  %v2983_v22 = vsel %vm2963_vm7, %v2925_v13, 0.0  ;;  %v3077_v35 = vmul.f32 %v5654_v44, %v2925_v13  ;;  %v2736_v53 = vpop.f32.mrb[61].mxu1 }
 0x19d   : > { %3425 = vst.msk [vmem:[%s5615_s16 + $0x3c] sm:$0xf] %vm3409_vm6, %v3919_v46  ;;  %v2928_v24 = vmul.f32 %v4392_v23, %v4323_v38  ;;  %v2985_v59 = vsel %vm2963_vm7, %v2926_v45, 0.0  ;;  %v3133_v2 = vadd.f32 %v3132_v27, %v3131_v17  ;;  %v2927_v60 = vmul.f32 %v4390_v16, %v2736_v53 }
 0x19e   : > { %v4271_v15 = vpop.f32.mrb[16].mxu0  ;;  %3423 = vst.msk [vmem:[%s5615_s16 + $0x34] sm:$0xf] %vm3409_vm6, %v3917_v34  ;;  %v3136_v31 = vsel %vm2963_vm7, %v3078_v47, 0.0  ;;  %v2984_v57 = vadd.f32 %v2983_v22, %v2982_v7  ;;  %v3134_v11 = vsel %vm2963_vm7, %v3077_v35, 0.0 }
 0x19f   : > { %v5705_v18 = vadd.f32 %v4271_v15, %v5548_v4  ;;  %v2237_v33 = vpop.f32.mrb[17].mxu0  ;;  %v3080_v44 = vmul.f32 %v4392_v23, %v2928_v24  ;;  %v3135_v10 = vadd.f32 %v3134_v11, %v3133_v2  ;;  %v2987_v40 = vsel %vm2963_vm7, %v2927_v60, 0.0  ;;  %v4326_v4 = vpop.f32.mrb[62].mxu1 }
 0x1a0   : > { %v4272_v39 = vpop.f32.mrb[18].mxu0  ;;  %v3079_v45 = vmul.f32 %v4390_v16, %v2927_v60  ;;  %v2989_v49 = vsel %vm2963_vm7, %v2928_v24, 0.0  ;;  %v2986_v46 = vadd.f32 %v2985_v59, %v2984_v57  ;;  %v4394_v13 = vadd.f32 %v2237_v33, %v5550_v25  ;;  %v2746_v17 = vpop.f32.mrb[63].mxu1 }
 0x1a1   : > { %v3922_v6 = vpack.c.bf16 %v5705_v18, %v5705_v18  ;;  %v2240_v37 = vpop.f32.mrb[19].mxu0  ;;  %v4395_v27 = vadd.f32 %v4272_v39, %v5552_v32  ;;  %v3137_v23 = vadd.f32 %v3136_v31, %v3135_v10  ;;  %v2930_v16 = vmul.f32 %v4391_v41, %v4326_v4 }
 0x1a2   : > { %v3138_v34 = vsel %vm2963_vm7, %v3079_v45, 0.0  ;;  %v4396_v47 = vadd.f32 %v2240_v37, %v5554_v42  ;;  %v2988_v38 = vadd.f32 %v2987_v40, %v2986_v46  ;;  %v3920_v7 = vpack.c.bf16 %v4394_v13, %v4394_v13 }
 0x1a3   : > { %3428 = vst.msk [vmem:[%s5615_s16 + $0x48] sm:$0xf] %vm3409_vm6, %v3922_v6  ;;  %v3923_v22 = vpack.c.bf16 %v4395_v27, %v4395_v27  ;;  %v2929_v35 = vmul.f32 %v5678_v56, %v2746_v17  ;;  %v3140_v25 = vsel %vm2963_vm7, %v3080_v44, 0.0  ;;  %v3139_v32 = vadd.f32 %v3138_v34, %v3137_v23  ;;  %v4329_v53 = vpop.f32.mrb[64].mxu1 }
 0x1a4   : > { %v3921_v24 = vpack.c.bf16 %v4396_v47, %v4396_v47  ;;  %v3082_v15 = vmul.f32 %v4391_v41, %v2930_v16  ;;  %3426 = vst.msk [vmem:[%s5615_s16 + $0x40] sm:$0xf] %vm3409_vm6, %v3920_v7  ;;  %v2990_v59 = vadd.f32 %v2989_v49, %v2988_v38  ;;  %v2932_v60 = vmul.f32 %v4396_v47, %v4329_v53  ;;  %v2756_v31 = vpop.f32.mrb[65].mxu1 }
 0x1a5   : > { %3429 = vst.msk [vmem:[%s5615_s16 + $0x4c] sm:$0xf] %vm3409_vm6, %v3923_v22  ;;  %v2991_v42 = vsel %vm2963_vm7, %v2929_v35, 0.0  ;;  %v3081_v2 = vmul.f32 %v5678_v56, %v2929_v35  ;;  %v2993_v57 = vsel %vm2963_vm7, %v2930_v16, 0.0  ;;  %v3141_v11 = vadd.f32 %v3140_v25, %v3139_v32 }
 0x1a6   : > { %v4275_v33 = vpop.f32.mrb[20].mxu0  ;;  %3427 = vst.msk [vmem:[%s5615_s16 + $0x44] sm:$0xf] %vm3409_vm6, %v3921_v24  ;;  %v2931_v44 = vmul.f32 %v4394_v13, %v2756_v31  ;;  %v3144_v10 = vsel %vm2963_vm7, %v3082_v15, 0.0  ;;  %v2992_v6 = vadd.f32 %v2991_v42, %v2990_v59  ;;  %v3084_v56 = vmul.f32 %v4396_v47, %v2932_v60 }
 0x1a7   : > { %v5731_v41 = vadd.f32 %v4275_v33, %v5556_v36  ;;  %v2253_v39 = vpop.f32.mrb[21].mxu0  ;;  %v3142_v40 = vsel %vm2963_vm7, %v3081_v2, 0.0  ;;  %v4332_v36 = vpop.f32.mrb[66].mxu1  ;;  %v2997_v23 = vsel %vm2963_vm7, %v2932_v60, 0.0 }
 0x1a8   : > { %v4276_v45 = vpop.f32.mrb[22].mxu0  ;;  %v3143_v37 = vadd.f32 %v3142_v40, %v3141_v11  ;;  %v2995_v49 = vsel %vm2963_vm7, %v2931_v44, 0.0  ;;  %v3083_v46 = vmul.f32 %v4394_v13, %v2931_v44  ;;  %v2994_v34 = vadd.f32 %v2993_v57, %v2992_v6  ;;  %v2766_v7 = vpop.f32.mrb[67].mxu1 }
 0x1a9   : > { %v3926_v4 = vpack.c.bf16 %v5731_v41, %v5731_v41  ;;  %v2256_v17 = vpop.f32.mrb[23].mxu0  ;;  %v4398_v16 = vadd.f32 %v2253_v39, %v5558_v51  ;;  %v4399_v38 = vadd.f32 %v4276_v45, %v5560_v63  ;;  %v2934_v13 = vmul.f32 %v4395_v27, %v4332_v36 }
 0x1aa   : > { %v3145_v47 = vadd.f32 %v3144_v10, %v3143_v37  ;;  %v3146_v22 = vsel %vm2963_vm7, %v3083_v46, 0.0  ;;  %v4400_v35 = vadd.f32 %v2256_v17, %v5562_v1  ;;  %v2996_v25 = vadd.f32 %v2995_v49, %v2994_v34 }
 0x1ab   : > { %3432 = vst.msk [vmem:[%s5615_s16 + $0x58] sm:$0xf] %vm3409_vm6, %v3926_v4  ;;  %v3924_v32 = vpack.c.bf16 %v4398_v16, %v4398_v16  ;;  %v3927_v24 = vpack.c.bf16 %v4399_v38, %v4399_v38  ;;  %v2933_v15 = vmul.f32 %v5705_v18, %v2766_v7  ;;  %v3148_v51 = vsel %vm2963_vm7, %v3084_v56, 0.0  ;;  %v4335_v42 = vpop.f32.mrb[68].mxu1 }
 0x1ac   : > { %v3147_v63 = vadd.f32 %v3146_v22, %v3145_v47  ;;  %v3925_v53 = vpack.c.bf16 %v4400_v35, %v4400_v35  ;;  %v3086_v59 = vmul.f32 %v4395_v27, %v2934_v13  ;;  %v2998_v2 = vadd.f32 %v2997_v23, %v2996_v25  ;;  %v2776_v57 = vpop.f32.mrb[69].mxu1 }
 0x1ad   : > { %3430 = vst.msk [vmem:[%s5615_s16 + $0x50] sm:$0xf] %vm3409_vm6, %v3924_v32  ;;  %3433 = vst.msk [vmem:[%s5615_s16 + $0x5c] sm:$0xf] %vm3409_vm6, %v3927_v24  ;;  %v2999_v1 = vsel %vm2963_vm7, %v2933_v15, 0.0  ;;  %v3085_v60 = vmul.f32 %v5705_v18, %v2933_v15  ;;  %v2936_v33 = vmul.f32 %v4400_v35, %v4335_v42  ;;  %v3001_v11 = vsel %vm2963_vm7, %v2934_v13, 0.0 }
 0x1ae   : > { %v4279_v31 = vpop.f32.mrb[24].mxu0  ;;  %3431 = vst.msk [vmem:[%s5615_s16 + $0x54] sm:$0xf] %vm3409_vm6, %v3925_v53  ;;  %v3149_v44 = vadd.f32 %v3148_v51, %v3147_v63  ;;  %v2935_v39 = vmul.f32 %v4398_v16, %v2776_v57  ;;  %v3152_v6 = vsel %vm2963_vm7, %v3086_v59, 0.0  ;;  %v3000_v40 = vadd.f32 %v2999_v1, %v2998_v2 }
 0x1af   : > { %v5757_v27 = vadd.f32 %v4279_v31, %v5564_v14  ;;  %v2269_v10 = vpop.f32.mrb[25].mxu0  ;;  %v3150_v56 = vsel %vm2963_vm7, %v3085_v60, 0.0  ;;  %v3088_v18 = vmul.f32 %v4400_v35, %v2936_v33  ;;  %v4338_v14 = vpop.f32.mrb[70].mxu1  ;;  %v3005_v36 = vsel %vm2963_vm7, %v2936_v33, 0.0 }
 0x1b0   : > { %v4280_v45 = vpop.f32.mrb[26].mxu0  ;;  %v3151_v37 = vadd.f32 %v3150_v56, %v3149_v44  ;;  %v3003_v49 = vsel %vm2963_vm7, %v2935_v39, 0.0  ;;  %v3087_v46 = vmul.f32 %v4398_v16, %v2935_v39  ;;  %v3002_v23 = vadd.f32 %v3001_v11, %v3000_v40  ;;  %v2786_v47 = vpop.f32.mrb[71].mxu1 }
 0x1b1   : > { %v3930_v4 = vpack.c.bf16 %v5757_v27, %v5757_v27  ;;  %v2272_v17 = vpop.f32.mrb[27].mxu0  ;;  %v4402_v34 = vadd.f32 %v2269_v10, %v5566_v48  ;;  %v4403_v7 = vadd.f32 %v4280_v45, %v5568_v30  ;;  %v2938_v16 = vmul.f32 %v4399_v38, %v4338_v14 }
 0x1b2   : > { %v3153_v22 = vadd.f32 %v3152_v6, %v3151_v37  ;;  %v3154_v35 = vsel %vm2963_vm7, %v3087_v46, 0.0  ;;  %v4404_v13 = vadd.f32 %v2272_v17, %v5570_v29  ;;  %v3004_v25 = vadd.f32 %v3003_v49, %v3002_v23 }
 0x1b3   : > { %3436 = vst.msk [vmem:[%s5615_s16 + $0x68] sm:$0xf] %vm3409_vm6, %v3930_v4  ;;  %v3928_v32 = vpack.c.bf16 %v4402_v34, %v4402_v34  ;;  %v3931_v24 = vpack.c.bf16 %v4403_v7, %v4403_v7  ;;  %v2937_v15 = vmul.f32 %v5731_v41, %v2786_v47  ;;  %v3156_v48 = vsel %vm2963_vm7, %v3088_v18, 0.0  ;;  %v4341_v53 = vpop.f32.mrb[72].mxu1 }
 0x1b4   : > { %v3155_v30 = vadd.f32 %v3154_v35, %v3153_v22  ;;  %v3929_v51 = vpack.c.bf16 %v4404_v13, %v4404_v13  ;;  %v3090_v63 = vmul.f32 %v4399_v38, %v2938_v16  ;;  %v3006_v59 = vadd.f32 %v3005_v36, %v3004_v25  ;;  %v2796_v60 = vpop.f32.mrb[73].mxu1 }
 0x1b5   : > { %3434 = vst.msk [vmem:[%s5615_s16 + $0x60] sm:$0xf] %vm3409_vm6, %v3928_v32  ;;  %3437 = vst.msk [vmem:[%s5615_s16 + $0x6c] sm:$0xf] %vm3409_vm6, %v3931_v24  ;;  %v3007_v29 = vsel %vm2963_vm7, %v2937_v15, 0.0  ;;  %v3089_v42 = vmul.f32 %v5731_v41, %v2937_v15  ;;  %v2940_v2 = vmul.f32 %v4404_v13, %v4341_v53  ;;  %v3009_v33 = vsel %vm2963_vm7, %v2938_v16, 0.0 }
 0x1b6   : > { %v4283_v1 = vpop.f32.mrb[28].mxu0  ;;  %3435 = vst.msk [vmem:[%s5615_s16 + $0x64] sm:$0xf] %vm3409_vm6, %v3929_v51  ;;  %v3157_v31 = vadd.f32 %v3156_v48, %v3155_v30  ;;  %v2939_v57 = vmul.f32 %v4402_v34, %v2796_v60  ;;  %v3160_v44 = vsel %vm2963_vm7, %v3090_v63, 0.0  ;;  %v3008_v39 = vadd.f32 %v3007_v29, %v3006_v59 }
 0x1b7   : > { %v5783_v38 = vadd.f32 %v4283_v1, %v5572_v0  ;;  %v2285_v11 = vpop.f32.mrb[29].mxu0  ;;  %v3158_v10 = vsel %vm2963_vm7, %v3089_v42, 0.0  ;;  %v3092_v41 = vmul.f32 %v4404_v13, %v2940_v2  ;;  %v4344_v0 = vpop.f32.mrb[74].mxu1  ;;  %v3013_v4 = vsel %vm2963_vm7, %v2940_v2, 0.0 }
 0x1b8   : > { %v4284_v6 = vpop.f32.mrb[30].mxu0  ;;  %v3159_v40 = vadd.f32 %v3158_v10, %v3157_v31  ;;  %v3011_v18 = vsel %vm2963_vm7, %v2939_v57, 0.0  ;;  %v3091_v45 = vmul.f32 %v4402_v34, %v2939_v57  ;;  %v3010_v49 = vadd.f32 %v3009_v33, %v3008_v39  ;;  %v2806_v14 = vpop.f32.mrb[75].mxu1 }
 0x1b9   : > { %v3934_v56 = vpack.c.bf16 %v5783_v38, %v5783_v38  ;;  %v2288_v37 = vpop.f32.mrb[31].mxu0  ;;  %v4406_v46 = vadd.f32 %v2285_v11, %v5574_v61  ;;  %v4407_v17 = vadd.f32 %v4284_v6, %v5576_v21  ;;  %v2942_v34 = vmul.f32 %v4403_v7, %v4344_v0 }
 0x1ba   : > { %v3161_v36 = vadd.f32 %v3160_v44, %v3159_v40  ;;  %v3162_v23 = vsel %vm2963_vm7, %v3091_v45, 0.0  ;;  %v4408_v47 = vadd.f32 %v2288_v37, %v5578_v20  ;;  %v3012_v22 = vadd.f32 %v3011_v18, %v3010_v49 }
 0x1bb   : > { %3440 = vst.msk [vmem:[%s5615_s16 + $0x78] sm:$0xf] %vm3409_vm6, %v3934_v56  ;;  %v3932_v35 = vpack.c.bf16 %v4406_v46, %v4406_v46  ;;  %v3935_v13 = vpack.c.bf16 %v4407_v17, %v4407_v17  ;;  %v2941_v16 = vmul.f32 %v5757_v27, %v2806_v14  ;;  %v3164_v61 = vsel %vm2963_vm7, %v3092_v41, 0.0  ;;  %v4347_v24 = vpop.f32.mrb[76].mxu1 }
 0x1bc   : > { %v3163_v21 = vadd.f32 %v3162_v23, %v3161_v36  ;;  %v3933_v25 = vpack.c.bf16 %v4408_v47, %v4408_v47  ;;  %v3094_v32 = vmul.f32 %v4403_v7, %v2942_v34  ;;  %v3014_v15 = vadd.f32 %v3013_v4, %v3012_v22  ;;  %v2816_v63 = vpop.f32.mrb[77].mxu1 }
 0x1bd   : > { %3438 = vst.msk [vmem:[%s5615_s16 + $0x70] sm:$0xf] %vm3409_vm6, %v3932_v35  ;;  %3441 = vst.msk [vmem:[%s5615_s16 + $0x7c] sm:$0xf] %vm3409_vm6, %v3935_v13  ;;  %v3015_v20 = vsel %vm2963_vm7, %v2941_v16, 0.0  ;;  %v3093_v48 = vmul.f32 %v5757_v27, %v2941_v16  ;;  %v2944_v30 = vmul.f32 %v4408_v47, %v4347_v24  ;;  %v3017_v53 = vsel %vm2963_vm7, %v2942_v34, 0.0 }
 0x1be   : > { %v4287_v51 = vpop.f32.mrb[32].mxu0  ;;  %3439 = vst.msk [vmem:[%s5615_s16 + $0x74] sm:$0xf] %vm3409_vm6, %v3933_v25  ;;  %v3165_v59 = vadd.f32 %v3164_v61, %v3163_v21  ;;  %v2943_v29 = vmul.f32 %v4406_v46, %v2816_v63  ;;  %v3168_v2 = vsel %vm2963_vm7, %v3094_v32, 0.0  ;;  %v3016_v1 = vadd.f32 %v3015_v20, %v3014_v15 }
 0x1bf   : > { %v5809_v7 = vadd.f32 %v4287_v51, %v5580_v5  ;;  %v2301_v42 = vpop.f32.mrb[33].mxu0  ;;  %v3166_v60 = vsel %vm2963_vm7, %v3093_v48, 0.0  ;;  %v3096_v27 = vmul.f32 %v4408_v47, %v2944_v30  ;;  %v4350_v5 = vpop.f32.mrb[78].mxu1  ;;  %v3021_v10 = vsel %vm2963_vm7, %v2944_v30, 0.0 }
 0x1c0   : > { %v4288_v33 = vpop.f32.mrb[34].mxu0  ;;  %v3167_v31 = vadd.f32 %v3166_v60, %v3165_v59  ;;  %v3019_v11 = vsel %vm2963_vm7, %v2943_v29, 0.0  ;;  %v3095_v44 = vmul.f32 %v4406_v46, %v2943_v29  ;;  %v3018_v41 = vadd.f32 %v3017_v53, %v3016_v1  ;;  %v2826_v56 = vpop.f32.mrb[79].mxu1 }
 0x1c1   : > { %v3938_v57 = vpack.c.bf16 %v5809_v7, %v5809_v7  ;;  %v2304_v39 = vpop.f32.mrb[35].mxu0  ;;  %v4410_v6 = vadd.f32 %v2301_v42, %v5582_v9  ;;  %v4411_v40 = vadd.f32 %v4288_v33, %v5584_v12  ;;  %v2946_v0 = vmul.f32 %v4407_v17, %v4350_v5 }
 0x1c2   : > { %v3169_v18 = vadd.f32 %v3168_v2, %v3167_v31  ;;  %v3170_v45 = vsel %vm2963_vm7, %v3095_v44, 0.0  ;;  %v4412_v37 = vadd.f32 %v2304_v39, %v5586_v55  ;;  %v3020_v4 = vadd.f32 %v3019_v11, %v3018_v41 }
 0x1c3   : > { %3444 = vst.msk [vmem:[%s5615_s16 + $0x88] sm:$0xf] %vm3409_vm6, %v3938_v57  ;;  %v3936_v49 = vpack.c.bf16 %v4410_v6, %v4410_v6  ;;  %v3939_v46 = vpack.c.bf16 %v4411_v40, %v4411_v40  ;;  %v2945_v14 = vmul.f32 %v5783_v38, %v2826_v56  ;;  %v3172_v9 = vsel %vm2963_vm7, %v3096_v27, 0.0  ;;  %v4353_v47 = vpop.f32.mrb[80].mxu1 }
 0x1c4   : > { %v3171_v12 = vadd.f32 %v3170_v45, %v3169_v18  ;;  %v3937_v36 = vpack.c.bf16 %v4412_v37, %v4412_v37  ;;  %v3098_v23 = vmul.f32 %v4407_v17, %v2946_v0  ;;  %v3022_v34 = vadd.f32 %v3021_v10, %v3020_v4  ;;  %v2836_v16 = vpop.f32.mrb[81].mxu1 }
 0x1c5   : > { %3442 = vst.msk [vmem:[%s5615_s16 + $0x80] sm:$0xf] %vm3409_vm6, %v3936_v49  ;;  %3445 = vst.msk [vmem:[%s5615_s16 + $0x8c] sm:$0xf] %vm3409_vm6, %v3939_v46  ;;  %v3023_v55 = vsel %vm2963_vm7, %v2945_v14, 0.0  ;;  %v3097_v22 = vmul.f32 %v5783_v38, %v2945_v14  ;;  %v2948_v35 = vmul.f32 %v4412_v37, %v4353_v47  ;;  %v3025_v61 = vsel %vm2963_vm7, %v2946_v0, 0.0 }
 0x1c6   : > { %v4291_v13 = vpop.f32.mrb[36].mxu0  ;;  %3443 = vst.msk [vmem:[%s5615_s16 + $0x84] sm:$0xf] %vm3409_vm6, %v3937_v36  ;;  %v3173_v21 = vadd.f32 %v3172_v9, %v3171_v12  ;;  %v2947_v25 = vmul.f32 %v4410_v6, %v2836_v16  ;;  %v3176_v24 = vsel %vm2963_vm7, %v3098_v23, 0.0  ;;  %v3024_v15 = vadd.f32 %v3023_v55, %v3022_v34 }
 0x1c7   : > { %v5835_v17 = vadd.f32 %v4291_v13, %v5588_v26  ;;  %v2317_v32 = vpop.f32.mrb[37].mxu0  ;;  %v3174_v20 = vsel %vm2963_vm7, %v3097_v22, 0.0  ;;  %v3100_v38 = vmul.f32 %v4412_v37, %v2948_v35  ;;  %v4356_v26 = vpop.f32.mrb[82].mxu1  ;;  %v3029_v29 = vsel %vm2963_vm7, %v2948_v35, 0.0 }
 0x1c8   : > { %v4292_v48 = vpop.f32.mrb[38].mxu0  ;;  %v3175_v30 = vadd.f32 %v3174_v20, %v3173_v21  ;;  %v3027_v63 = vsel %vm2963_vm7, %v2947_v25, 0.0  ;;  %v3099_v53 = vmul.f32 %v4410_v6, %v2947_v25  ;;  %v3026_v42 = vadd.f32 %v3025_v61, %v3024_v15  ;;  %v2846_v60 = vpop.f32.mrb[83].mxu1 }
 0x1c9   : > { %v3942_v51 = vpack.c.bf16 %v5835_v17, %v5835_v17  ;;  %v2320_v59 = vpop.f32.mrb[39].mxu0  ;;  %v4414_v2 = vadd.f32 %v2317_v32, %v5590_v3  ;;  %v4415_v1 = vadd.f32 %v4292_v48, %v5592_v50  ;;  %v2950_v57 = vmul.f32 %v4411_v40, %v4356_v26 }
 0x1ca   : > { %v3177_v27 = vadd.f32 %v3176_v24, %v3175_v30  ;;  %v3178_v33 = vsel %vm2963_vm7, %v3099_v53, 0.0  ;;  %v4416_v31 = vadd.f32 %v2320_v59, %v5594_v58  ;;  %v3028_v11 = vadd.f32 %v3027_v63, %v3026_v42 }
 0x1cb   : > { %3448 = vst.msk [vmem:[%s5615_s16 + $0x98] sm:$0xf] %vm3409_vm6, %v3942_v51  ;;  %v3940_v44 = vpack.c.bf16 %v4414_v2, %v4414_v2  ;;  %v3943_v39 = vpack.c.bf16 %v4415_v1, %v4415_v1  ;;  %v2949_v5 = vmul.f32 %v5809_v7, %v2846_v60  ;;  %v3180_v3 = vsel %vm2963_vm7, %v3100_v38, 0.0  ;;  %v4359_v6 = vpop.f32.mrb[84].mxu1 }
 0x1cc   : > { %v3179_v50 = vadd.f32 %v3178_v33, %v3177_v27  ;;  %v3941_v10 = vpack.c.bf16 %v4416_v31, %v4416_v31  ;;  %v3102_v41 = vmul.f32 %v4411_v40, %v2950_v57  ;;  %v3030_v56 = vadd.f32 %v3029_v29, %v3028_v11  ;;  %v2856_v0 = vpop.f32.mrb[85].mxu1 }
 0x1cd   : > { %3446 = vst.msk [vmem:[%s5615_s16 + $0x90] sm:$0xf] %vm3409_vm6, %v3940_v44  ;;  %3449 = vst.msk [vmem:[%s5615_s16 + $0x9c] sm:$0xf] %vm3409_vm6, %v3943_v39  ;;  %v3031_v58 = vsel %vm2963_vm7, %v2949_v5, 0.0  ;;  %v3101_v18 = vmul.f32 %v5809_v7, %v2949_v5  ;;  %v2952_v45 = vmul.f32 %v4416_v31, %v4359_v6  ;;  %v3033_v4 = vsel %vm2963_vm7, %v2950_v57, 0.0 }
 0x1ce   : > { %v4295_v37 = vpop.f32.mrb[40].mxu0  ;;  %3447 = vst.msk [vmem:[%s5615_s16 + $0x94] sm:$0xf] %vm3409_vm6, %v3941_v10  ;;  %v3181_v49 = vadd.f32 %v3180_v3, %v3179_v50  ;;  %v2951_v46 = vmul.f32 %v4414_v2, %v2856_v0  ;;  %v3184_v9 = vsel %vm2963_vm7, %v3102_v41, 0.0  ;;  %v3032_v12 = vadd.f32 %v3031_v58, %v3030_v56 }
 0x1cf   : > { %v5861_v40 = vadd.f32 %v4295_v37, %v5596_v28  ;;  %v2333_v14 = vpop.f32.mrb[41].mxu0  ;;  %v3182_v36 = vsel %vm2963_vm7, %v3101_v18, 0.0  ;;  %v3104_v7 = vmul.f32 %v4416_v31, %v2952_v45  ;;  %v4362_v28 = vpop.f32.mrb[86].mxu1  ;;  %v3037_v13 = vsel %vm2963_vm7, %v2952_v45, 0.0 }
 0x1d0   : > { %v4296_v23 = vpop.f32.mrb[42].mxu0  ;;  %v3183_v47 = vadd.f32 %v3182_v36, %v3181_v49  ;;  %v3035_v55 = vsel %vm2963_vm7, %v2951_v46, 0.0  ;;  %v3103_v22 = vmul.f32 %v4414_v2, %v2951_v46  ;;  %v3034_v16 = vadd.f32 %v3033_v4, %v3032_v12  ;;  %v2866_v25 = vpop.f32.mrb[87].mxu1  ;;  %v6046_v49 = vld [vmem:[#allocation2_spill] sm:$0xff] }
 0x1d1   : > { %v3946_v34 = vpack.c.bf16 %v5861_v40, %v5861_v40  ;;  %v2336_v35 = vpop.f32.mrb[43].mxu0  ;;  %v4418_v61 = vadd.f32 %v2333_v14, %v5598_v52  ;;  %v4419_v21 = vadd.f32 %v4296_v23, %v5600_v54  ;;  %v2954_v20 = vmul.f32 %v4415_v1, %v4362_v28 }
 0x1d2   : > { %v3185_v32 = vadd.f32 %v3184_v9, %v3183_v47  ;;  %v3186_v24 = vsel %vm2963_vm7, %v3103_v22, 0.0  ;;  %v4420_v15 = vadd.f32 %v2336_v35, %v5602_v8  ;;  %v3036_v38 = vadd.f32 %v3035_v55, %v3034_v16 }
 0x1d3   : > { %3452 = vst.msk [vmem:[%s5615_s16 + $0xa8] sm:$0xf] %vm3409_vm6, %v3946_v34  ;;  %v3944_v48 = vpack.c.bf16 %v4418_v61, %v4418_v61  ;;  %v3947_v30 = vpack.c.bf16 %v4419_v21, %v4419_v21  ;;  %v2953_v51 = vmul.f32 %v5835_v17, %v2866_v25  ;;  %v3188_v52 = vsel %vm2963_vm7, %v3104_v7, 0.0  ;;  %v4365_v59 = vpop.f32.mrb[88].mxu1 }
 0x1d4   : > { %v3187_v54 = vadd.f32 %v3186_v24, %v3185_v32  ;;  %v3945_v63 = vpack.c.bf16 %v4420_v15, %v4420_v15  ;;  %v3106_v53 = vmul.f32 %v4415_v1, %v2954_v20  ;;  %v3038_v26 = vadd.f32 %v3037_v13, %v3036_v38  ;;  %v2876_v60 = vpop.f32.mrb[89].mxu1 }
 0x1d5   : > { %3450 = vst.msk [vmem:[%s5615_s16 + $0xa0] sm:$0xf] %vm3409_vm6, %v3944_v48  ;;  %3453 = vst.msk [vmem:[%s5615_s16 + $0xac] sm:$0xf] %vm3409_vm6, %v3947_v30  ;;  %v3039_v8 = vsel %vm2963_vm7, %v2953_v51, 0.0  ;;  %v3105_v29 = vmul.f32 %v5835_v17, %v2953_v51  ;;  %v2956_v42 = vmul.f32 %v4420_v15, %v4365_v59  ;;  %v3041_v27 = vsel %vm2963_vm7, %v2954_v20, 0.0 }
 0x1d6   : > { %v4299_v2 = vpop.f32.mrb[44].mxu0  ;;  %3451 = vst.msk [vmem:[%s5615_s16 + $0xa4] sm:$0xf] %vm3409_vm6, %v3945_v63  ;;  %v3189_v33 = vadd.f32 %v3188_v52, %v3187_v54  ;;  %v2955_v31 = vmul.f32 %v4418_v61, %v2876_v60  ;;  %v3192_v11 = vsel %vm2963_vm7, %v3106_v53, 0.0  ;;  %v3040_v44 = vadd.f32 %v3039_v8, %v3038_v26 }
 0x1d7   : > { %v5887_v1 = vadd.f32 %v4299_v2, %v5605_v62  ;;  %v2349_v57 = vpop.f32.mrb[45].mxu0  ;;  %v3190_v39 = vsel %vm2963_vm7, %v3105_v29, 0.0  ;;  %v3108_v17 = vmul.f32 %v4420_v15, %v2956_v42  ;;  %v4368_v62 = vpop.f32.mrb[90].mxu1  ;;  %v3045_v56 = vsel %vm2963_vm7, %v2956_v42, 0.0 }
 0x1d8   : > { %v4300_v5 = vpop.f32.mrb[46].mxu0  ;;  %v3191_v3 = vadd.f32 %v3190_v39, %v3189_v33  ;;  %v3043_v10 = vsel %vm2963_vm7, %v2955_v31, 0.0  ;;  %v3107_v41 = vmul.f32 %v4418_v61, %v2955_v31  ;;  %v3042_v58 = vadd.f32 %v3041_v27, %v3040_v44  ;;  %v2886_v37 = vpop.f32.mrb[91].mxu1 }
 0x1d9   : > { %v3950_v50 = vpack.c.bf16 %v5887_v1, %v5887_v1  ;;  %v2352_v6 = vpop.f32.mrb[47].mxu0  ;;  %v4422_v18 = vadd.f32 %v2349_v57, %v5607_v43  ;;  %v4423_v45 = vadd.f32 %v4300_v5, %v5610_v19  ;;  %v2958_v14 = vmul.f32 %v4419_v21, %v4368_v62 }
 0x1da   : > { %v3193_v0 = vadd.f32 %v3192_v11, %v3191_v3  ;;  %v3194_v4 = vsel %vm2963_vm7, %v3107_v41, 0.0  ;;  %v4424_v46 = vadd.f32 %v2352_v6, %v6046_v49  ;;  %v3044_v9 = vadd.f32 %v3043_v10, %v3042_v58 }
 0x1db   : > { %3456 = vst.msk [vmem:[%s5615_s16 + $0xb8] sm:$0xf] %vm3409_vm6, %v3950_v50  ;;  %v3948_v12 = vpack.c.bf16 %v4422_v18, %v4422_v18  ;;  %v3951_v36 = vpack.c.bf16 %v4423_v45, %v4423_v45  ;;  %v2957_v7 = vmul.f32 %v5861_v40, %v2886_v37  ;;  %v3196_v43 = vsel %vm2963_vm7, %v3108_v17, 0.0  ;;  %v4371_v34 = vpop.f32.mrb[92].mxu1 }
 0x1dc   : > { %v3195_v19 = vadd.f32 %v3194_v4, %v3193_v0  ;;  %v3949_v23 = vpack.c.bf16 %v4424_v46, %v4424_v46  ;;  %v3110_v47 = vmul.f32 %v4419_v21, %v2958_v14  ;;  %v3046_v55 = vadd.f32 %v3045_v56, %v3044_v9  ;;  %v2896_v13 = vpop.f32.mrb[93].mxu1 }
 0x1dd   : > { %3454 = vst.msk [vmem:[%s5615_s16 + $0xb0] sm:$0xf] %vm3409_vm6, %v3948_v12  ;;  %3457 = vst.msk [vmem:[%s5615_s16 + $0xbc] sm:$0xf] %vm3409_vm6, %v3951_v36  ;;  %v3047_v22 = vsel %vm2963_vm7, %v2957_v7, 0.0  ;;  %v3109_v35 = vmul.f32 %v5861_v40, %v2957_v7  ;;  %v2960_v28 = vmul.f32 %v4424_v46, %v4371_v34  ;;  %v2959_v61 = vmul.f32 %v4422_v18, %v2896_v13 }
 0x1de   : > { %3455 = vst.msk [vmem:[%s5615_s16 + $0xb4] sm:$0xf] %vm3409_vm6, %v3949_v23  ;;  %v3197_v16 = vadd.f32 %v3196_v43, %v3195_v19  ;;  %v3048_v25 = vadd.f32 %v3047_v22, %v3046_v55  ;;  %v3049_v24 = vsel %vm2963_vm7, %v2958_v14, 0.0  ;;  %v3200_v30 = vsel %vm2963_vm7, %v3110_v47, 0.0 }
 0x1df   : > { %v3198_v32 = vsel %vm2963_vm7, %v3109_v35, 0.0  ;;  %v3112_v21 = vmul.f32 %v4424_v46, %v2960_v28  ;;  %v3051_v20 = vsel %vm2963_vm7, %v2959_v61, 0.0  ;;  %v3111_v38 = vmul.f32 %v4422_v18, %v2959_v61  ;;  %v4374_v48 = vpop.f32.mrb[94].mxu1 }
 0x1e0   : > { %v3199_v15 = vadd.f32 %v3198_v32, %v3197_v16  ;;  %v3050_v40 = vadd.f32 %v3049_v24, %v3048_v25  ;;  %v2962_v51 = vmul.f32 %v4423_v45, %v4374_v48  ;;  %v2906_v52 = vpop.f32.mrb[95].mxu1  ;;  %v3053_v8 = vsel %vm2963_vm7, %v2960_v28, 0.0 }
 0x1e1   : > { %v3202_v63 = vsel %vm2963_vm7, %v3111_v38, 0.0  ;;  %v2961_v53 = vmul.f32 %v5887_v1, %v2906_v52  ;;  %v3204_v60 = vsel %vm2963_vm7, %v3112_v21, 0.0 }
 0x1e2   : > { %v3201_v54 = vadd.f32 %v3200_v30, %v3199_v15  ;;  %v3052_v59 = vadd.f32 %v3051_v20, %v3050_v40  ;;  %v3114_v26 = vmul.f32 %v4423_v45, %v2962_v51  ;;  %v3057_v11 = vsel %vm2963_vm7, %v2962_v51, 0.0 }
 0x1e3   : > { %v3055_v42 = vsel %vm2963_vm7, %v2961_v53, 0.0  ;;  %v3113_v2 = vmul.f32 %v5887_v1, %v2961_v53 }
 0x1e4   : > { %v3203_v29 = vadd.f32 %v3202_v63, %v3201_v54  ;;  %v3054_v27 = vadd.f32 %v3053_v8, %v3052_v59  ;;  %v3208_v39 = vsel %vm2963_vm7, %v3114_v26, 0.0 }
 0x1e5   : > { %v3206_v31 = vsel %vm2963_vm7, %v3113_v2, 0.0 }
 0x1e6   : > { %v3205_v33 = vadd.f32 %v3204_v60, %v3203_v29  ;;  %v3056_v57 = vadd.f32 %v3055_v42, %v3054_v27 }
 0x1e8   : > { %v3207_v44 = vadd.f32 %v3206_v31, %v3205_v33  ;;  %v3058_v17 = vadd.f32 %v3057_v11, %v3056_v57 }
 0x1ea   : > { %v3209_v5 = vadd.f32 %v3208_v39, %v3207_v44  ;;  %v3059_v3 = vrot.slane %v3058_v17, 4 }
 0x1ec   : > { %v3210_v50 = vrot.slane %v3209_v5, 4  ;;  %v3060_v10 = vadd.f32 %v3059_v3, %v3058_v17 }
 0x1ee   : > { %v3211_v1 = vadd.f32 %v3210_v50, %v3209_v5  ;;  %v3061_v41 = vrot.slane %v3060_v10, 2 }
 0x1f0   : > { %v3212_v6 = vrot.slane %v3211_v1, 2  ;;  %v3062_v62 = vadd.f32 %v3061_v41, %v3060_v10 }
 0x1f2   : > { %v3213_v56 = vadd.f32 %v3212_v6, %v3211_v1  ;;  %v3063_v58 = vrot.slane %v3062_v62, 1 }
 0x1f4   : > { %v3214_v18 = vrot.slane %v3213_v56, 1  ;;  %v3064_v45 = vadd.f32 %v3063_v58, %v3062_v62 }
 0x1f6   : > { %v3215_v37 = vadd.f32 %v3214_v18, %v3213_v56  ;;  %3066 = vst.msk [vmem:[%s440_s18] sm:$0x1] %vm3065_vm8, %v3064_v45 }
 0x1f8   : > { %3216 = vst.msk [vmem:[%s446_s21] sm:$0x1] %vm3065_vm8, %v3215_v37 }
 0x1f9 PF: > { %s18_s26 = sadd.s32 1, %s4598_s26   ;;  %s6047_s24 = smov %s4594_s25 }
 0x1fa   : > { %p15_p8 = scmp.ge.s32.totalorder %s18_s26, 4   ;;  %s6048_s25 = smov %s6050_s27 }
 0x1fc   :  { %17 = sbr.rel (!%p15_p8) target bundleno = 2 (0x2), region = 109 }

// kernel: generator_forward.17
= control target key start
LH: loop header
LB: loop body
LE: loop exit
PB: predicated region body
PF: predicated region fallthrough
CT: control target
= control target key end

     0   :  { %13 = vsyncpa [#allocation3], 0  ;;  %s7445_s0 = inlined_call_operand.vmem [shape: bf16[2624,8], index: 0, kind: input, shape index: {}, may-alias: {0,1}]   ;;  %s7446_s1 = inlined_call_operand.vmem [shape: bf16[2624,8], index: 1, kind: input, shape index: {}, may-alias: {0,1}]   ;;  %s7447_s2 = inlined_call_operand.vmem [shape: bf16[4,8,12], index: 2, kind: input, shape index: {}]   ;;  %s7448_s3 = inlined_call_operand.vmem [shape: f32[2560,4], index: 3, kind: input, shape index: {}]   ;;  %s7449_s4 = inlined_call_operand.vmem [shape: f32[4,12], index: 4, kind: input, shape index: {}]   ;;  %s7450_s5 = inlined_call_operand.vmem [shape: f32[2560,12], index: 5, kind: output, shape index: {0}]   ;;  %s7451_s6 = inlined_call_operand.hbm [shape: f32[5,1,12], index: 6, kind: output, shape index: {1}]   ;;  %s7452_s7 = inlined_call_operand.hbm [shape: f32[5,1,12], index: 7, kind: output, shape index: {2}]  }
   0x1   :  { %15 = vsyncpa [#allocation3 + $0x1], 0 }
   0x2   :  { %16 = vsyncpa [#allocation5], 0 }
   0x3   :  { %18 = vsyncpa [#allocation5 + $0x1], 0  ;;  %s5784_s24 = smov 0   ;;  %s5786_s25 = smov 0  }
   0x4   :  { %s5788_s26 = smov 0   ;;  %s5790_s27 = smov 0  }
   0x5   :  { %s5792_s28 = smov 0   ;;  %s5794_s29 = smov 0  }
   0x6 LB: > { %s4382_s30 = sadd.s32 4294967295, %s5740_s29   ;;  %s4383_s8 = sadd.s32 4294967294, %s5740_s29   ;;  %s5740_s29 = sphi %s5794_s29, %s24_s29   ;;  %s5736_s28 = sphi %s5792_s28, %s7551_s28   ;;  %s5732_s27 = sphi %s5790_s27, %s7550_s27   ;;  %s5728_s26 = sphi %s5788_s26, %s7549_s26   ;;  %s5724_s25 = sphi %s5786_s25, %s7548_s25   ;;  %s5720_s24 = sphi %s5784_s24, %s7547_s24  }
   0x7   : > { %s33_s9 = sadd.s32 1, %s5736_s28  ;;  %s207_s10 = sadd.s32 1, %s5728_s26 }
   0x8   : > { %p34_p0 = scmp.ge.s32.totalorder %s33_s9, 5  ;;  %p217_p1 = scmp.ne.s32.totalorder %s5728_s26, %s5724_s25 }
   0x9   : > { %p218_p2 = scmp.eq.s32.totalorder %s4382_s30, 4  ;;  %p223_p3 = scmp.ne.s32.totalorder %s5724_s25, %s5720_s24 }
   0xa   : > { %s7553_s9 = smov (%p34_p0, %s33_s9), 0  ;;  %p224_p5 = scmp.eq.s32.totalorder %s4383_s8, 4 }
   0xb   : > { %p5824_p4 = por %p218_p2, %p217_p1  ;;  %s202_s12 = ssub.s32 %s5736_s28, %s7553_s9 }
   0xc   : > { %p4390_p6 = scmp.ge.s32.totalorder %s5740_s29, 1  ;;  %p205_p7 = scmp.eq.s32.totalorder %s202_s12, 0 }
   0xd   : > { %p5831_p8 = por %p224_p5, %p223_p3  ;;  %p323_p9 = scmp.lt.s32.totalorder %s5740_s29, 6 }
   0xe   : > { %s5837_s14 = scalar_select %p205_p7, %s5728_s26, %s207_s10  }
   0xf   : > { %p324_p10 = pnand %p4390_p6, %p323_p9 }
  0x11   : > { %327 = sbr.rel (%p324_p10) target bundleno = 627 (0x273), region = 40 }
  0x18   : > { %v819_v0 = vld [vmem:[%s7447_s2] sm:$0xf]  ;;  %vm1181_vm0 = vcmask 1043456   ;;  %s5843_s17 = sshll.u32 %s5732_s27, 6  ;;  %v4436_v2 = vld [vmem:[%s7447_s2 + $0x4] sm:$0xf] }
  0x19   : > { %5402 = vmatprep.subr.msk.bf16.mxu0 %vm1181_vm0, %v819_v0  ;;  %v1539_v1 = vsel %vm1181_vm0, %v819_v0, 0  ;;  %p395_p11 = scmp.lt.s32.totalorder %s5843_s17, 327  ;;  %v4502_v3 = vld [vmem:[%s7447_s2 + $0x8] sm:$0xf]  ;;  %5401 = vmatprep.subr.msk.bf16.mxu1 %vm1181_vm0, %v4436_v2  ;;  %v1183_v4 = vsel %vm1181_vm0, %v4436_v2, 0  ;;  %vm1084_vm1 = vcmask 64512  }
  0x1a   : > { %4912 = vmatpush3.bf16.msra.mxu0 %v1539_v1  ;;  %4846 = vmatpush3.bf16.msra.mxu1 %v1183_v4  ;;  %vm823_vm2 = vsmask.f32 7424  ;;  %v5868_v6 = vld [vmem:[%s7447_s2 + $0xc] sm:$0xf]  ;;  %v2031_v8 = vsel %vm1181_vm0, %v4502_v3, 0  ;;  %s4647_s16 = sadd.s32 64, %s5843_s17 }
  0x1b   : > { %s396_s22 = scalar_select %p395_p11, %s5843_s17, 327  ;;  %5404 = vmatprep.subr.msk.bf16.mxu0 %vm1181_vm0, %v4502_v3  ;;  %5403 = vmatprep.subr.msk.bf16.mxu1 %vm1181_vm0, %v819_v0  ;;  %vm1868_vm3 = vcmask 1046528   ;;  %vm2388_vm4 = vsmask.f32 6400  ;;  %vm3052_vm5 = vcmask 31744   ;;  %vm3697_vm6 = vcmask 97280  }
  0x1c   : > { %p407_p12 = scmp.lt.s32.totalorder %s4647_s16, 327  ;;  %p419_p13 = scmp.lt.s32.totalorder %s5843_s17, 319  ;;  %vm3831_vm7 = vcmask 90112  }
  0x1d   : > { %s4392_s23 = sshll.u32 %s396_s22, 2  ;;  %s4633_s19 = sshll.u32 %s5732_s27, 4 }
  0x1e   : > { %s5862_s10 = scalar_lea.vmem %s7445_s0, %s4392_s23  ;;  %s7555_s16 = smov (!%p407_p12, %s4647_s16), 327 }
  0x1f   : > { %v5466_v5 = vld [vmem:[%s5862_s10] sm:$0xff]   ;;  %v5467_v7 = vld [vmem:[%s5862_s10 + $0x8] sm:$0xff]   ;;  %v5875_v13 = vld [vmem:[%s5862_s10 + $0x10] sm:$0xff]   ;;  %s4395_s18 = sshll.u32 %s7555_s16, 2  ;;  %s7557_s17 = smov (!%p419_p13, %s5843_s17), 319 }
  0x20   : > { %4913 = vmatprep.mubr.msk.bf16.mxu0 %vm1084_vm1, %v5466_v5  ;;  %v825_v9 = vshrl.u32 %v5466_v5, 16  ;;  %v827_v10 = vshll.u32 %v5466_v5, 16  ;;  %v832_v11 = vshll.u32 %v5467_v7, 16  ;;  %v836_v12 = vshrl.u32 %v5467_v7, 16  ;;  %v5878_v14 = vld [vmem:[%s5862_s10 + $0x18] sm:$0xff]   ;;  %v5881_v16 = vld [vmem:[%s5862_s10 + $0x20] sm:$0xff]   ;;  %s6040_s23 = scalar_lea.vmem %s7446_s1, %s4395_s18  ;;  %s7372_s15 = scalar_lea.hbm %s7452_s7, %s4633_s19 }
  0x21   : > { %4914 = vmatmul.mubr.msk.bf16.vlgmr.msra.gmra.mrb[0].mxu0 %vm1084_vm1, %v5467_v7  ;;  %v840_v18 = vshll.u32 %v5875_v13, 16  ;;  %v844_v19 = vshrl.u32 %v5875_v13, 16  ;;  %v848_v20 = vshll.u32 %v5878_v14, 16  ;;  %v856_v22 = vshll.u32 %v5881_v16, 16  ;;  %v5897_v27 = vld [vmem:[%s5862_s10 + $0x28] sm:$0xff]   ;;  %v5910_v34 = vld [vmem:[%s5862_s10 + $0x30] sm:$0xff]  }
  0x22   : > { %4978 = vmatpush3.bf16.msra.mxu0 %v2031_v8  ;;  %v829_v15 = vrot.slane %v827_v10, 1  ;;  %v834_v17 = vrot.slane %v832_v11, 1  ;;  %4917 = vmatprep.mubr.msk.bf16.mxu0 %vm1084_vm1, %v5875_v13  ;;  %v852_v26 = vshrl.u32 %v5878_v14, 16  ;;  %v860_v29 = vshrl.u32 %v5881_v16, 16  ;;  %v5925_v39 = vld [vmem:[%s5862_s10 + $0x38] sm:$0xff]   ;;  %v5937_v47 = vld [vmem:[%s5862_s10 + $0x40] sm:$0xff]  }
  0x23   : > { %5405 = vmatprep.subr.msk.bf16.mxu0 %vm1181_vm0, %v5868_v6  ;;  %v842_v24 = vrot.slane %v840_v18, 1  ;;  %v850_v25 = vrot.slane %v848_v20, 1  ;;  %v864_v32 = vshll.u32 %v5897_v27, 16  ;;  %v858_v33 = vrot.slane %v856_v22, 1  ;;  %v5951_v51 = vld [vmem:[%s5862_s10 + $0x48] sm:$0xff]   ;;  %v5963_v59 = vld [vmem:[%s5862_s10 + $0x50] sm:$0xff]  }
  0x24   : > { %v830_v21 = vor.u32 %v829_v15, %v825_v9  ;;  %v838_v23 = vor.u32 %v836_v12, %v834_v17  ;;  %v872_v40 = vshll.u32 %v5910_v34, 16  ;;  %v868_v42 = vshrl.u32 %v5897_v27, 16  ;;  %v5977_v63 = vld [vmem:[%s5862_s10 + $0x58] sm:$0xff]   ;;  %v5990_v8 = vld [vmem:[%s5862_s10 + $0x60] sm:$0xff]   ;;  %v6004_v12 = vld [vmem:[%s5862_s10 + $0x68] sm:$0xff]   ;;  %s4397_s30 = sshll.u32 %s7557_s17, 3 }
  0x25   : > { %v846_v31 = vor.u32 %v844_v19, %v842_v24  ;;  %v854_v36 = vor.u32 %v852_v26, %v850_v25  ;;  %v862_v37 = vor.u32 %v860_v29, %v858_v33  ;;  %v866_v38 = vrot.slane %v864_v32, 1  ;;  %s6465_s12 = scalar_lea.vmem %s7448_s3, %s4397_s30  ;;  %s6900_s18 = scalar_lea.vmem %s7450_s5, %s4397_s30 }
  0x26   : > { %v835_v28 = vsel %vm823_vm2, %v830_v21, %v834_v17  ;;  %v843_v30 = vsel %vm823_vm2, %v838_v23, %v842_v24  ;;  %v876_v44 = vshrl.u32 %v5910_v34, 16  ;;  %v880_v45 = vshll.u32 %v5925_v39, 16  ;;  %s7354_s17 = sand.u32 1, %s5724_s25   ;;  %s5742_s30 = smov [#allocation2]  }
  0x27   : > { %4847 = vmatprep.mubr.msk.bf16.mxu1 %vm1084_vm1, %v835_v28  ;;  %v851_v35 = vsel %vm823_vm2, %v846_v31, %v850_v25  ;;  %v859_v41 = vsel %vm823_vm2, %v854_v36, %v858_v33  ;;  %v867_v43 = vsel %vm823_vm2, %v862_v37, %v866_v38  ;;  %v874_v46 = vrot.slane %v872_v40, 1  ;;  %v6021_v31 = vld [vmem:[%s7449_s4] sm:$0xf]  ;;  %v6035_v37 = vld [vmem:[%s5862_s10 + $0x78] sm:$0xff]   ;;  %s383_s20 = scalar_lea.vmem [#allocation2], %s7354_s17  ;;  %s7481_s22 = scalar_lea.vmem [#allocation4], %s7354_s17 }
  0x28   : > { %4848 = vmatmul.mubr.msk.bf16.vlgmr.msra.gmra.mrb[0].mxu1 %vm1084_vm1, %v843_v30  ;;  %v870_v48 = vor.u32 %v868_v42, %v866_v38  ;;  %v882_v50 = vrot.slane %v880_v45, 1  ;;  %v888_v52 = vshll.u32 %v5937_v47, 16  ;;  %v884_v54 = vshrl.u32 %v5925_v39, 16  ;;  %v6016_v30 = vld [vmem:[%s5862_s10 + $0x70] sm:$0xff]   ;;  %s4189_s21 = sshll.u32 %s383_s20, 4  ;;  %s4168_s16 = scalar_lea.sflag [#allocation3], %s7354_s17  ;;  %s7366_s21 = int_to_ptr.vmem [resolvable:$true] %s4189_s21 }
  0x29   : > { %5208 = vmatpush3.bf16.msra.mxu1 %v1539_v1  ;;  %4918 = vmatmul.mubr.msk.bf16.gmra.mrb[4].mxu0 %vm1084_vm1, %v5878_v14  ;;  %v878_v49 = vor.u32 %v876_v44, %v874_v46  ;;  %v892_v56 = vshrl.u32 %v5937_v47, 16  ;;  %v896_v57 = vshll.u32 %v5951_v51, 16  ;;  %v904_v0 = vshll.u32 %v5963_v59, 16  ;;  %s5634_s8 = sshll.u32 %s5742_s30, 4  ;;  %s5635_s8 = int_to_ptr.vmem [resolvable:$false] %s5634_s8 }
  0x2a   : > { %4851 = vmatprep.mubr.msk.bf16.mxu1 %vm1084_vm1, %v851_v35  ;;  %4921 = vmatprep.mubr.msk.bf16.mxu0 %vm1084_vm1, %v5881_v16  ;;  %v875_v53 = vsel %vm823_vm2, %v870_v48, %v874_v46  ;;  %v890_v58 = vrot.slane %v888_v52, 1  ;;  %v886_v60 = vor.u32 %v884_v54, %v882_v50  ;;  %v900_v2 = vshrl.u32 %v5951_v51, 16  ;;  %p5637_p3 = scmp.lt.s32.totalorder %s7366_s21, %s5635_s8 }
  0x2b   : > { %v883_v55 = vsel %vm823_vm2, %v878_v49, %v882_v50  ;;  %v898_v62 = vrot.slane %v896_v57, 1  ;;  %v908_v4 = vshrl.u32 %v5963_v59, 16  ;;  %v912_v5 = vshll.u32 %v5977_v63, 16  ;;  %5109 = vmatprep.subr.msk.mxu1 %vm1181_vm0, %v6021_v31 }
  0x2c   : > { %v894_v61 = vor.u32 %v892_v56, %v890_v58  ;;  %v891_v1 = vsel %vm823_vm2, %v886_v60, %v890_v58  ;;  %v906_v7 = vrot.slane %v904_v0, 1  ;;  %v920_v15 = vshll.u32 %v5990_v8, 16  ;;  %v6061_v60 = vld [vmem:[%s6040_s23] sm:$0xf] }
  0x2d   : > { %v902_v9 = vor.u32 %v900_v2, %v898_v62  ;;  %v914_v11 = vrot.slane %v912_v5, 1  ;;  %v916_v21 = vshrl.u32 %v5977_v63, 16  ;;  %v924_v24 = vshrl.u32 %v5990_v8, 16 }
  0x2e   : > { %v899_v3 = vsel %vm823_vm2, %v894_v61, %v898_v62  ;;  %v910_v10 = vor.u32 %v908_v4, %v906_v7  ;;  %v7462_v25 = vshll.u32 %v6004_v12, 16  ;;  %v922_v28 = vrot.slane %v920_v15, 1 }
  0x2f   : > { %v907_v17 = vsel %vm823_vm2, %v902_v9, %v906_v7  ;;  %v918_v33 = vor.u32 %v916_v21, %v914_v11  ;;  %v7455_v38 = vshll.u32 %v6016_v30, 16  ;;  %v932_v46 = vshrl.u32 %v6004_v12, 16  ;;  %v6076_v7 = vld [vmem:[%s5862_s10 + $0x88] sm:$0xff]  }
  0x30   : > { %4852 = vmatmul.mubr.msk.bf16.gmra.mrb[4].mxu1 %vm1084_vm1, %v859_v41  ;;  %v915_v23 = vsel %vm823_vm2, %v910_v10, %v914_v11  ;;  %v926_v35 = vor.u32 %v924_v24, %v922_v28  ;;  %v930_v36 = vrot.slane %v7462_v25, 1  ;;  %v6046_v41 = vld [vmem:[%s5862_s10 + $0xf8] sm:$0xff]   ;;  %v7456_v49 = vshrl.u32 %v6016_v30, 16 }
  0x31   : > { %4922 = vmatmul.mubr.msk.bf16.gmra.mrb[8].mxu0 %vm1084_vm1, %v5897_v27  ;;  %4855 = vmatprep.mubr.msk.bf16.mxu1 %vm1084_vm1, %v867_v43  ;;  %v923_v43 = vsel %vm823_vm2, %v918_v33, %v922_v28  ;;  %v7454_v50 = vshll.u32 %v6035_v37, 16  ;;  %v7453_v58 = vshll.u32 %v6046_v41, 16  ;;  %v7457_v62 = vshrl.u32 %v6046_v41, 16 }
  0x32   : > { %4925 = vmatprep.mubr.msk.bf16.mxu0 %vm1084_vm1, %v5910_v34  ;;  %v931_v48 = vsel %vm823_vm2, %v926_v35, %v930_v36  ;;  %v934_v61 = vor.u32 %v932_v46, %v930_v36  ;;  %v1869_v10 = vrot.slane %v5875_v13, 1  ;;  %v1870_v11 = vrot.slane %v5878_v14, 1 }
  0x33   : > { %v6080_v9 = vrot.slane %v7453_v58, 1  ;;  %v7461_v33 = vshrl.u32 %v6035_v37, 16  ;;  %v7459_v58 = vshll.u32 %v6076_v7, 16  ;;  %v2632_v13 = vsel %vm1181_vm0, %v5868_v6, 0 }
  0x34   : > { %v1876_v14 = vrot.slane %v5910_v34, 1 }
  0x35   : > { %v1078_v35 = vor.u32 %v7457_v62, %v6080_v9 }
  0x38   : > { %4856 = vmatmul.mubr.msk.bf16.gmra.mrb[8].mxu1 %vm1084_vm1, %v875_v53  ;;  %v938_v53 = vrot.slane %v7455_v38, 1  ;;  %v1872_v38 = vrot.slane %v5881_v16, 1 }
  0x39   : > { %4926 = vmatmul.mubr.msk.bf16.gmra.mrb[12].mxu0 %vm1084_vm1, %v5925_v39  ;;  %4859 = vmatprep.mubr.msk.bf16.mxu1 %vm1084_vm1, %v883_v55  ;;  %v6057_v55 = vld [vmem:[%s5862_s10 + $0x80] sm:$0xff]  }
  0x3a   : > { %4929 = vmatprep.mubr.msk.bf16.mxu0 %vm1084_vm1, %v5937_v47  ;;  %v939_v28 = vsel %vm823_vm2, %v934_v61, %v938_v53  ;;  %v6101_v61 = vld [vmem:[%s5862_s10 + $0x90] sm:$0xff]  }
  0x3b   : > { %v968_v16 = vshll.u32 %v6101_v61, 16 }
  0x40   : > { %4860 = vmatmul.mubr.msk.bf16.gmra.mrb[12].mxu1 %vm1084_vm1, %v891_v1  ;;  %v942_v1 = vor.u32 %v7456_v49, %v938_v53 }
  0x41   : > { %4930 = vmatmul.mubr.msk.bf16.gmra.mrb[16].mxu0 %vm1084_vm1, %v5951_v51  ;;  %4863 = vmatprep.mubr.msk.bf16.mxu1 %vm1084_vm1, %v899_v3  ;;  %v946_v3 = vrot.slane %v7454_v50, 1  ;;  %v1871_v50 = vsel %vm1868_vm3, %v1869_v10, %v1870_v11 }
  0x42   : > { %4933 = vmatprep.mubr.msk.bf16.mxu0 %vm1084_vm1, %v5963_v59 }
  0x48   : > { %4864 = vmatmul.mubr.msk.bf16.gmra.mrb[16].mxu1 %vm1084_vm1, %v907_v17  ;;  %v4644_v17 = vcombine.low %v6061_v60, %v6061_v60 }
  0x49   : > { %4934 = vmatmul.mubr.msk.bf16.gmra.mrb[20].mxu0 %vm1084_vm1, %v5977_v63  ;;  %4867 = vmatprep.mubr.msk.bf16.mxu1 %vm1084_vm1, %v915_v23  ;;  %v7458_v23 = vshll.u32 %v6057_v55, 16 }
  0x4a   : > { %4937 = vmatprep.mubr.msk.bf16.mxu0 %vm1084_vm1, %v5990_v8  ;;  %v1080_v36 = vshll.u32 %v4644_v17, 16  ;;  %v6109_v17 = vld [vmem:[%s5862_s10 + $0x98] sm:$0xff]  }
  0x4b   : > { %v954_v53 = vrot.slane %v7458_v23, 1  ;;  %v1874_v23 = vrot.slane %v5897_v27, 1 }
  0x4c   : > { %v1082_v49 = vrot.slane %v1080_v36, 1  ;;  %v2396_v36 = vrot.slane %v860_v29, 1  ;;  %v2390_v29 = vrot.slane %v840_v18, 2 }
  0x4d   : > { %v1875_v18 = vsel %vm1868_vm3, %v1872_v38, %v1874_v23 }
  0x4e   : > { %v6112_v10 = vsel %vm823_vm2, %v1078_v35, %v1082_v49  ;;  %v2389_v49 = vrot.slane %v844_v19, 1  ;;  %v2393_v19 = vrot.slane %v848_v20, 2  ;;  %v6147_v20 = vld [vmem:[%s5862_s10 + $0xa0] sm:$0xff]  }
  0x4f   : > { %v7477_v27 = vshrl.u32 %v6147_v20, 16 }
  0x50   : > { %4868 = vmatmul.mubr.msk.bf16.gmra.mrb[20].mxu1 %vm1084_vm1, %v923_v43  ;;  %v947_v43 = vsel %vm823_vm2, %v942_v1, %v946_v3  ;;  %v950_v1 = vor.u32 %v7461_v33, %v946_v3  ;;  %v1873_v3 = vsel %vm1868_vm3, %v1870_v11, %v1872_v38  ;;  %v972_v11 = vshrl.u32 %v6101_v61, 16 }
  0x51   : > { %4938 = vmatmul.mubr.msk.bf16.gmra.mrb[24].mxu0 %vm1084_vm1, %v6004_v12  ;;  %4871 = vmatprep.mubr.msk.bf16.mxu1 %vm1084_vm1, %v931_v48  ;;  %v7460_v48 = vshrl.u32 %v6057_v55, 16  ;;  %v2391_v33 = vor.u32 %v2390_v29, %v2389_v49  ;;  %v2404_v49 = vrot.slane %v876_v44, 1  ;;  %v2405_v29 = vrot.slane %v872_v40, 2 }
  0x52   : > { %4941 = vmatprep.mubr.msk.bf16.mxu0 %vm1084_vm1, %v6016_v30  ;;  %v955_v35 = vsel %vm823_vm2, %v950_v1, %v954_v53  ;;  %v2400_v1 = vrot.slane %v868_v42, 1 }
  0x53   : > { %v958_v62 = vor.u32 %v7460_v48, %v954_v53  ;;  %v970_v53 = vrot.slane %v968_v16, 1  ;;  %v2406_v44 = vor.u32 %v2405_v29, %v2404_v49  ;;  %v2412_v49 = vrot.slane %v892_v56, 1 }
  0x54   : > { %v2413_v29 = vrot.slane %v888_v52, 2 }
  0x58   : > { %4872 = vmatmul.mubr.msk.bf16.gmra.mrb[24].mxu1 %vm1084_vm1, %v939_v28  ;;  %v2397_v28 = vrot.slane %v856_v22, 2  ;;  %v964_v22 = vshrl.u32 %v6076_v7, 16 }
  0x59   : > { %4942 = vmatmul.mubr.msk.bf16.gmra.mrb[28].mxu0 %vm1084_vm1, %v6035_v37  ;;  %4875 = vmatprep.mubr.msk.bf16.mxu1 %vm1084_vm1, %v947_v43  ;;  %v962_v43 = vrot.slane %v7459_v58, 1  ;;  %v976_v58 = vshll.u32 %v6109_v17, 16 }
  0x5a   : > { %4979 = vmatprep.mubr.msk.bf16.mxu0 %vm1084_vm1, %v1871_v50  ;;  %v2392_v50 = vrot.slane %v852_v26, 1  ;;  %v2398_v25 = vor.u32 %v2397_v28, %v2396_v36  ;;  %v974_v28 = vor.u32 %v972_v11, %v970_v53  ;;  %v6167_v36 = vld [vmem:[%s5862_s10 + $0xa8] sm:$0xff]  }
  0x5b   : > { %v963_v48 = vsel %vm823_vm2, %v958_v62, %v962_v43  ;;  %v966_v6 = vor.u32 %v964_v22, %v962_v43  ;;  %v1878_v43 = vrot.slane %v5925_v39, 1 }
  0x5c   : > { %v2394_v26 = vor.u32 %v2393_v19, %v2392_v50  ;;  %v980_v19 = vshrl.u32 %v6109_v17, 16 }
  0x5d   : > { %v971_v50 = vsel %vm823_vm2, %v966_v6, %v970_v53  ;;  %v1879_v34 = vsel %vm1868_vm3, %v1876_v14, %v1878_v43  ;;  %v1880_v53 = vrot.slane %v5937_v47, 1 }
  0x5e   : > { %v6154_v38 = vsel %vm2388_vm4, %v2391_v33, %v2394_v26  ;;  %v6157_v62 = vsel %vm2388_vm4, %v2394_v26, %v2398_v25  ;;  %v2401_v33 = vrot.slane %v864_v32, 2 }
  0x60   : > { %4876 = vmatmul.mubr.msk.bf16.gmra.mrb[28].mxu1 %vm1084_vm1, %v955_v35  ;;  %v2402_v42 = vor.u32 %v2401_v33, %v2400_v1  ;;  %v1877_v35 = vsel %vm1868_vm3, %v1874_v23, %v1876_v14  ;;  %v6191_v23 = vld [vmem:[%s5862_s10 + $0xb0] sm:$0xff]   ;;  %v6207_v1 = vld [vmem:[%s5862_s10 + $0xb8] sm:$0xff]   ;;  %v2408_v33 = vrot.slane %v884_v54, 1 }
  0x61   : > { %4980 = vmatmul.mubr.msk.bf16.vlgmr.msra.gmra.mrb[0].mxu0 %vm1084_vm1, %v1873_v3  ;;  %4879 = vmatprep.mubr.msk.bf16.mxu1 %vm1084_vm1, %v963_v48  ;;  %v978_v48 = vrot.slane %v976_v58, 1  ;;  %v7476_v3 = vshll.u32 %v6147_v20, 16  ;;  %v7470_v39 = vshrl.u32 %v6191_v23, 16 }
  0x62   : > { %5044 = vmatpush3.bf16.msra.mxu0 %v2632_v13  ;;  %4983 = vmatprep.mubr.msk.bf16.mxu0 %vm1084_vm1, %v1875_v18  ;;  %v7463_v13 = vshll.u32 %v6167_v36, 16  ;;  %v6184_v18 = vsel %vm2388_vm4, %v2398_v25, %v2402_v42  ;;  %v6194_v26 = vsel %vm2388_vm4, %v2402_v42, %v2406_v44  ;;  %v7465_v42 = vshll.u32 %v6191_v23, 16 }
  0x63   : > { %v979_v32 = vsel %vm823_vm2, %v974_v28, %v978_v48  ;;  %v986_v40 = vrot.slane %v7476_v3, 1  ;;  %v982_v25 = vor.u32 %v980_v19, %v978_v48  ;;  %v1882_v28 = vrot.slane %v5951_v51, 1  ;;  %v2992_v51 = vld [vmem:[%s6465_s12 + $0x28] sm:$0xff] }
  0x64   : > { %v994_v6 = vrot.slane %v7463_v13, 1  ;;  %v2409_v48 = vrot.slane %v880_v45, 2  ;;  %v7464_v45 = vshll.u32 %v6207_v1, 16  ;;  %v6225_v13 = vor.u32 %v2413_v29, %v2412_v49 }
  0x65   : > { %v990_v14 = vor.u32 %v7477_v27, %v986_v40  ;;  %v1883_v56 = vsel %vm1868_vm3, %v1880_v53, %v1882_v28  ;;  %v1002_v52 = vrot.slane %v7465_v42, 1  ;;  %v6267_v42 = vld [vmem:[%s5862_s10 + $0xd0] sm:$0xff]  }
  0x66   : > { %v6323_v27 = vld [vmem:[%s5862_s10 + $0xf0] sm:$0xff]  }
  0x67   : > { %v995_v54 = vsel %vm823_vm2, %v990_v14, %v994_v6  ;;  %v1010_v14 = vrot.slane %v7464_v45, 1 }
  0x68   : > { %4880 = vmatmul.mubr.msk.bf16.gmra.mrb[32].mxu1 %vm1084_vm1, %v971_v50  ;;  %v987_v50 = vsel %vm823_vm2, %v982_v25, %v986_v40 }
  0x69   : > { %4984 = vmatmul.mubr.msk.bf16.gmra.mrb[4].mxu0 %vm1084_vm1, %v1877_v35  ;;  %4883 = vmatprep.mubr.msk.bf16.mxu1 %vm1084_vm1, %v979_v32  ;;  %v1881_v35 = vsel %vm1868_vm3, %v1878_v43, %v1880_v53  ;;  %v7471_v32 = vshrl.u32 %v6167_v36, 16  ;;  %v6235_v43 = vld [vmem:[%s5862_s10 + $0xc0] sm:$0xff]   ;;  %v1006_v53 = vor.u32 %v7470_v39, %v1002_v52 }
  0x6a   : > { %4987 = vmatprep.mubr.msk.bf16.mxu0 %vm1084_vm1, %v1879_v34  ;;  %v2410_v34 = vor.u32 %v2409_v48, %v2408_v33  ;;  %v6252_v33 = vld [vmem:[%s5862_s10 + $0xc8] sm:$0xff]   ;;  %v1886_v48 = vrot.slane %v5977_v63, 1  ;;  %v7466_v49 = vshll.u32 %v6235_v43, 16 }
  0x6b   : > { %v998_v25 = vor.u32 %v7471_v32, %v994_v6  ;;  %v7468_v6 = vshrl.u32 %v6207_v1, 16  ;;  %v6295_v32 = vld [vmem:[%s5862_s10 + $0xe0] sm:$0xff]   ;;  %v2996_v63 = vld [vmem:[%s6465_s12 + $0x48] sm:$0xff] }
  0x6c   : > { %v6229_v47 = vsel %vm2388_vm4, %v2406_v44, %v2410_v34  ;;  %v6239_v40 = vsel %vm2388_vm4, %v2410_v34, %v6225_v13  ;;  %v1884_v44 = vrot.slane %v5963_v59, 1  ;;  %v7467_v34 = vshrl.u32 %v6235_v43, 16  ;;  %v2995_v59 = vld [vmem:[%s6465_s12 + $0x40] sm:$0xff] }
  0x6d   : > { %v1003_v29 = vsel %vm823_vm2, %v998_v25, %v1002_v52  ;;  %v1018_v45 = vrot.slane %v7466_v49, 1  ;;  %v1888_v52 = vrot.slane %v5990_v8, 1 }
  0x6f   : > { %v1022_v25 = vor.u32 %v7467_v34, %v1018_v45  ;;  %v7474_v34 = vshrl.u32 %v6267_v42, 16 }
  0x70   : > { %4884 = vmatmul.mubr.msk.bf16.gmra.mrb[36].mxu1 %vm1084_vm1, %v987_v50  ;;  %v1885_v50 = vsel %vm1868_vm3, %v1882_v28, %v1884_v44  ;;  %v1014_v28 = vor.u32 %v7468_v6, %v1010_v14 }
  0x71   : > { %4988 = vmatmul.mubr.msk.bf16.gmra.mrb[8].mxu0 %vm1084_vm1, %v1881_v35  ;;  %4887 = vmatprep.mubr.msk.bf16.mxu1 %vm1084_vm1, %v995_v54  ;;  %v1011_v35 = vsel %vm823_vm2, %v1006_v53, %v1010_v14  ;;  %v7469_v54 = vshll.u32 %v6252_v33, 16  ;;  %v6280_v53 = vld [vmem:[%s5862_s10 + $0xd8] sm:$0xff]   ;;  %v7473_v14 = vshrl.u32 %v6252_v33, 16 }
  0x72   : > { %4991 = vmatprep.mubr.msk.bf16.mxu0 %vm1084_vm1, %v1883_v56  ;;  %v1887_v56 = vsel %vm1868_vm3, %v1884_v44, %v1886_v48  ;;  %v7475_v6 = vshll.u32 %v6280_v53, 16 }
  0x73   : > { %v1026_v44 = vrot.slane %v7469_v54, 1 }
  0x75   : > { %v1027_v49 = vsel %vm823_vm2, %v1022_v25, %v1026_v44  ;;  %v6308_v25 = vld [vmem:[%s5862_s10 + $0xe8] sm:$0xff]   ;;  %s7364_s10 = scalar_lea.hbm %s7451_s6, %s4633_s19 }
  0x78   : > { %4888 = vmatmul.mubr.msk.bf16.gmra.mrb[40].mxu1 %vm1084_vm1, %v1003_v29  ;;  %v1890_v29 = vrot.slane %v6004_v12, 1 }
  0x79   : > { %4992 = vmatmul.mubr.msk.bf16.gmra.mrb[12].mxu0 %vm1084_vm1, %v1885_v50  ;;  %4891 = vmatprep.mubr.msk.bf16.mxu1 %vm1084_vm1, %v1011_v35  ;;  %v7472_v50 = vshll.u32 %v6267_v42, 16  ;;  %v1019_v35 = vsel %vm823_vm2, %v1014_v28, %v1018_v45  ;;  %v1030_v45 = vor.u32 %v7473_v14, %v1026_v44  ;;  %v7479_v44 = vshrl.u32 %v6280_v53, 16 }
  0x7a   : > { %4995 = vmatprep.mubr.msk.bf16.mxu0 %vm1084_vm1, %v1887_v56  ;;  %v1889_v56 = vsel %vm1868_vm3, %v1886_v48, %v1888_v52  ;;  %v1891_v54 = vsel %vm1868_vm3, %v1888_v52, %v1890_v29  ;;  %v1892_v48 = vrot.slane %v6016_v30, 1  ;;  %v1042_v52 = vrot.slane %v7475_v6, 1 }
  0x7b   : > { %v1034_v39 = vrot.slane %v7472_v50, 1  ;;  %v1052_v14 = vshrl.u32 %v6295_v32, 16 }
  0x7d   : > { %v1038_v28 = vor.u32 %v7474_v34, %v1034_v39  ;;  %v7480_v34 = vshll.u32 %v6308_v25, 16 }
  0x7f   : > { %v1043_v50 = vsel %vm823_vm2, %v1038_v28, %v1042_v52  ;;  %v1898_v28 = vrot.slane %v6076_v7, 1 }
  0x80   : > { %4892 = vmatmul.mubr.msk.bf16.gmra.mrb[44].mxu1 %vm1084_vm1, %v1019_v35  ;;  %v1894_v35 = vrot.slane %v6035_v37, 1 }
  0x81   : > { %4996 = vmatmul.mubr.msk.bf16.gmra.mrb[16].mxu0 %vm1084_vm1, %v1889_v56  ;;  %4895 = vmatprep.mubr.msk.bf16.mxu1 %vm1084_vm1, %v1027_v49  ;;  %v7478_v49 = vshll.u32 %v6295_v32, 16  ;;  %v1035_v56 = vsel %vm823_vm2, %v1030_v45, %v1034_v39  ;;  %v1046_v39 = vor.u32 %v7479_v44, %v1042_v52 }
  0x82   : > { %4999 = vmatprep.mubr.msk.bf16.mxu0 %vm1084_vm1, %v1891_v54  ;;  %v1893_v54 = vsel %vm1868_vm3, %v1890_v29, %v1892_v48  ;;  %v1895_v6 = vsel %vm1868_vm3, %v1892_v48, %v1894_v35  ;;  %v1896_v29 = vrot.slane %v6057_v55, 1  ;;  %v1058_v48 = vrot.slane %v7480_v34, 1 }
  0x83   : > { %v1050_v3 = vrot.slane %v7478_v49, 1  ;;  %v1068_v49 = vshrl.u32 %v6323_v27, 16 }
  0x84   : > { %v1897_v52 = vsel %vm1868_vm3, %v1894_v35, %v1896_v29  ;;  %v1899_v44 = vsel %vm1868_vm3, %v1896_v29, %v1898_v28  ;;  %v1900_v35 = vrot.slane %v6101_v61, 1  ;;  %v1902_v29 = vrot.slane %v6109_v17, 1 }
  0x85   : > { %v1054_v45 = vor.u32 %v1052_v14, %v1050_v3 }
  0x88   : > { %4896 = vmatmul.mubr.msk.bf16.gmra.mrb[48].mxu1 %vm1084_vm1, %v1035_v56  ;;  %v1064_v56 = vshll.u32 %v6323_v27, 16 }
  0x89   : > { %5000 = vmatmul.mubr.msk.bf16.gmra.mrb[20].mxu0 %vm1084_vm1, %v1893_v54  ;;  %4899 = vmatprep.mubr.msk.bf16.mxu1 %vm1084_vm1, %v1043_v50  ;;  %v1051_v54 = vsel %vm823_vm2, %v1046_v39, %v1050_v3  ;;  %v1060_v50 = vshrl.u32 %v6308_v25, 16 }
  0x8a   : > { %5003 = vmatprep.mubr.msk.bf16.mxu0 %vm1084_vm1, %v1895_v6  ;;  %v1059_v6 = vsel %vm823_vm2, %v1054_v45, %v1058_v48  ;;  %v1066_v34 = vrot.slane %v1064_v56, 1 }
  0x8b   : > { %v1062_v3 = vor.u32 %v1060_v50, %v1058_v48  ;;  %v1906_v48 = vrot.slane %v6167_v36, 1 }
  0x8c   : > { %v1070_v39 = vor.u32 %v1068_v49, %v1066_v34 }
  0x8d   : > { %v1067_v45 = vsel %vm823_vm2, %v1062_v3, %v1066_v34  ;;  %v1910_v3 = vrot.slane %v6207_v1, 1 }
  0x90   : > { %4900 = vmatmul.mubr.msk.bf16.gmra.mrb[52].mxu1 %vm1084_vm1, %v1051_v54  ;;  %v1901_v54 = vsel %vm1868_vm3, %v1898_v28, %v1900_v35 }
  0x91   : > { %5004 = vmatmul.mubr.msk.bf16.gmra.mrb[24].mxu0 %vm1084_vm1, %v1897_v52  ;;  %4903 = vmatprep.mubr.msk.bf16.mxu1 %vm1084_vm1, %v1059_v6  ;;  %v1075_v52 = vsel %vm823_vm2, %v1070_v39, %v6080_v9  ;;  %v1903_v6 = vsel %vm1868_vm3, %v1900_v35, %v1902_v29  ;;  %v1908_v9 = vrot.slane %v6191_v23, 1 }
  0x92   : > { %5007 = vmatprep.mubr.msk.bf16.mxu0 %vm1084_vm1, %v1899_v44  ;;  %v1904_v44 = vrot.slane %v6147_v20, 1 }
  0x93   : > { %v1909_v35 = vsel %vm1868_vm3, %v1906_v48, %v1908_v9  ;;  %v1911_v39 = vsel %vm1868_vm3, %v1908_v9, %v1910_v3 }
  0x94   : > { %v1905_v34 = vsel %vm1868_vm3, %v1902_v29, %v1904_v44  ;;  %v1907_v28 = vsel %vm1868_vm3, %v1904_v44, %v1906_v48  ;;  %v1914_v29 = vrot.slane %v6252_v33, 1  ;;  %v1920_v48 = vrot.slane %v6295_v32, 1 }
  0x98   : > { %4904 = vmatmul.mubr.msk.bf16.gmra.mrb[56].mxu1 %vm1084_vm1, %v1067_v45 }
  0x99   : > { %5008 = vmatmul.mubr.msk.bf16.gmra.mrb[28].mxu0 %vm1084_vm1, %v1901_v54  ;;  %4907 = vmatprep.mubr.msk.bf16.mxu1 %vm1084_vm1, %v1075_v52  ;;  %v1918_v52 = vrot.slane %v6280_v53, 1 }
  0x9a   : > { %5011 = vmatprep.mubr.msk.bf16.mxu0 %vm1084_vm1, %v1903_v6 }
  0xa0   : > { %4908 = vmatmul.mubr.msk.bf16.gmra.mrb[60].mxu1 %vm1084_vm1, %v6112_v10  ;;  %v1912_v10 = vrot.slane %v6235_v43, 1 }
  0xa1   : > { %5012 = vmatmul.mubr.msk.bf16.gmra.mrb[32].mxu0 %vm1084_vm1, %v1905_v34  ;;  %4945 = vmatprep.mubr.msk.bf16.mxu1 %vm1084_vm1, %v6057_v55  ;;  %v1922_v34 = vrot.slane %v6308_v25, 1 }
  0xa2   : > { %5015 = vmatprep.mubr.msk.bf16.mxu0 %vm1084_vm1, %v1907_v28  ;;  %v1913_v45 = vsel %vm1868_vm3, %v1910_v3, %v1912_v10  ;;  %v1915_v54 = vsel %vm1868_vm3, %v1912_v10, %v1914_v29  ;;  %v1921_v28 = vsel %vm1868_vm3, %v1918_v52, %v1920_v48  ;;  %v1924_v3 = vrot.slane %v6323_v27, 1 }
  0xa3   : > { %v1923_v9 = vsel %vm1868_vm3, %v1920_v48, %v1922_v34 }
  0xa8   : > { %4946 = vmatmul.mubr.msk.bf16.vlgmr.msra.gmra.mrb[32].mxu1 %vm1084_vm1, %v6076_v7 }
  0xa9   : > { %5110 = vmatpush3.msk.msra.mxu1 %vm1181_vm0, %v6021_v31  ;;  %5016 = vmatmul.mubr.msk.bf16.gmra.mrb[36].mxu0 %vm1084_vm1, %v1909_v35  ;;  %v1916_v31 = vrot.slane %v6267_v42, 1  ;;  %v503_v35 = vld [vmem:[%s6040_s23 + $0x4] sm:$0xf] }
  0xaa   : > { %4949 = vmatprep.mubr.msk.bf16.mxu1 %vm1084_vm1, %v6101_v61  ;;  %5019 = vmatprep.mubr.msk.bf16.mxu0 %vm1084_vm1, %v1911_v39  ;;  %v1926_v39 = vrot.slane %v6046_v41, 1  ;;  %v6420_v10 = vcombine.low %v6061_v60, %v503_v35  ;;  %v2417_v35 = vrot.slane %v896_v57, 2  ;;  %v2993_v57 = vld [vmem:[%s6465_s12 + $0x30] sm:$0xff] }
  0xab   : > { %v1917_v6 = vsel %vm1868_vm3, %v1914_v29, %v1916_v31  ;;  %v1919_v44 = vsel %vm1868_vm3, %v1916_v31, %v1918_v52  ;;  %v1925_v29 = vsel %vm1868_vm3, %v1922_v34, %v1924_v3 }
  0xac   : > { %v1928_v60 = vrot.slane %v6420_v10, 1 }
  0xae   : > { %v1929_v52 = vsel %vm1868_vm3, %v1926_v39, %v1928_v60 }
  0xb0   : > { %4950 = vmatmul.mubr.msk.bf16.gmra.mrb[36].mxu1 %vm1084_vm1, %v6109_v17  ;;  %v3012_v17 = vld [vmem:[%s6465_s12 + $0xc8] sm:$0xff] }
  0xb1   : > { %5020 = vmatmul.mubr.msk.bf16.gmra.mrb[40].mxu0 %vm1084_vm1, %v1913_v45  ;;  %4953 = vmatprep.mubr.msk.bf16.mxu1 %vm1084_vm1, %v6147_v20  ;;  %v1927_v45 = vsel %vm1868_vm3, %v1924_v3, %v1926_v39  ;;  %v2416_v3 = vrot.slane %v900_v2, 1  ;;  %v2991_v39 = vld [vmem:[%s6465_s12 + $0x20] sm:$0xff]  ;;  %v2420_v2 = vrot.slane %v908_v4, 1  ;;  %v2994_v4 = vld [vmem:[%s6465_s12 + $0x38] sm:$0xff] }
  0xb2   : > { %5023 = vmatprep.mubr.msk.bf16.mxu0 %vm1084_vm1, %v1915_v54  ;;  %v6425_v54 = vld [vmem:[%s6040_s23 + $0x8] sm:$0xff]  }
  0xb3   : > { %v1930_v31 = vrot.slane %v6425_v54, 1 }
  0xb8   : > { %4954 = vmatmul.mubr.msk.bf16.gmra.mrb[40].mxu1 %vm1084_vm1, %v6167_v36 }
  0xb9   : > { %5024 = vmatmul.mubr.msk.bf16.gmra.mrb[44].mxu0 %vm1084_vm1, %v1917_v6  ;;  %4957 = vmatprep.mubr.msk.bf16.mxu1 %vm1084_vm1, %v6191_v23  ;;  %v6437_v6 = vld [vmem:[%s6040_s23 + $0x10] ss:$0 sps:$4 sm:$0xff]   ;;  %s4203_s23 = sshll.u32 %s7481_s22, 4  ;;  %s5636_s22 = scalar_lea.vmem %s5635_s8, 32  ;;  %s7374_s23 = int_to_ptr.vmem [resolvable:$true] %s4203_s23 }
  0xba   : > { %5027 = vmatprep.mubr.msk.bf16.mxu0 %vm1084_vm1, %v1919_v44  ;;  %v1931_v44 = vsel %vm1868_vm3, %v1928_v60, %v1930_v31  ;;  %v1932_v48 = vrot.slane %v6437_v6, 1  ;;  %v2429_v60 = vrot.slane %v920_v15, 2 }
  0xbc   : > { %v1933_v34 = vsel %vm1868_vm3, %v1930_v31, %v1932_v48 }
  0xc0   : > { %4958 = vmatmul.mubr.msk.bf16.gmra.mrb[44].mxu1 %vm1084_vm1, %v6207_v1 }
  0xc1   : > { %5028 = vmatmul.mubr.msk.bf16.gmra.mrb[48].mxu0 %vm1084_vm1, %v1921_v28  ;;  %4961 = vmatprep.mubr.msk.bf16.mxu1 %vm1084_vm1, %v6235_v43  ;;  %v2987_v28 = vld [vmem:[%s6465_s12] sm:$0xff] }
  0xc2   : > { %5031 = vmatprep.mubr.msk.bf16.mxu0 %vm1084_vm1, %v1923_v9  ;;  %v2989_v9 = vld [vmem:[%s6465_s12 + $0x10] sm:$0xff] }
  0xc8   : > { %4962 = vmatmul.mubr.msk.bf16.gmra.mrb[48].mxu1 %vm1084_vm1, %v6252_v33 }
  0xc9   : > { %5032 = vmatmul.mubr.msk.bf16.gmra.mrb[52].mxu0 %vm1084_vm1, %v1925_v29  ;;  %4965 = vmatprep.mubr.msk.bf16.mxu1 %vm1084_vm1, %v6267_v42 }
  0xca   : > { %5035 = vmatprep.mubr.msk.bf16.mxu0 %vm1084_vm1, %v1927_v45  ;;  %v2425_v45 = vrot.slane %v912_v5, 2 }
  0xd0   : > { %4966 = vmatmul.mubr.msk.bf16.gmra.mrb[52].mxu1 %vm1084_vm1, %v6280_v53 }
  0xd1   : > { %5036 = vmatmul.mubr.msk.bf16.gmra.mrb[56].mxu0 %vm1084_vm1, %v1929_v52  ;;  %4969 = vmatprep.mubr.msk.bf16.mxu1 %vm1084_vm1, %v6295_v32  ;;  %v2432_v52 = vrot.slane %v932_v46, 1  ;;  %v3000_v46 = vld [vmem:[%s6465_s12 + $0x68] sm:$0xff] }
  0xd2   : > { %5039 = vmatprep.mubr.msk.bf16.mxu0 %vm1084_vm1, %v1931_v44  ;;  %v7484_v44 = vshll.u32 %v6004_v12, 16 }
  0xd4   : > { %v2433_v48 = vrot.slane %v7484_v44, 2 }
  0xd8   : > { %4970 = vmatmul.mubr.msk.bf16.gmra.mrb[56].mxu1 %vm1084_vm1, %v6308_v25 }
  0xd9   : > { %5040 = vmatmul.mubr.msk.bf16.gmra.mrb[60].mxu0 %vm1084_vm1, %v1933_v34  ;;  %4973 = vmatprep.mubr.msk.bf16.mxu1 %vm1084_vm1, %v6323_v27  ;;  %v2999_v34 = vld [vmem:[%s6465_s12 + $0x60] sm:$0xff] }
  0xda   : > { %5045 = vmatprep.mubr.msk.bf16.mxu0 %vm1084_vm1, %v6154_v38  ;;  %v2988_v38 = vld [vmem:[%s6465_s12 + $0x8] sm:$0xff] }
  0xe0   : > { %4974 = vmatmul.mubr.msk.bf16.gmra.mrb[60].mxu1 %vm1084_vm1, %v6046_v41 }
  0xe1   : > { %5046 = vmatmul.mubr.msk.bf16.vlgmr.msra.gmra.mrb[0].mxu0 %vm1084_vm1, %v6157_v62  ;;  %5111 = vmatprep.mubr.msk.f32.mxu1 %vm3052_vm5, %v2987_v28  ;;  %v2990_v62 = vld [vmem:[%s6465_s12 + $0x18] sm:$0xff]  ;;  %v2434_v28 = vor.u32 %v2433_v48, %v2432_v52  ;;  %v7490_v52 = vshll.u32 %v6057_v55, 16 }
  0xe2   : > { %5049 = vmatprep.mubr.msk.bf16.mxu0 %vm1084_vm1, %v6184_v18  ;;  %v2418_v18 = vor.u32 %v2417_v35, %v2416_v3  ;;  %v3001_v35 = vld [vmem:[%s6465_s12 + $0x70] sm:$0xff] }
  0xe3   : > { %v2445_v44 = vrot.slane %v7490_v52, 2 }
  0xe4   : > { %v2419_v29 = vsel %vm2388_vm4, %v6225_v13, %v2418_v18 }
  0xe8   : > { %5112 = vmatmul.mubr.msk.f32.vlgmr.msra.gmra.mrb[64].mxu1 %vm3052_vm5, %v2988_v38 }
  0xe9   : > { %5050 = vmatmul.mubr.msk.bf16.gmra.mrb[4].mxu0 %vm1084_vm1, %v6194_v26  ;;  %5114 = vmatprep.mubr.msk.f32.mxu1 %vm3052_vm5, %v2989_v9  ;;  %v2421_v26 = vrot.slane %v904_v0, 2 }
  0xea   : > { %5053 = vmatprep.mubr.msk.bf16.mxu0 %vm1084_vm1, %v6229_v47  ;;  %v2424_v47 = vrot.slane %v916_v21, 1  ;;  %v2997_v21 = vld [vmem:[%s6465_s12 + $0x50] sm:$0xff] }
  0xeb   : > { %v2422_v0 = vor.u32 %v2421_v26, %v2420_v2  ;;  %v7487_v2 = vshrl.u32 %v6035_v37, 16 }
  0xec   : > { %5115 = vmatmul.mubr.msk.f32.gmra.mrb[66].mxu1 %vm3052_vm5, %v2990_v62  ;;  %v2426_v13 = vor.u32 %v2425_v45, %v2424_v47  ;;  %v7485_v62 = vshrl.u32 %v6016_v30, 16  ;;  %v3002_v45 = vld [vmem:[%s6465_s12 + $0x78] sm:$0xff] }
  0xed   : > { %5117 = vmatprep.mubr.msk.f32.mxu1 %vm3052_vm5, %v2991_v39  ;;  %v2423_v5 = vsel %vm2388_vm4, %v2418_v18, %v2422_v0  ;;  %v7486_v18 = vshll.u32 %v6016_v30, 16  ;;  %v2440_v26 = vrot.slane %v7487_v2, 1  ;;  %v2453_v2 = vrot.slane %v968_v16, 2 }
  0xee   : > { %v2427_v31 = vsel %vm2388_vm4, %v2422_v0, %v2426_v13  ;;  %v2436_v39 = vrot.slane %v7485_v62, 1 }
  0xf0   : > { %5118 = vmatmul.mubr.msk.f32.gmra.mrb[68].mxu1 %vm3052_vm5, %v2992_v51  ;;  %v2437_v51 = vrot.slane %v7486_v18, 2 }
  0xf1   : > { %5054 = vmatmul.mubr.msk.bf16.gmra.mrb[8].mxu0 %vm1084_vm1, %v6239_v40  ;;  %5120 = vmatprep.mubr.msk.f32.mxu1 %vm3052_vm5, %v2993_v57  ;;  %v2428_v40 = vrot.slane %v924_v24, 1  ;;  %v2998_v24 = vld [vmem:[%s6465_s12 + $0x58] sm:$0xff] }
  0xf2   : > { %5057 = vmatprep.mubr.msk.bf16.mxu0 %vm1084_vm1, %v2419_v29  ;;  %v7488_v29 = vshll.u32 %v6035_v37, 16  ;;  %v2438_v30 = vor.u32 %v2437_v51, %v2436_v39  ;;  %v3009_v51 = vld [vmem:[%s6465_s12 + $0xb0] sm:$0xff] }
  0xf3   : > { %v2430_v8 = vor.u32 %v2429_v60, %v2428_v40  ;;  %v3005_v40 = vld [vmem:[%s6465_s12 + $0x90] sm:$0xff]  ;;  %v7489_v60 = vshrl.u32 %v6057_v55, 16 }
  0xf4   : > { %5121 = vmatmul.mubr.msk.f32.gmra.mrb[70].mxu1 %vm3052_vm5, %v2994_v4  ;;  %v2441_v47 = vrot.slane %v7488_v29, 2  ;;  %v3003_v4 = vld [vmem:[%s6465_s12 + $0x80] sm:$0xff]  ;;  %v2456_v29 = vrot.slane %v980_v19, 1 }
  0xf5   : > { %5123 = vmatprep.mubr.msk.f32.mxu1 %vm3052_vm5, %v2995_v59  ;;  %v2431_v3 = vsel %vm2388_vm4, %v2426_v13, %v2430_v8  ;;  %v2435_v57 = vsel %vm2388_vm4, %v2430_v8, %v2434_v28 }
  0xf6   : > { %v2442_v0 = vor.u32 %v2441_v47, %v2440_v26  ;;  %v2457_v47 = vrot.slane %v976_v58, 2 }
  0xf8   : > { %5124 = vmatmul.mubr.msk.f32.gmra.mrb[72].mxu1 %vm3052_vm5, %v2996_v63  ;;  %v3004_v63 = vld [vmem:[%s6465_s12 + $0x88] sm:$0xff]  ;;  %v2443_v48 = vsel %vm2388_vm4, %v2438_v30, %v2442_v0 }
  0xf9   : > { %5058 = vmatmul.mubr.msk.bf16.gmra.mrb[12].mxu0 %vm1084_vm1, %v2423_v5  ;;  %5126 = vmatprep.mubr.msk.f32.mxu1 %vm3052_vm5, %v2997_v21  ;;  %v2439_v21 = vsel %vm2388_vm4, %v2434_v28, %v2438_v30  ;;  %v3006_v28 = vld [vmem:[%s6465_s12 + $0x98] sm:$0xff] }
  0xfa   : > { %5061 = vmatprep.mubr.msk.bf16.mxu0 %vm1084_vm1, %v2427_v31  ;;  %v2444_v31 = vrot.slane %v7489_v60, 1  ;;  %v7493_v60 = vshll.u32 %v6147_v20, 16 }
  0xfb   : > { %v6530_v15 = vpop.f32.mrb[0].mxu1 }
  0xfc   : > { %v6532_v38 = vpop.f32.mrb[1].mxu1  ;;  %5127 = vmatmul.mubr.msk.f32.gmra.mrb[74].mxu1 %vm3052_vm5, %v2998_v24  ;;  %v2448_v24 = vrot.slane %v964_v22, 1  ;;  %v2446_v55 = vor.u32 %v2445_v44, %v2444_v31  ;;  %v3008_v22 = vld [vmem:[%s6465_s12 + $0xa8] sm:$0xff]  ;;  %v2461_v31 = vrot.slane %v7493_v60, 2  ;;  %v7494_v44 = vshrl.u32 %v6167_v36, 16 }
  0xfd   : > { %v6535_v12 = vpop.f32.mrb[2].mxu1  ;;  %5129 = vmatprep.mubr.msk.f32.mxu1 %vm3052_vm5, %v2999_v34  ;;  %v7491_v34 = vshll.u32 %v6076_v7, 16 }
  0xfe   : > { %v6539_v9 = vpop.f32.mrb[3].mxu1  ;;  %v2447_v18 = vsel %vm2388_vm4, %v2442_v0, %v2446_v55 }
  0xff   : > { %v2449_v8 = vrot.slane %v7491_v34, 2 }
 0x100   : > { %5130 = vmatmul.mubr.msk.f32.gmra.mrb[76].mxu1 %vm3052_vm5, %v3000_v46  ;;  %v3007_v46 = vld [vmem:[%s6465_s12 + $0xa0] sm:$0xff] }
 0x101   : > { %5062 = vmatmul.mubr.msk.bf16.gmra.mrb[16].mxu0 %vm1084_vm1, %v2431_v3  ;;  %5132 = vmatprep.mubr.msk.f32.mxu1 %vm3052_vm5, %v3001_v35  ;;  %v2450_v35 = vor.u32 %v2449_v8, %v2448_v24  ;;  %v7495_v24 = vshll.u32 %v6167_v36, 16  ;;  %v3014_v8 = vld [vmem:[%s6465_s12 + $0xd8] sm:$0xff] }
 0x102   : > { %5065 = vmatprep.mubr.msk.bf16.mxu0 %vm1084_vm1, %v2435_v57  ;;  %v2452_v57 = vrot.slane %v972_v11, 1  ;;  %v3010_v11 = vld [vmem:[%s6465_s12 + $0xb8] sm:$0xff] }
 0x103   : > { %v6558_v59 = vpop.f32.mrb[4].mxu1  ;;  %v2451_v26 = vsel %vm2388_vm4, %v2446_v55, %v2450_v35  ;;  %v2465_v34 = vrot.slane %v7495_v24, 2  ;;  %v7500_v24 = vshrl.u32 %v6235_v43, 16 }
 0x104   : > { %v6560_v13 = vpop.f32.mrb[5].mxu1  ;;  %5133 = vmatmul.mubr.msk.f32.gmra.mrb[78].mxu1 %vm3052_vm5, %v3002_v45  ;;  %v3011_v45 = vld [vmem:[%s6465_s12 + $0xc0] sm:$0xff]  ;;  %v2454_v61 = vor.u32 %v2453_v2, %v2452_v57  ;;  %v3017_v57 = vld [vmem:[%s6465_s12 + $0xf0] sm:$0xff]  ;;  %v7496_v2 = vshrl.u32 %v6191_v23, 16 }
 0x105   : > { %v6563_v37 = vpop.f32.mrb[6].mxu1  ;;  %5135 = vmatprep.mubr.msk.f32.mxu1 %vm3052_vm5, %v3003_v4  ;;  %v2458_v4 = vor.u32 %v2457_v47, %v2456_v29  ;;  %v7497_v29 = vshll.u32 %v6191_v23, 16 }
 0x106   : > { %v6567_v5 = vpop.f32.mrb[7].mxu1  ;;  %v2455_v0 = vsel %vm2388_vm4, %v2450_v35, %v2454_v61 }
 0x107   : > { %v2459_v52 = vsel %vm2388_vm4, %v2454_v61, %v2458_v4  ;;  %v2469_v47 = vrot.slane %v7497_v29, 2 }
 0x108   : > { %5136 = vmatmul.mubr.msk.f32.gmra.mrb[80].mxu1 %vm3052_vm5, %v3004_v63  ;;  %v3013_v63 = vld [vmem:[%s6465_s12 + $0xd0] sm:$0xff] }
 0x109   : > { %5066 = vmatmul.mubr.msk.bf16.gmra.mrb[20].mxu0 %vm1084_vm1, %v2439_v21  ;;  %5138 = vmatprep.mubr.msk.f32.mxu1 %vm3052_vm5, %v3005_v40  ;;  %v7492_v21 = vshrl.u32 %v6147_v20, 16 }
 0x10a   : > { %5069 = vmatprep.mubr.msk.bf16.mxu0 %vm1084_vm1, %v2443_v48  ;;  %v2464_v48 = vrot.slane %v7494_v44, 1 }
 0x10b   : > { %v6586_v3 = vpop.f32.mrb[8].mxu1  ;;  %v2460_v40 = vrot.slane %v7492_v21, 1 }
 0x10c   : > { %v6588_v62 = vpop.f32.mrb[9].mxu1  ;;  %5139 = vmatmul.mubr.msk.f32.gmra.mrb[82].mxu1 %vm3052_vm5, %v3006_v28  ;;  %v3015_v28 = vld [vmem:[%s6465_s12 + $0xe0] sm:$0xff]  ;;  %v2466_v55 = vor.u32 %v2465_v34, %v2464_v48  ;;  %v3021_v48 = vld [vmem:[%s6465_s12 + $0x110] sm:$0xff]  ;;  %v2476_v34 = vrot.slane %v7500_v24, 1 }
 0x10d   : > { %v6591_v7 = vpop.f32.mrb[10].mxu1  ;;  %5141 = vmatprep.mubr.msk.f32.mxu1 %vm3052_vm5, %v3007_v46  ;;  %v2462_v20 = vor.u32 %v2461_v31, %v2460_v40  ;;  %v3020_v31 = vld [vmem:[%s6465_s12 + $0x108] sm:$0xff] }
 0x10e   : > { %v6595_v39 = vpop.f32.mrb[11].mxu1 }
 0x110   : > { %5142 = vmatmul.mubr.msk.f32.gmra.mrb[84].mxu1 %vm3052_vm5, %v3008_v22  ;;  %v3016_v22 = vld [vmem:[%s6465_s12 + $0xe8] sm:$0xff] }
 0x111   : > { %5070 = vmatmul.mubr.msk.bf16.gmra.mrb[24].mxu0 %vm1084_vm1, %v2447_v18  ;;  %5144 = vmatprep.mubr.msk.f32.mxu1 %vm3052_vm5, %v3009_v51  ;;  %v2463_v51 = vsel %vm2388_vm4, %v2458_v4, %v2462_v20  ;;  %v3018_v4 = vld [vmem:[%s6465_s12 + $0xf8] sm:$0xff] }
 0x112   : > { %5073 = vmatprep.mubr.msk.bf16.mxu0 %vm1084_vm1, %v2451_v26  ;;  %v2468_v26 = vrot.slane %v7496_v2, 1 }
 0x113   : > { %v6614_v16 = vpop.f32.mrb[12].mxu1 }
 0x114   : > { %v6616_v30 = vpop.f32.mrb[13].mxu1  ;;  %5145 = vmatmul.mubr.msk.f32.gmra.mrb[86].mxu1 %vm3052_vm5, %v3010_v11  ;;  %v2467_v11 = vsel %vm2388_vm4, %v2462_v20, %v2466_v55  ;;  %v2470_v23 = vor.u32 %v2469_v47, %v2468_v26  ;;  %v3023_v26 = vld [vmem:[%s6465_s12 + $0x120] sm:$0xff] }
 0x115   : > { %v6619_v58 = vpop.f32.mrb[14].mxu1  ;;  %5147 = vmatprep.mubr.msk.f32.mxu1 %vm3052_vm5, %v3011_v45  ;;  %v7498_v45 = vshrl.u32 %v6207_v1, 16 }
 0x116   : > { %v6623_v19 = vpop.f32.mrb[15].mxu1  ;;  %v2471_v44 = vsel %vm2388_vm4, %v2466_v55, %v2470_v23  ;;  %v3022_v55 = vld [vmem:[%s6465_s12 + $0x118] sm:$0xff] }
 0x117   : > { %v2472_v61 = vrot.slane %v7498_v45, 1  ;;  %v3024_v45 = vld [vmem:[%s6465_s12 + $0x128] sm:$0xff] }
 0x118   : > { %5148 = vmatmul.mubr.msk.f32.gmra.mrb[88].mxu1 %vm3052_vm5, %v3012_v17  ;;  %v7499_v17 = vshll.u32 %v6207_v1, 16 }
 0x119   : > { %5074 = vmatmul.mubr.msk.bf16.gmra.mrb[28].mxu0 %vm1084_vm1, %v2455_v0  ;;  %5150 = vmatprep.mubr.msk.f32.mxu1 %vm3052_vm5, %v3013_v63  ;;  %v3019_v63 = vld [vmem:[%s6465_s12 + $0x100] sm:$0xff] }
 0x11a   : > { %5077 = vmatprep.mubr.msk.bf16.mxu0 %vm1084_vm1, %v2459_v52  ;;  %v2473_v0 = vrot.slane %v7499_v17, 2 }
 0x11b   : > { %v6642_v46 = vpop.f32.mrb[16].mxu1 }
 0x11c   : > { %v6644_v35 = vpop.f32.mrb[17].mxu1  ;;  %5151 = vmatmul.mubr.msk.f32.gmra.mrb[90].mxu1 %vm3052_vm5, %v3014_v8  ;;  %v2474_v40 = vor.u32 %v2473_v0, %v2472_v61  ;;  %v7501_v8 = vshll.u32 %v6235_v43, 16  ;;  %v3025_v0 = vld [vmem:[%s6465_s12 + $0x130] sm:$0xff] }
 0x11d   : > { %v6647_v36 = vpop.f32.mrb[18].mxu1  ;;  %5153 = vmatprep.mubr.msk.f32.mxu1 %vm3052_vm5, %v3015_v28 }
 0x11e   : > { %v6651_v18 = vpop.f32.mrb[19].mxu1  ;;  %v2477_v28 = vrot.slane %v7501_v8, 2  ;;  %v2475_v20 = vsel %vm2388_vm4, %v2470_v23, %v2474_v40  ;;  %v7505_v23 = vshll.u32 %v6267_v42, 16 }
 0x120   : > { %5154 = vmatmul.mubr.msk.f32.gmra.mrb[92].mxu1 %vm3052_vm5, %v3016_v22  ;;  %v7502_v22 = vshrl.u32 %v6252_v33, 16  ;;  %v2478_v43 = vor.u32 %v2477_v28, %v2476_v34  ;;  %v7507_v34 = vshll.u32 %v6280_v53, 16  ;;  %v3027_v28 = vld [vmem:[%s6465_s12 + $0x140] sm:$0xff] }
 0x121   : > { %5078 = vmatmul.mubr.msk.bf16.gmra.mrb[32].mxu0 %vm1084_vm1, %v2463_v51  ;;  %5156 = vmatprep.mubr.msk.f32.mxu1 %vm3052_vm5, %v3017_v57  ;;  %v7503_v57 = vshll.u32 %v6252_v33, 16 }
 0x122   : > { %5081 = vmatprep.mubr.msk.bf16.mxu0 %vm1084_vm1, %v2467_v11  ;;  %v2480_v51 = vrot.slane %v7502_v22, 1  ;;  %v2479_v17 = vsel %vm2388_vm4, %v2474_v40, %v2478_v43  ;;  %v2489_v8 = vrot.slane %v7507_v34, 2  ;;  %v3026_v40 = vld [vmem:[%s6465_s12 + $0x138] sm:$0xff] }
 0x123   : > { %v6670_v21 = vpop.f32.mrb[20].mxu1  ;;  %v2481_v2 = vrot.slane %v7503_v57, 2  ;;  %v3028_v57 = vld [vmem:[%s6465_s12 + $0x148] sm:$0xff] }
 0x124   : > { %v6672_v60 = vpop.f32.mrb[21].mxu1  ;;  %5157 = vmatmul.mubr.msk.f32.gmra.mrb[94].mxu1 %vm3052_vm5, %v3018_v4  ;;  %v7504_v4 = vshrl.u32 %v6267_v42, 16 }
 0x125   : > { %v6675_v1 = vpop.f32.mrb[22].mxu1  ;;  %5159 = vmatprep.mubr.msk.f32.mxu1 %vm3052_vm5, %v3019_v63  ;;  %v2482_v47 = vor.u32 %v2481_v2, %v2480_v51 }
 0x126   : > { %v6679_v52 = vpop.f32.mrb[23].mxu1  ;;  %v2484_v63 = vrot.slane %v7504_v4, 1  ;;  %v2496_v4 = vrot.slane %v1060_v50, 1 }
 0x128   : > { %5160 = vmatmul.mubr.msk.f32.gmra.mrb[96].mxu1 %vm3052_vm5, %v3020_v31  ;;  %v2485_v31 = vrot.slane %v7505_v23, 2 }
 0x129   : > { %5082 = vmatmul.mubr.msk.bf16.gmra.mrb[36].mxu0 %vm1084_vm1, %v2471_v44  ;;  %5162 = vmatprep.mubr.msk.f32.mxu1 %vm3052_vm5, %v3021_v48  ;;  %v2483_v44 = vsel %vm2388_vm4, %v2478_v43, %v2482_v47  ;;  %v7506_v48 = vshrl.u32 %v6280_v53, 16  ;;  %v2492_v43 = vrot.slane %v1052_v14, 1  ;;  %v3031_v14 = vld [vmem:[%s6465_s12 + $0x160] sm:$0xff] }
 0x12a   : > { %5085 = vmatprep.mubr.msk.bf16.mxu0 %vm1084_vm1, %v2475_v20  ;;  %v2486_v42 = vor.u32 %v2485_v31, %v2484_v63  ;;  %v7509_v63 = vshll.u32 %v6308_v25, 16  ;;  %v3032_v25 = vld [vmem:[%s6465_s12 + $0x168] sm:$0xff] }
 0x12b   : > { %v6698_v29 = vpop.f32.mrb[24].mxu1  ;;  %v2488_v24 = vrot.slane %v7506_v48, 1  ;;  %v2500_v48 = vrot.slane %v1068_v49, 1  ;;  %v3034_v49 = vld [vmem:[%s6465_s12 + $0x178] sm:$0xff] }
 0x12c   : > { %v6700_v11 = vpop.f32.mrb[25].mxu1  ;;  %5163 = vmatmul.mubr.msk.f32.gmra.mrb[98].mxu1 %vm3052_vm5, %v3022_v55  ;;  %v2487_v55 = vsel %vm2388_vm4, %v2482_v47, %v2486_v42  ;;  %v2497_v23 = vrot.slane %v7509_v63, 2  ;;  %v3030_v47 = vld [vmem:[%s6465_s12 + $0x158] sm:$0xff] }
 0x12d   : > { %v6703_v33 = vpop.f32.mrb[26].mxu1  ;;  %5165 = vmatprep.mubr.msk.f32.mxu1 %vm3052_vm5, %v3023_v26  ;;  %v2490_v22 = vor.u32 %v2489_v8, %v2488_v24  ;;  %v3029_v26 = vld [vmem:[%s6465_s12 + $0x150] sm:$0xff]  ;;  %v2501_v24 = vrot.slane %v1064_v56, 2  ;;  %v7510_v8 = vshrl.u32 %v6046_v41, 16  ;;  %v2509_v56 = vshrl.u32 %v6420_v10, 16 }
 0x12e   : > { %v6707_v61 = vpop.f32.mrb[27].mxu1  ;;  %v2498_v31 = vor.u32 %v2497_v23, %v2496_v4 }
 0x12f   : > { %v2502_v27 = vor.u32 %v2501_v24, %v2500_v48  ;;  %v3041_v48 = vld [vmem:[%s6465_s12 + $0x1b0] sm:$0xff] }
 0x130   : > { %5166 = vmatmul.mubr.msk.f32.gmra.mrb[100].mxu1 %vm3052_vm5, %v3024_v45  ;;  %v7508_v45 = vshll.u32 %v6295_v32, 16 }
 0x131   : > { %5086 = vmatmul.mubr.msk.bf16.gmra.mrb[40].mxu0 %vm1084_vm1, %v2479_v17  ;;  %5168 = vmatprep.mubr.msk.f32.mxu1 %vm3052_vm5, %v3025_v0  ;;  %v2491_v0 = vsel %vm2388_vm4, %v2486_v42, %v2490_v22 }
 0x132   : > { %5089 = vmatprep.mubr.msk.bf16.mxu0 %vm1084_vm1, %v2483_v44  ;;  %v2493_v17 = vrot.slane %v7508_v45, 2  ;;  %v3033_v44 = vld [vmem:[%s6465_s12 + $0x170] sm:$0xff]  ;;  %v2503_v45 = vsel %vm2388_vm4, %v2498_v31, %v2502_v27 }
 0x133   : > { %v6726_v20 = vpop.f32.mrb[28].mxu1 }
 0x134   : > { %v6728_v51 = vpop.f32.mrb[29].mxu1  ;;  %5169 = vmatmul.mubr.msk.f32.gmra.mrb[102].mxu1 %vm3052_vm5, %v3026_v40  ;;  %v2494_v32 = vor.u32 %v2493_v17, %v2492_v43  ;;  %v2504_v40 = vrot.slane %v7510_v8, 1  ;;  %v3036_v43 = vld [vmem:[%s6465_s12 + $0x188] sm:$0xff]  ;;  %v3037_v17 = vld [vmem:[%s6465_s12 + $0x190] sm:$0xff] }
 0x135   : > { %v6731_v53 = vpop.f32.mrb[30].mxu1  ;;  %5171 = vmatprep.mubr.msk.f32.mxu1 %vm3052_vm5, %v3027_v28  ;;  %v7511_v28 = vshll.u32 %v6046_v41, 16  ;;  %v2518_v41 = vshrl.u32 %v6425_v54, 16 }
 0x136   : > { %v6735_v2 = vpop.f32.mrb[31].mxu1  ;;  %v2495_v50 = vsel %vm2388_vm4, %v2490_v22, %v2494_v32  ;;  %v2499_v34 = vsel %vm2388_vm4, %v2494_v32, %v2498_v31  ;;  %v3035_v22 = vld [vmem:[%s6465_s12 + $0x180] sm:$0xff]  ;;  %v2527_v32 = vshrl.u32 %v6437_v6, 16  ;;  %v2530_v31 = vshll.u32 %v6437_v6, 16  ;;  %v3042_v6 = vld [vmem:[%s6465_s12 + $0x1b8] sm:$0xff] }
 0x137   : > { %v2505_v42 = vrot.slane %v7511_v28, 2  ;;  %v2520_v63 = vrot.slane %v2518_v41, 1  ;;  %v3050_v41 = vld [vmem:[%s6465_s12 + $0x1f8] sm:$0xff] }
 0x138   : > { %5172 = vmatmul.mubr.msk.f32.gmra.mrb[104].mxu1 %vm3052_vm5, %v3028_v57  ;;  %v2512_v57 = vshll.u32 %v6420_v10, 16  ;;  %v2529_v24 = vrot.slane %v2527_v32, 1 }
 0x139   : > { %5090 = vmatmul.mubr.msk.bf16.gmra.mrb[44].mxu0 %vm1084_vm1, %v2487_v55  ;;  %5174 = vmatprep.mubr.msk.f32.mxu1 %vm3052_vm5, %v3029_v26  ;;  %v2506_v55 = vor.u32 %v2505_v42, %v2504_v40  ;;  %v2521_v26 = vshll.u32 %v6425_v54, 16  ;;  %v3038_v54 = vld [vmem:[%s6465_s12 + $0x198] sm:$0xff]  ;;  %v3043_v40 = vld [vmem:[%s6465_s12 + $0x1c0] sm:$0xff]  ;;  %v3044_v42 = vld [vmem:[%s6465_s12 + $0x1c8] sm:$0xff] }
 0x13a   : > { %5093 = vmatprep.mubr.msk.bf16.mxu0 %vm1084_vm1, %v2491_v0  ;;  %v2511_v0 = vrot.slane %v2509_v56, 1  ;;  %v2514_v4 = vrot.slane %v2512_v57, 2  ;;  %v3047_v56 = vld [vmem:[%s6465_s12 + $0x1e0] sm:$0xff]  ;;  %v3048_v57 = vld [vmem:[%s6465_s12 + $0x1e8] sm:$0xff] }
 0x13b   : > { %v2507_v10 = vsel %vm2388_vm4, %v2502_v27, %v2506_v55  ;;  %v2523_v23 = vrot.slane %v2521_v26, 2  ;;  %v3046_v27 = vld [vmem:[%s6465_s12 + $0x1d8] sm:$0xff] }
 0x13c   : > { %5175 = vmatmul.mubr.msk.f32.gmra.mrb[106].mxu1 %vm3052_vm5, %v3030_v47  ;;  %v3039_v47 = vld [vmem:[%s6465_s12 + $0x1a0] sm:$0xff] }
 0x13d   : > { %5177 = vmatprep.mubr.msk.f32.mxu1 %vm3052_vm5, %v3031_v14  ;;  %v2515_v14 = vor.u32 %v2514_v4, %v2511_v0 }
 0x140   : > { %5178 = vmatmul.mubr.msk.f32.gmra.mrb[108].mxu1 %vm3052_vm5, %v3032_v25  ;;  %v2524_v25 = vor.u32 %v2523_v23, %v2520_v63 }
 0x141   : > { %5094 = vmatmul.mubr.msk.bf16.gmra.mrb[48].mxu0 %vm1084_vm1, %v2495_v50  ;;  %5180 = vmatprep.mubr.msk.f32.mxu1 %vm3052_vm5, %v3033_v44  ;;  %v3040_v50 = vld [vmem:[%s6465_s12 + $0x1a8] sm:$0xff]  ;;  %v2516_v44 = vsel %vm2388_vm4, %v2506_v55, %v2515_v14  ;;  %v3049_v55 = vld [vmem:[%s6465_s12 + $0x1f0] sm:$0xff] }
 0x142   : > { %5097 = vmatprep.mubr.msk.bf16.mxu0 %vm1084_vm1, %v2499_v34  ;;  %v2532_v34 = vrot.slane %v2530_v31, 2  ;;  %v2525_v8 = vsel %vm2388_vm4, %v2515_v14, %v2524_v25 }
 0x144   : > { %5181 = vmatmul.mubr.msk.f32.gmra.mrb[110].mxu1 %vm3052_vm5, %v3034_v49  ;;  %v2533_v28 = vor.u32 %v2532_v34, %v2529_v24 }
 0x145   : > { %5183 = vmatprep.mubr.msk.f32.mxu1 %vm3052_vm5, %v3035_v22  ;;  %v3045_v22 = vld [vmem:[%s6465_s12 + $0x1d0] sm:$0xff] }
 0x146   : > { %v2534_v49 = vsel %vm2388_vm4, %v2524_v25, %v2533_v28 }
 0x148   : > { %5184 = vmatmul.mubr.msk.f32.gmra.mrb[112].mxu1 %vm3052_vm5, %v3036_v43 }
 0x149   : > { %5098 = vmatmul.mubr.msk.bf16.gmra.mrb[52].mxu0 %vm1084_vm1, %v2503_v45  ;;  %5186 = vmatprep.mubr.msk.f32.mxu1 %vm3052_vm5, %v3037_v17 }
 0x14a   : > { %5101 = vmatprep.mubr.msk.bf16.mxu0 %vm1084_vm1, %v2507_v10 }
 0x14c   : > { %5187 = vmatmul.mubr.msk.f32.gmra.mrb[114].mxu1 %vm3052_vm5, %v3038_v54 }
 0x14d   : > { %5189 = vmatprep.mubr.msk.f32.mxu1 %vm3052_vm5, %v3039_v47 }
 0x150   : > { %5190 = vmatmul.mubr.msk.f32.gmra.mrb[116].mxu1 %vm3052_vm5, %v3040_v50 }
 0x151   : > { %5102 = vmatmul.mubr.msk.bf16.gmra.mrb[56].mxu0 %vm1084_vm1, %v2516_v44  ;;  %5192 = vmatprep.mubr.msk.f32.mxu1 %vm3052_vm5, %v3041_v48 }
 0x152   : > { %5105 = vmatprep.mubr.msk.bf16.mxu0 %vm1084_vm1, %v2525_v8 }
 0x154   : > { %5193 = vmatmul.mubr.msk.f32.gmra.mrb[118].mxu1 %vm3052_vm5, %v3042_v6 }
 0x155   : > { %5195 = vmatprep.mubr.msk.f32.mxu1 %vm3052_vm5, %v3043_v40 }
 0x158   : > { %5196 = vmatmul.mubr.msk.f32.gmra.mrb[120].mxu1 %vm3052_vm5, %v3044_v42 }
 0x159   : > { %5106 = vmatmul.mubr.msk.bf16.gmra.mrb[60].mxu0 %vm1084_vm1, %v2534_v49  ;;  %5198 = vmatprep.mubr.msk.f32.mxu1 %vm3052_vm5, %v3045_v22 }
 0x15c   : > { %5199 = vmatmul.mubr.msk.f32.gmra.mrb[122].mxu1 %vm3052_vm5, %v3046_v27 }
 0x15d   : > { %5201 = vmatprep.mubr.msk.f32.mxu1 %vm3052_vm5, %v3047_v56 }
 0x160   : > { %5202 = vmatmul.mubr.msk.f32.gmra.mrb[124].mxu1 %vm3052_vm5, %v3048_v57 }
 0x161   : > { %5204 = vmatprep.mubr.msk.f32.mxu1 %vm3052_vm5, %v3049_v55 }
 0x164   : > { %5205 = vmatmul.mubr.msk.f32.gmra.mrb[126].mxu1 %vm3052_vm5, %v3050_v41 }
 0x17b   : > { %v6822_v26 = vpop.f32.mrb[32].mxu1 }
 0x17c   : > { %v6824_v43 = vpop.f32.mrb[33].mxu1 }
 0x17d   : > { %v6826_v45 = vpop.f32.mrb[34].mxu1 }
 0x17e   : > { %v6828_v17 = vpop.f32.mrb[35].mxu1 }
 0x183   : > { %v6830_v0 = vpop.f32.mrb[36].mxu1 }
 0x184   : > { %v6832_v4 = vpop.f32.mrb[37].mxu1 }
 0x185   : > { %v6834_v10 = vpop.f32.mrb[38].mxu1 }
 0x186   : > { %v6836_v63 = vpop.f32.mrb[39].mxu1 }
 0x18b   : > { %v6838_v23 = vpop.f32.mrb[40].mxu1 }
 0x18c   : > { %v6840_v54 = vpop.f32.mrb[41].mxu1 }
 0x18d   : > { %v6842_v47 = vpop.f32.mrb[42].mxu1 }
 0x18e   : > { %v6844_v14 = vpop.f32.mrb[43].mxu1 }
 0x193   : > { %v6846_v32 = vpop.f32.mrb[44].mxu1 }
 0x194   : > { %v6848_v31 = vpop.f32.mrb[45].mxu1 }
 0x195   : > { %v6850_v25 = vpop.f32.mrb[46].mxu1 }
 0x196   : > { %v6852_v50 = vpop.f32.mrb[47].mxu1 }
 0x197   : > { %7512 = vst [vmem:[#allocation8_spill] sm:$0xff] %v6852_v50 }
 0x19b   : > { %v6854_v44 = vpop.f32.mrb[48].mxu1 }
 0x19c   : > { %7513 = vst [vmem:[#allocation9_spill] sm:$0xff] %v6854_v44  ;;  %v6856_v48 = vpop.f32.mrb[49].mxu1 }
 0x19d   : > { %7514 = vst [vmem:[#allocation10_spill] sm:$0xff] %v6856_v48  ;;  %v6858_v24 = vpop.f32.mrb[50].mxu1 }
 0x19e   : > { %7515 = vst [vmem:[#allocation11_spill] sm:$0xff] %v6858_v24  ;;  %v6860_v34 = vpop.f32.mrb[51].mxu1 }
 0x19f   : > { %7516 = vst [vmem:[#allocation12_spill] sm:$0xff] %v6860_v34 }
 0x1a3   : > { %v6862_v8 = vpop.f32.mrb[52].mxu1 }
 0x1a4   : > { %7517 = vst [vmem:[#allocation13_spill] sm:$0xff] %v6862_v8  ;;  %v6864_v6 = vpop.f32.mrb[53].mxu1 }
 0x1a5   : > { %7518 = vst [vmem:[#allocation14_spill] sm:$0xff] %v6864_v6  ;;  %v6866_v40 = vpop.f32.mrb[54].mxu1 }
 0x1a6   : > { %7519 = vst [vmem:[#allocation15_spill] sm:$0xff] %v6866_v40  ;;  %v6868_v28 = vpop.f32.mrb[55].mxu1 }
 0x1a7   : > { %7520 = vst [vmem:[#allocation16_spill] sm:$0xff] %v6868_v28 }
 0x1ab   : > { %v6870_v42 = vpop.f32.mrb[56].mxu1 }
 0x1ac   : > { %7521 = vst [vmem:[#allocation17_spill] sm:$0xff] %v6870_v42  ;;  %v6872_v49 = vpop.f32.mrb[57].mxu1 }
 0x1ad   : > { %7522 = vst [vmem:[#allocation18_spill] sm:$0xff] %v6872_v49  ;;  %v6874_v22 = vpop.f32.mrb[58].mxu1 }
 0x1ae   : > { %7523 = vst [vmem:[#allocation19_spill] sm:$0xff] %v6874_v22  ;;  %v6876_v27 = vpop.f32.mrb[59].mxu1 }
 0x1af   : > { %7524 = vst [vmem:[#allocation20_spill] sm:$0xff] %v6876_v27 }
 0x1b3   : > { %v6878_v56 = vpop.f32.mrb[60].mxu1 }
 0x1b4   : > { %7525 = vst [vmem:[#allocation21_spill] sm:$0xff] %v6878_v56  ;;  %v6880_v57 = vpop.f32.mrb[61].mxu1  ;;  %v5047_v55 = vpop.f32.mrb[0].mxu0 }
 0x1b5   : > { %7526 = vst [vmem:[#allocation22_spill] sm:$0xff] %v6880_v57  ;;  %v5209_v41 = vadd.f32 %v5047_v55, %v6530_v15  ;;  %v6883_v6 = vpop.f32.mrb[62].mxu1  ;;  %v2668_v40 = vpop.f32.mrb[1].mxu0 }
 0x1b6   : > { %7527 = vst [vmem:[#allocation23_spill] sm:$0xff] %v6883_v6  ;;  %v5210_v28 = vadd.f32 %v2668_v40, %v6532_v38  ;;  %v6886_v8 = vpop.f32.mrb[63].mxu1  ;;  %v5048_v42 = vpop.f32.mrb[2].mxu0 }
 0x1b7   : > { %7528 = vst [vmem:[#allocation24_spill] sm:$0xff] %v6886_v8  ;;  %5502 = vtanh.f32 %v5209_v41  ;;  %v5211_v22 = vadd.f32 %v5048_v42, %v6535_v12  ;;  %v2671_v49 = vpop.f32.mrb[3].mxu0 }
 0x1b8   : > { %5504 = vtanh.f32 %v5210_v28  ;;  %v5212_v56 = vadd.f32 %v2671_v49, %v6539_v9 }
 0x1b9   : > { %5506 = vtanh.f32 %v5211_v22 }
 0x1ba   : > { %5508 = vtanh.f32 %v5212_v56 }
 0x1bb   : > { %v5113_v15 = vpop.f32.mrb[64].mxu1 }
 0x1bc   : > { %v3634_v55 = vmul.f32 %v5212_v56, %v5113_v15  ;;  %v5051_v6 = vpop.f32.mrb[4].mxu0  ;;  %v3314_v57 = vpop.f32.mrb[65].mxu1 }
 0x1bd   : > { %v6891_v38 = vadd.f32 %v5051_v6, %v6558_v59  ;;  %v3633_v40 = vmul.f32 %v5210_v28, %v3314_v57  ;;  %v2684_v8 = vpop.f32.mrb[5].mxu0 }
 0x1be   : > { %v3699_v27 = vsel %vm3697_vm6, %v3634_v55, 0.0  ;;  %v3834_v12 = vmul.f32 %v5212_v56, %v3634_v55  ;;  %v5214_v42 = vadd.f32 %v2684_v8, %v6560_v13  ;;  %v5052_v34 = vpop.f32.mrb[6].mxu0 }
 0x1bf   : > { %5510 = vtanh.f32 %v6891_v38  ;;  %v3698_v9 = vsel %vm3697_vm6, %v3633_v40, 0.0  ;;  %v3833_v59 = vmul.f32 %v5210_v28, %v3633_v40  ;;  %v6905_v6 = vadd.f32 %v5052_v34, %v6563_v37  ;;  %v2687_v49 = vpop.f32.mrb[7].mxu0  ;;  %v5116_v56 = vpop.f32.mrb[66].mxu1 }
 0x1c0   : > { %v3898_v13 = vsel %vm3697_vm6, %v3834_v12, 0.0  ;;  %v3700_v8 = vadd.f32 %v3699_v27, %v3698_v9  ;;  %5512 = vtanh.f32 %v5214_v42  ;;  %v5216_v57 = vadd.f32 %v2687_v49, %v6567_v5  ;;  %v3324_v15 = vpop.f32.mrb[67].mxu1 }
 0x1c1   : > { %v5503_v55 = vpop.eup %5502  ;;  %v3897_v24 = vsel %vm3697_vm6, %v3833_v59, 0.0  ;;  %5514 = vtanh.f32 %v6905_v6  ;;  %v3636_v28 = vmul.f32 %v5211_v22, %v5116_v56  ;;  %v3635_v40 = vmul.f32 %v5209_v41, %v3324_v15 }
 0x1c2   : > { %v5505_v37 = vpop.eup %5504  ;;  %4097 = vst.msk [vmem:[%s6900_s18 + $0x10] sm:$0xff] %vm3697_vm6, %v5503_v55  ;;  %v3899_v34 = vadd.f32 %v3898_v13, %v3897_v24  ;;  %5516 = vtanh.f32 %v5216_v57 }
 0x1c3   : > { %v5507_v12 = vpop.eup %5506  ;;  %4095 = vst.msk [vmem:[%s6900_s18] sm:$0xff] %vm3697_vm6, %v5505_v37  ;;  %v3836_v27 = vmul.f32 %v5211_v22, %v3636_v28  ;;  %v3701_v5 = vsel %vm3697_vm6, %v3635_v40, 0.0  ;;  %v3835_v9 = vmul.f32 %v5209_v41, %v3635_v40  ;;  %v5119_v49 = vpop.f32.mrb[68].mxu1  ;;  %v3703_v24 = vsel %vm3697_vm6, %v3636_v28, 0.0 }
 0x1c4   : > { %v5509_v48 = vpop.eup %5508  ;;  %4098 = vst.msk [vmem:[%s6900_s18 + $0x18] sm:$0xff] %vm3697_vm6, %v5507_v12  ;;  %v3702_v59 = vadd.f32 %v3701_v5, %v3700_v8  ;;  %v3638_v56 = vmul.f32 %v5216_v57, %v5119_v49  ;;  %v5055_v15 = vpop.f32.mrb[8].mxu0 }
 0x1c5   : > { %v3334_v44 = vpop.f32.mrb[69].mxu1  ;;  %4096 = vst.msk [vmem:[%s6900_s18 + $0x8] sm:$0xff] %vm3697_vm6, %v5509_v48  ;;  %v3900_v13 = vsel %vm3697_vm6, %v3835_v9, 0.0  ;;  %v6923_v55 = vadd.f32 %v5055_v15, %v6586_v3  ;;  %v2700_v37 = vpop.f32.mrb[9].mxu0  ;;  %v3902_v41 = vsel %vm3697_vm6, %v3836_v27, 0.0 }
 0x1c6   : > { %v3637_v22 = vmul.f32 %v5214_v42, %v3334_v44  ;;  %v3704_v40 = vadd.f32 %v3703_v24, %v3702_v59  ;;  %v3901_v50 = vadd.f32 %v3900_v13, %v3899_v34  ;;  %v3838_v12 = vmul.f32 %v5216_v57, %v3638_v56  ;;  %v5056_v8 = vpop.f32.mrb[10].mxu0 }
 0x1c7   : > { %5518 = vtanh.f32 %v6923_v55  ;;  %v5218_v28 = vadd.f32 %v2700_v37, %v6588_v62  ;;  %v2703_v9 = vpop.f32.mrb[11].mxu0  ;;  %v5122_v49 = vpop.f32.mrb[70].mxu1  ;;  %v3707_v44 = vsel %vm3697_vm6, %v3638_v56, 0.0  ;;  %v5219_v27 = vadd.f32 %v5056_v8, %v6591_v7 }
 0x1c8   : > { %v3705_v5 = vsel %vm3697_vm6, %v3637_v22, 0.0  ;;  %v3837_v48 = vmul.f32 %v5214_v42, %v3637_v22  ;;  %v3903_v3 = vadd.f32 %v3902_v41, %v3901_v50  ;;  %v3344_v34 = vpop.f32.mrb[71].mxu1  ;;  %v5220_v24 = vadd.f32 %v2703_v9, %v6595_v39 }
 0x1c9   : > { %v3706_v15 = vadd.f32 %v3705_v5, %v3704_v40  ;;  %v5511_v57 = vpop.eup %5510  ;;  %5520 = vtanh.f32 %v5218_v28  ;;  %v3640_v42 = vmul.f32 %v6905_v6, %v5122_v49  ;;  %v3639_v56 = vmul.f32 %v6891_v38, %v3344_v34 }
 0x1ca   : > { %v3904_v59 = vsel %vm3697_vm6, %v3837_v48, 0.0  ;;  %v5513_v62 = vpop.eup %5512  ;;  %4101 = vst.msk [vmem:[%s6900_s18 + $0x30] sm:$0xff] %vm3697_vm6, %v5511_v57  ;;  %5522 = vtanh.f32 %v5219_v27  ;;  %v3906_v22 = vsel %vm3697_vm6, %v3838_v12, 0.0 }
 0x1cb   : > { %v3905_v50 = vadd.f32 %v3904_v59, %v3903_v3  ;;  %v3708_v13 = vadd.f32 %v3707_v44, %v3706_v15  ;;  %v5515_v7 = vpop.eup %5514  ;;  %4099 = vst.msk [vmem:[%s6900_s18 + $0x20] sm:$0xff] %vm3697_vm6, %v5513_v62  ;;  %5524 = vtanh.f32 %v5220_v24  ;;  %v3840_v37 = vmul.f32 %v6905_v6, %v3640_v42  ;;  %v5125_v39 = vpop.f32.mrb[72].mxu1 }
 0x1cc   : > { %v5517_v41 = vpop.eup %5516  ;;  %4102 = vst.msk [vmem:[%s6900_s18 + $0x38] sm:$0xff] %vm3697_vm6, %v5515_v7  ;;  %v3709_v40 = vsel %vm3697_vm6, %v3639_v56, 0.0  ;;  %v3839_v8 = vmul.f32 %v6891_v38, %v3639_v56  ;;  %v3642_v48 = vmul.f32 %v5220_v24, %v5125_v39  ;;  %v5059_v9 = vpop.f32.mrb[12].mxu0  ;;  %v3711_v15 = vsel %vm3697_vm6, %v3640_v42, 0.0 }
 0x1cd   : > { %v3907_v5 = vadd.f32 %v3906_v22, %v3905_v50  ;;  %v3354_v49 = vpop.f32.mrb[73].mxu1  ;;  %4100 = vst.msk [vmem:[%s6900_s18 + $0x28] sm:$0xff] %vm3697_vm6, %v5517_v41  ;;  %v3710_v3 = vadd.f32 %v3709_v40, %v3708_v13  ;;  %v6948_v12 = vadd.f32 %v5059_v9, %v6614_v16  ;;  %v2716_v6 = vpop.f32.mrb[13].mxu0  ;;  %v3910_v7 = vsel %vm3697_vm6, %v3840_v37, 0.0 }
 0x1ce   : > { %v3641_v44 = vmul.f32 %v5218_v28, %v3354_v49  ;;  %v3908_v34 = vsel %vm3697_vm6, %v3839_v8, 0.0  ;;  %v3842_v57 = vmul.f32 %v5220_v24, %v3642_v48  ;;  %v5222_v59 = vadd.f32 %v2716_v6, %v6616_v30  ;;  %v5060_v38 = vpop.f32.mrb[14].mxu0 }
 0x1cf   : > { %v3909_v62 = vadd.f32 %v3908_v34, %v3907_v5  ;;  %5526 = vtanh.f32 %v6948_v12  ;;  %v3712_v50 = vadd.f32 %v3711_v15, %v3710_v3  ;;  %v2719_v13 = vpop.f32.mrb[15].mxu0  ;;  %v5128_v16 = vpop.f32.mrb[74].mxu1  ;;  %v6957_v42 = vadd.f32 %v5060_v38, %v6619_v58 }
 0x1d0   : > { %v3713_v56 = vsel %vm3697_vm6, %v3641_v44, 0.0  ;;  %v3841_v22 = vmul.f32 %v5218_v28, %v3641_v44  ;;  %5528 = vtanh.f32 %v5222_v59  ;;  %v3364_v24 = vpop.f32.mrb[75].mxu1  ;;  %v5224_v40 = vadd.f32 %v2719_v13, %v6623_v19 }
 0x1d1   : > { %v5519_v39 = vpop.eup %5518  ;;  %v3714_v30 = vadd.f32 %v3713_v56, %v3712_v50  ;;  %v3911_v41 = vadd.f32 %v3910_v7, %v3909_v62  ;;  %v3644_v8 = vmul.f32 %v5219_v27, %v5128_v16  ;;  %v3715_v5 = vsel %vm3697_vm6, %v3642_v48, 0.0 }
 0x1d2   : > { %4105 = vst.msk [vmem:[%s6900_s18 + $0x50] sm:$0xff] %vm3697_vm6, %v5519_v39  ;;  %v3912_v9 = vsel %vm3697_vm6, %v3841_v22, 0.0  ;;  %5530 = vtanh.f32 %v6957_v42  ;;  %v3643_v28 = vmul.f32 %v6923_v55, %v3364_v24  ;;  %v3914_v37 = vsel %vm3697_vm6, %v3842_v57, 0.0 }
 0x1d3   : > { %v5521_v58 = vpop.eup %5520  ;;  %v3913_v49 = vadd.f32 %v3912_v9, %v3911_v41  ;;  %5532 = vtanh.f32 %v5224_v40  ;;  %v3844_v3 = vmul.f32 %v5219_v27, %v3644_v8  ;;  %v5131_v19 = vpop.f32.mrb[76].mxu1  ;;  %v3716_v6 = vadd.f32 %v3715_v5, %v3714_v30 }
 0x1d4   : > { %v5523_v44 = vpop.eup %5522  ;;  %4103 = vst.msk [vmem:[%s6900_s18 + $0x40] sm:$0xff] %vm3697_vm6, %v5521_v58  ;;  %v3717_v48 = vsel %vm3697_vm6, %v3643_v28, 0.0  ;;  %v3843_v15 = vmul.f32 %v6923_v55, %v3643_v28  ;;  %v3646_v34 = vmul.f32 %v5224_v40, %v5131_v19  ;;  %v5063_v38 = vpop.f32.mrb[16].mxu0  ;;  %v3719_v16 = vsel %vm3697_vm6, %v3644_v8, 0.0 }
 0x1d5   : > { %v3374_v62 = vpop.f32.mrb[77].mxu1  ;;  %v5525_v50 = vpop.eup %5524  ;;  %4106 = vst.msk [vmem:[%s6900_s18 + $0x58] sm:$0xff] %vm3697_vm6, %v5523_v44  ;;  %v3915_v57 = vadd.f32 %v3914_v37, %v3913_v49  ;;  %v6974_v56 = vadd.f32 %v5063_v38, %v6642_v46  ;;  %v3718_v7 = vadd.f32 %v3717_v48, %v3716_v6  ;;  %v3918_v9 = vsel %vm3697_vm6, %v3844_v3, 0.0 }
 0x1d6   : > { %v3645_v27 = vmul.f32 %v5222_v59, %v3374_v62  ;;  %v2732_v13 = vpop.f32.mrb[17].mxu0  ;;  %4104 = vst.msk [vmem:[%s6900_s18 + $0x48] sm:$0xff] %vm3697_vm6, %v5525_v50  ;;  %v3916_v22 = vsel %vm3697_vm6, %v3843_v15, 0.0  ;;  %v3846_v55 = vmul.f32 %v5224_v40, %v3646_v34  ;;  %v3723_v3 = vsel %vm3697_vm6, %v3646_v34, 0.0 }
 0x1d7   : > { %v5064_v24 = vpop.f32.mrb[18].mxu0  ;;  %v3917_v39 = vadd.f32 %v3916_v22, %v3915_v57  ;;  %5534 = vtanh.f32 %v6974_v56  ;;  %v5134_v5 = vpop.f32.mrb[78].mxu1  ;;  %v3720_v28 = vadd.f32 %v3719_v16, %v3718_v7  ;;  %v5226_v8 = vadd.f32 %v2732_v13, %v6644_v35 }
 0x1d8   : > { %v3721_v30 = vsel %vm3697_vm6, %v3645_v27, 0.0  ;;  %v3845_v41 = vmul.f32 %v5222_v59, %v3645_v27  ;;  %v2735_v46 = vpop.f32.mrb[19].mxu0  ;;  %v6985_v58 = vadd.f32 %v5064_v24, %v6647_v36  ;;  %v3384_v40 = vpop.f32.mrb[79].mxu1  ;;  %v3648_v59 = vmul.f32 %v6957_v42, %v5134_v5 }
 0x1d9   : > { %v5527_v37 = vpop.eup %5526  ;;  %v3919_v49 = vadd.f32 %v3918_v9, %v3917_v39  ;;  %v5228_v44 = vadd.f32 %v2735_v46, %v6651_v18  ;;  %v3722_v48 = vadd.f32 %v3721_v30, %v3720_v28  ;;  %5536 = vtanh.f32 %v5226_v8 }
 0x1da   : > { %v3920_v19 = vsel %vm3697_vm6, %v3845_v41, 0.0  ;;  %v5529_v6 = vpop.eup %5528  ;;  %4109 = vst.msk [vmem:[%s6900_s18 + $0x70] sm:$0xff] %vm3697_vm6, %v5527_v37  ;;  %v3647_v35 = vmul.f32 %v6948_v12, %v3384_v40  ;;  %v3922_v36 = vsel %vm3697_vm6, %v3846_v55, 0.0  ;;  %5538 = vtanh.f32 %v6985_v58 }
 0x1db   : > { %4107 = vst.msk [vmem:[%s6900_s18 + $0x60] sm:$0xff] %vm3697_vm6, %v5529_v6  ;;  %v3921_v15 = vadd.f32 %v3920_v19, %v3919_v49  ;;  %v3848_v18 = vmul.f32 %v6957_v42, %v3648_v59  ;;  %v5137_v38 = vpop.f32.mrb[80].mxu1  ;;  %5540 = vtanh.f32 %v5228_v44  ;;  %v3724_v50 = vadd.f32 %v3723_v3, %v3722_v48 }
 0x1dc   : > { %v5531_v62 = vpop.eup %5530  ;;  %v3725_v34 = vsel %vm3697_vm6, %v3647_v35, 0.0  ;;  %v3847_v57 = vmul.f32 %v6948_v12, %v3647_v35  ;;  %v5067_v27 = vpop.f32.mrb[20].mxu0  ;;  %v3727_v7 = vsel %vm3697_vm6, %v3648_v59, 0.0  ;;  %v3650_v55 = vmul.f32 %v5228_v44, %v5137_v38 }
 0x1dd   : > { %v3394_v13 = vpop.f32.mrb[81].mxu1  ;;  %v5533_v16 = vpop.eup %5532  ;;  %4110 = vst.msk [vmem:[%s6900_s18 + $0x78] sm:$0xff] %vm3697_vm6, %v5531_v62  ;;  %v3923_v22 = vadd.f32 %v3922_v36, %v3921_v15  ;;  %v7005_v42 = vadd.f32 %v5067_v27, %v6670_v21  ;;  %v3726_v39 = vadd.f32 %v3725_v34, %v3724_v50  ;;  %v3926_v5 = vsel %vm3697_vm6, %v3848_v18, 0.0 }
 0x1de   : > { %v2748_v24 = vpop.f32.mrb[21].mxu0  ;;  %4108 = vst.msk [vmem:[%s6900_s18 + $0x68] sm:$0xff] %vm3697_vm6, %v5533_v16  ;;  %v3924_v30 = vsel %vm3697_vm6, %v3847_v57, 0.0  ;;  %v3649_v41 = vmul.f32 %v5226_v8, %v3394_v13  ;;  %v3850_v28 = vmul.f32 %v5228_v44, %v3650_v55 }
 0x1df   : > { %v5230_v12 = vadd.f32 %v2748_v24, %v6672_v60  ;;  %v5068_v46 = vpop.f32.mrb[22].mxu0  ;;  %v3925_v9 = vadd.f32 %v3924_v30, %v3923_v22  ;;  %5542 = vtanh.f32 %v7005_v42  ;;  %v5140_v21 = vpop.f32.mrb[82].mxu1  ;;  %v3728_v37 = vadd.f32 %v3727_v7, %v3726_v39 }
 0x1e0   : > { %v2751_v40 = vpop.f32.mrb[23].mxu0  ;;  %v3729_v49 = vsel %vm3697_vm6, %v3649_v41, 0.0  ;;  %v3849_v19 = vmul.f32 %v5226_v8, %v3649_v41  ;;  %v3404_v59 = vpop.f32.mrb[83].mxu1  ;;  %v7015_v60 = vadd.f32 %v5068_v46, %v6675_v1  ;;  %v3652_v36 = vmul.f32 %v6985_v58, %v5140_v21 }
 0x1e1   : > { %5544 = vtanh.f32 %v5230_v12  ;;  %v5535_v6 = vpop.eup %5534  ;;  %v3927_v3 = vadd.f32 %v3926_v5, %v3925_v9  ;;  %v5232_v48 = vadd.f32 %v2751_v40, %v6679_v52  ;;  %v3730_v44 = vadd.f32 %v3729_v49, %v3728_v37 }
 0x1e2   : > { %4113 = vst.msk [vmem:[%s6900_s18 + $0x90] sm:$0xff] %vm3697_vm6, %v5535_v6  ;;  %v3928_v35 = vsel %vm3697_vm6, %v3849_v19, 0.0  ;;  %v3651_v15 = vmul.f32 %v6974_v56, %v3404_v59  ;;  %v3731_v8 = vsel %vm3697_vm6, %v3650_v55, 0.0  ;;  %5546 = vtanh.f32 %v7015_v60 }
 0x1e3   : > { %v3929_v18 = vadd.f32 %v3928_v35, %v3927_v3  ;;  %v5143_v38 = vpop.f32.mrb[84].mxu1  ;;  %v5537_v1 = vpop.eup %5536  ;;  %v3930_v52 = vsel %vm3697_vm6, %v3850_v28, 0.0  ;;  %5548 = vtanh.f32 %v5232_v48  ;;  %v3852_v62 = vmul.f32 %v6985_v58, %v3652_v36 }
 0x1e4   : > { %v3732_v50 = vadd.f32 %v3731_v8, %v3730_v44  ;;  %v5071_v34 = vpop.f32.mrb[24].mxu0  ;;  %v3414_v57 = vpop.f32.mrb[85].mxu1  ;;  %4111 = vst.msk [vmem:[%s6900_s18 + $0x80] sm:$0xff] %vm3697_vm6, %v5537_v1  ;;  %v3733_v13 = vsel %vm3697_vm6, %v3651_v15, 0.0  ;;  %v3851_v16 = vmul.f32 %v6974_v56, %v3651_v15  ;;  %v3654_v22 = vmul.f32 %v5232_v48, %v5143_v38 }
 0x1e5   : > { %v5539_v27 = vpop.eup %5538  ;;  %v3931_v7 = vadd.f32 %v3930_v52, %v3929_v18  ;;  %v2764_v55 = vpop.f32.mrb[25].mxu0  ;;  %v7034_v58 = vadd.f32 %v5071_v34, %v6698_v29  ;;  %v3653_v30 = vmul.f32 %v5230_v12, %v3414_v57  ;;  %v3735_v46 = vsel %vm3697_vm6, %v3652_v36, 0.0 }
 0x1e6   : > { %v5541_v24 = vpop.eup %5540  ;;  %4114 = vst.msk [vmem:[%s6900_s18 + $0x98] sm:$0xff] %vm3697_vm6, %v5539_v27  ;;  %v3734_v39 = vadd.f32 %v3733_v13, %v3732_v50  ;;  %v5072_v41 = vpop.f32.mrb[26].mxu0  ;;  %v3932_v5 = vsel %vm3697_vm6, %v3851_v16, 0.0  ;;  %v3854_v56 = vmul.f32 %v5232_v48, %v3654_v22  ;;  %v5234_v9 = vadd.f32 %v2764_v55, %v6700_v11 }
 0x1e7   : > { %4112 = vst.msk [vmem:[%s6900_s18 + $0x88] sm:$0xff] %vm3697_vm6, %v5541_v24  ;;  %v2767_v28 = vpop.f32.mrb[27].mxu0  ;;  %v5146_v40 = vpop.f32.mrb[86].mxu1  ;;  %v3933_v21 = vadd.f32 %v3932_v5, %v3931_v7  ;;  %5550 = vtanh.f32 %v7034_v58  ;;  %v3737_v37 = vsel %vm3697_vm6, %v3653_v30, 0.0  ;;  %v3934_v59 = vsel %vm3697_vm6, %v3852_v62, 0.0 }
 0x1e8   : > { %v3736_v29 = vadd.f32 %v3735_v46, %v3734_v39  ;;  %v3424_v49 = vpop.f32.mrb[87].mxu1  ;;  %v3853_v6 = vmul.f32 %v5230_v12, %v3653_v30  ;;  %5552 = vtanh.f32 %v5234_v9  ;;  %v7045_v3 = vadd.f32 %v5072_v41, %v6703_v33 }
 0x1e9   : > { %v5543_v19 = vpop.eup %5542  ;;  %v3935_v44 = vadd.f32 %v3934_v59, %v3933_v21  ;;  %v5236_v35 = vadd.f32 %v2767_v28, %v6707_v61  ;;  %v3656_v36 = vmul.f32 %v7015_v60, %v5146_v40  ;;  %v3739_v15 = vsel %vm3697_vm6, %v3654_v22, 0.0 }
 0x1ea   : > { %4117 = vst.msk [vmem:[%s6900_s18 + $0xb0] sm:$0xff] %vm3697_vm6, %v5543_v19  ;;  %v3738_v11 = vadd.f32 %v3737_v37, %v3736_v29  ;;  %v3936_v8 = vsel %vm3697_vm6, %v3853_v6, 0.0  ;;  %5554 = vtanh.f32 %v7045_v3  ;;  %v3655_v33 = vmul.f32 %v7005_v42, %v3424_v49 }
 0x1eb   : > { %v5545_v48 = vpop.eup %5544  ;;  %v5149_v12 = vpop.f32.mrb[88].mxu1  ;;  %v3938_v18 = vsel %vm3697_vm6, %v3854_v56, 0.0  ;;  %v3937_v38 = vadd.f32 %v3936_v8, %v3935_v44  ;;  %5556 = vtanh.f32 %v5236_v35  ;;  %v3856_v61 = vmul.f32 %v7015_v60, %v3656_v36 }
 0x1ec   : > { %4115 = vst.msk [vmem:[%s6900_s18 + $0xa0] sm:$0xff] %vm3697_vm6, %v5545_v48  ;;  %v5075_v1 = vpop.f32.mrb[28].mxu0  ;;  %v3434_v52 = vpop.f32.mrb[89].mxu1  ;;  %v3740_v50 = vadd.f32 %v3739_v15, %v3738_v11  ;;  %v3741_v34 = vsel %vm3697_vm6, %v3655_v33, 0.0  ;;  %v3855_v57 = vmul.f32 %v7005_v42, %v3655_v33  ;;  %v3658_v27 = vmul.f32 %v5236_v35, %v5149_v12 }
 0x1ed   : > { %v5547_v62 = vpop.eup %5546  ;;  %v2780_v13 = vpop.f32.mrb[29].mxu0  ;;  %v3939_v7 = vadd.f32 %v3938_v18, %v3937_v38  ;;  %v7064_v22 = vadd.f32 %v5075_v1, %v6726_v20  ;;  %v3657_v55 = vmul.f32 %v5234_v9, %v3434_v52  ;;  %v3743_v60 = vsel %vm3697_vm6, %v3656_v36, 0.0 }
 0x1ee   : > { %v5549_v16 = vpop.eup %5548  ;;  %4118 = vst.msk [vmem:[%s6900_s18 + $0xb8] sm:$0xff] %vm3697_vm6, %v5547_v62  ;;  %v5076_v24 = vpop.f32.mrb[30].mxu0  ;;  %v3742_v39 = vadd.f32 %v3741_v34, %v3740_v50  ;;  %v3940_v30 = vsel %vm3697_vm6, %v3855_v57, 0.0  ;;  %v3858_v41 = vmul.f32 %v5236_v35, %v3658_v27  ;;  %v3942_v40 = vsel %vm3697_vm6, %v3856_v61, 0.0 }
 0x1ef   : > { %4116 = vst.msk [vmem:[%s6900_s18 + $0xa8] sm:$0xff] %vm3697_vm6, %v5549_v16  ;;  %v2783_v42 = vpop.f32.mrb[31].mxu0  ;;  %v5152_v46 = vpop.f32.mrb[90].mxu1  ;;  %v3941_v5 = vadd.f32 %v3940_v30, %v3939_v7  ;;  %5558 = vtanh.f32 %v7064_v22  ;;  %v3745_v56 = vsel %vm3697_vm6, %v3657_v55, 0.0  ;;  %v3857_v20 = vmul.f32 %v5234_v9, %v3657_v55 }
 0x1f0   : > { %v3444_v28 = vpop.f32.mrb[91].mxu1  ;;  %v3744_v21 = vadd.f32 %v3743_v60, %v3742_v39  ;;  %v5238_v29 = vadd.f32 %v2780_v13, %v6728_v51  ;;  %v7075_v37 = vadd.f32 %v5076_v24, %v6731_v53  ;;  %v5240_v6 = vadd.f32 %v2783_v42, %v6735_v2 }
 0x1f1   : > { %v5551_v49 = vpop.eup %5550  ;;  %v3943_v19 = vadd.f32 %v3942_v40, %v3941_v5  ;;  %v3944_v59 = vsel %vm3697_vm6, %v3857_v20, 0.0  ;;  %v3660_v48 = vmul.f32 %v7045_v3, %v5152_v46  ;;  %v3747_v9 = vsel %vm3697_vm6, %v3658_v27, 0.0 }
 0x1f2   : > { %v5553_v11 = vpop.eup %5552  ;;  %4121 = vst.msk [vmem:[%s6900_s18 + $0xd0] sm:$0xff] %vm3697_vm6, %v5551_v49  ;;  %v3746_v44 = vadd.f32 %v3745_v56, %v3744_v21  ;;  %5560 = vtanh.f32 %v5238_v29  ;;  %v3659_v51 = vmul.f32 %v7034_v58, %v3444_v28  ;;  %v3946_v35 = vsel %vm3697_vm6, %v3858_v41, 0.0 }
 0x1f3   : > { %v5155_v53 = vpop.f32.mrb[92].mxu1  ;;  %4119 = vst.msk [vmem:[%s6900_s18 + $0xc0] sm:$0xff] %vm3697_vm6, %v5553_v11  ;;  %v3945_v36 = vadd.f32 %v3944_v59, %v3943_v19  ;;  %5562 = vtanh.f32 %v7075_v37  ;;  %v3860_v2 = vmul.f32 %v7045_v3, %v3660_v48  ;;  %v3751_v52 = vsel %vm3697_vm6, %v3660_v48, 0.0 }
 0x1f4   : > { %v5079_v15 = vpop.f32.mrb[32].mxu0  ;;  %v3454_v8 = vpop.f32.mrb[93].mxu1  ;;  %5564 = vtanh.f32 %v5240_v6  ;;  %v3748_v12 = vadd.f32 %v3747_v9, %v3746_v44  ;;  %v3749_v18 = vsel %vm3697_vm6, %v3659_v51, 0.0  ;;  %v3859_v38 = vmul.f32 %v7034_v58, %v3659_v51 }
 0x1f5   : > { %v5555_v33 = vpop.eup %5554  ;;  %v2796_v61 = vpop.f32.mrb[33].mxu0  ;;  %v3947_v62 = vadd.f32 %v3946_v35, %v3945_v36  ;;  %v3662_v50 = vmul.f32 %v5240_v6, %v5155_v53  ;;  %v7095_v3 = vadd.f32 %v5079_v15, %v6822_v26  ;;  %v3661_v13 = vmul.f32 %v5238_v29, %v3454_v8 }
 0x1f6   : > { %v5557_v1 = vpop.eup %5556  ;;  %4122 = vst.msk [vmem:[%s6900_s18 + $0xd8] sm:$0xff] %vm3697_vm6, %v5555_v33  ;;  %v5080_v34 = vpop.f32.mrb[34].mxu0  ;;  %v3750_v57 = vadd.f32 %v3749_v18, %v3748_v12  ;;  %v3948_v27 = vsel %vm3697_vm6, %v3859_v38, 0.0  ;;  %v5242_v58 = vadd.f32 %v2796_v61, %v6824_v43  ;;  %v3950_v55 = vsel %vm3697_vm6, %v3860_v2, 0.0 }
 0x1f7   : > { %4120 = vst.msk [vmem:[%s6900_s18 + $0xc8] sm:$0xff] %vm3697_vm6, %v5557_v1  ;;  %v2799_v16 = vpop.f32.mrb[35].mxu0  ;;  %v5158_v7 = vpop.f32.mrb[94].mxu1  ;;  %v3949_v24 = vadd.f32 %v3948_v27, %v3947_v62  ;;  %v3862_v60 = vmul.f32 %v5240_v6, %v3662_v50  ;;  %5566 = vtanh.f32 %v7095_v3  ;;  %v3753_v30 = vsel %vm3697_vm6, %v3661_v13, 0.0 }
 0x1f8   : > { %v3464_v26 = vpop.f32.mrb[95].mxu1  ;;  %v3752_v39 = vadd.f32 %v3751_v52, %v3750_v57  ;;  %v3861_v41 = vmul.f32 %v5238_v29, %v3661_v13  ;;  %5568 = vtanh.f32 %v5242_v58  ;;  %v7105_v5 = vadd.f32 %v5080_v34, %v6826_v45 }
 0x1f9   : > { %v5559_v42 = vpop.eup %5558  ;;  %v3951_v46 = vadd.f32 %v3950_v55, %v3949_v24  ;;  %v5244_v43 = vadd.f32 %v2799_v16, %v6828_v17  ;;  %v3664_v28 = vmul.f32 %v7075_v37, %v5158_v7  ;;  %v3663_v40 = vmul.f32 %v7064_v22, %v3464_v26 }
 0x1fa   : > { %4125 = vst.msk [vmem:[%s6900_s18 + $0xf0] sm:$0xff] %vm3697_vm6, %v5559_v42  ;;  %v3754_v56 = vadd.f32 %v3753_v30, %v3752_v39  ;;  %v3952_v20 = vsel %vm3697_vm6, %v3861_v41, 0.0  ;;  %v3755_v29 = vsel %vm3697_vm6, %v3662_v50, 0.0  ;;  %5570 = vtanh.f32 %v7105_v5 }
 0x1fb   : > { %v5161_v21 = vpop.f32.mrb[96].mxu1  ;;  %v3953_v49 = vadd.f32 %v3952_v20, %v3951_v46  ;;  %v3954_v6 = vsel %vm3697_vm6, %v3862_v60, 0.0  ;;  %5572 = vtanh.f32 %v5244_v43  ;;  %v3864_v48 = vmul.f32 %v7075_v37, %v3664_v28 }
 0x1fc   : > { %v3666_v45 = vmul.f32 %v5244_v43, %v5161_v21  ;;  %v5083_v19 = vpop.f32.mrb[36].mxu0  ;;  %v3474_v17 = vpop.f32.mrb[97].mxu1  ;;  %v3756_v11 = vadd.f32 %v3755_v29, %v3754_v56  ;;  %v3759_v51 = vsel %vm3697_vm6, %v3664_v28, 0.0  ;;  %v3757_v53 = vsel %vm3697_vm6, %v3663_v40, 0.0 }
 0x1fd   : > { %v5561_v59 = vpop.eup %5560  ;;  %v2812_v9 = vpop.f32.mrb[37].mxu0  ;;  %v3863_v35 = vmul.f32 %v7064_v22, %v3663_v40  ;;  %v3955_v36 = vadd.f32 %v3954_v6, %v3953_v49  ;;  %v7126_v12 = vadd.f32 %v5083_v19, %v6830_v0  ;;  %v3665_v22 = vmul.f32 %v5242_v58, %v3474_v17 }
 0x1fe   : > { %v5563_v44 = vpop.eup %5562  ;;  %4123 = vst.msk [vmem:[%s6900_s18 + $0xe0] sm:$0xff] %vm3697_vm6, %v5561_v59  ;;  %v5084_v2 = vpop.f32.mrb[38].mxu0  ;;  %v3758_v8 = vadd.f32 %v3757_v53, %v3756_v11  ;;  %v3763_v37 = vsel %vm3697_vm6, %v3666_v45, 0.0  ;;  %v3866_v33 = vmul.f32 %v5244_v43, %v3666_v45  ;;  %v5246_v1 = vadd.f32 %v2812_v9, %v6832_v4 }
 0x1ff   : > { %v5565_v15 = vpop.eup %5564  ;;  %4126 = vst.msk [vmem:[%s6900_s18 + $0xf8] sm:$0xff] %vm3697_vm6, %v5563_v44  ;;  %v2815_v18 = vpop.f32.mrb[39].mxu0  ;;  %v3956_v61 = vsel %vm3697_vm6, %v3863_v35, 0.0  ;;  %v7133_v52 = vadd.f32 %v5084_v2, %v6834_v10  ;;  %v3958_v50 = vsel %vm3697_vm6, %v3864_v48, 0.0  ;;  %5574 = vtanh.f32 %v7126_v12 }
 0x200   : > { %v5164_v38 = vpop.f32.mrb[98].mxu1  ;;  %4124 = vst.msk [vmem:[%s6900_s18 + $0xe8] sm:$0xff] %vm3697_vm6, %v5565_v15  ;;  %v3957_v34 = vadd.f32 %v3956_v61, %v3955_v36  ;;  %v3760_v0 = vadd.f32 %v3759_v51, %v3758_v8  ;;  %v3761_v27 = vsel %vm3697_vm6, %v3665_v22, 0.0  ;;  %v3865_v13 = vmul.f32 %v5242_v58, %v3665_v22 }
 0x201   : > { %v3484_v62 = vpop.f32.mrb[99].mxu1  ;;  %v5567_v57 = vpop.eup %5566  ;;  %5576 = vtanh.f32 %v5246_v1  ;;  %v5248_v16 = vadd.f32 %v2815_v18, %v6836_v63  ;;  %v3668_v55 = vmul.f32 %v7105_v5, %v5164_v38  ;;  %v3962_v30 = vsel %vm3697_vm6, %v3866_v33, 0.0 }
 0x202   : > { %v5569_v7 = vpop.eup %5568  ;;  %4129 = vst.msk [vmem:[%s6900_s18 + $0x110] sm:$0xff] %vm3697_vm6, %v5567_v57  ;;  %v3762_v4 = vadd.f32 %v3761_v27, %v3760_v0  ;;  %v3959_v10 = vadd.f32 %v3958_v50, %v3957_v34  ;;  %5578 = vtanh.f32 %v7133_v52  ;;  %v3960_v60 = vsel %vm3697_vm6, %v3865_v13, 0.0 }
 0x203   : > { %v5167_v24 = vpop.f32.mrb[100].mxu1  ;;  %4127 = vst.msk [vmem:[%s6900_s18 + $0x100] sm:$0xff] %vm3697_vm6, %v5569_v7  ;;  %5580 = vtanh.f32 %v5248_v16  ;;  %v3667_v58 = vmul.f32 %v7095_v3, %v3484_v62  ;;  %v3868_v42 = vmul.f32 %v7105_v5, %v3668_v55  ;;  %v3767_v20 = vsel %vm3697_vm6, %v3668_v55, 0.0 }
 0x204   : > { %v3670_v26 = vmul.f32 %v5248_v16, %v5167_v24  ;;  %v5087_v63 = vpop.f32.mrb[40].mxu0  ;;  %v3494_v39 = vpop.f32.mrb[101].mxu1  ;;  %v3961_v41 = vadd.f32 %v3960_v60, %v3959_v10  ;;  %v3764_v46 = vadd.f32 %v3763_v37, %v3762_v4 }
 0x205   : > { %v2828_v43 = vpop.f32.mrb[41].mxu0  ;;  %v5571_v56 = vpop.eup %5570  ;;  %v3765_v28 = vsel %vm3697_vm6, %v3667_v58, 0.0  ;;  %v3867_v40 = vmul.f32 %v7095_v3, %v3667_v58  ;;  %v7156_v5 = vadd.f32 %v5087_v63, %v6838_v23  ;;  %v3966_v48 = vsel %vm3697_vm6, %v3868_v42, 0.0 }
 0x206   : > { %v3870_v21 = vmul.f32 %v5248_v16, %v3670_v26  ;;  %v5088_v29 = vpop.f32.mrb[42].mxu0  ;;  %v5573_v49 = vpop.eup %5572  ;;  %4130 = vst.msk [vmem:[%s6900_s18 + $0x118] sm:$0xff] %vm3697_vm6, %v5571_v56  ;;  %v3766_v45 = vadd.f32 %v3765_v28, %v3764_v46  ;;  %v3963_v19 = vadd.f32 %v3962_v30, %v3961_v41  ;;  %v3771_v17 = vsel %vm3697_vm6, %v3670_v26, 0.0 }
 0x207   : > { %v2831_v59 = vpop.f32.mrb[43].mxu0  ;;  %v5170_v6 = vpop.f32.mrb[102].mxu1  ;;  %4128 = vst.msk [vmem:[%s6900_s18 + $0x108] sm:$0xff] %vm3697_vm6, %v5573_v49  ;;  %v3964_v3 = vsel %vm3697_vm6, %v3867_v40, 0.0  ;;  %v3669_v11 = vmul.f32 %v5246_v1, %v3494_v39  ;;  %v5250_v9 = vadd.f32 %v2828_v43, %v6840_v54  ;;  %5582 = vtanh.f32 %v7156_v5 }
 0x208   : > { %v3504_v44 = vpop.f32.mrb[103].mxu1  ;;  %v3965_v51 = vadd.f32 %v3964_v3, %v3963_v19  ;;  %v3768_v53 = vadd.f32 %v3767_v20, %v3766_v45  ;;  %v7165_v23 = vadd.f32 %v5088_v29, %v6842_v47  ;;  %v5252_v2 = vadd.f32 %v2831_v59, %v6844_v14  ;;  %v7529_v20 = vld [vmem:[#allocation8_spill] sm:$0xff] }
 0x209   : > { %v3769_v35 = vsel %vm3697_vm6, %v3669_v11, 0.0  ;;  %v3869_v36 = vmul.f32 %v5246_v1, %v3669_v11  ;;  %5584 = vtanh.f32 %v5250_v9  ;;  %v5575_v15 = vpop.eup %5574  ;;  %v3672_v54 = vmul.f32 %v7133_v52, %v5170_v6 }
 0x20a   : > { %v3770_v8 = vadd.f32 %v3769_v35, %v3768_v53  ;;  %v3967_v37 = vadd.f32 %v3966_v48, %v3965_v51  ;;  %5586 = vtanh.f32 %v7165_v23  ;;  %4133 = vst.msk [vmem:[%s6900_s18 + $0x130] sm:$0xff] %vm3697_vm6, %v5575_v15  ;;  %v3671_v38 = vmul.f32 %v7126_v12, %v3504_v44 }
 0x20b   : > { %v5173_v33 = vpop.f32.mrb[104].mxu1  ;;  %v5577_v18 = vpop.eup %5576  ;;  %v3968_v47 = vsel %vm3697_vm6, %v3869_v36, 0.0  ;;  %5588 = vtanh.f32 %v5252_v2  ;;  %v3970_v62 = vsel %vm3697_vm6, %v3870_v21, 0.0  ;;  %v3872_v34 = vmul.f32 %v7133_v52, %v3672_v54 }
 0x20c   : > { %v3674_v61 = vmul.f32 %v5252_v2, %v5173_v33  ;;  %v5091_v14 = vpop.f32.mrb[44].mxu0  ;;  %v3514_v22 = vpop.f32.mrb[105].mxu1  ;;  %4131 = vst.msk [vmem:[%s6900_s18 + $0x120] sm:$0xff] %vm3697_vm6, %v5577_v18  ;;  %v3969_v50 = vadd.f32 %v3968_v47, %v3967_v37  ;;  %v3772_v0 = vadd.f32 %v3771_v17, %v3770_v8  ;;  %v3775_v13 = vsel %vm3697_vm6, %v3672_v54, 0.0 }
 0x20d   : > { %v5579_v1 = vpop.eup %5578  ;;  %v2844_v57 = vpop.f32.mrb[45].mxu0  ;;  %v3773_v16 = vsel %vm3697_vm6, %v3671_v38, 0.0  ;;  %v3871_v7 = vmul.f32 %v7126_v12, %v3671_v38  ;;  %v7188_v52 = vadd.f32 %v5091_v14, %v6846_v32  ;;  %v3974_v63 = vsel %vm3697_vm6, %v3872_v34, 0.0 }
 0x20e   : > { %v5581_v27 = vpop.eup %5580  ;;  %4134 = vst.msk [vmem:[%s6900_s18 + $0x138] sm:$0xff] %vm3697_vm6, %v5579_v1  ;;  %v3874_v4 = vmul.f32 %v5252_v2, %v3674_v61  ;;  %v5092_v10 = vpop.f32.mrb[46].mxu0  ;;  %v3774_v55 = vadd.f32 %v3773_v16, %v3772_v0  ;;  %v3971_v24 = vadd.f32 %v3970_v62, %v3969_v50  ;;  %v3779_v60 = vsel %vm3697_vm6, %v3674_v61, 0.0  ;;  %v7531_v1 = vld [vmem:[#allocation10_spill] sm:$0xff]  ;;  %v7532_v0 = vld [vmem:[#allocation11_spill] sm:$0xff]  ;;  %v7533_v16 = vld [vmem:[#allocation12_spill] sm:$0xff] }
 0x20f   : > { %4132 = vst.msk [vmem:[%s6900_s18 + $0x128] sm:$0xff] %vm3697_vm6, %v5581_v27  ;;  %v2847_v58 = vpop.f32.mrb[47].mxu0  ;;  %v5176_v26 = vpop.f32.mrb[106].mxu1  ;;  %v3972_v39 = vsel %vm3697_vm6, %v3871_v7, 0.0  ;;  %v3673_v30 = vmul.f32 %v5250_v9, %v3514_v22  ;;  %v5254_v12 = vadd.f32 %v2844_v57, %v6848_v31  ;;  %5590 = vtanh.f32 %v7188_v52 }
 0x210   : > { %v3524_v41 = vpop.f32.mrb[107].mxu1  ;;  %v3973_v42 = vadd.f32 %v3972_v39, %v3971_v24  ;;  %v3776_v46 = vadd.f32 %v3775_v13, %v3774_v55  ;;  %v7195_v43 = vadd.f32 %v5092_v10, %v6850_v25  ;;  %v5256_v28 = vadd.f32 %v2847_v58, %v7529_v20 }
 0x211   : > { %v3777_v32 = vsel %vm3697_vm6, %v3673_v30, 0.0  ;;  %v3873_v56 = vmul.f32 %v5250_v9, %v3673_v30  ;;  %5592 = vtanh.f32 %v5254_v12  ;;  %v5583_v40 = vpop.eup %5582  ;;  %v3676_v31 = vmul.f32 %v7165_v23, %v5176_v26 }
 0x212   : > { %v3778_v21 = vadd.f32 %v3777_v32, %v3776_v46  ;;  %v3975_v29 = vadd.f32 %v3974_v63, %v3973_v42  ;;  %5594 = vtanh.f32 %v7195_v43  ;;  %4137 = vst.msk [vmem:[%s6900_s18 + $0x150] sm:$0xff] %vm3697_vm6, %v5583_v40  ;;  %v3675_v19 = vmul.f32 %v7156_v5, %v3524_v41 }
 0x213   : > { %v5179_v49 = vpop.f32.mrb[108].mxu1  ;;  %v5585_v45 = vpop.eup %5584  ;;  %v3976_v25 = vsel %vm3697_vm6, %v3873_v56, 0.0  ;;  %5596 = vtanh.f32 %v5256_v28  ;;  %v3978_v3 = vsel %vm3697_vm6, %v3874_v4, 0.0  ;;  %v3876_v9 = vmul.f32 %v7165_v23, %v3676_v31  ;;  %v7530_v23 = vld [vmem:[#allocation9_spill] sm:$0xff] }
 0x214   : > { %v3678_v17 = vmul.f32 %v5256_v28, %v5179_v49  ;;  %v5095_v59 = vpop.f32.mrb[48].mxu0  ;;  %v3534_v6 = vpop.f32.mrb[109].mxu1  ;;  %4135 = vst.msk [vmem:[%s6900_s18 + $0x140] sm:$0xff] %vm3697_vm6, %v5585_v45  ;;  %v3977_v11 = vadd.f32 %v3976_v25, %v3975_v29  ;;  %v3780_v44 = vadd.f32 %v3779_v60, %v3778_v21  ;;  %v3783_v35 = vsel %vm3697_vm6, %v3676_v31, 0.0 }
 0x215   : > { %v5587_v48 = vpop.eup %5586  ;;  %v2860_v51 = vpop.f32.mrb[49].mxu0  ;;  %v3781_v36 = vsel %vm3697_vm6, %v3675_v19, 0.0  ;;  %v3875_v2 = vmul.f32 %v7156_v5, %v3675_v19  ;;  %v7218_v18 = vadd.f32 %v5095_v59, %v7530_v23  ;;  %v3982_v61 = vsel %vm3697_vm6, %v3876_v9, 0.0  ;;  %v7535_v9 = vld [vmem:[#allocation14_spill] sm:$0xff] }
 0x216   : > { %v5589_v53 = vpop.eup %5588  ;;  %4138 = vst.msk [vmem:[%s6900_s18 + $0x158] sm:$0xff] %vm3697_vm6, %v5587_v48  ;;  %v3878_v15 = vmul.f32 %v5256_v28, %v3678_v17  ;;  %v5096_v8 = vpop.f32.mrb[50].mxu0  ;;  %v3782_v37 = vadd.f32 %v3781_v36, %v3780_v44  ;;  %v3979_v54 = vadd.f32 %v3978_v3, %v3977_v11  ;;  %v3787_v33 = vsel %vm3697_vm6, %v3678_v17, 0.0 }
 0x217   : > { %4136 = vst.msk [vmem:[%s6900_s18 + $0x148] sm:$0xff] %vm3697_vm6, %v5589_v53  ;;  %v2863_v47 = vpop.f32.mrb[51].mxu0  ;;  %v5182_v38 = vpop.f32.mrb[110].mxu1  ;;  %v3980_v14 = vsel %vm3697_vm6, %v3875_v2, 0.0  ;;  %v3677_v22 = vmul.f32 %v5254_v12, %v3534_v6  ;;  %v5258_v5 = vadd.f32 %v2860_v51, %v7531_v1  ;;  %5598 = vtanh.f32 %v7218_v18 }
 0x218   : > { %v3544_v62 = vpop.f32.mrb[111].mxu1  ;;  %v3981_v50 = vadd.f32 %v3980_v14, %v3979_v54  ;;  %v3784_v34 = vadd.f32 %v3783_v35, %v3782_v37  ;;  %v7225_v57 = vadd.f32 %v5096_v8, %v7532_v0  ;;  %v5260_v7 = vadd.f32 %v2863_v47, %v7533_v16  ;;  %v7536_v35 = vld [vmem:[#allocation15_spill] sm:$0xff]  ;;  %v7537_v8 = vld [vmem:[#allocation16_spill] sm:$0xff] }
 0x219   : > { %v3785_v27 = vsel %vm3697_vm6, %v3677_v22, 0.0  ;;  %v3877_v13 = vmul.f32 %v5254_v12, %v3677_v22  ;;  %5600 = vtanh.f32 %v5258_v5  ;;  %v5591_v4 = vpop.eup %5590  ;;  %v3680_v24 = vmul.f32 %v7195_v43, %v5182_v38 }
 0x21a   : > { %v3786_v10 = vadd.f32 %v3785_v27, %v3784_v34  ;;  %v3983_v55 = vadd.f32 %v3982_v61, %v3981_v50  ;;  %5602 = vtanh.f32 %v7225_v57  ;;  %4141 = vst.msk [vmem:[%s6900_s18 + $0x170] sm:$0xff] %vm3697_vm6, %v5591_v4  ;;  %v3679_v63 = vmul.f32 %v7188_v52, %v3544_v62 }
 0x21b   : > { %v5185_v60 = vpop.f32.mrb[112].mxu1  ;;  %v5593_v58 = vpop.eup %5592  ;;  %v3984_v26 = vsel %vm3697_vm6, %v3877_v13, 0.0  ;;  %5604 = vtanh.f32 %v5260_v7  ;;  %v3986_v42 = vsel %vm3697_vm6, %v3878_v15, 0.0  ;;  %v3880_v32 = vmul.f32 %v7195_v43, %v3680_v24  ;;  %v7534_v43 = vld [vmem:[#allocation13_spill] sm:$0xff] }
 0x21c   : > { %v3682_v39 = vmul.f32 %v5260_v7, %v5185_v60  ;;  %v5099_v30 = vpop.f32.mrb[52].mxu0  ;;  %v3554_v12 = vpop.f32.mrb[113].mxu1  ;;  %4139 = vst.msk [vmem:[%s6900_s18 + $0x160] sm:$0xff] %vm3697_vm6, %v5593_v58  ;;  %v3985_v46 = vadd.f32 %v3984_v26, %v3983_v55  ;;  %v3788_v56 = vadd.f32 %v3787_v33, %v3786_v10  ;;  %v3791_v40 = vsel %vm3697_vm6, %v3680_v24, 0.0 }
 0x21d   : > { %v5595_v41 = vpop.eup %5594  ;;  %v2876_v20 = vpop.f32.mrb[53].mxu0  ;;  %v3789_v21 = vsel %vm3697_vm6, %v3679_v63, 0.0  ;;  %v3879_v29 = vmul.f32 %v7188_v52, %v3679_v63  ;;  %v7248_v17 = vadd.f32 %v5099_v30, %v7534_v43  ;;  %v3990_v48 = vsel %vm3697_vm6, %v3880_v32, 0.0  ;;  %v7539_v32 = vld [vmem:[#allocation18_spill] sm:$0xff] }
 0x21e   : > { %v5597_v28 = vpop.eup %5596  ;;  %4142 = vst.msk [vmem:[%s6900_s18 + $0x178] sm:$0xff] %vm3697_vm6, %v5595_v41  ;;  %v3882_v31 = vmul.f32 %v5260_v7, %v3682_v39  ;;  %v5100_v49 = vpop.f32.mrb[54].mxu0  ;;  %v3790_v45 = vadd.f32 %v3789_v21, %v3788_v56  ;;  %v3987_v25 = vadd.f32 %v3986_v42, %v3985_v46  ;;  %v3795_v19 = vsel %vm3697_vm6, %v3682_v39, 0.0 }
 0x21f   : > { %4140 = vst.msk [vmem:[%s6900_s18 + $0x168] sm:$0xff] %vm3697_vm6, %v5597_v28  ;;  %v2879_v59 = vpop.f32.mrb[55].mxu0  ;;  %v5188_v6 = vpop.f32.mrb[114].mxu1  ;;  %v3988_v3 = vsel %vm3697_vm6, %v3879_v29, 0.0  ;;  %v3681_v11 = vmul.f32 %v5258_v5, %v3554_v12  ;;  %v5262_v52 = vadd.f32 %v2876_v20, %v7535_v9  ;;  %5606 = vtanh.f32 %v7248_v17 }
 0x220   : > { %v3564_v44 = vpop.f32.mrb[115].mxu1  ;;  %v3989_v51 = vadd.f32 %v3988_v3, %v3987_v25  ;;  %v3792_v53 = vadd.f32 %v3791_v40, %v3790_v45  ;;  %v7255_v36 = vadd.f32 %v5100_v49, %v7536_v35  ;;  %v5264_v37 = vadd.f32 %v2879_v59, %v7537_v8  ;;  %v7540_v40 = vld [vmem:[#allocation19_spill] sm:$0xff]  ;;  %v7541_v49 = vld [vmem:[#allocation20_spill] sm:$0xff] }
 0x221   : > { %v3793_v2 = vsel %vm3697_vm6, %v3681_v11, 0.0  ;;  %v3881_v15 = vmul.f32 %v5258_v5, %v3681_v11  ;;  %5608 = vtanh.f32 %v5262_v52  ;;  %v5599_v54 = vpop.eup %5598  ;;  %v3684_v47 = vmul.f32 %v7225_v57, %v5188_v6 }
 0x222   : > { %v3794_v33 = vadd.f32 %v3793_v2, %v3792_v53  ;;  %v3991_v23 = vadd.f32 %v3990_v48, %v3989_v51  ;;  %5610 = vtanh.f32 %v7255_v36  ;;  %4145 = vst.msk [vmem:[%s6900_s18 + $0x190] sm:$0xff] %vm3697_vm6, %v5599_v54  ;;  %v3683_v22 = vmul.f32 %v7218_v18, %v3564_v44 }
 0x223   : > { %v5191_v38 = vpop.f32.mrb[116].mxu1  ;;  %v5601_v61 = vpop.eup %5600  ;;  %v3992_v14 = vsel %vm3697_vm6, %v3881_v15, 0.0  ;;  %5612 = vtanh.f32 %v5264_v37  ;;  %v3994_v34 = vsel %vm3697_vm6, %v3882_v31, 0.0  ;;  %v3884_v27 = vmul.f32 %v7225_v57, %v3684_v47  ;;  %v7538_v57 = vld [vmem:[#allocation17_spill] sm:$0xff] }
 0x224   : > { %v3686_v1 = vmul.f32 %v5264_v37, %v5191_v38  ;;  %v5103_v5 = vpop.f32.mrb[56].mxu0  ;;  %v3574_v62 = vpop.f32.mrb[117].mxu1  ;;  %4143 = vst.msk [vmem:[%s6900_s18 + $0x180] sm:$0xff] %vm3697_vm6, %v5601_v61  ;;  %v3993_v0 = vadd.f32 %v3992_v14, %v3991_v23  ;;  %v3796_v13 = vadd.f32 %v3795_v19, %v3794_v33  ;;  %v3799_v4 = vsel %vm3697_vm6, %v3684_v47, 0.0 }
 0x225   : > { %v5603_v50 = vpop.eup %5602  ;;  %v2892_v16 = vpop.f32.mrb[57].mxu0  ;;  %v3797_v10 = vsel %vm3697_vm6, %v3683_v22, 0.0  ;;  %v3883_v55 = vmul.f32 %v7218_v18, %v3683_v22  ;;  %v7278_v39 = vadd.f32 %v5103_v5, %v7538_v57  ;;  %v3998_v41 = vsel %vm3697_vm6, %v3884_v27, 0.0  ;;  %v7543_v27 = vld [vmem:[#allocation22_spill] sm:$0xff] }
 0x226   : > { %v5605_v7 = vpop.eup %5604  ;;  %4146 = vst.msk [vmem:[%s6900_s18 + $0x198] sm:$0xff] %vm3697_vm6, %v5603_v50  ;;  %v3886_v24 = vmul.f32 %v5264_v37, %v3686_v1  ;;  %v5104_v60 = vpop.f32.mrb[58].mxu0  ;;  %v3798_v58 = vadd.f32 %v3797_v10, %v3796_v13  ;;  %v3995_v26 = vadd.f32 %v3994_v34, %v3993_v0  ;;  %v3803_v63 = vsel %vm3697_vm6, %v3686_v1, 0.0 }
 0x227   : > { %4144 = vst.msk [vmem:[%s6900_s18 + $0x188] sm:$0xff] %vm3697_vm6, %v5605_v7  ;;  %v2895_v30 = vpop.f32.mrb[59].mxu0  ;;  %v5194_v12 = vpop.f32.mrb[118].mxu1  ;;  %v3996_v42 = vsel %vm3697_vm6, %v3883_v55, 0.0  ;;  %v3685_v46 = vmul.f32 %v5262_v52, %v3574_v62  ;;  %v5266_v18 = vadd.f32 %v2892_v16, %v7539_v32  ;;  %5614 = vtanh.f32 %v7278_v39 }
 0x228   : > { %v3584_v56 = vpop.f32.mrb[119].mxu1  ;;  %v3997_v20 = vadd.f32 %v3996_v42, %v3995_v26  ;;  %v3800_v28 = vadd.f32 %v3799_v4, %v3798_v58  ;;  %v7285_v21 = vadd.f32 %v5104_v60, %v7540_v40  ;;  %v5268_v45 = vadd.f32 %v2895_v30, %v7541_v49  ;;  %v7544_v4 = vld [vmem:[#allocation23_spill] sm:$0xff]  ;;  %v7545_v60 = vld [vmem:[#allocation24_spill] sm:$0xff] }
 0x229   : > { %v3801_v29 = vsel %vm3697_vm6, %v3685_v46, 0.0  ;;  %v3885_v31 = vmul.f32 %v5262_v52, %v3685_v46  ;;  %5616 = vtanh.f32 %v5266_v18  ;;  %v5607_v25 = vpop.eup %5606  ;;  %v3688_v59 = vmul.f32 %v7255_v36, %v5194_v12 }
 0x22a   : > { %v3802_v19 = vadd.f32 %v3801_v29, %v3800_v28  ;;  %v3999_v43 = vadd.f32 %v3998_v41, %v3997_v20  ;;  %5618 = vtanh.f32 %v7285_v21  ;;  %4149 = vst.msk [vmem:[%s6900_s18 + $0x1b0] sm:$0xff] %vm3697_vm6, %v5607_v25  ;;  %v3687_v11 = vmul.f32 %v7248_v17, %v3584_v56 }
 0x22b   : > { %v5197_v6 = vpop.f32.mrb[120].mxu1  ;;  %v5609_v48 = vpop.eup %5608  ;;  %v4000_v3 = vsel %vm3697_vm6, %v3885_v31, 0.0  ;;  %5620 = vtanh.f32 %v5268_v45  ;;  %v4002_v53 = vsel %vm3697_vm6, %v3886_v24, 0.0  ;;  %v3888_v2 = vmul.f32 %v7255_v36, %v3688_v59  ;;  %v7542_v36 = vld [vmem:[#allocation21_spill] sm:$0xff] }
 0x22c   : > { %v3690_v9 = vmul.f32 %v5268_v45, %v5197_v6  ;;  %v5107_v52 = vpop.f32.mrb[60].mxu0  ;;  %v3594_v44 = vpop.f32.mrb[121].mxu1  ;;  %4147 = vst.msk [vmem:[%s6900_s18 + $0x1a0] sm:$0xff] %vm3697_vm6, %v5609_v48  ;;  %v4001_v35 = vadd.f32 %v4000_v3, %v3999_v43  ;;  %v3804_v15 = vadd.f32 %v3803_v63, %v3802_v19  ;;  %v3807_v54 = vsel %vm3697_vm6, %v3688_v59, 0.0 }
 0x22d   : > { %v5611_v51 = vpop.eup %5610  ;;  %v2908_v8 = vpop.f32.mrb[61].mxu0  ;;  %v3805_v33 = vsel %vm3697_vm6, %v3687_v11, 0.0  ;;  %v3887_v23 = vmul.f32 %v7248_v17, %v3687_v11  ;;  %v7308_v1 = vadd.f32 %v5107_v52, %v7542_v36  ;;  %v4006_v50 = vsel %vm3697_vm6, %v3888_v2, 0.0 }
 0x22e   : > { %v5613_v37 = vpop.eup %5612  ;;  %4150 = vst.msk [vmem:[%s6900_s18 + $0x1b8] sm:$0xff] %vm3697_vm6, %v5611_v51  ;;  %v3890_v47 = vmul.f32 %v5268_v45, %v3690_v9  ;;  %v5108_v38 = vpop.f32.mrb[62].mxu0  ;;  %v3806_v61 = vadd.f32 %v3805_v33, %v3804_v15  ;;  %v4003_v14 = vadd.f32 %v4002_v53, %v4001_v35  ;;  %v3811_v22 = vsel %vm3697_vm6, %v3690_v9, 0.0 }
 0x22f   : > { %4148 = vst.msk [vmem:[%s6900_s18 + $0x1a8] sm:$0xff] %vm3697_vm6, %v5613_v37  ;;  %v2911_v5 = vpop.f32.mrb[63].mxu0  ;;  %v5200_v62 = vpop.f32.mrb[122].mxu1  ;;  %v4004_v34 = vsel %vm3697_vm6, %v3887_v23, 0.0  ;;  %v3689_v0 = vmul.f32 %v5266_v18, %v3594_v44  ;;  %v5270_v17 = vadd.f32 %v2908_v8, %v7543_v27  ;;  %5622 = vtanh.f32 %v7308_v1 }
 0x230   : > { %v3604_v13 = vpop.f32.mrb[123].mxu1  ;;  %v4005_v16 = vadd.f32 %v4004_v34, %v4003_v14  ;;  %v3808_v7 = vadd.f32 %v3807_v54, %v3806_v61  ;;  %v5271_v10 = vadd.f32 %v5108_v38, %v7544_v4  ;;  %v5272_v58 = vadd.f32 %v2911_v5, %v7545_v60 }
 0x231   : > { %v3809_v55 = vsel %vm3697_vm6, %v3689_v0, 0.0  ;;  %v3889_v24 = vmul.f32 %v5266_v18, %v3689_v0  ;;  %5624 = vtanh.f32 %v5270_v17  ;;  %v5615_v26 = vpop.eup %5614  ;;  %v3692_v30 = vmul.f32 %v7285_v21, %v5200_v62 }
 0x232   : > { %v3810_v63 = vadd.f32 %v3809_v55, %v3808_v7  ;;  %v4007_v57 = vadd.f32 %v4006_v50, %v4005_v16  ;;  %5626 = vtanh.f32 %v5271_v10  ;;  %4153 = vst.msk [vmem:[%s6900_s18 + $0x1d0] sm:$0xff] %vm3697_vm6, %v5615_v26  ;;  %v3691_v46 = vmul.f32 %v7278_v39, %v3604_v13 }
 0x233   : > { %v5203_v12 = vpop.f32.mrb[124].mxu1  ;;  %v5617_v41 = vpop.eup %5616  ;;  %v4008_v42 = vsel %vm3697_vm6, %v3889_v24, 0.0  ;;  %5628 = vtanh.f32 %v5272_v58  ;;  %v3892_v28 = vmul.f32 %v7285_v21, %v3692_v30  ;;  %v4010_v31 = vsel %vm3697_vm6, %v3890_v47, 0.0 }
 0x234   : > { %v3694_v32 = vmul.f32 %v5272_v58, %v5203_v12  ;;  %v3614_v18 = vpop.f32.mrb[125].mxu1  ;;  %v5619_v56 = vpop.eup %5618  ;;  %4151 = vst.msk [vmem:[%s6900_s18 + $0x1c0] sm:$0xff] %vm3697_vm6, %v5617_v41  ;;  %v4009_v20 = vadd.f32 %v4008_v42, %v4007_v57  ;;  %v3812_v40 = vadd.f32 %v3811_v22, %v3810_v63  ;;  %v3813_v49 = vsel %vm3697_vm6, %v3691_v46, 0.0 }
 0x235   : > { %v5621_v29 = vpop.eup %5620  ;;  %4154 = vst.msk [vmem:[%s6900_s18 + $0x1d8] sm:$0xff] %vm3697_vm6, %v5619_v56  ;;  %v3891_v45 = vmul.f32 %v7278_v39, %v3691_v46  ;;  %v3693_v59 = vmul.f32 %v5270_v17, %v3614_v18  ;;  %v3815_v48 = vsel %vm3697_vm6, %v3692_v30, 0.0  ;;  %v4014_v51 = vsel %vm3697_vm6, %v3892_v28, 0.0 }
 0x236   : > { %v3894_v25 = vmul.f32 %v5272_v58, %v3694_v32  ;;  %4152 = vst.msk [vmem:[%s6900_s18 + $0x1c8] sm:$0xff] %vm3697_vm6, %v5621_v29  ;;  %v3814_v19 = vadd.f32 %v3813_v49, %v3812_v40  ;;  %v4011_v43 = vadd.f32 %v4010_v31, %v4009_v20  ;;  %v3819_v33 = vsel %vm3697_vm6, %v3694_v32, 0.0 }
 0x237   : > { %v5206_v6 = vpop.f32.mrb[126].mxu1  ;;  %v4012_v21 = vsel %vm3697_vm6, %v3891_v45, 0.0  ;;  %v3817_v44 = vsel %vm3697_vm6, %v3693_v59, 0.0  ;;  %v3893_v39 = vmul.f32 %v5270_v17, %v3693_v59 }
 0x238   : > { %v3696_v3 = vmul.f32 %v5271_v10, %v5206_v6  ;;  %v3624_v11 = vpop.f32.mrb[127].mxu1  ;;  %v4013_v9 = vadd.f32 %v4012_v21, %v4011_v43  ;;  %v3816_v52 = vadd.f32 %v3815_v48, %v3814_v19  ;;  %v4018_v36 = vsel %vm3697_vm6, %v3894_v25, 0.0 }
 0x239   : > { %v3695_v35 = vmul.f32 %v7308_v1, %v3624_v11  ;;  %v5623_v2 = vpop.eup %5622  ;;  %v4016_v37 = vsel %vm3697_vm6, %v3893_v39, 0.0 }
 0x23a   : > { %v3896_v53 = vmul.f32 %v5271_v10, %v3696_v3  ;;  %v3818_v15 = vadd.f32 %v3817_v44, %v3816_v52  ;;  %v4015_v8 = vadd.f32 %v4014_v51, %v4013_v9  ;;  %4157 = vst.msk [vmem:[%s6900_s18 + $0x1f0] sm:$0xff] %vm3697_vm6, %v5623_v2 }
 0x23b   : > { %v5625_v54 = vpop.eup %5624  ;;  %v3821_v23 = vsel %vm3697_vm6, %v3695_v35, 0.0  ;;  %v3895_v47 = vmul.f32 %v7308_v1, %v3695_v35  ;;  %v3823_v1 = vsel %vm3697_vm6, %v3696_v3, 0.0 }
 0x23c   : > { %v5627_v38 = vpop.eup %5626  ;;  %4155 = vst.msk [vmem:[%s6900_s18 + $0x1e0] sm:$0xff] %vm3697_vm6, %v5625_v54  ;;  %v4017_v61 = vadd.f32 %v4016_v37, %v4015_v8  ;;  %v3820_v14 = vadd.f32 %v3819_v33, %v3818_v15  ;;  %v4022_v27 = vsel %vm3697_vm6, %v3896_v53, 0.0 }
 0x23d   : > { %v5629_v22 = vpop.eup %5628  ;;  %4158 = vst.msk [vmem:[%s6900_s18 + $0x1f8] sm:$0xff] %vm3697_vm6, %v5627_v38  ;;  %v4020_v5 = vsel %vm3697_vm6, %v3895_v47, 0.0 }
 0x23e   : > { %4156 = vst.msk [vmem:[%s6900_s18 + $0x1e8] sm:$0xff] %vm3697_vm6, %v5629_v22  ;;  %v3822_v62 = vadd.f32 %v3821_v23, %v3820_v14  ;;  %v4019_v50 = vadd.f32 %v4018_v36, %v4017_v61  ;;  %s5630_s18 = scalar_lea.vmem %s7366_s21, 16 }
 0x23f   : > { %p5631_p0 = scmp.ne.s32.totalorder %s7366_s21, %s5630_s18  ;;  %p5638_p5 = scmp.lt.s32.totalorder %s5636_s22, %s5630_s18 }
 0x240   : > { %v3824_v34 = vadd.f32 %v3823_v1, %v3822_v62  ;;  %v4021_v0 = vadd.f32 %v4020_v5, %v4019_v50 }
 0x241   : > { %p5632_p1 = pnand %p5631_p0, %p5824_p4  ;;  %p5639_p6 = por %p5638_p5, %p5637_p3 }
 0x242   : > { %v3825_v17 = vrot.slane %v3824_v34, 4  ;;  %v4023_v13 = vadd.f32 %v4022_v27, %v4021_v0 }
 0x243   : > { %p5633_p2 = pneg %p5632_p1 }
 0x244   : > { %v3826_v16 = vadd.f32 %v3825_v17, %v3824_v34  ;;  %v4024_v7 = vrot.slane %v4023_v13, 4 }
 0x245   : > { %p5640_p7 = pnand %p5639_p6, %p5633_p2 }
 0x246   : > { %v3827_v4 = vrot.slane %v3826_v16, 2  ;;  %v4025_v10 = vadd.f32 %v4024_v7, %v4023_v13 }
 0x248   : > { %v3828_v55 = vadd.f32 %v3827_v4, %v3826_v16  ;;  %v4026_v24 = vrot.slane %v4025_v10, 2 }
 0x24a   : > { %v3829_v60 = vrot.slane %v3828_v55, 1  ;;  %v4027_v58 = vadd.f32 %v4026_v24, %v4025_v10 }
 0x24c   : > { %v3830_v26 = vadd.f32 %v3829_v60, %v3828_v55  ;;  %v4028_v63 = vrot.slane %v4027_v58, 1 }
 0x24e   : > { %3832 = vst.msk [vmem:[%s383_s20] sm:$0x1] %vm3831_vm7, %v3830_v26  ;;  %v4029_v57 = vadd.f32 %v4028_v63, %v4027_v58 }
 0x24f   : > { %5643 = shalt.err (!%p5640_p7)
}
 0x250   : > { %s5644_s19 = scalar_lea.hbm %s7364_s10, 16  ;;  %s5648_s12 = scalar_lea.hbm %s7451_s6, 80 }
 0x251   : > { %p5645_p9 = scmp.ne.s32.totalorder %s7364_s10, %s5644_s19  ;;  %p5649_p12 = scmp.lt.u32.totalorder %s7364_s10, %s7451_s6 }
 0x252   : > { %p5650_p13 = scmp.lt.u32.totalorder %s5648_s12, %s5644_s19  ;;  %p5652_p1 = scmp.lt.u32.totalorder %s5644_s19, %s7364_s10 }
 0x253   : > { %p5646_p10 = pnand %p5645_p9, %p5824_p4 }
 0x254   : > { %p5651_p0 = por %p5650_p13, %p5649_p12 }
 0x255   : > { %p5647_p11 = pneg %p5646_p10 }
 0x256   : > { %p5653_p2 = por %p5652_p1, %p5651_p0 }
 0x258   : > { %p5654_p3 = pnand %p5653_p2, %p5647_p11 }
 0x25a   : > { %5657 = shalt.err (!%p5654_p3)
}
 0x25b   : > { %5406 = dma.vmem_to_hbm [thread:$0]  (%p5824_p4), %s7366_s21, 16, %s7364_s10, %s4168_s16  }
 0x25c   : > { %s7546_s22 = scalar_lea.vmem [#allocation4], %s7354_s17  ;;  %s4172_s18 = scalar_lea.sflag [#allocation5], %s7354_s17 }
 0x25d   : > { %4030 = vst.msk [vmem:[%s7546_s22] sm:$0x1] %vm3831_vm7, %v4029_v57  ;;  %s5658_s20 = scalar_lea.vmem %s7374_s23, 16  ;;  %s5743_s19 = smov [#allocation4]  }
 0x25e   : > { %p5659_p5 = scmp.ne.s32.totalorder %s7374_s23, %s5658_s20  ;;  %s5662_s27 = sshll.u32 %s5743_s19, 4  ;;  %s5663_s27 = int_to_ptr.vmem [resolvable:$false] %s5662_s27 }
 0x25f   : > { %s5664_s12 = scalar_lea.vmem %s5663_s27, 32  ;;  %p5665_p9 = scmp.lt.s32.totalorder %s7374_s23, %s5663_s27 }
 0x260   : > { %p5660_p6 = pnand %p5659_p5, %p5824_p4  ;;  %p5666_p10 = scmp.lt.s32.totalorder %s5664_s12, %s5658_s20 }
 0x262   : > { %p5661_p7 = pneg %p5660_p6  ;;  %p5667_p11 = por %p5666_p10, %p5665_p9 }
 0x264   : > { %p5668_p12 = pnand %p5667_p11, %p5661_p7 }
 0x266   : > { %5671 = shalt.err (!%p5668_p12)
}
 0x267   : > { %s5672_s17 = scalar_lea.hbm %s7372_s15, 16  ;;  %s5676_s16 = scalar_lea.hbm %s7452_s7, 80 }
 0x268   : > { %p5673_p13 = scmp.ne.s32.totalorder %s7372_s15, %s5672_s17  ;;  %p5677_p2 = scmp.lt.u32.totalorder %s7372_s15, %s7452_s7 }
 0x269   : > { %p5678_p3 = scmp.lt.u32.totalorder %s5676_s16, %s5672_s17  ;;  %p5680_p6 = scmp.lt.u32.totalorder %s5672_s17, %s7372_s15 }
 0x26a   : > { %p5674_p0 = pnand %p5673_p13, %p5824_p4 }
 0x26b   : > { %p5679_p5 = por %p5678_p3, %p5677_p2 }
 0x26c   : > { %p5675_p1 = pneg %p5674_p0 }
 0x26d   : > { %p5681_p7 = por %p5680_p6, %p5679_p5 }
 0x26f   : > { %p5682_p9 = pnand %p5681_p7, %p5675_p1 }
 0x271   : > { %5685 = shalt.err (!%p5682_p9)
}
 0x272   : > { %5407 = dma.vmem_to_hbm [thread:$0]  (%p5824_p4), %s7374_s23, 16, %s7372_s15, %s4172_s18  }
 0x273 PF: > { %p5417_p10 = scmp.ge.s32.totalorder %s5740_s29, 2  ;;  %s4226_s22 = sand.u32 1, %s5720_s24  }
 0x274   : > { %s4227_s20 = scalar_lea.sflag [#allocation3], %s4226_s22 }
 0x275   : > { %p5411_p11 = pnand %p5417_p10, %p5831_p8 }
 0x277   : > { %5711 = dma.done.wait (!%p5411_p11), %s4227_s20, 16  }
 0x278   : > { %5713 = vsyncadd (!%p5411_p11), %s4227_s20, 4294967280  ;;  %s4235_s19 = scalar_lea.sflag [#allocation5], %s4226_s22 }
 0x279   : > { %5715 = dma.done.wait (!%p5411_p11), %s4235_s19, 16  }
 0x27a   : > { %5717 = vsyncadd (!%p5411_p11), %s4235_s19, 4294967280  ;;  %s24_s29 = sadd.s32 1, %s5740_s29   ;;  %s7547_s24 = smov %s5724_s25 }
 0x27b   : > { %p21_p12 = scmp.ge.s32.totalorder %s24_s29, 7   ;;  %s7548_s25 = smov %s5728_s26 }
 0x27c   : > { %s7549_s26 = smov %s5837_s14  ;;  %s7550_s27 = smov %s5736_s28 }
 0x27d   : > { %s7551_s28 = smov %s7553_s9  ;;  %23 = sbr.rel (!%p21_p12) target bundleno = 6 (0x6), region = 119 }
 0x284   :  { %4239 = vsyncpa [#allocation3], 1 }
 0x285   :  { %4241 = vsyncpa [#allocation3 + $0x1], 1 }
 0x286   :  { %4242 = vsyncpa [#allocation5], 1 }
 0x287   :  { %4244 = vsyncpa [#allocation5 + $0x1], 1 }

</bundles_post_ra>
